<compile_context>
chip_gen: v6e
topology: v6e:2x2x1
jax: 0.10.0
libtpu: 0.0.40
codegen_flags: <defaults>
</compile_context>

<pallas_src>
import jax
import jax.numpy as jnp
from jax.experimental import pallas as pl
from jax.experimental.pallas import tpu as pltpu


_SQRT_2_OVER_PI = 0.7978845608028654  # sqrt(2 / pi), hoisted constant


def _round_up(n, m):
    return ((n + m - 1) // m) * m


def _largest_divisor_tile(total, cap, align):
    """Largest multiple of `align` that divides `total` and is <= cap."""
    cap = max(align, min(cap, total))
    t = (cap // align) * align
    while t >= align:
        if total % t == 0:
            return t
        t -= align
    return align


def ffn_kernel(x_ref, w1_ref, b1_ref, w2_ref, b2_ref, o_ref):
    # x_ref:  (tm, D)  input row tile (caller dtype; cast to bf16 here)
    # w1_ref: (D, th)  bf16  column chunk of first linear weight
    # b1_ref: (1, th)  f32   matching chunk of first bias
    # w2_ref: (th, D)  bf16  row chunk of second linear weight
    # b2_ref: (1, D)   f32   second bias (constant across grid)
    # o_ref:  (tm, D)  f32   output tile; VMEM-resident across the h axis -> accumulator
    h_idx = pl.program_id(1)

    # Linear 1 on this hidden chunk: bf16 MXU operands, f32 accumulation.
    x_bf = x_ref[...].astype(jnp.bfloat16)
    h = jnp.dot(x_bf, w1_ref[...], preferred_element_type=jnp.float32) + b1_ref[...]

    # GELU (tanh approximation, same formula as the torch module), in f32.
    g = 0.5 * h * (1.0 + jnp.tanh(_SQRT_2_OVER_PI * (h + 0.044715 * (h * h * h))))

    # Linear 2: this hidden chunk's contribution to the output tile.
    contrib = jnp.dot(g.astype(jnp.bfloat16), w2_ref[...],
                      preferred_element_type=jnp.float32)

    @pl.when(h_idx == 0)
    def _():
        o_ref[...] = contrib + b2_ref[...]          # fold b2 into the first step

    @pl.when(h_idx > 0)
    def _():
        o_ref[...] = o_ref[...] + contrib


def feed_forward(x, w1, b1, w2, b2, *, tm_pref=512,
                 vmem_budget_bytes=48 * 1024 * 1024):
    """x: (B, T, D). w1: (D, 4D), b1: (4D,), w2: (4D, D), b2: (D,). Returns (B, T, D)."""
    B, T, D = x.shape
    H = w1.shape[1]
    assert w1.shape == (D, H) and w2.shape == (H, D)
    assert b1.shape == (H,) and b2.shape == (D,)
    assert D % 128 == 0, "emb_dim must be a multiple of 128 (TPU lane width)"
    assert H % 128 == 0, "hidden dim must be a multiple of 128"

    M = B * T
    x_bytes = jnp.dtype(x.dtype).itemsize

    # ---- Row tile: large enough to amortize weight streaming; minimal padding for small M.
    if M <= tm_pref:
        tm = _round_up(M, 16)
    else:
        tm = _round_up(tm_pref, 256)
    M_pad = _round_up(M, tm)

    # ---- Hidden tile from remaining VMEM budget (all pipelined buffers double-buffered).
    # fixed: x tile (db) + f32 output tile (db) + b2 (db, padded to 8 sublanes)
    fixed = 2 * tm * D * x_bytes + 2 * tm * D * 4 + 2 * 8 * D * 4
    # per unit of th: W1 + W2 bf16 chunks (db) + b1 chunk f32 (db, 8-sublane pad)
    per_th = 8 * D + 64
    th_cap = max(128, (vmem_budget_bytes - fixed) // per_th)
    align = 256 if H % 256 == 0 else 128
    th = _largest_divisor_tile(H, th_cap, align)

    x2d = x.reshape(M, D)
    if M_pad != M:
        x2d = jnp.pad(x2d, ((0, M_pad - M), (0, 0)))

    w1_bf = w1.astype(jnp.bfloat16)
    w2_bf = w2.astype(jnp.bfloat16)
    b1_2d = b1.reshape(1, H).astype(jnp.float32)
    b2_2d = b2.reshape(1, D).astype(jnp.float32)

    grid = (M_pad // tm, H // th)

    est = fixed + per_th * th
    vmem_limit = int(min(max(est + (8 << 20), 32 << 20), 96 << 20))

    out2d = pl.pallas_call(
        ffn_kernel,
        out_shape=jax.ShapeDtypeStruct((M_pad, D), jnp.float32),
        grid_spec=pltpu.PrefetchScalarGridSpec(
            num_scalar_prefetch=0,
            grid=grid,
            in_specs=[
                pl.BlockSpec((tm, D), lambda i, h: (i, 0)),   # x row tile
                pl.BlockSpec((D, th), lambda i, h: (0, h)),   # W1 column chunk
                pl.BlockSpec((1, th), lambda i, h: (0, h)),   # b1 chunk
                pl.BlockSpec((th, D), lambda i, h: (h, 0)),   # W2 row chunk
                pl.BlockSpec((1, D), lambda i, h: (0, 0)),    # b2 (constant)
            ],
            out_specs=pl.BlockSpec((tm, D), lambda i, h: (i, 0)),
        ),
        compiler_params=pltpu.CompilerParams(
            dimension_semantics=("parallel", "arbitrary"),
            vmem_limit_bytes=vmem_limit,
        ),
    )(x2d, w1_bf, b1_2d, w2_bf, b2_2d)

    if M_pad != M:
        out2d = out2d[:M]
    out = out2d.reshape(B, T, D)
    if out.dtype != x.dtype:
        out = out.astype(x.dtype)
    return out


def reference_ffn(x, w1, b1, w2, b2, operand_dtype=jnp.float32):
    """Pure-JAX reference; operand_dtype controls matmul operand precision."""
    xd = x.reshape(-1, x.shape[-1]).astype(operand_dtype)
    w1d = w1.astype(operand_dtype)
    w2d = w2.astype(operand_dtype)
    h = jnp.dot(xd, w1d, preferred_element_type=jnp.float32) + b1
    g = 0.5 * h * (1.0 + jnp.tanh(_SQRT_2_OVER_PI * (h + 0.044715 * h ** 3)))
    out = jnp.dot(g.astype(operand_dtype), w2d,
                  preferred_element_type=jnp.float32) + b2
    return out.reshape(x.shape)


if __name__ == "__main__":
    # Matches the spec's input: x = torch.rand(2, 4, 768), emb_dim=768 -> hidden=3072.
    B, T, D = 2, 4, 768
    H = 4 * D

    key = jax.random.PRNGKey(0)
    kx, kw1, kb1, kw2, kb2 = jax.random.split(key, 5)

    x = jax.random.normal(kx, (B, T, D), dtype=jnp.float32)
    # Deterministic parameter init (synthetic; not a checkpoint load)
    w1 = jax.random.normal(kw1, (D, H), dtype=jnp.float32) * (1.0 / jnp.sqrt(D))
    b1 = jax.random.normal(kb1, (H,), dtype=jnp.float32) * 0.01
    w2 = jax.random.normal(kw2, (H, D), dtype=jnp.float32) * (1.0 / jnp.sqrt(H))
    b2 = jax.random.normal(kb2, (D,), dtype=jnp.float32) * 0.01

    out = jax.block_until_ready(feed_forward(x, w1, b1, w2, b2))
    assert out.shape == (B, T, D)
    assert bool(jnp.all(jnp.isfinite(out)))

    # Precision-matched reference (bf16 matmul operands, f32 accumulate).
    ref_bf16 = reference_ffn(x, w1, b1, w2, b2, operand_dtype=jnp.bfloat16)
    assert jnp.allclose(out, ref_bf16, atol=2e-2, rtol=2e-2), "mismatch vs bf16 reference"

    # Exact f32 formula; only difference is bf16 matmul quantization (documented tolerance).
    ref_f32 = reference_ffn(x, w1, b1, w2, b2, operand_dtype=jnp.float32)
    assert jnp.allclose(out, ref_f32, atol=1e-1, rtol=1e-1), "mismatch vs f32 reference"

    print("KERNEL_OK")
</pallas_src>

<mosaic_0001>
module attributes {stable_mosaic.version = 11 : i64} {
  func.func @ffn_kernel(%arg0: i32, %arg1: i32, %arg2: memref<16x768xf32, #tpu.memory_space<vmem>>, %arg3: memref<768x3072xbf16, #tpu.memory_space<vmem>>, %arg4: memref<1x3072xf32, #tpu.memory_space<vmem>>, %arg5: memref<3072x768xbf16, #tpu.memory_space<vmem>>, %arg6: memref<1x768xf32, #tpu.memory_space<vmem>>, %arg7: memref<16x768xf32, #tpu.memory_space<vmem>>) attributes {dimension_semantics = [#tpu.dimension_semantics<parallel>, #tpu.dimension_semantics<arbitrary>], iteration_bounds = array<i64: 1, 1>, scalar_prefetch = 0 : i64, scratch_operands = 0 : i64, tpu.core_type = #tpu.core_type<tc>, window_params = [{transform_indices = @transform_0, window_bounds = array<i64: 16, 768>}, {transform_indices = @transform_1, window_bounds = array<i64: 768, 3072>}, {transform_indices = @transform_2, window_bounds = array<i64: 1, 3072>}, {transform_indices = @transform_3, window_bounds = array<i64: 3072, 768>}, {pipeline_mode = #tpu.pipeline_mode<synchronous>, transform_indices = @transform_4, window_bounds = array<i64: 1, 768>}, {transform_indices = @transform_5, window_bounds = array<i64: 16, 768>}]} {
    %c0 = arith.constant 0 : index
    %c0_0 = arith.constant 0 : index
    %0 = vector.load %arg2[%c0, %c0_0] : memref<16x768xf32, #tpu.memory_space<vmem>>, vector<16x768xf32>
    %1 = arith.truncf %0 : vector<16x768xf32> to vector<16x768xbf16>
    %c0_1 = arith.constant 0 : index
    %c0_2 = arith.constant 0 : index
    %2 = vector.load %arg3[%c0_1, %c0_2] : memref<768x3072xbf16, #tpu.memory_space<vmem>>, vector<768x3072xbf16>
    %cst = arith.constant dense<0.000000e+00> : vector<16x3072xf32>
    %3 = tpu.matmul %1, %2, %cst {dimension_numbers = #tpu.dot_dimension_numbers<[1], [0], [0], [1], [0, 0, 1, 1], [], []>} : vector<16x768xbf16>, vector<768x3072xbf16>, vector<16x3072xf32> -> vector<16x3072xf32>
    %c0_3 = arith.constant 0 : index
    %c0_4 = arith.constant 0 : index
    %4 = vector.load %arg4[%c0_3, %c0_4] : memref<1x3072xf32, #tpu.memory_space<vmem>>, vector<1x3072xf32>
    %5 = vector.broadcast %4 : vector<1x3072xf32> to vector<16x3072xf32>
    %6 = arith.addf %3, %5 : vector<16x3072xf32>
    %cst_5 = arith.constant 5.000000e-01 : f32
    %7 = vector.broadcast %cst_5 : f32 to vector<16x3072xf32>
    %8 = arith.mulf %7, %6 : vector<16x3072xf32>
    %9 = arith.mulf %6, %6 : vector<16x3072xf32>
    %10 = arith.mulf %9, %6 : vector<16x3072xf32>
    %cst_6 = arith.constant 4.471500e-02 : f32
    %11 = vector.broadcast %cst_6 : f32 to vector<16x3072xf32>
    %12 = arith.mulf %11, %10 : vector<16x3072xf32>
    %13 = arith.addf %6, %12 : vector<16x3072xf32>
    %cst_7 = arith.constant 0.797884583 : f32
    %14 = vector.broadcast %cst_7 : f32 to vector<16x3072xf32>
    %15 = arith.mulf %14, %13 : vector<16x3072xf32>
    %16 = math.tanh %15 : vector<16x3072xf32>
    %cst_8 = arith.constant 1.000000e+00 : f32
    %17 = vector.broadcast %cst_8 : f32 to vector<16x3072xf32>
    %18 = arith.addf %17, %16 : vector<16x3072xf32>
    %19 = arith.mulf %8, %18 : vector<16x3072xf32>
    %20 = arith.truncf %19 : vector<16x3072xf32> to vector<16x3072xbf16>
    %c0_9 = arith.constant 0 : index
    %c0_10 = arith.constant 0 : index
    %21 = vector.load %arg5[%c0_9, %c0_10] : memref<3072x768xbf16, #tpu.memory_space<vmem>>, vector<3072x768xbf16>
    %cst_11 = arith.constant dense<0.000000e+00> : vector<16x768xf32>
    %22 = tpu.matmul %20, %21, %cst_11 {dimension_numbers = #tpu.dot_dimension_numbers<[1], [0], [0], [1], [0, 0, 1, 1], [], []>} : vector<16x3072xbf16>, vector<3072x768xbf16>, vector<16x768xf32> -> vector<16x768xf32>
    %c0_i32 = arith.constant 0 : i32
    %23 = arith.cmpi eq, %arg1, %c0_i32 : i32
    %24 = arith.extui %23 : i1 to i32
    %c0_i32_12 = arith.constant 0 : i32
    %25 = arith.cmpi ne, %24, %c0_i32_12 : i32
    scf.if %25 {
      %c0_15 = arith.constant 0 : index
      %c0_16 = arith.constant 0 : index
      %29 = vector.load %arg6[%c0_15, %c0_16] : memref<1x768xf32, #tpu.memory_space<vmem>>, vector<1x768xf32>
      %30 = vector.broadcast %29 : vector<1x768xf32> to vector<16x768xf32>
      %31 = arith.addf %22, %30 : vector<16x768xf32>
      %c0_17 = arith.constant 0 : index
      %c0_18 = arith.constant 0 : index
      %32 = vector.load %arg7[%c0_17, %c0_18] : memref<16x768xf32, #tpu.memory_space<vmem>>, vector<16x768xf32>
      tpu.vector_store %arg7[%c0_17, %c0_18], %31 {strides = array<i32>} : memref<16x768xf32, #tpu.memory_space<vmem>>, vector<16x768xf32>,
    } else {
    }
    %c0_i32_13 = arith.constant 0 : i32
    %26 = arith.cmpi sgt, %arg1, %c0_i32_13 : i32
    %27 = arith.extui %26 : i1 to i32
    %c0_i32_14 = arith.constant 0 : i32
    %28 = arith.cmpi ne, %27, %c0_i32_14 : i32
    scf.if %28 {
      %c0_15 = arith.constant 0 : index
      %c0_16 = arith.constant 0 : index
      %29 = vector.load %arg7[%c0_15, %c0_16] : memref<16x768xf32, #tpu.memory_space<vmem>>, vector<16x768xf32>
      %30 = arith.addf %29, %22 : vector<16x768xf32>
      %c0_17 = arith.constant 0 : index
      %c0_18 = arith.constant 0 : index
      %31 = vector.load %arg7[%c0_17, %c0_18] : memref<16x768xf32, #tpu.memory_space<vmem>>, vector<16x768xf32>
      tpu.vector_store %arg7[%c0_17, %c0_18], %30 {strides = array<i32>} : memref<16x768xf32, #tpu.memory_space<vmem>>, vector<16x768xf32>,
    } else {
    }
    return
  }
  func.func @transform_0(%arg0: i32, %arg1: i32) -> (i32, i32) {
    %c0_i32 = arith.constant 0 : i32
    %c0_i32_0 = arith.constant 0 : i32
    return %arg0, %c0_i32 : i32, i32
  }
  func.func @transform_1(%arg0: i32, %arg1: i32) -> (i32, i32) {
    %c0_i32 = arith.constant 0 : i32
    %c0_i32_0 = arith.constant 0 : i32
    return %c0_i32, %arg1 : i32, i32
  }
  func.func @transform_2(%arg0: i32, %arg1: i32) -> (i32, i32) {
    %c0_i32 = arith.constant 0 : i32
    %c0_i32_0 = arith.constant 0 : i32
    return %c0_i32, %arg1 : i32, i32
  }
  func.func @transform_3(%arg0: i32, %arg1: i32) -> (i32, i32) {
    %c0_i32 = arith.constant 0 : i32
    %c0_i32_0 = arith.constant 0 : i32
    return %arg1, %c0_i32 : i32, i32
  }
  func.func @transform_4(%arg0: i32, %arg1: i32) -> (i32, i32) {
    %c0_i32 = arith.constant 0 : i32
    %c0_i32_0 = arith.constant 0 : i32
    %c0_i32_1 = arith.constant 0 : i32
    return %c0_i32, %c0_i32_0 : i32, i32
  }
  func.func @transform_5(%arg0: i32, %arg1: i32) -> (i32, i32) {
    %c0_i32 = arith.constant 0 : i32
    %c0_i32_0 = arith.constant 0 : i32
    return %arg0, %c0_i32 : i32, i32
  }
}

</mosaic_0001>

<bundles_post_ra>
// kernel: tpu_custom_call.1
= control target key start
LH: loop header
LB: loop body
LE: loop exit
PB: predicated region body
PF: predicated region fallthrough
CT: control target
= control target key end

     0   :  { %10 = vsyncpa [#allocation3], 0  ;;  %s23104_s0 = inlined_call_operand.hbm [shape: f32[16,768], index: 0, kind: input, shape index: {}]   ;;  %s23105_s1 = inlined_call_operand.hbm [shape: bf16[768,3072], index: 1, kind: input, shape index: {}]   ;;  %s23106_s2 = inlined_call_operand.hbm [shape: f32[1,3072], index: 2, kind: input, shape index: {}]   ;;  %s23107_s3 = inlined_call_operand.hbm [shape: bf16[3072,768], index: 3, kind: input, shape index: {}]   ;;  %s23108_s4 = inlined_call_operand.hbm [shape: f32[1,768], index: 4, kind: input, shape index: {}]   ;;  %s23109_s5 = inlined_call_operand.hbm [shape: f32[16,768], index: 5, kind: output, shape index: {}]  }
   0x1   :  { %11 = vsyncpa [#allocation6], 0 }
   0x2   :  { %12 = vsyncpa [#allocation9], 0 }
   0x3   :  { %13 = vsyncpa [#allocation4], 0  ;;  %s22000_s18 = smov [#allocation5]  }
   0x4   :  { %s31_s19 = sshll.u32 %s22000_s18, 4  ;;  %s32_s19 = int_to_ptr.vmem [resolvable:$true] %s31_s19 }
   0x5   :  { %s21880_s20 = scalar_lea.vmem %s32_s19, 147456  ;;  %p21885_p1 = scmp.lt.s32.totalorder %s32_s19, %s32_s19 }
   0x6   :  { %p21881_p0 = scmp.ne.s32.totalorder %s32_s19, %s21880_s20  ;;  %p21886_p2 = scmp.lt.s32.totalorder %s21880_s20, %s21880_s20 }
   0x8   :  { %p21887_p3 = por %p21886_p2, %p21885_p1 }
   0xa   :  { %p21888_p4 = pnand %p21887_p3, %p21881_p0 }
   0xc   :  { %21891 = shalt.err (!%p21888_p4)
}
   0xd   :  { %s22001_s21 = smov 1536   ;;  %s22002_s22 = smov 96  }
   0xe   :  { %37 = dma.hbm_to_vmem [thread:$0]  %s23105_s1, 147456, %s32_s19, [#allocation6], %s22001_s21, %s22001_s21, %s22002_s22  }
   0xf   :  { %s22003_s25 = smov [#allocation8]  }
  0x10   :  { %s53_s26 = sshll.u32 %s22003_s25, 4  ;;  %s54_s26 = int_to_ptr.vmem [resolvable:$true] %s53_s26 }
  0x11   :  { %s21900_s27 = scalar_lea.vmem %s54_s26, 147456  ;;  %p21905_p6 = scmp.lt.s32.totalorder %s54_s26, %s54_s26 }
  0x12   :  { %p21901_p5 = scmp.ne.s32.totalorder %s54_s26, %s21900_s27  ;;  %p21906_p7 = scmp.lt.s32.totalorder %s21900_s27, %s21900_s27 }
  0x14   :  { %p21907_p8 = por %p21906_p7, %p21905_p6 }
  0x16   :  { %p21908_p9 = pnand %p21907_p8, %p21901_p5 }
  0x18   :  { %21911 = shalt.err (!%p21908_p9)
}
  0x19   :  { %s22004_s28 = smov 384   ;;  %s22005_s29 = smov 24  }
  0x1a   :  { %59 = dma.hbm_to_vmem [thread:$0]  %s23107_s3, 147456, %s54_s26, [#allocation9], %s22004_s28, %s22004_s28, %s22005_s29  }
  0x1b   :  { %s22006_s7 = smov [#allocation2]  }
  0x1c   :  { %s19_s8 = sshll.u32 %s22006_s7, 4  ;;  %s20_s8 = int_to_ptr.vmem [resolvable:$true] %s19_s8 }
  0x1d   :  { %s21920_s1 = scalar_lea.vmem %s20_s8, 1536  ;;  %p21925_p11 = scmp.lt.s32.totalorder %s20_s8, %s20_s8 }
  0x1e   :  { %p21921_p10 = scmp.ne.s32.totalorder %s20_s8, %s21920_s1  ;;  %p21926_p12 = scmp.lt.s32.totalorder %s21920_s1, %s21920_s1 }
  0x20   :  { %p21927_p13 = por %p21926_p12, %p21925_p11 }
  0x22   :  { %p21928_p0 = pnand %p21927_p13, %p21921_p10 }
  0x24   :  { %21931 = shalt.err (!%p21928_p0)
}
  0x25   :  { %s22007_s9 = smov 768   ;;  %s22008_s10 = smov 48  }
  0x26   :  { %25 = dma.hbm_to_vmem [thread:$0]  %s23104_s0, 1536, %s20_s8, [#allocation3], %s22007_s9, %s22007_s9, %s22008_s10  }
  0x27   :  { %s22009_s3 = smov [#allocation7]   ;;  %s22010_s14 = smov [#allocation10]  }
  0x28   :  { %s44_s13 = sshll.u32 %s22009_s3, 4  ;;  %s66_s15 = sshll.u32 %s22010_s14, 4  ;;  %s45_s13 = int_to_ptr.vmem [resolvable:$true] %s44_s13  ;;  %s67_s15 = int_to_ptr.vmem [resolvable:$true] %s66_s15 }
  0x29   :  { %s21940_s16 = scalar_lea.vmem %s45_s13, 384  ;;  %p21945_p2 = scmp.lt.s32.totalorder %s45_s13, %s45_s13 }
  0x2a   :  { %p21941_p1 = scmp.ne.s32.totalorder %s45_s13, %s21940_s16  ;;  %p21946_p3 = scmp.lt.s32.totalorder %s21940_s16, %s21940_s16 }
  0x2c   :  { %p21947_p4 = por %p21946_p3, %p21945_p2 }
  0x2e   :  { %p21948_p5 = pnand %p21947_p4, %p21941_p1 }
  0x30   :  { %21951 = shalt.err (!%p21948_p5)
}
  0x31   :  { %47 = dma.hbm_to_vmem [thread:$0]  %s23106_s2, 384, %s45_s13, [#allocation6]  }
  0x32   :  { %s21960_s19 = scalar_lea.vmem %s67_s15, 96  ;;  %p21965_p7 = scmp.lt.s32.totalorder %s67_s15, %s67_s15 }
  0x33   :  { %p21961_p6 = scmp.ne.s32.totalorder %s67_s15, %s21960_s19  ;;  %p21966_p8 = scmp.lt.s32.totalorder %s21960_s19, %s21960_s19 }
  0x35   :  { %p21967_p9 = por %p21966_p8, %p21965_p7 }
  0x37   :  { %p21968_p10 = pnand %p21967_p9, %p21961_p6 }
  0x39   :  { %21971 = shalt.err (!%p21968_p10)
}
  0x3a   :  { %69 = dma.hbm_to_vmem [thread:$0]  %s23108_s4, 96, %s67_s15, [#allocation9]  }
  0x3b   :  { %21992 = dma.done.wait [#allocation3], 1536  }
  0x3c   :  { %21993 = vsyncadd [#allocation3], 4294965760 }
  0x3d   :  { %21994 = dma.done.wait [#allocation6], 147840  }
  0x3e   :  { %21995 = vsyncadd [#allocation6], 4294819456 }
  0x3f   :  { %21996 = dma.done.wait [#allocation9], 147552  }
  0x40   :  { %21997 = vsyncadd [#allocation9], 4294819744  ;;  %v271_v0 = vld [vmem:[#allocation5 + $0x540] sm:$0xff]  ;;  %v86_v54 = vld [vmem:[#allocation2 + $0x8] sm:$0xff]  ;;  %s22011_s2 = smov [#allocation11]  }
  0x41   :  { %v283_v1 = vld [vmem:[#allocation5 + $0x5a0] sm:$0xff]  ;;  %v92_v55 = vld [vmem:[#allocation2 + $0x38] sm:$0xff]  ;;  %v94_v60 = vld [vmem:[#allocation2 + $0x48] sm:$0xff]  ;;  %s17710_s4 = sshll.u32 %s22011_s2, 4  ;;  %s17711_s4 = int_to_ptr.vmem [resolvable:$true] %s17710_s4 }
  0x42   :  { %v655_v2 = vld [vmem:[#allocation5 + $0x1140] sm:$0xff]  ;;  %v17893_v3 = vcombine.high %v271_v0, %v283_v1  ;;  %v17892_v5 = vcombine.low %v271_v0, %v283_v1  ;;  %v22060_v58 = vpack.c.bf16 %v92_v55, %v86_v54  ;;  %v88_v59 = vld [vmem:[#allocation2 + $0x18] sm:$0xff]  ;;  %s21972_s21 = scalar_lea.vmem %s17711_s4, 1536  ;;  %p21977_p12 = scmp.lt.s32.totalorder %s17711_s4, %s17711_s4 }
  0x43   :  { %v667_v4 = vld [vmem:[#allocation5 + $0x11a0] sm:$0xff]  ;;  %v22062_v63 = vpack.c.bf16 %v94_v60, %v88_v59  ;;  %p21973_p11 = scmp.ne.s32.totalorder %s17711_s4, %s21972_s21  ;;  %p21978_p13 = scmp.lt.s32.totalorder %s21972_s21, %s21972_s21 }
  0x44   :  { %v247_v6 = vld [vmem:[#allocation5 + $0x480] sm:$0xff]  ;;  %v18277_v8 = vcombine.high %v655_v2, %v667_v4  ;;  %v18276_v9 = vcombine.low %v655_v2, %v667_v4  ;;  %7141 = vmatprep.subr.bf16.mxu0 %v17893_v3  ;;  %7173 = vmatprep.mubr.bf16.mxu0 %v22060_v58 }
  0x45   :  { %v259_v7 = vld [vmem:[#allocation5 + $0x4e0] sm:$0xff]  ;;  %7142 = vmatpush1.bf16.msra.mxu0 %v17892_v5  ;;  %7216 = vmatprep.mubr.bf16.mxu1 %v22062_v63  ;;  %p21979_p0 = por %p21978_p13, %p21977_p12 }
  0x46   :  { %v17869_v10 = vcombine.high %v247_v6, %v259_v7  ;;  %v631_v11 = vld [vmem:[#allocation5 + $0x1080] sm:$0xff]  ;;  %7184 = vmatprep.subr.bf16.mxu1 %v18277_v8  ;;  %v17868_v18 = vcombine.low %v247_v6, %v259_v7 }
  0x47   :  { %v643_v12 = vld [vmem:[#allocation5 + $0x10e0] sm:$0xff]  ;;  %7185 = vmatpush1.bf16.msra.mxu1 %v18276_v9  ;;  %p21980_p1 = pnand %p21979_p0, %p21973_p11 }
  0x48   :  { %v223_v13 = vld [vmem:[#allocation5 + $0x3c0] sm:$0xff]  ;;  %v18253_v14 = vcombine.high %v631_v11, %v643_v12  ;;  %7143 = vmatprep.subr.bf16.mxu0 %v17869_v10  ;;  %v18252_v19 = vcombine.low %v631_v11, %v643_v12 }
  0x49   :  { %v235_v15 = vld [vmem:[#allocation5 + $0x420] sm:$0xff]  ;;  %7144 = vmatpush1.bf16.msra.mxu0 %v17868_v18 }
  0x4a   :  { %v607_v16 = vld [vmem:[#allocation5 + $0xfc0] sm:$0xff]  ;;  %v17845_v20 = vcombine.high %v223_v13, %v235_v15  ;;  %7186 = vmatprep.subr.bf16.mxu1 %v18253_v14  ;;  %v17844_v26 = vcombine.low %v223_v13, %v235_v15 }
  0x4b   :  { %v619_v17 = vld [vmem:[#allocation5 + $0x1020] sm:$0xff]  ;;  %7187 = vmatpush1.bf16.msra.mxu1 %v18252_v19 }
  0x4c   :  { %v18229_v21 = vcombine.high %v607_v16, %v619_v17  ;;  %v199_v22 = vld [vmem:[#allocation5 + $0x300] sm:$0xff]  ;;  %7145 = vmatprep.subr.bf16.mxu0 %v17845_v20  ;;  %v18228_v27 = vcombine.low %v607_v16, %v619_v17 }
  0x4d   :  { %v211_v23 = vld [vmem:[#allocation5 + $0x360] sm:$0xff]  ;;  %7146 = vmatpush1.bf16.msra.mxu0 %v17844_v26 }
  0x4e   :  { %v583_v24 = vld [vmem:[#allocation5 + $0xf00] sm:$0xff]  ;;  %v17821_v28 = vcombine.high %v199_v22, %v211_v23  ;;  %7188 = vmatprep.subr.bf16.mxu1 %v18229_v21  ;;  %v17820_v34 = vcombine.low %v199_v22, %v211_v23 }
  0x4f   :  { %v595_v25 = vld [vmem:[#allocation5 + $0xf60] sm:$0xff]  ;;  %7189 = vmatpush1.bf16.msra.mxu1 %v18228_v27 }
  0x50   :  { %v18205_v29 = vcombine.high %v583_v24, %v595_v25  ;;  %v175_v30 = vld [vmem:[#allocation5 + $0x240] sm:$0xff]  ;;  %7147 = vmatprep.subr.bf16.mxu0 %v17821_v28  ;;  %v18204_v35 = vcombine.low %v583_v24, %v595_v25 }
  0x51   :  { %v187_v31 = vld [vmem:[#allocation5 + $0x2a0] sm:$0xff]  ;;  %7148 = vmatpush1.bf16.msra.mxu0 %v17820_v34 }
  0x52   :  { %v559_v32 = vld [vmem:[#allocation5 + $0xe40] sm:$0xff]  ;;  %v17797_v36 = vcombine.high %v175_v30, %v187_v31  ;;  %7190 = vmatprep.subr.bf16.mxu1 %v18205_v29  ;;  %v17796_v42 = vcombine.low %v175_v30, %v187_v31 }
  0x53   :  { %v571_v33 = vld [vmem:[#allocation5 + $0xea0] sm:$0xff]  ;;  %7191 = vmatpush1.bf16.msra.mxu1 %v18204_v35 }
  0x54   :  { %v18181_v37 = vcombine.high %v559_v32, %v571_v33  ;;  %v151_v38 = vld [vmem:[#allocation5 + $0x180] sm:$0xff]  ;;  %7149 = vmatprep.subr.bf16.mxu0 %v17797_v36  ;;  %v18180_v43 = vcombine.low %v559_v32, %v571_v33 }
  0x55   :  { %v163_v39 = vld [vmem:[#allocation5 + $0x1e0] sm:$0xff]  ;;  %7150 = vmatpush1.bf16.msra.mxu0 %v17796_v42 }
  0x56   :  { %v535_v40 = vld [vmem:[#allocation5 + $0xd80] sm:$0xff]  ;;  %v17773_v44 = vcombine.high %v151_v38, %v163_v39  ;;  %7192 = vmatprep.subr.bf16.mxu1 %v18181_v37  ;;  %v17772_v50 = vcombine.low %v151_v38, %v163_v39 }
  0x57   :  { %v547_v41 = vld [vmem:[#allocation5 + $0xde0] sm:$0xff]  ;;  %7193 = vmatpush1.bf16.msra.mxu1 %v18180_v43 }
  0x58   :  { %v18157_v45 = vcombine.high %v535_v40, %v547_v41  ;;  %v127_v46 = vld [vmem:[#allocation5 + $0xc0] sm:$0xff]  ;;  %7151 = vmatprep.subr.bf16.mxu0 %v17773_v44  ;;  %v18156_v51 = vcombine.low %v535_v40, %v547_v41 }
  0x59   :  { %v139_v47 = vld [vmem:[#allocation5 + $0x120] sm:$0xff]  ;;  %7152 = vmatpush1.bf16.msra.mxu0 %v17772_v50 }
  0x5a   :  { %v511_v48 = vld [vmem:[#allocation5 + $0xcc0] sm:$0xff]  ;;  %v17749_v52 = vcombine.high %v127_v46, %v139_v47  ;;  %7194 = vmatprep.subr.bf16.mxu1 %v18157_v45  ;;  %v17748_v0 = vcombine.low %v127_v46, %v139_v47 }
  0x5b   :  { %v523_v49 = vld [vmem:[#allocation5 + $0xd20] sm:$0xff]  ;;  %7195 = vmatpush1.bf16.msra.mxu1 %v18156_v51 }
  0x5c   :  { %v103_v53 = vld [vmem:[#allocation5] sm:$0xff]  ;;  %v18133_v56 = vcombine.high %v511_v48, %v523_v49  ;;  %7153 = vmatprep.subr.bf16.mxu0 %v17749_v52  ;;  %v18132_v1 = vcombine.low %v511_v48, %v523_v49 }
  0x5d   :  { %v115_v57 = vld [vmem:[#allocation5 + $0x60] sm:$0xff]  ;;  %7154 = vmatpush1.bf16.msra.mxu0 %v17748_v0 }
  0x5e   :  { %v487_v61 = vld [vmem:[#allocation5 + $0xc00] sm:$0xff]  ;;  %v17725_v2 = vcombine.high %v103_v53, %v115_v57  ;;  %7196 = vmatprep.subr.bf16.mxu1 %v18133_v56  ;;  %v17724_v8 = vcombine.low %v103_v53, %v115_v57 }
  0x5f   :  { %v499_v62 = vld [vmem:[#allocation5 + $0xc60] sm:$0xff]  ;;  %7197 = vmatpush1.bf16.msra.mxu1 %v18132_v1 }
  0x60   :  { %v18109_v3 = vcombine.high %v487_v61, %v499_v62  ;;  %v463_v4 = vld [vmem:[#allocation5 + $0xb40] sm:$0xff]  ;;  %7155 = vmatprep.subr.bf16.mxu0 %v17725_v2  ;;  %v18108_v9 = vcombine.low %v487_v61, %v499_v62 }
  0x61   :  { %v475_v5 = vld [vmem:[#allocation5 + $0xba0] sm:$0xff]  ;;  %7156 = vmatpush1.bf16.msra.mxu0 %v17724_v8  ;;  %v272_v8 = vld [vmem:[#allocation5 + $0x548] sm:$0xff] }
  0x62   :  { %v847_v6 = vld [vmem:[#allocation5 + $0x1740] sm:$0xff]  ;;  %v18085_v10 = vcombine.high %v463_v4, %v475_v5  ;;  %7198 = vmatprep.subr.bf16.mxu1 %v18109_v3  ;;  %v18084_v16 = vcombine.low %v463_v4, %v475_v5 }
  0x63   :  { %v859_v7 = vld [vmem:[#allocation5 + $0x17a0] sm:$0xff]  ;;  %7199 = vmatpush1.bf16.msra.mxu1 %v18108_v9  ;;  %v284_v9 = vld [vmem:[#allocation5 + $0x5a8] sm:$0xff] }
  0x64   :  { %v18469_v11 = vcombine.high %v847_v6, %v859_v7  ;;  %v439_v12 = vld [vmem:[#allocation5 + $0xa80] sm:$0xff]  ;;  %7157 = vmatprep.subr.bf16.mxu0 %v18085_v10  ;;  %v18468_v17 = vcombine.low %v847_v6, %v859_v7 }
  0x65   :  { %v451_v13 = vld [vmem:[#allocation5 + $0xae0] sm:$0xff]  ;;  %7158 = vmatpush2.bf16.msra.mxu0 %v18084_v16 }
  0x66   :  { %v823_v14 = vld [vmem:[#allocation5 + $0x1680] sm:$0xff]  ;;  %v18061_v18 = vcombine.high %v439_v12, %v451_v13  ;;  %7200 = vmatprep.subr.bf16.mxu1 %v18469_v11  ;;  %v18060_v24 = vcombine.low %v439_v12, %v451_v13  ;;  %v91_v12 = vld [vmem:[#allocation2 + $0x30] sm:$0xff] }
  0x67   :  { %v835_v15 = vld [vmem:[#allocation5 + $0x16e0] sm:$0xff]  ;;  %7201 = vmatpush2.bf16.msra.mxu1 %v18468_v17  ;;  %v17895_v17 = vcombine.high %v272_v8, %v284_v9 }
  0x68   :  { %v18445_v19 = vcombine.high %v823_v14, %v835_v15  ;;  %v415_v20 = vld [vmem:[#allocation5 + $0x9c0] sm:$0xff]  ;;  %7159 = vmatprep.subr.bf16.mxu0 %v18061_v18  ;;  %v18444_v25 = vcombine.low %v823_v14, %v835_v15  ;;  %v87_v14 = vld [vmem:[#allocation2 + $0x10] sm:$0xff] }
  0x69   :  { %v427_v21 = vld [vmem:[#allocation5 + $0xa20] sm:$0xff]  ;;  %7160 = vmatpush2.bf16.msra.mxu0 %v18060_v24  ;;  %v96_v24 = vld [vmem:[#allocation2 + $0x58] sm:$0xff] }
  0x6a   :  { %v799_v22 = vld [vmem:[#allocation5 + $0x15c0] sm:$0xff]  ;;  %v18037_v26 = vcombine.high %v415_v20, %v427_v21  ;;  %7202 = vmatprep.subr.bf16.mxu1 %v18445_v19  ;;  %v18036_v32 = vcombine.low %v415_v20, %v427_v21  ;;  %v248_v20 = vld [vmem:[#allocation5 + $0x488] sm:$0xff] }
  0x6b   :  { %v811_v23 = vld [vmem:[#allocation5 + $0x1620] sm:$0xff]  ;;  %7203 = vmatpush2.bf16.msra.mxu1 %v18444_v25 }
  0x6c   :  { %v18421_v27 = vcombine.high %v799_v22, %v811_v23  ;;  %v391_v28 = vld [vmem:[#allocation5 + $0x900] sm:$0xff]  ;;  %7161 = vmatprep.subr.bf16.mxu0 %v18037_v26  ;;  %v18420_v33 = vcombine.low %v799_v22, %v811_v23  ;;  %v260_v22 = vld [vmem:[#allocation5 + $0x4e8] sm:$0xff] }
  0x6d   :  { %v403_v29 = vld [vmem:[#allocation5 + $0x960] sm:$0xff]  ;;  %7162 = vmatpush2.bf16.msra.mxu0 %v18036_v32  ;;  %v90_v23 = vld [vmem:[#allocation2 + $0x28] sm:$0xff] }
  0x6e   :  { %v775_v30 = vld [vmem:[#allocation5 + $0x1500] sm:$0xff]  ;;  %v18013_v34 = vcombine.high %v391_v28, %v403_v29  ;;  %7204 = vmatprep.subr.bf16.mxu1 %v18421_v27  ;;  %v18012_v40 = vcombine.low %v391_v28, %v403_v29  ;;  %v17894_v27 = vcombine.low %v272_v8, %v284_v9  ;;  %v17871_v29 = vcombine.high %v248_v20, %v260_v22 }
  0x6f   :  { %v787_v31 = vld [vmem:[#allocation5 + $0x1560] sm:$0xff]  ;;  %7205 = vmatpush2.bf16.msra.mxu1 %v18420_v33  ;;  %v22070_v32 = vpack.c.bf16 %v96_v24, %v90_v23  ;;  %v224_v33 = vld [vmem:[#allocation5 + $0x3c8] sm:$0xff] }
  0x70   :  { %v18397_v35 = vcombine.high %v775_v30, %v787_v31  ;;  %v367_v36 = vld [vmem:[#allocation5 + $0x840] sm:$0xff]  ;;  %7163 = vmatprep.subr.bf16.mxu0 %v18013_v34  ;;  %v18396_v41 = vcombine.low %v775_v30, %v787_v31  ;;  %v236_v34 = vld [vmem:[#allocation5 + $0x428] sm:$0xff] }
  0x71   :  { %v379_v37 = vld [vmem:[#allocation5 + $0x8a0] sm:$0xff]  ;;  %7164 = vmatpush2.bf16.msra.mxu0 %v18012_v40  ;;  %v17847_v40 = vcombine.high %v224_v33, %v236_v34 }
  0x72   :  { %v751_v38 = vld [vmem:[#allocation5 + $0x1440] sm:$0xff]  ;;  %v17989_v42 = vcombine.high %v367_v36, %v379_v37  ;;  %7206 = vmatprep.subr.bf16.mxu1 %v18397_v35  ;;  %v17988_v48 = vcombine.low %v367_v36, %v379_v37  ;;  %v17870_v36 = vcombine.low %v248_v20, %v260_v22  ;;  %v476_v20 = vld [vmem:[#allocation5 + $0xba8] sm:$0xff] }
  0x73   :  { %v763_v39 = vld [vmem:[#allocation5 + $0x14a0] sm:$0xff]  ;;  %7207 = vmatpush2.bf16.msra.mxu1 %v18396_v41  ;;  %v200_v41 = vld [vmem:[#allocation5 + $0x308] sm:$0xff] }
  0x74   :  { %v18373_v43 = vcombine.high %v751_v38, %v763_v39  ;;  %v343_v44 = vld [vmem:[#allocation5 + $0x780] sm:$0xff]  ;;  %7165 = vmatprep.subr.bf16.mxu0 %v17989_v42  ;;  %v18372_v49 = vcombine.low %v751_v38, %v763_v39  ;;  %v212_v42 = vld [vmem:[#allocation5 + $0x368] sm:$0xff] }
  0x75   :  { %v355_v45 = vld [vmem:[#allocation5 + $0x7e0] sm:$0xff]  ;;  %7166 = vmatpush2.bf16.msra.mxu0 %v17988_v48  ;;  %v176_v48 = vld [vmem:[#allocation5 + $0x248] sm:$0xff] }
  0x76   :  { %v727_v46 = vld [vmem:[#allocation5 + $0x1380] sm:$0xff]  ;;  %v17965_v50 = vcombine.high %v343_v44, %v355_v45  ;;  %7208 = vmatprep.subr.bf16.mxu1 %v18373_v43  ;;  %v17964_v56 = vcombine.low %v343_v44, %v355_v45  ;;  %v17846_v44 = vcombine.low %v224_v33, %v236_v34 }
  0x77   :  { %v739_v47 = vld [vmem:[#allocation5 + $0x13e0] sm:$0xff]  ;;  %7209 = vmatpush2.bf16.msra.mxu1 %v18372_v49  ;;  %v17823_v49 = vcombine.high %v200_v41, %v212_v42 }
  0x78   :  { %v18349_v51 = vcombine.high %v727_v46, %v739_v47  ;;  %v319_v52 = vld [vmem:[#allocation5 + $0x6c0] sm:$0xff]  ;;  %7167 = vmatprep.subr.bf16.mxu0 %v17965_v50  ;;  %v18348_v57 = vcombine.low %v727_v46, %v739_v47  ;;  %v188_v50 = vld [vmem:[#allocation5 + $0x2a8] sm:$0xff] }
  0x79   :  { %v331_v53 = vld [vmem:[#allocation5 + $0x720] sm:$0xff]  ;;  %7168 = vmatpush2.bf16.msra.mxu0 %v17964_v56  ;;  %v152_v56 = vld [vmem:[#allocation5 + $0x188] sm:$0xff] }
  0x7a   :  { %v703_v54 = vld [vmem:[#allocation5 + $0x12c0] sm:$0xff]  ;;  %v17941_v59 = vcombine.high %v319_v52, %v331_v53  ;;  %7210 = vmatprep.subr.bf16.mxu1 %v18349_v51  ;;  %v17940_v2 = vcombine.low %v319_v52, %v331_v53  ;;  %v17822_v52 = vcombine.low %v200_v41, %v212_v42 }
  0x7b   :  { %v715_v55 = vld [vmem:[#allocation5 + $0x1320] sm:$0xff]  ;;  %7211 = vmatpush2.bf16.msra.mxu1 %v18348_v57  ;;  %v17799_v57 = vcombine.high %v176_v48, %v188_v50 }
  0x7c   :  { %v18325_v60 = vcombine.high %v703_v54, %v715_v55  ;;  %v295_v61 = vld [vmem:[#allocation5 + $0x600] sm:$0xff]  ;;  %7169 = vmatprep.subr.bf16.mxu0 %v17941_v59  ;;  %v18324_v3 = vcombine.low %v703_v54, %v715_v55  ;;  %v164_v59 = vld [vmem:[#allocation5 + $0x1e8] sm:$0xff] }
  0x7d   :  { %v307_v62 = vld [vmem:[#allocation5 + $0x660] sm:$0xff]  ;;  %7170 = vmatpush2.bf16.msra.mxu0 %v17940_v2  ;;  %v128_v2 = vld [vmem:[#allocation5 + $0xc8] sm:$0xff] }
  0x7e   :  { %v679_v0 = vld [vmem:[#allocation5 + $0x1200] sm:$0xff]  ;;  %v17917_v4 = vcombine.high %v295_v61, %v307_v62  ;;  %7212 = vmatprep.subr.bf16.mxu1 %v18325_v60  ;;  %v17916_v10 = vcombine.low %v295_v61, %v307_v62  ;;  %v17798_v61 = vcombine.low %v176_v48, %v188_v50 }
  0x7f   :  { %v691_v1 = vld [vmem:[#allocation5 + $0x1260] sm:$0xff]  ;;  %7213 = vmatpush2.bf16.msra.mxu1 %v18324_v3  ;;  %v17775_v3 = vcombine.high %v152_v56, %v164_v59 }
  0x80   :  { %v18301_v5 = vcombine.high %v679_v0, %v691_v1  ;;  %v1039_v6 = vld [vmem:[#allocation5 + $0x1d40] sm:$0xff]  ;;  %7171 = vmatprep.subr.bf16.mxu0 %v17917_v4  ;;  %v18300_v13 = vcombine.low %v679_v0, %v691_v1  ;;  %v140_v4 = vld [vmem:[#allocation5 + $0x128] sm:$0xff] }
  0x81   :  { %v1051_v7 = vld [vmem:[#allocation5 + $0x1da0] sm:$0xff]  ;;  %7172 = vmatpush2.bf16.msra.mxu0 %v17916_v10  ;;  %v104_v10 = vld [vmem:[#allocation5 + $0x8] sm:$0xff] }
  0x82   :  { %v85_v11 = vld [vmem:[#allocation2] sm:$0xff]  ;;  %v18661_v16 = vcombine.high %v1039_v6, %v1051_v7  ;;  %7214 = vmatprep.subr.bf16.mxu1 %v18301_v5  ;;  %v18660_v26 = vcombine.low %v1039_v6, %v1051_v7  ;;  %v17774_v6 = vcombine.low %v152_v56, %v164_v59 }
  0x83   :  { %v93_v15 = vld [vmem:[#allocation2 + $0x40] sm:$0xff]  ;;  %v22066_v21 = vpack.c.bf16 %v91_v12, %v85_v11  ;;  %7215 = vmatpush2.bf16.msra.mxu1 %v18300_v13  ;;  %v17751_v11 = vcombine.high %v128_v2, %v140_v4  ;;  %v116_v12 = vld [vmem:[#allocation5 + $0x68] sm:$0xff] }
  0x84   :  { %v1015_v18 = vld [vmem:[#allocation5 + $0x1c80] sm:$0xff]  ;;  %v22068_v25 = vpack.c.bf16 %v93_v15, %v87_v14  ;;  %7227 = vmatprep.subr.bf16.mxu0 %v18661_v16  ;;  %7270 = vmatprep.subr.bf16.mxu1 %v17895_v17  ;;  %v17750_v14 = vcombine.low %v128_v2, %v140_v4  ;;  %v17726_v23 = vcombine.low %v104_v10, %v116_v12 }
  0x85   :  { %v1027_v19 = vld [vmem:[#allocation5 + $0x1ce0] sm:$0xff]  ;;  %7174 = vmatmul.mubr.bf16.vlgmr.msra.gmra.mxu0 %v22066_v21 }
  0x86   :  { %v18637_v28 = vcombine.high %v1015_v18, %v1027_v19  ;;  %v991_v30 = vld [vmem:[#allocation5 + $0x1bc0] sm:$0xff]  ;;  %7217 = vmatmul.mubr.bf16.vlgmr.msra.gmra.mxu1 %v22068_v25  ;;  %7228 = vmatpush1.bf16.msra.mxu0 %v18660_v26  ;;  %v18636_v35 = vcombine.low %v1015_v18, %v1027_v19  ;;  %v464_v18 = vld [vmem:[#allocation5 + $0xb48] sm:$0xff]  ;;  %v17727_v19 = vcombine.high %v104_v10, %v116_v12 }
  0x87   :  { %v1003_v31 = vld [vmem:[#allocation5 + $0x1c20] sm:$0xff]  ;;  %7271 = vmatpush1.bf16.msra.mxu1 %v17894_v27  ;;  %7259 = vmatprep.mubr.bf16.mxu0 %v22070_v32  ;;  %v18086_v33 = vcombine.low %v464_v18, %v476_v20 }
  0x88   :  { %7229 = vmatprep.subr.bf16.mxu0 %v18637_v28  ;;  %v18613_v37 = vcombine.high %v991_v30, %v1003_v31  ;;  %v967_v38 = vld [vmem:[#allocation5 + $0x1b00] sm:$0xff]  ;;  %7272 = vmatprep.subr.bf16.mxu1 %v17871_v29  ;;  %v18612_v43 = vcombine.low %v991_v30, %v1003_v31  ;;  %v440_v28 = vld [vmem:[#allocation5 + $0xa88] sm:$0xff]  ;;  %v18087_v29 = vcombine.high %v464_v18, %v476_v20 }
  0x89   :  { %v979_v39 = vld [vmem:[#allocation5 + $0x1b60] sm:$0xff]  ;;  %7302 = vmatprep.mubr.bf16.mxu1 %v22060_v58  ;;  %v452_v30 = vld [vmem:[#allocation5 + $0xae8] sm:$0xff] }
  0x8a   :  { %7230 = vmatpush1.bf16.msra.mxu0 %v18636_v35  ;;  %v18589_v45 = vcombine.high %v967_v38, %v979_v39  ;;  %v943_v46 = vld [vmem:[#allocation5 + $0x1a40] sm:$0xff]  ;;  %v18588_v51 = vcombine.low %v967_v38, %v979_v39  ;;  %v18063_v38 = vcombine.high %v440_v28, %v452_v30  ;;  %v428_v39 = vld [vmem:[#allocation5 + $0xa28] sm:$0xff]  ;;  %v18062_v41 = vcombine.low %v440_v28, %v452_v30  ;;  %v95_v28 = vld [vmem:[#allocation2 + $0x50] sm:$0xff] }
  0x8b   :  { %7273 = vmatpush1.bf16.msra.mxu1 %v17870_v36  ;;  %7231 = vmatprep.subr.bf16.mxu0 %v18613_v37  ;;  %v955_v47 = vld [vmem:[#allocation5 + $0x1aa0] sm:$0xff]  ;;  %v416_v37 = vld [vmem:[#allocation5 + $0x9c8] sm:$0xff] }
  0x8c   :  { %7274 = vmatprep.subr.bf16.mxu1 %v17847_v40  ;;  %v18565_v53 = vcombine.high %v943_v46, %v955_v47  ;;  %v919_v54 = vld [vmem:[#allocation5 + $0x1980] sm:$0xff]  ;;  %v18564_v60 = vcombine.low %v943_v46, %v955_v47  ;;  %v18039_v46 = vcombine.high %v416_v37, %v428_v39  ;;  %v404_v47 = vld [vmem:[#allocation5 + $0x968] sm:$0xff] }
  0x8d   :  { %v931_v55 = vld [vmem:[#allocation5 + $0x19e0] sm:$0xff] }
  0x8e   :  { %7232 = vmatpush1.bf16.msra.mxu0 %v18612_v43  ;;  %v18541_v62 = vcombine.high %v919_v54, %v931_v55  ;;  %v895_v0 = vld [vmem:[#allocation5 + $0x18c0] sm:$0xff]  ;;  %v18540_v5 = vcombine.low %v919_v54, %v931_v55  ;;  %v380_v55 = vld [vmem:[#allocation5 + $0x8a8] sm:$0xff] }
  0x8f   :  { %7275 = vmatpush1.bf16.msra.mxu1 %v17846_v44  ;;  %7233 = vmatprep.subr.bf16.mxu0 %v18589_v45  ;;  %v907_v1 = vld [vmem:[#allocation5 + $0x1920] sm:$0xff]  ;;  %v392_v45 = vld [vmem:[#allocation5 + $0x908] sm:$0xff] }
  0x90   :  { %7276 = vmatprep.subr.bf16.mxu1 %v17823_v49  ;;  %v18517_v7 = vcombine.high %v895_v0, %v907_v1  ;;  %v871_v8 = vld [vmem:[#allocation5 + $0x1800] sm:$0xff]  ;;  %v18516_v13 = vcombine.low %v895_v0, %v907_v1  ;;  %v18038_v49 = vcombine.low %v416_v37, %v428_v39  ;;  %v18015_v54 = vcombine.high %v392_v45, %v404_v47  ;;  %v356_v1 = vld [vmem:[#allocation5 + $0x7e8] sm:$0xff] }
  0x91   :  { %v883_v9 = vld [vmem:[#allocation5 + $0x1860] sm:$0xff] }
  0x92   :  { %7234 = vmatpush1.bf16.msra.mxu0 %v18588_v51  ;;  %v18493_v15 = vcombine.high %v871_v8, %v883_v9  ;;  %v1231_v16 = vld [vmem:[#allocation5 + $0x2340] sm:$0xff]  ;;  %v18492_v22 = vcombine.low %v871_v8, %v883_v9  ;;  %v332_v9 = vld [vmem:[#allocation5 + $0x728] sm:$0xff] }
  0x93   :  { %7277 = vmatpush1.bf16.msra.mxu1 %v17822_v52  ;;  %7235 = vmatprep.subr.bf16.mxu0 %v18565_v53  ;;  %v1243_v17 = vld [vmem:[#allocation5 + $0x23a0] sm:$0xff]  ;;  %v368_v53 = vld [vmem:[#allocation5 + $0x848] sm:$0xff] }
  0x94   :  { %7278 = vmatprep.subr.bf16.mxu1 %v17799_v57  ;;  %v18853_v24 = vcombine.high %v1231_v16, %v1243_v17  ;;  %v1207_v26 = vld [vmem:[#allocation5 + $0x2280] sm:$0xff]  ;;  %v18852_v31 = vcombine.low %v1231_v16, %v1243_v17  ;;  %v18014_v57 = vcombine.low %v392_v45, %v404_v47  ;;  %v17991_v0 = vcombine.high %v368_v53, %v380_v55  ;;  %v308_v17 = vld [vmem:[#allocation5 + $0x668] sm:$0xff] }
  0x95   :  { %v1219_v27 = vld [vmem:[#allocation5 + $0x22e0] sm:$0xff]  ;;  %v1004_v47 = vld [vmem:[#allocation5 + $0x1c28] sm:$0xff] }
  0x96   :  { %7236 = vmatpush1.bf16.msra.mxu0 %v18564_v60  ;;  %v18829_v34 = vcombine.high %v1207_v26, %v1219_v27  ;;  %v1183_v35 = vld [vmem:[#allocation5 + $0x21c0] sm:$0xff]  ;;  %v18828_v40 = vcombine.low %v1207_v26, %v1219_v27 }
  0x97   :  { %7279 = vmatpush1.bf16.msra.mxu1 %v17798_v61  ;;  %7237 = vmatprep.subr.bf16.mxu0 %v18541_v62  ;;  %v1195_v36 = vld [vmem:[#allocation5 + $0x2220] sm:$0xff]  ;;  %v344_v62 = vld [vmem:[#allocation5 + $0x788] sm:$0xff] }
  0x98   :  { %7280 = vmatprep.subr.bf16.mxu1 %v17775_v3  ;;  %v18805_v42 = vcombine.high %v1183_v35, %v1195_v36  ;;  %v1159_v43 = vld [vmem:[#allocation5 + $0x2100] sm:$0xff]  ;;  %v18804_v48 = vcombine.low %v1183_v35, %v1195_v36  ;;  %v17990_v3 = vcombine.low %v368_v53, %v380_v55  ;;  %v17967_v8 = vcombine.high %v344_v62, %v356_v1  ;;  %v644_v35 = vld [vmem:[#allocation5 + $0x10e8] sm:$0xff] }
  0x99   :  { %v1171_v44 = vld [vmem:[#allocation5 + $0x2160] sm:$0xff]  ;;  %v1016_v36 = vld [vmem:[#allocation5 + $0x1c88] sm:$0xff] }
  0x9a   :  { %7238 = vmatpush1.bf16.msra.mxu0 %v18540_v5  ;;  %v18781_v50 = vcombine.high %v1159_v43, %v1171_v44  ;;  %v1135_v51 = vld [vmem:[#allocation5 + $0x2040] sm:$0xff]  ;;  %v18780_v56 = vcombine.low %v1159_v43, %v1171_v44  ;;  %v608_v43 = vld [vmem:[#allocation5 + $0xfc8] sm:$0xff] }
  0x9b   :  { %7281 = vmatpush1.bf16.msra.mxu1 %v17774_v6  ;;  %7239 = vmatprep.subr.bf16.mxu0 %v18517_v7  ;;  %v1147_v52 = vld [vmem:[#allocation5 + $0x20a0] sm:$0xff]  ;;  %v320_v7 = vld [vmem:[#allocation5 + $0x6c8] sm:$0xff] }
  0x9c   :  { %7282 = vmatprep.subr.bf16.mxu1 %v17751_v11  ;;  %v18757_v59 = vcombine.high %v1135_v51, %v1147_v52  ;;  %v1111_v60 = vld [vmem:[#allocation5 + $0x1f80] sm:$0xff]  ;;  %v18756_v2 = vcombine.low %v1135_v51, %v1147_v52  ;;  %v17966_v11 = vcombine.low %v344_v62, %v356_v1  ;;  %v17943_v16 = vcombine.high %v320_v7, %v332_v9  ;;  %v620_v44 = vld [vmem:[#allocation5 + $0x1028] sm:$0xff] }
  0x9d   :  { %v1123_v61 = vld [vmem:[#allocation5 + $0x1fe0] sm:$0xff]  ;;  %v584_v51 = vld [vmem:[#allocation5 + $0xf08] sm:$0xff] }
  0x9e   :  { %7240 = vmatpush1.bf16.msra.mxu0 %v18516_v13  ;;  %v18733_v4 = vcombine.high %v1111_v60, %v1123_v61  ;;  %v1087_v5 = vld [vmem:[#allocation5 + $0x1ec0] sm:$0xff]  ;;  %v18732_v10 = vcombine.low %v1111_v60, %v1123_v61  ;;  %v596_v52 = vld [vmem:[#allocation5 + $0xf68] sm:$0xff] }
  0x9f   :  { %7283 = vmatpush1.bf16.msra.mxu1 %v17750_v14  ;;  %7241 = vmatprep.subr.bf16.mxu0 %v18493_v15  ;;  %v1099_v6 = vld [vmem:[#allocation5 + $0x1f20] sm:$0xff]  ;;  %v296_v15 = vld [vmem:[#allocation5 + $0x608] sm:$0xff] }
  0xa0   :  { %7284 = vmatprep.subr.bf16.mxu1 %v17727_v19  ;;  %v18709_v12 = vcombine.high %v1087_v5, %v1099_v6  ;;  %v1063_v13 = vld [vmem:[#allocation5 + $0x1e00] sm:$0xff]  ;;  %v18708_v18 = vcombine.low %v1087_v5, %v1099_v6  ;;  %v17942_v19 = vcombine.low %v320_v7, %v332_v9  ;;  %v17919_v26 = vcombine.high %v296_v15, %v308_v17  ;;  %v968_v53 = vld [vmem:[#allocation5 + $0x1b08] sm:$0xff] }
  0xa1   :  { %v1075_v14 = vld [vmem:[#allocation5 + $0x1e60] sm:$0xff]  ;;  %v980_v55 = vld [vmem:[#allocation5 + $0x1b68] sm:$0xff] }
  0xa2   :  { %7242 = vmatpush1.bf16.msra.mxu0 %v18492_v22  ;;  %v18685_v20 = vcombine.high %v1063_v13, %v1075_v14  ;;  %v656_v22 = vld [vmem:[#allocation5 + $0x1148] sm:$0xff]  ;;  %v89_v27 = vld [vmem:[#allocation2 + $0x20] sm:$0xff]  ;;  %v18684_v30 = vcombine.low %v1063_v13, %v1075_v14 }
  0xa3   :  { %7285 = vmatpush1.bf16.msra.mxu1 %v17726_v23  ;;  %7243 = vmatprep.subr.bf16.mxu0 %v18853_v24  ;;  %v668_v23 = vld [vmem:[#allocation5 + $0x11a8] sm:$0xff]  ;;  %v22076_v39 = vpack.c.bf16 %v95_v28, %v89_v27 }
  0xa4   :  { %7286 = vmatprep.subr.bf16.mxu1 %v18087_v29  ;;  %v1040_v24 = vld [vmem:[#allocation5 + $0x1d48] sm:$0xff] }
  0xa5   :  { %v1052_v29 = vld [vmem:[#allocation5 + $0x1da8] sm:$0xff] }
  0xa6   :  { %7244 = vmatpush2.bf16.msra.mxu0 %v18852_v31  ;;  %v17918_v31 = vcombine.low %v296_v15, %v308_v17  ;;  %v18663_v37 = vcombine.high %v1040_v24, %v1052_v29  ;;  %v560_v60 = vld [vmem:[#allocation5 + $0xe48] sm:$0xff] }
  0xa7   :  { %7287 = vmatpush2.bf16.msra.mxu1 %v18086_v33  ;;  %7245 = vmatprep.subr.bf16.mxu0 %v18829_v34  ;;  %v18279_v33 = vcombine.high %v656_v22, %v668_v23  ;;  %v632_v34 = vld [vmem:[#allocation5 + $0x1088] sm:$0xff] }
  0xa8   :  { %7288 = vmatprep.subr.bf16.mxu1 %v18063_v38  ;;  %v1028_v38 = vld [vmem:[#allocation5 + $0x1ce8] sm:$0xff] }
  0xa9   :  { %v18639_v45 = vcombine.high %v1016_v36, %v1028_v38  ;;  %v572_v61 = vld [vmem:[#allocation5 + $0xea8] sm:$0xff] }
  0xaa   :  { %7246 = vmatpush2.bf16.msra.mxu0 %v18828_v40  ;;  %v18278_v40 = vcombine.low %v656_v22, %v668_v23  ;;  %v944_v62 = vld [vmem:[#allocation5 + $0x1a48] sm:$0xff] }
  0xab   :  { %7289 = vmatpush2.bf16.msra.mxu1 %v18062_v41  ;;  %7247 = vmatprep.subr.bf16.mxu0 %v18805_v42  ;;  %v18662_v41 = vcombine.low %v1040_v24, %v1052_v29  ;;  %v18255_v42 = vcombine.high %v632_v34, %v644_v35  ;;  %v956_v1 = vld [vmem:[#allocation5 + $0x1aa8] sm:$0xff] }
  0xac   :  { %7290 = vmatprep.subr.bf16.mxu1 %v18039_v46  ;;  %v992_v46 = vld [vmem:[#allocation5 + $0x1bc8] sm:$0xff] }
  0xad   :  { %v536_v5 = vld [vmem:[#allocation5 + $0xd88] sm:$0xff] }
  0xae   :  { %7248 = vmatpush2.bf16.msra.mxu0 %v18804_v48  ;;  %v18254_v48 = vcombine.low %v632_v34, %v644_v35  ;;  %v548_v6 = vld [vmem:[#allocation5 + $0xde8] sm:$0xff] }
  0xaf   :  { %7291 = vmatpush2.bf16.msra.mxu1 %v18038_v49  ;;  %7249 = vmatprep.subr.bf16.mxu0 %v18781_v50  ;;  %v18638_v49 = vcombine.low %v1016_v36, %v1028_v38  ;;  %v18231_v50 = vcombine.high %v608_v43, %v620_v44  ;;  %v920_v7 = vld [vmem:[#allocation5 + $0x1988] sm:$0xff] }
  0xb0   :  { %7292 = vmatprep.subr.bf16.mxu1 %v18015_v54  ;;  %v18615_v54 = vcombine.high %v992_v46, %v1004_v47  ;;  %v932_v9 = vld [vmem:[#allocation5 + $0x19e8] sm:$0xff] }
  0xb1   :  { %v512_v13 = vld [vmem:[#allocation5 + $0xcc8] sm:$0xff] }
  0xb2   :  { %7250 = vmatpush2.bf16.msra.mxu0 %v18780_v56  ;;  %v18230_v56 = vcombine.low %v608_v43, %v620_v44  ;;  %v524_v14 = vld [vmem:[#allocation5 + $0xd28] sm:$0xff] }
  0xb3   :  { %7293 = vmatpush2.bf16.msra.mxu1 %v18014_v57  ;;  %7251 = vmatprep.subr.bf16.mxu0 %v18757_v59  ;;  %v18614_v57 = vcombine.low %v992_v46, %v1004_v47  ;;  %v18207_v59 = vcombine.high %v584_v51, %v596_v52  ;;  %v896_v15 = vld [vmem:[#allocation5 + $0x18c8] sm:$0xff]  ;;  %v18134_v28 = vcombine.low %v512_v13, %v524_v14 }
  0xb4   :  { %7294 = vmatprep.subr.bf16.mxu1 %v17991_v0  ;;  %v18591_v0 = vcombine.high %v968_v53, %v980_v55  ;;  %v908_v17 = vld [vmem:[#allocation5 + $0x1928] sm:$0xff] }
  0xb5   :  { %v488_v22 = vld [vmem:[#allocation5 + $0xc08] sm:$0xff]  ;;  %v18518_v29 = vcombine.low %v896_v15, %v908_v17 }
  0xb6   :  { %7252 = vmatpush2.bf16.msra.mxu0 %v18756_v2  ;;  %v18206_v2 = vcombine.low %v584_v51, %v596_v52  ;;  %v500_v23 = vld [vmem:[#allocation5 + $0xc68] sm:$0xff] }
  0xb7   :  { %7295 = vmatpush2.bf16.msra.mxu1 %v17990_v3  ;;  %7253 = vmatprep.subr.bf16.mxu0 %v18733_v4  ;;  %v18590_v3 = vcombine.low %v968_v53, %v980_v55  ;;  %v18183_v4 = vcombine.high %v560_v60, %v572_v61  ;;  %v872_v24 = vld [vmem:[#allocation5 + $0x1808] sm:$0xff] }
  0xb8   :  { %7296 = vmatprep.subr.bf16.mxu1 %v17967_v8  ;;  %v18567_v8 = vcombine.high %v944_v62, %v956_v1  ;;  %v884_v27 = vld [vmem:[#allocation5 + $0x1868] sm:$0xff] }
  0xb9   :  { %v1232_v34 = vld [vmem:[#allocation5 + $0x2348] sm:$0xff]  ;;  %v18495_v35 = vcombine.high %v872_v24, %v884_v27  ;;  %v18494_v38 = vcombine.low %v872_v24, %v884_v27 }
  0xba   :  { %7254 = vmatpush2.bf16.msra.mxu0 %v18732_v10  ;;  %v18182_v10 = vcombine.low %v560_v60, %v572_v61  ;;  %v1244_v36 = vld [vmem:[#allocation5 + $0x23a8] sm:$0xff] }
  0xbb   :  { %7297 = vmatpush2.bf16.msra.mxu1 %v17966_v11  ;;  %7255 = vmatprep.subr.bf16.mxu0 %v18709_v12  ;;  %v18566_v11 = vcombine.low %v944_v62, %v956_v1  ;;  %v18159_v12 = vcombine.high %v536_v5, %v548_v6  ;;  %v1208_v43 = vld [vmem:[#allocation5 + $0x2288] sm:$0xff]  ;;  %v18855_v44 = vcombine.high %v1232_v34, %v1244_v36 }
  0xbc   :  { %7298 = vmatprep.subr.bf16.mxu1 %v17943_v16  ;;  %v18543_v16 = vcombine.high %v920_v7, %v932_v9  ;;  %v18854_v47 = vcombine.low %v1232_v34, %v1244_v36  ;;  %v1184_v51 = vld [vmem:[#allocation5 + $0x21c8] sm:$0xff] }
  0xbd   :  { %v1196_v53 = vld [vmem:[#allocation5 + $0x2228] sm:$0xff] }
  0xbe   :  { %7256 = vmatpush2.bf16.msra.mxu0 %v18708_v18  ;;  %v18158_v18 = vcombine.low %v536_v5, %v548_v6  ;;  %v1160_v60 = vld [vmem:[#allocation5 + $0x2108] sm:$0xff]  ;;  %v18807_v61 = vcombine.high %v1184_v51, %v1196_v53  ;;  %v18806_v1 = vcombine.low %v1184_v51, %v1196_v53  ;;  %v645_v51 = vld [vmem:[#allocation5 + $0x10f0] sm:$0xff] }
  0xbf   :  { %7299 = vmatpush2.bf16.msra.mxu1 %v17942_v19  ;;  %7257 = vmatprep.subr.bf16.mxu0 %v18685_v20  ;;  %v18542_v19 = vcombine.low %v920_v7, %v932_v9  ;;  %v18135_v20 = vcombine.high %v512_v13, %v524_v14  ;;  %v1172_v62 = vld [vmem:[#allocation5 + $0x2168] sm:$0xff] }
  0xc0   :  { %7300 = vmatprep.subr.bf16.mxu1 %v17919_v26  ;;  %v18519_v26 = vcombine.high %v896_v15, %v908_v17  ;;  %v1136_v5 = vld [vmem:[#allocation5 + $0x2048] sm:$0xff]  ;;  %v18783_v6 = vcombine.high %v1160_v60, %v1172_v62  ;;  %v18782_v9 = vcombine.low %v1160_v60, %v1172_v62  ;;  %v621_v60 = vld [vmem:[#allocation5 + $0x1030] sm:$0xff] }
  0xc1   :  { %v1148_v7 = vld [vmem:[#allocation5 + $0x20a8] sm:$0xff] }
  0xc2   :  { %7258 = vmatpush2.bf16.msra.mxu0 %v18684_v30  ;;  %v18111_v30 = vcombine.high %v488_v22, %v500_v23  ;;  %v1112_v13 = vld [vmem:[#allocation5 + $0x1f88] sm:$0xff]  ;;  %v18759_v14 = vcombine.high %v1136_v5, %v1148_v7  ;;  %v18758_v17 = vcombine.low %v1136_v5, %v1148_v7  ;;  %v597_v5 = vld [vmem:[#allocation5 + $0xf70] sm:$0xff] }
  0xc3   :  { %7301 = vmatpush2.bf16.msra.mxu1 %v17918_v31  ;;  %7313 = vmatprep.subr.bf16.mxu0 %v18279_v33  ;;  %v848_v31 = vld [vmem:[#allocation5 + $0x1748] sm:$0xff] }
  0xc4   :  { %7356 = vmatprep.subr.bf16.mxu1 %v18663_v37  ;;  %v860_v33 = vld [vmem:[#allocation5 + $0x17a8] sm:$0xff]  ;;  %v18110_v37 = vcombine.low %v488_v22, %v500_v23 }
  0xc5   :  { %7260 = vmatmul.mubr.bf16.vlgmr.msra.gmra.mxu0 %v22076_v39  ;;  %v18470_v46 = vcombine.low %v848_v31, %v860_v33  ;;  %v1124_v15 = vld [vmem:[#allocation5 + $0x1fe8] sm:$0xff] }
  0xc6   :  { %7303 = vmatmul.mubr.bf16.vlgmr.msra.gmra.mxu1 %v22066_v21  ;;  %7314 = vmatpush1.bf16.msra.mxu0 %v18278_v40  ;;  %v18471_v40 = vcombine.high %v848_v31, %v860_v33  ;;  %v1088_v22 = vld [vmem:[#allocation5 + $0x1ec8] sm:$0xff]  ;;  %v18735_v23 = vcombine.high %v1112_v13, %v1124_v15  ;;  %v18734_v27 = vcombine.low %v1112_v13, %v1124_v15  ;;  %v573_v13 = vld [vmem:[#allocation5 + $0xeb0] sm:$0xff] }
  0xc7   :  { %7357 = vmatpush1.bf16.msra.mxu1 %v18662_v41  ;;  %7315 = vmatprep.subr.bf16.mxu0 %v18255_v42  ;;  %v824_v41 = vld [vmem:[#allocation5 + $0x1688] sm:$0xff] }
  0xc8   :  { %7358 = vmatprep.subr.bf16.mxu1 %v18639_v45  ;;  %7345 = vmatprep.mubr.bf16.mxu0 %v22062_v63  ;;  %v836_v42 = vld [vmem:[#allocation5 + $0x16e8] sm:$0xff] }
  0xc9   :  { %7388 = vmatprep.mubr.bf16.mxu1 %v22070_v32  ;;  %v1220_v45 = vld [vmem:[#allocation5 + $0x22e8] sm:$0xff] }
  0xca   :  { %7316 = vmatpush1.bf16.msra.mxu0 %v18254_v48  ;;  %v18447_v48 = vcombine.high %v824_v41, %v836_v42  ;;  %v18831_v52 = vcombine.high %v1208_v43, %v1220_v45  ;;  %v18830_v55 = vcombine.low %v1208_v43, %v1220_v45  ;;  %v1100_v24 = vld [vmem:[#allocation5 + $0x1f28] sm:$0xff]  ;;  %v669_v43 = vld [vmem:[#allocation5 + $0x11b0] sm:$0xff] }
  0xcb   :  { %7359 = vmatpush1.bf16.msra.mxu1 %v18638_v49  ;;  %7317 = vmatprep.subr.bf16.mxu0 %v18231_v50  ;;  %v800_v49 = vld [vmem:[#allocation5 + $0x15c8] sm:$0xff]  ;;  %v18711_v33 = vcombine.high %v1088_v22, %v1100_v24  ;;  %v18710_v36 = vcombine.low %v1088_v22, %v1100_v24  ;;  %v549_v22 = vld [vmem:[#allocation5 + $0xdf0] sm:$0xff] }
  0xcc   :  { %7360 = vmatprep.subr.bf16.mxu1 %v18615_v54  ;;  %v812_v50 = vld [vmem:[#allocation5 + $0x1628] sm:$0xff]  ;;  %v18446_v54 = vcombine.low %v824_v41, %v836_v42  ;;  %v657_v41 = vld [vmem:[#allocation5 + $0x1150] sm:$0xff] }
  0xcd   :  { %v1064_v31 = vld [vmem:[#allocation5 + $0x1e08] sm:$0xff]  ;;  %v18280_v53 = vcombine.low %v657_v41, %v669_v43 }
  0xce   :  { %7318 = vmatpush1.bf16.msra.mxu0 %v18230_v56  ;;  %v18423_v56 = vcombine.high %v800_v49, %v812_v50  ;;  %v1076_v34 = vld [vmem:[#allocation5 + $0x1e68] sm:$0xff] }
  0xcf   :  { %7361 = vmatpush1.bf16.msra.mxu1 %v18614_v57  ;;  %7319 = vmatprep.subr.bf16.mxu0 %v18207_v59  ;;  %v776_v57 = vld [vmem:[#allocation5 + $0x1508] sm:$0xff]  ;;  %v18687_v42 = vcombine.high %v1064_v31, %v1076_v34  ;;  %v18686_v45 = vcombine.low %v1064_v31, %v1076_v34  ;;  %v525_v31 = vld [vmem:[#allocation5 + $0xd30] sm:$0xff] }
  0xd0   :  { %7362 = vmatprep.subr.bf16.mxu1 %v18591_v0  ;;  %v788_v59 = vld [vmem:[#allocation5 + $0x1568] sm:$0xff]  ;;  %v18422_v0 = vcombine.low %v800_v49, %v812_v50  ;;  %v633_v49 = vld [vmem:[#allocation5 + $0x1090] sm:$0xff]  ;;  %v18281_v50 = vcombine.high %v657_v41, %v669_v43 }
  0xd1   :  { %v18256_v62 = vcombine.low %v633_v49, %v645_v51  ;;  %v501_v41 = vld [vmem:[#allocation5 + $0xc70] sm:$0xff] }
  0xd2   :  { %7320 = vmatpush1.bf16.msra.mxu0 %v18206_v2  ;;  %v18399_v2 = vcombine.high %v776_v57, %v788_v59 }
  0xd3   :  { %7363 = vmatpush1.bf16.msra.mxu1 %v18590_v3  ;;  %7321 = vmatprep.subr.bf16.mxu0 %v18183_v4  ;;  %v752_v3 = vld [vmem:[#allocation5 + $0x1448] sm:$0xff] }
  0xd4   :  { %7364 = vmatprep.subr.bf16.mxu1 %v18567_v8  ;;  %v764_v4 = vld [vmem:[#allocation5 + $0x14a8] sm:$0xff]  ;;  %v18398_v8 = vcombine.low %v776_v57, %v788_v59  ;;  %v609_v57 = vld [vmem:[#allocation5 + $0xfd0] sm:$0xff]  ;;  %v18257_v59 = vcombine.high %v633_v49, %v645_v51 }
  0xd5   :  { %v18232_v7 = vcombine.low %v609_v57, %v621_v60  ;;  %v861_v49 = vld [vmem:[#allocation5 + $0x17b0] sm:$0xff] }
  0xd6   :  { %7322 = vmatpush1.bf16.msra.mxu0 %v18182_v10  ;;  %v18375_v10 = vcombine.high %v752_v3, %v764_v4 }
  0xd7   :  { %7365 = vmatpush1.bf16.msra.mxu1 %v18566_v11  ;;  %7323 = vmatprep.subr.bf16.mxu0 %v18159_v12  ;;  %v728_v11 = vld [vmem:[#allocation5 + $0x1388] sm:$0xff] }
  0xd8   :  { %7366 = vmatprep.subr.bf16.mxu1 %v18543_v16  ;;  %v740_v12 = vld [vmem:[#allocation5 + $0x13e8] sm:$0xff]  ;;  %v18374_v16 = vcombine.low %v752_v3, %v764_v4  ;;  %v585_v3 = vld [vmem:[#allocation5 + $0xf10] sm:$0xff]  ;;  %v18233_v4 = vcombine.high %v609_v57, %v621_v60 }
  0xd9   :  { %v18208_v15 = vcombine.low %v585_v3, %v597_v5  ;;  %v837_v57 = vld [vmem:[#allocation5 + $0x16f0] sm:$0xff] }
  0xda   :  { %7324 = vmatpush1.bf16.msra.mxu0 %v18158_v18  ;;  %v18351_v18 = vcombine.high %v728_v11, %v740_v12 }
  0xdb   :  { %7367 = vmatpush1.bf16.msra.mxu1 %v18542_v19  ;;  %7325 = vmatprep.subr.bf16.mxu0 %v18135_v20  ;;  %v704_v19 = vld [vmem:[#allocation5 + $0x12c8] sm:$0xff] }
  0xdc   :  { %7368 = vmatprep.subr.bf16.mxu1 %v18519_v26  ;;  %v716_v20 = vld [vmem:[#allocation5 + $0x1328] sm:$0xff]  ;;  %v18350_v26 = vcombine.low %v728_v11, %v740_v12  ;;  %v561_v11 = vld [vmem:[#allocation5 + $0xe50] sm:$0xff]  ;;  %v18209_v12 = vcombine.high %v585_v3, %v597_v5 }
  0xdd   :  { %v18184_v24 = vcombine.low %v561_v11, %v573_v13  ;;  %v813_v3 = vld [vmem:[#allocation5 + $0x1630] sm:$0xff] }
  0xde   :  { %7326 = vmatpush1.bf16.msra.mxu0 %v18134_v28  ;;  %v18327_v28 = vcombine.high %v704_v19, %v716_v20 }
  0xdf   :  { %7369 = vmatpush1.bf16.msra.mxu1 %v18518_v29  ;;  %7327 = vmatprep.subr.bf16.mxu0 %v18111_v30  ;;  %v680_v29 = vld [vmem:[#allocation5 + $0x1208] sm:$0xff] }
  0xe0   :  { %7370 = vmatprep.subr.bf16.mxu1 %v18495_v35  ;;  %v692_v30 = vld [vmem:[#allocation5 + $0x1268] sm:$0xff]  ;;  %v18326_v35 = vcombine.low %v704_v19, %v716_v20  ;;  %v537_v19 = vld [vmem:[#allocation5 + $0xd90] sm:$0xff]  ;;  %v18185_v20 = vcombine.high %v561_v11, %v573_v13 }
  0xe1   :  { %v18160_v34 = vcombine.low %v537_v19, %v549_v22  ;;  %v789_v11 = vld [vmem:[#allocation5 + $0x1570] sm:$0xff] }
  0xe2   :  { %7328 = vmatpush1.bf16.msra.mxu0 %v18110_v37  ;;  %v18303_v37 = vcombine.high %v680_v29, %v692_v30 }
  0xe3   :  { %7371 = vmatpush1.bf16.msra.mxu1 %v18494_v38  ;;  %7329 = vmatprep.subr.bf16.mxu0 %v18471_v40  ;;  %v273_v38 = vld [vmem:[#allocation5 + $0x550] sm:$0xff] }
  0xe4   :  { %7372 = vmatprep.subr.bf16.mxu1 %v18855_v44  ;;  %v285_v40 = vld [vmem:[#allocation5 + $0x5b0] sm:$0xff]  ;;  %v18302_v44 = vcombine.low %v680_v29, %v692_v30  ;;  %v18161_v30 = vcombine.high %v537_v19, %v549_v22 }
  0xe5   :  { %v513_v29 = vld [vmem:[#allocation5 + $0xcd0] sm:$0xff] }
  0xe6   :  { %7330 = vmatpush2.bf16.msra.mxu0 %v18470_v46  ;;  %v17897_v46 = vcombine.high %v273_v38, %v285_v40  ;;  %v18136_v43 = vcombine.low %v513_v29, %v525_v31  ;;  %v765_v19 = vld [vmem:[#allocation5 + $0x14b0] sm:$0xff] }
  0xe7   :  { %7373 = vmatpush2.bf16.msra.mxu1 %v18854_v47  ;;  %7331 = vmatprep.subr.bf16.mxu0 %v18447_v48  ;;  %v249_v47 = vld [vmem:[#allocation5 + $0x490] sm:$0xff] }
  0xe8   :  { %7374 = vmatprep.subr.bf16.mxu1 %v18831_v52  ;;  %v261_v48 = vld [vmem:[#allocation5 + $0x4f0] sm:$0xff]  ;;  %v17896_v52 = vcombine.low %v273_v38, %v285_v40  ;;  %v18137_v40 = vcombine.high %v513_v29, %v525_v31 }
  0xe9   :  { %v489_v38 = vld [vmem:[#allocation5 + $0xc10] sm:$0xff] }
  0xea   :  { %7332 = vmatpush2.bf16.msra.mxu0 %v18446_v54  ;;  %v17873_v54 = vcombine.high %v249_v47, %v261_v48  ;;  %v18112_v51 = vcombine.low %v489_v38, %v501_v41  ;;  %v741_v29 = vld [vmem:[#allocation5 + $0x13f0] sm:$0xff] }
  0xeb   :  { %7375 = vmatpush2.bf16.msra.mxu1 %v18830_v55  ;;  %7333 = vmatprep.subr.bf16.mxu0 %v18423_v56  ;;  %v225_v55 = vld [vmem:[#allocation5 + $0x3d0] sm:$0xff] }
  0xec   :  { %7376 = vmatprep.subr.bf16.mxu1 %v18807_v61  ;;  %v237_v56 = vld [vmem:[#allocation5 + $0x430] sm:$0xff]  ;;  %v17872_v61 = vcombine.low %v249_v47, %v261_v48  ;;  %v18113_v48 = vcombine.high %v489_v38, %v501_v41  ;;  %v1261_v41 = vlaneseq }
  0xed   :  { %v849_v47 = vld [vmem:[#allocation5 + $0x1750] sm:$0xff] }
  0xee   :  { %7334 = vmatpush2.bf16.msra.mxu0 %v18422_v0  ;;  %v17849_v0 = vcombine.high %v225_v55, %v237_v56  ;;  %v18472_v60 = vcombine.low %v849_v47, %v861_v49  ;;  %v717_v38 = vld [vmem:[#allocation5 + $0x1330] sm:$0xff] }
  0xef   :  { %7377 = vmatpush2.bf16.msra.mxu1 %v18806_v1  ;;  %7335 = vmatprep.subr.bf16.mxu0 %v18399_v2  ;;  %v201_v1 = vld [vmem:[#allocation5 + $0x310] sm:$0xff] }
  0xf0   :  { %7378 = vmatprep.subr.bf16.mxu1 %v18783_v6  ;;  %v213_v2 = vld [vmem:[#allocation5 + $0x370] sm:$0xff]  ;;  %v17848_v6 = vcombine.low %v225_v55, %v237_v56  ;;  %v18473_v56 = vcombine.high %v849_v47, %v861_v49 }
  0xf1   :  { %v825_v55 = vld [vmem:[#allocation5 + $0x1690] sm:$0xff] }
  0xf2   :  { %7336 = vmatpush2.bf16.msra.mxu0 %v18398_v8  ;;  %v17825_v8 = vcombine.high %v201_v1, %v213_v2  ;;  %v18448_v5 = vcombine.low %v825_v55, %v837_v57 }
  0xf3   :  { %7379 = vmatpush2.bf16.msra.mxu1 %v18782_v9  ;;  %7337 = vmatprep.subr.bf16.mxu0 %v18375_v10  ;;  %v177_v9 = vld [vmem:[#allocation5 + $0x250] sm:$0xff] }
  0xf4   :  { %7380 = vmatprep.subr.bf16.mxu1 %v18759_v14  ;;  %v189_v10 = vld [vmem:[#allocation5 + $0x2b0] sm:$0xff]  ;;  %v17824_v14 = vcombine.low %v201_v1, %v213_v2  ;;  %v18449_v2 = vcombine.high %v825_v55, %v837_v57  ;;  %v274_v55 = vld [vmem:[#allocation5 + $0x558] sm:$0xff] }
  0xf5   :  { %v801_v1 = vld [vmem:[#allocation5 + $0x15d0] sm:$0xff]  ;;  %v286_v57 = vld [vmem:[#allocation5 + $0x5b8] sm:$0xff] }
  0xf6   :  { %7338 = vmatpush2.bf16.msra.mxu0 %v18374_v16  ;;  %v17801_v16 = vcombine.high %v177_v9, %v189_v10  ;;  %v18424_v13 = vcombine.low %v801_v1, %v813_v3 }
  0xf7   :  { %7381 = vmatpush2.bf16.msra.mxu1 %v18758_v17  ;;  %7339 = vmatprep.subr.bf16.mxu0 %v18351_v18  ;;  %v153_v17 = vld [vmem:[#allocation5 + $0x190] sm:$0xff] }
  0xf8   :  { %7382 = vmatprep.subr.bf16.mxu1 %v18735_v23  ;;  %v165_v18 = vld [vmem:[#allocation5 + $0x1f0] sm:$0xff]  ;;  %v17800_v23 = vcombine.low %v177_v9, %v189_v10  ;;  %v18425_v10 = vcombine.high %v801_v1, %v813_v3  ;;  %v250_v3 = vld [vmem:[#allocation5 + $0x498] sm:$0xff] }
  0xf9   :  { %v777_v9 = vld [vmem:[#allocation5 + $0x1510] sm:$0xff] }
  0xfa   :  { %7340 = vmatpush2.bf16.msra.mxu0 %v18350_v26  ;;  %v17777_v26 = vcombine.high %v153_v17, %v165_v18  ;;  %v18400_v22 = vcombine.low %v777_v9, %v789_v11  ;;  %v1017_v1 = vld [vmem:[#allocation5 + $0x1c90] sm:$0xff] }
  0xfb   :  { %7383 = vmatpush2.bf16.msra.mxu1 %v18734_v27  ;;  %7341 = vmatprep.subr.bf16.mxu0 %v18327_v28  ;;  %v129_v27 = vld [vmem:[#allocation5 + $0xd0] sm:$0xff] }
  0xfc   :  { %7384 = vmatprep.subr.bf16.mxu1 %v18711_v33  ;;  %v141_v28 = vld [vmem:[#allocation5 + $0x130] sm:$0xff]  ;;  %v17776_v33 = vcombine.low %v153_v17, %v165_v18  ;;  %v18401_v18 = vcombine.high %v777_v9, %v789_v11 }
  0xfd   :  { %v753_v17 = vld [vmem:[#allocation5 + $0x1450] sm:$0xff] }
  0xfe   :  { %7342 = vmatpush2.bf16.msra.mxu0 %v18326_v35  ;;  %v17753_v35 = vcombine.high %v129_v27, %v141_v28  ;;  %v18376_v31 = vcombine.low %v753_v17, %v765_v19  ;;  %v1005_v11 = vld [vmem:[#allocation5 + $0x1c30] sm:$0xff] }
  0xff   :  { %7385 = vmatpush2.bf16.msra.mxu1 %v18710_v36  ;;  %7343 = vmatprep.subr.bf16.mxu0 %v18303_v37  ;;  %v105_v36 = vld [vmem:[#allocation5 + $0x10] sm:$0xff] }
 0x100   :  { %7386 = vmatprep.subr.bf16.mxu1 %v18687_v42  ;;  %v117_v37 = vld [vmem:[#allocation5 + $0x70] sm:$0xff]  ;;  %v17752_v42 = vcombine.low %v129_v27, %v141_v28  ;;  %v18377_v28 = vcombine.high %v753_v17, %v765_v19 }
 0x101   :  { %v729_v27 = vld [vmem:[#allocation5 + $0x1390] sm:$0xff] }
 0x102   :  { %7344 = vmatpush2.bf16.msra.mxu0 %v18302_v44  ;;  %v17729_v44 = vcombine.high %v105_v36, %v117_v37 }
 0x103   :  { %7387 = vmatpush2.bf16.msra.mxu1 %v18686_v45  ;;  %7399 = vmatprep.subr.bf16.mxu0 %v17897_v46  ;;  %v465_v45 = vld [vmem:[#allocation5 + $0xb50] sm:$0xff] }
 0x104   :  { %7442 = vmatprep.subr.bf16.mxu1 %v18281_v50  ;;  %v477_v46 = vld [vmem:[#allocation5 + $0xbb0] sm:$0xff]  ;;  %v17728_v50 = vcombine.low %v105_v36, %v117_v37  ;;  %v18353_v37 = vcombine.high %v729_v27, %v741_v29 }
 0x105   :  { %7346 = vmatmul.mubr.bf16.vlgmr.msra.gmra.mxu0 %v22068_v25  ;;  %v705_v36 = vld [vmem:[#allocation5 + $0x12d0] sm:$0xff] }
 0x106   :  { %7389 = vmatmul.mubr.bf16.vlgmr.msra.gmra.mxu1 %v22076_v39  ;;  %7400 = vmatpush1.bf16.msra.mxu0 %v17896_v52  ;;  %v18089_v52 = vcombine.high %v465_v45, %v477_v46  ;;  %v18329_v47 = vcombine.high %v705_v36, %v717_v38 }
 0x107   :  { %7443 = vmatpush1.bf16.msra.mxu1 %v18280_v53  ;;  %7401 = vmatprep.subr.bf16.mxu0 %v17873_v54  ;;  %v441_v53 = vld [vmem:[#allocation5 + $0xa90] sm:$0xff] }
 0x108   :  { %7444 = vmatprep.subr.bf16.mxu1 %v18257_v59  ;;  %7431 = vmatprep.mubr.bf16.mxu0 %v22060_v58  ;;  %v453_v54 = vld [vmem:[#allocation5 + $0xaf0] sm:$0xff]  ;;  %v18088_v59 = vcombine.low %v465_v45, %v477_v46 }
 0x109   :  { %7474 = vmatprep.mubr.bf16.mxu1 %v22062_v63  ;;  %v309_v45 = vld [vmem:[#allocation5 + $0x670] sm:$0xff] }
 0x10a   :  { %7402 = vmatpush1.bf16.msra.mxu0 %v17872_v61  ;;  %v18065_v61 = vcombine.high %v441_v53, %v453_v54  ;;  %v681_v46 = vld [vmem:[#allocation5 + $0x1210] sm:$0xff] }
 0x10b   :  { %7445 = vmatpush1.bf16.msra.mxu1 %v18256_v62  ;;  %7403 = vmatprep.subr.bf16.mxu0 %v17849_v0  ;;  %v417_v62 = vld [vmem:[#allocation5 + $0x9d0] sm:$0xff] }
 0x10c   :  { %7446 = vmatprep.subr.bf16.mxu1 %v18233_v4  ;;  %v429_v0 = vld [vmem:[#allocation5 + $0xa30] sm:$0xff]  ;;  %v18064_v4 = vcombine.low %v441_v53, %v453_v54 }
 0x10d   :  { %v1041_v53 = vld [vmem:[#allocation5 + $0x1d50] sm:$0xff] }
 0x10e   :  { %7404 = vmatpush1.bf16.msra.mxu0 %v17848_v6  ;;  %v18041_v6 = vcombine.high %v417_v62, %v429_v0  ;;  %v1053_v54 = vld [vmem:[#allocation5 + $0x1db0] sm:$0xff] }
 0x10f   :  { %7447 = vmatpush1.bf16.msra.mxu1 %v18232_v7  ;;  %7405 = vmatprep.subr.bf16.mxu0 %v17825_v8  ;;  %v393_v7 = vld [vmem:[#allocation5 + $0x910] sm:$0xff] }
 0x110   :  { %7448 = vmatprep.subr.bf16.mxu1 %v18209_v12  ;;  %v405_v8 = vld [vmem:[#allocation5 + $0x970] sm:$0xff]  ;;  %v18040_v12 = vcombine.low %v417_v62, %v429_v0  ;;  %v18665_v0 = vcombine.high %v1041_v53, %v1053_v54 }
 0x112   :  { %7406 = vmatpush1.bf16.msra.mxu0 %v17824_v14  ;;  %v18017_v14 = vcombine.high %v393_v7, %v405_v8 }
 0x113   :  { %7449 = vmatpush1.bf16.msra.mxu1 %v18208_v15  ;;  %7407 = vmatprep.subr.bf16.mxu0 %v17801_v16  ;;  %v369_v15 = vld [vmem:[#allocation5 + $0x850] sm:$0xff] }
 0x114   :  { %7450 = vmatprep.subr.bf16.mxu1 %v18185_v20  ;;  %v381_v16 = vld [vmem:[#allocation5 + $0x8b0] sm:$0xff]  ;;  %v18016_v20 = vcombine.low %v393_v7, %v405_v8  ;;  %v18664_v7 = vcombine.low %v1041_v53, %v1053_v54  ;;  %v17898_v8 = vcombine.low %v274_v55, %v286_v57  ;;  %v166_v53 = vld [vmem:[#allocation5 + $0x1f8] sm:$0xff] }
 0x116   :  { %7408 = vmatpush1.bf16.msra.mxu0 %v17800_v23  ;;  %v17993_v23 = vcombine.high %v369_v15, %v381_v16 }
 0x117   :  { %7451 = vmatpush1.bf16.msra.mxu1 %v18184_v24  ;;  %7409 = vmatprep.subr.bf16.mxu0 %v17777_v26  ;;  %v345_v24 = vld [vmem:[#allocation5 + $0x790] sm:$0xff] }
 0x118   :  { %7452 = vmatprep.subr.bf16.mxu1 %v18161_v30  ;;  %v357_v26 = vld [vmem:[#allocation5 + $0x7f0] sm:$0xff]  ;;  %v17992_v30 = vcombine.low %v369_v15, %v381_v16 }
 0x11a   :  { %7410 = vmatpush1.bf16.msra.mxu0 %v17776_v33  ;;  %v17969_v33 = vcombine.high %v345_v24, %v357_v26 }
 0x11b   :  { %7453 = vmatpush1.bf16.msra.mxu1 %v18160_v34  ;;  %7411 = vmatprep.subr.bf16.mxu0 %v17753_v35  ;;  %v321_v34 = vld [vmem:[#allocation5 + $0x6d0] sm:$0xff] }
 0x11c   :  { %7454 = vmatprep.subr.bf16.mxu1 %v18137_v40  ;;  %v333_v35 = vld [vmem:[#allocation5 + $0x730] sm:$0xff]  ;;  %v17968_v40 = vcombine.low %v345_v24, %v357_v26  ;;  %v202_v26 = vld [vmem:[#allocation5 + $0x318] sm:$0xff] }
 0x11d   :  { %v17944_v49 = vcombine.low %v321_v34, %v333_v35  ;;  %v981_v24 = vld [vmem:[#allocation5 + $0x1b70] sm:$0xff] }
 0x11e   :  { %7412 = vmatpush1.bf16.msra.mxu0 %v17752_v42  ;;  %v18352_v42 = vcombine.low %v729_v27, %v741_v29 }
 0x11f   :  { %7455 = vmatpush1.bf16.msra.mxu1 %v18136_v43  ;;  %7413 = vmatprep.subr.bf16.mxu0 %v17729_v44  ;;  %v17945_v43 = vcombine.high %v321_v34, %v333_v35  ;;  %v297_v44 = vld [vmem:[#allocation5 + $0x610] sm:$0xff] }
 0x120   :  { %7456 = vmatprep.subr.bf16.mxu1 %v18113_v48  ;;  %v693_v48 = vld [vmem:[#allocation5 + $0x1270] sm:$0xff] }
 0x121   :  { %v18304_v62 = vcombine.low %v681_v46, %v693_v48 }
 0x122   :  { %7414 = vmatpush1.bf16.msra.mxu0 %v17728_v50  ;;  %v22086_v50 = vshrl.u32 %v1261_v41, 7  ;;  %v178_v41 = vld [vmem:[#allocation5 + $0x258] sm:$0xff] }
 0x123   :  { %7457 = vmatpush1.bf16.msra.mxu1 %v18112_v51  ;;  %7415 = vmatprep.subr.bf16.mxu0 %v18089_v52  ;;  %v18328_v51 = vcombine.low %v705_v36, %v717_v38  ;;  %v17921_v52 = vcombine.high %v297_v44, %v309_v45  ;;  %v945_v38 = vld [vmem:[#allocation5 + $0x1a50] sm:$0xff] }
 0x124   :  { %7458 = vmatprep.subr.bf16.mxu1 %v18473_v56  ;;  %v18305_v56 = vcombine.high %v681_v46, %v693_v48  ;;  %v921_v48 = vld [vmem:[#allocation5 + $0x1990] sm:$0xff] }
 0x126   :  { %7416 = vmatpush2.bf16.msra.mxu0 %v18088_v59  ;;  %v1255_v59 = vld [vmem:[#allocation7] sm:$0xff] }
 0x127   :  { %7459 = vmatpush2.bf16.msra.mxu1 %v18472_v60  ;;  %7417 = vmatprep.subr.bf16.mxu0 %v18065_v61  ;;  %v17920_v60 = vcombine.low %v297_v44, %v309_v45  ;;  %v22089_v61 = vsub.s32 0, %v22086_v50  ;;  %v190_v44 = vld [vmem:[#allocation5 + $0x2b8] sm:$0xff] }
 0x128   :  { %7460 = vmatprep.subr.bf16.mxu1 %v18449_v2  ;;  %v1029_v2 = vld [vmem:[#allocation5 + $0x1cf0] sm:$0xff] }
 0x129   :  { %23125 = vst [vmem:[#allocation16_spill] sm:$0xff] %v22089_v61  ;;  %v18641_v9 = vcombine.high %v1017_v1, %v1029_v2 }
 0x12a   :  { %7418 = vmatpush2.bf16.msra.mxu0 %v18064_v4  ;;  %v17899_v4 = vcombine.high %v274_v55, %v286_v57  ;;  %v17802_v55 = vcombine.low %v178_v41, %v190_v44  ;;  %v897_v57 = vld [vmem:[#allocation5 + $0x18d0] sm:$0xff] }
 0x12b   :  { %7461 = vmatpush2.bf16.msra.mxu1 %v18448_v5  ;;  %7419 = vmatprep.subr.bf16.mxu0 %v18041_v6  ;;  %v262_v5 = vld [vmem:[#allocation5 + $0x4f8] sm:$0xff]  ;;  %v1264_v6 = vrot.slane %v1255_v59, %v22089_v61  ;;  %v909_v59 = vld [vmem:[#allocation5 + $0x1930] sm:$0xff] }
 0x12c   :  { %7462 = vmatprep.subr.bf16.mxu1 %v18425_v10  ;;  %v993_v10 = vld [vmem:[#allocation5 + $0x1bd0] sm:$0xff] }
 0x12d   :  { %v18616_v34 = vcombine.low %v993_v10, %v1005_v11 }
 0x12e   :  { %7420 = vmatpush2.bf16.msra.mxu0 %v18040_v12  ;;  %v226_v12 = vld [vmem:[#allocation5 + $0x3d8] sm:$0xff] }
 0x12f   :  { %7463 = vmatpush2.bf16.msra.mxu1 %v18424_v13  ;;  %7421 = vmatprep.subr.bf16.mxu0 %v18017_v14  ;;  %v17875_v13 = vcombine.high %v250_v3, %v262_v5  ;;  %v238_v14 = vld [vmem:[#allocation5 + $0x438] sm:$0xff] }
 0x130   :  { %7464 = vmatprep.subr.bf16.mxu1 %v18401_v18  ;;  %v18640_v18 = vcombine.low %v1017_v1, %v1029_v2  ;;  %v17851_v29 = vcombine.high %v226_v12, %v238_v14  ;;  %v17850_v36 = vcombine.low %v226_v12, %v238_v14  ;;  %v1233_v12 = vld [vmem:[#allocation5 + $0x2350] sm:$0xff]  ;;  %v466_v14 = vld [vmem:[#allocation5 + $0xb58] sm:$0xff] }
 0x132   :  { %7422 = vmatpush2.bf16.msra.mxu0 %v18016_v20  ;;  %v17874_v20 = vcombine.low %v250_v3, %v262_v5  ;;  %v18521_v3 = vcombine.high %v897_v57, %v909_v59  ;;  %v885_v5 = vld [vmem:[#allocation5 + $0x1870] sm:$0xff] }
 0x133   :  { %7465 = vmatpush2.bf16.msra.mxu1 %v18400_v22  ;;  %7423 = vmatprep.subr.bf16.mxu0 %v17993_v23  ;;  %v18617_v22 = vcombine.high %v993_v10, %v1005_v11  ;;  %v969_v23 = vld [vmem:[#allocation5 + $0x1b10] sm:$0xff] }
 0x134   :  { %7466 = vmatprep.subr.bf16.mxu1 %v18377_v28  ;;  %v18592_v45 = vcombine.low %v969_v23, %v981_v24 }
 0x136   :  { %7424 = vmatpush2.bf16.msra.mxu0 %v17992_v30  ;;  %v214_v30 = vld [vmem:[#allocation5 + $0x378] sm:$0xff] }
 0x137   :  { %7467 = vmatpush2.bf16.msra.mxu1 %v18376_v31  ;;  %7425 = vmatprep.subr.bf16.mxu0 %v17969_v33  ;;  %v17826_v46 = vcombine.low %v202_v26, %v214_v30 }
 0x138   :  { %7468 = vmatprep.subr.bf16.mxu1 %v18353_v37  ;;  %v18593_v37 = vcombine.high %v969_v23, %v981_v24  ;;  %v1221_v23 = vld [vmem:[#allocation5 + $0x22f0] sm:$0xff]  ;;  %v442_v24 = vld [vmem:[#allocation5 + $0xa98] sm:$0xff] }
 0x13a   :  { %7426 = vmatpush2.bf16.msra.mxu0 %v17968_v40  ;;  %v957_v40 = vld [vmem:[#allocation5 + $0x1ab0] sm:$0xff] }
 0x13b   :  { %7469 = vmatpush2.bf16.msra.mxu1 %v18352_v42  ;;  %7427 = vmatprep.subr.bf16.mxu0 %v17945_v43  ;;  %v17827_v43 = vcombine.high %v202_v26, %v214_v30  ;;  %v18568_v54 = vcombine.low %v945_v38, %v957_v40 }
 0x13c   :  { %7470 = vmatprep.subr.bf16.mxu1 %v18329_v47  ;;  %v18569_v47 = vcombine.high %v945_v38, %v957_v40  ;;  %v430_v38 = vld [vmem:[#allocation5 + $0xa38] sm:$0xff] }
 0x13e   :  { %7428 = vmatpush2.bf16.msra.mxu0 %v17944_v49  ;;  %v933_v49 = vld [vmem:[#allocation5 + $0x19f0] sm:$0xff] }
 0x13f   :  { %7471 = vmatpush2.bf16.msra.mxu1 %v18328_v51  ;;  %7429 = vmatprep.subr.bf16.mxu0 %v17921_v52  ;;  %v154_v51 = vld [vmem:[#allocation5 + $0x198] sm:$0xff]  ;;  %v17803_v52 = vcombine.high %v178_v41, %v190_v44  ;;  %v18544_v1 = vcombine.low %v921_v48, %v933_v49  ;;  %v1161_v44 = vld [vmem:[#allocation5 + $0x2110] sm:$0xff] }
 0x140   :  { %7472 = vmatprep.subr.bf16.mxu1 %v18305_v56  ;;  %v18545_v56 = vcombine.high %v921_v48, %v933_v49  ;;  %v17778_v2 = vcombine.low %v154_v51, %v166_v53  ;;  %v406_v48 = vld [vmem:[#allocation5 + $0x978] sm:$0xff] }
 0x142   :  { %7430 = vmatpush2.bf16.msra.mxu0 %v17920_v60  ;;  %v130_v60 = vld [vmem:[#allocation5 + $0xd8] sm:$0xff] }
 0x143   :  { %7473 = vmatpush2.bf16.msra.mxu1 %v18304_v62  ;;  %7485 = vmatprep.subr.bf16.mxu0 %v18665_v0  ;;  %v17779_v62 = vcombine.high %v154_v51, %v166_v53  ;;  %v142_v0 = vld [vmem:[#allocation5 + $0x138] sm:$0xff]  ;;  %v1137_v53 = vld [vmem:[#allocation5 + $0x2050] sm:$0xff] }
 0x144   :  { %7528 = vmatprep.subr.bf16.mxu1 %v17899_v4  ;;  %v873_v4 = vld [vmem:[#allocation5 + $0x1810] sm:$0xff]  ;;  %v17754_v10 = vcombine.low %v130_v60, %v142_v0 }
 0x145   :  { %v7175_v15 = vpop.f32.mrf.mxu0  ;;  %7432 = vmatmul.mubr.bf16.vlgmr.msra.gmra.mxu0 %v22066_v21  ;;  %v18497_v11 = vcombine.high %v873_v4, %v885_v5 }
 0x146   :  { %v7176_v16 = vadd.f32 %v7175_v15, %v1264_v6  ;;  %v7218_v17 = vpop.f32.mrf.mxu1  ;;  %7475 = vmatmul.mubr.bf16.vlgmr.msra.gmra.mxu1 %v22068_v25  ;;  %7486 = vmatpush1.bf16.msra.mxu0 %v18664_v7  ;;  %v17755_v7 = vcombine.high %v130_v60, %v142_v0  ;;  %v1113_v0 = vld [vmem:[#allocation5 + $0x1f90] sm:$0xff] }
 0x147   :  { %7529 = vmatpush1.bf16.msra.mxu1 %v17898_v8  ;;  %v22094_v19 = vpop.f32.mrf.mxu0  ;;  %7487 = vmatprep.subr.bf16.mxu0 %v18641_v9  ;;  %v118_v8 = vld [vmem:[#allocation5 + $0x78] sm:$0xff]  ;;  %v18520_v9 = vcombine.low %v897_v57, %v909_v59 }
 0x148   :  { %v22096_v27 = vadd.f32 %v7218_v17, %v7176_v16  ;;  %v22098_v28 = vpop.f32.mrf.mxu1  ;;  %7530 = vmatprep.subr.bf16.mxu1 %v17875_v13  ;;  %7517 = vmatprep.mubr.bf16.mxu0 %v22070_v32  ;;  %v1245_v13 = vld [vmem:[#allocation5 + $0x23b0] sm:$0xff]  ;;  %v478_v16 = vld [vmem:[#allocation5 + $0xbb8] sm:$0xff]  ;;  %v18496_v17 = vcombine.low %v873_v4, %v885_v5 }
 0x149   :  { %v7179_v31 = vpop.f32.mrf.mxu0  ;;  %7560 = vmatprep.mubr.bf16.mxu1 %v22060_v58  ;;  %v18091_v26 = vcombine.high %v466_v14, %v478_v16  ;;  %v18856_v30 = vcombine.low %v1233_v12, %v1245_v13  ;;  %v382_v57 = vld [vmem:[#allocation5 + $0x8b8] sm:$0xff] }
 0x14a   :  { %v7180_v33 = vadd.f32 %v7179_v31, %v1264_v6  ;;  %7488 = vmatpush1.bf16.msra.mxu0 %v18640_v18  ;;  %v7222_v35 = vpop.f32.mrf.mxu1  ;;  %v106_v6 = vld [vmem:[#allocation5 + $0x18] sm:$0xff]  ;;  %v18090_v31 = vcombine.low %v466_v14, %v478_v16  ;;  %v1065_v16 = vld [vmem:[#allocation5 + $0x1e10] sm:$0xff] }
 0x14b   :  { %7531 = vmatpush1.bf16.msra.mxu1 %v17874_v20  ;;  %7489 = vmatprep.subr.bf16.mxu0 %v18617_v22  ;;  %v17731_v15 = vcombine.high %v106_v6, %v118_v8  ;;  %v17730_v18 = vcombine.low %v106_v6, %v118_v8  ;;  %v18857_v20 = vcombine.high %v1233_v12, %v1245_v13  ;;  %v1209_v22 = vld [vmem:[#allocation5 + $0x2290] sm:$0xff]  ;;  %v358_v4 = vld [vmem:[#allocation5 + $0x7f8] sm:$0xff] }
 0x14c   :  { %v22102_v42 = vadd.f32 %v7222_v35, %v7180_v33  ;;  %7532 = vmatprep.subr.bf16.mxu1 %v17851_v29  ;;  %v454_v29 = vld [vmem:[#allocation5 + $0xaf8] sm:$0xff]  ;;  %v18833_v33 = vcombine.high %v1209_v22, %v1221_v23  ;;  %v1197_v35 = vld [vmem:[#allocation5 + $0x2230] sm:$0xff]  ;;  %v18832_v40 = vcombine.low %v1209_v22, %v1221_v23 }
 0x14d   :  { %v18066_v41 = vcombine.low %v442_v24, %v454_v29  ;;  %v1089_v8 = vld [vmem:[#allocation5 + $0x1ed0] sm:$0xff]  ;;  %v334_v12 = vld [vmem:[#allocation5 + $0x738] sm:$0xff] }
 0x14e   :  { %7490 = vmatpush1.bf16.msra.mxu0 %v18616_v34  ;;  %v1185_v34 = vld [vmem:[#allocation5 + $0x21d0] sm:$0xff]  ;;  %v310_v22 = vld [vmem:[#allocation5 + $0x678] sm:$0xff] }
 0x14f   :  { %7533 = vmatpush1.bf16.msra.mxu1 %v17850_v36  ;;  %7491 = vmatprep.subr.bf16.mxu0 %v18593_v37  ;;  %v418_v36 = vld [vmem:[#allocation5 + $0x9d8] sm:$0xff]  ;;  %v18067_v37 = vcombine.high %v442_v24, %v454_v29  ;;  %v18808_v49 = vcombine.low %v1185_v34, %v1197_v35 }
 0x150   :  { %7534 = vmatprep.subr.bf16.mxu1 %v17827_v43  ;;  %v18809_v43 = vcombine.high %v1185_v34, %v1197_v35  ;;  %v18042_v51 = vcombine.low %v418_v36, %v430_v38  ;;  %v658_v29 = vld [vmem:[#allocation5 + $0x1158] sm:$0xff] }
 0x151   :  { %v1054_v34 = vld [vmem:[#allocation5 + $0x1db8] sm:$0xff] }
 0x152   :  { %7492 = vmatpush1.bf16.msra.mxu0 %v18592_v45  ;;  %v1173_v45 = vld [vmem:[#allocation5 + $0x2170] sm:$0xff] }
 0x153   :  { %7535 = vmatpush1.bf16.msra.mxu1 %v17826_v46  ;;  %7493 = vmatprep.subr.bf16.mxu0 %v18569_v47  ;;  %v394_v46 = vld [vmem:[#allocation5 + $0x918] sm:$0xff]  ;;  %v18043_v47 = vcombine.high %v418_v36, %v430_v38  ;;  %v18784_v59 = vcombine.low %v1161_v44, %v1173_v45 }
 0x154   :  { %7536 = vmatprep.subr.bf16.mxu1 %v17803_v52  ;;  %v18785_v52 = vcombine.high %v1161_v44, %v1173_v45  ;;  %v18018_v60 = vcombine.low %v394_v46, %v406_v48  ;;  %v634_v38 = vld [vmem:[#allocation5 + $0x1098] sm:$0xff] }
 0x155   :  { %v1030_v44 = vld [vmem:[#allocation5 + $0x1cf8] sm:$0xff] }
 0x156   :  { %7494 = vmatpush1.bf16.msra.mxu0 %v18568_v54  ;;  %v1149_v54 = vld [vmem:[#allocation5 + $0x20b0] sm:$0xff] }
 0x157   :  { %7537 = vmatpush1.bf16.msra.mxu1 %v17802_v55  ;;  %7495 = vmatprep.subr.bf16.mxu0 %v18545_v56  ;;  %v370_v55 = vld [vmem:[#allocation5 + $0x858] sm:$0xff]  ;;  %v18019_v56 = vcombine.high %v394_v46, %v406_v48  ;;  %v18760_v5 = vcombine.low %v1137_v53, %v1149_v54  ;;  %v22104_v46 = vpop.f32.mrf.mxu0 }
 0x158   :  { %7538 = vmatprep.subr.bf16.mxu1 %v17779_v62  ;;  %v18761_v62 = vcombine.high %v1137_v53, %v1149_v54  ;;  %v17994_v6 = vcombine.low %v370_v55, %v382_v57  ;;  %v1006_v54 = vld [vmem:[#allocation5 + $0x1c38] sm:$0xff] }
 0x15a   :  { %7496 = vmatpush1.bf16.msra.mxu0 %v18544_v1  ;;  %v1125_v1 = vld [vmem:[#allocation5 + $0x1ff0] sm:$0xff] }
 0x15b   :  { %7539 = vmatpush1.bf16.msra.mxu1 %v17778_v2  ;;  %7497 = vmatprep.subr.bf16.mxu0 %v18521_v3  ;;  %v346_v2 = vld [vmem:[#allocation5 + $0x798] sm:$0xff]  ;;  %v17995_v3 = vcombine.high %v370_v55, %v382_v57  ;;  %v18736_v13 = vcombine.low %v1113_v0, %v1125_v1 }
 0x15c   :  { %7540 = vmatprep.subr.bf16.mxu1 %v17755_v7  ;;  %v18737_v7 = vcombine.high %v1113_v0, %v1125_v1  ;;  %v17970_v14 = vcombine.low %v346_v2, %v358_v4  ;;  %v586_v0 = vld [vmem:[#allocation5 + $0xf18] sm:$0xff] }
 0x15d   :  { %v598_v1 = vld [vmem:[#allocation5 + $0xf78] sm:$0xff] }
 0x15e   :  { %7498 = vmatpush1.bf16.msra.mxu0 %v18520_v9  ;;  %v1101_v9 = vld [vmem:[#allocation5 + $0x1f30] sm:$0xff] }
 0x15f   :  { %7541 = vmatpush1.bf16.msra.mxu1 %v17754_v10  ;;  %7499 = vmatprep.subr.bf16.mxu0 %v18497_v11  ;;  %v322_v10 = vld [vmem:[#allocation5 + $0x6d8] sm:$0xff]  ;;  %v17971_v11 = vcombine.high %v346_v2, %v358_v4  ;;  %v18712_v23 = vcombine.low %v1089_v8, %v1101_v9 }
 0x160   :  { %7542 = vmatprep.subr.bf16.mxu1 %v17731_v15  ;;  %v18713_v15 = vcombine.high %v1089_v8, %v1101_v9  ;;  %v17946_v24 = vcombine.low %v322_v10, %v334_v12  ;;  %v970_v2 = vld [vmem:[#allocation5 + $0x1b18] sm:$0xff] }
 0x162   :  { %7500 = vmatpush1.bf16.msra.mxu0 %v18496_v17  ;;  %v1077_v17 = vld [vmem:[#allocation5 + $0x1e70] sm:$0xff] }
 0x163   :  { %7543 = vmatpush1.bf16.msra.mxu1 %v17730_v18  ;;  %7501 = vmatprep.subr.bf16.mxu0 %v18857_v20  ;;  %v298_v18 = vld [vmem:[#allocation5 + $0x618] sm:$0xff]  ;;  %v17947_v20 = vcombine.high %v322_v10, %v334_v12  ;;  %v18688_v35 = vcombine.low %v1065_v16, %v1077_v17  ;;  %v18211_v10 = vcombine.high %v586_v0, %v598_v1 }
 0x164   :  { %7544 = vmatprep.subr.bf16.mxu1 %v18091_v26  ;;  %v18689_v26 = vcombine.high %v1065_v16, %v1077_v17  ;;  %v17922_v36 = vcombine.low %v298_v18, %v310_v22  ;;  %v574_v12 = vld [vmem:[#allocation5 + $0xeb8] sm:$0xff] }
 0x165   :  { %v958_v17 = vld [vmem:[#allocation5 + $0x1ab8] sm:$0xff] }
 0x166   :  { %7502 = vmatpush2.bf16.msra.mxu0 %v18856_v30  ;;  %v670_v30 = vld [vmem:[#allocation5 + $0x11b8] sm:$0xff] }
 0x167   :  { %7545 = vmatpush2.bf16.msra.mxu1 %v18090_v31  ;;  %7503 = vmatprep.subr.bf16.mxu0 %v18833_v33  ;;  %v1042_v31 = vld [vmem:[#allocation5 + $0x1d58] sm:$0xff]  ;;  %v17923_v33 = vcombine.high %v298_v18, %v310_v22  ;;  %v18282_v45 = vcombine.low %v658_v29, %v670_v30 }
 0x168   :  { %7546 = vmatprep.subr.bf16.mxu1 %v18067_v37  ;;  %v18283_v37 = vcombine.high %v658_v29, %v670_v30  ;;  %v922_v29 = vld [vmem:[#allocation5 + $0x1998] sm:$0xff] }
 0x16a   :  { %7504 = vmatpush2.bf16.msra.mxu0 %v18832_v40  ;;  %v646_v40 = vld [vmem:[#allocation5 + $0x10f8] sm:$0xff] }
 0x16b   :  { %7547 = vmatpush2.bf16.msra.mxu1 %v18066_v41  ;;  %7505 = vmatprep.subr.bf16.mxu0 %v18809_v43  ;;  %v1018_v41 = vld [vmem:[#allocation5 + $0x1c98] sm:$0xff]  ;;  %v18667_v43 = vcombine.high %v1042_v31, %v1054_v34  ;;  %v18259_v48 = vcombine.high %v634_v38, %v646_v40  ;;  %v18258_v57 = vcombine.low %v634_v38, %v646_v40 }
 0x16c   :  { %7548 = vmatprep.subr.bf16.mxu1 %v18043_v47  ;;  %v18666_v47 = vcombine.low %v1042_v31, %v1054_v34  ;;  %v18643_v53 = vcombine.high %v1018_v41, %v1030_v44  ;;  %v934_v34 = vld [vmem:[#allocation5 + $0x19f8] sm:$0xff] }
 0x16d   :  { %v514_v40 = vld [vmem:[#allocation5 + $0xcd8] sm:$0xff] }
 0x16e   :  { %7506 = vmatpush2.bf16.msra.mxu0 %v18808_v49  ;;  %v610_v49 = vld [vmem:[#allocation5 + $0xfd8] sm:$0xff] }
 0x16f   :  { %7549 = vmatpush2.bf16.msra.mxu1 %v18042_v51  ;;  %7507 = vmatprep.subr.bf16.mxu0 %v18785_v52  ;;  %v622_v51 = vld [vmem:[#allocation5 + $0x1038] sm:$0xff] }
 0x170   :  { %7550 = vmatprep.subr.bf16.mxu1 %v18019_v56  ;;  %v994_v52 = vld [vmem:[#allocation5 + $0x1bd8] sm:$0xff]  ;;  %v18234_v8 = vcombine.low %v610_v49, %v622_v51 }
 0x171   :  { %v18619_v4 = vcombine.high %v994_v52, %v1006_v54  ;;  %v18618_v9 = vcombine.low %v994_v52, %v1006_v54  ;;  %v490_v52 = vld [vmem:[#allocation5 + $0xc18] sm:$0xff] }
 0x172   :  { %7508 = vmatpush2.bf16.msra.mxu0 %v18784_v59  ;;  %v874_v54 = vld [vmem:[#allocation5 + $0x1818] sm:$0xff] }
 0x173   :  { %7551 = vmatpush2.bf16.msra.mxu1 %v18018_v60  ;;  %7509 = vmatprep.subr.bf16.mxu0 %v18761_v62  ;;  %v18642_v60 = vcombine.low %v1018_v41, %v1030_v44  ;;  %v18235_v62 = vcombine.high %v610_v49, %v622_v51  ;;  %v526_v41 = vld [vmem:[#allocation5 + $0xd38] sm:$0xff]  ;;  %v18546_v49 = vcombine.low %v922_v29, %v934_v34 }
 0x174   :  { %7552 = vmatprep.subr.bf16.mxu1 %v17995_v3  ;;  %v18139_v51 = vcombine.high %v514_v40, %v526_v41 }
 0x176   :  { %7510 = vmatpush2.bf16.msra.mxu0 %v18760_v5 }
 0x177   :  { %7553 = vmatpush2.bf16.msra.mxu1 %v17994_v6  ;;  %7511 = vmatprep.subr.bf16.mxu0 %v18737_v7 }
 0x178   :  { %7554 = vmatprep.subr.bf16.mxu1 %v17971_v11  ;;  %v562_v11 = vld [vmem:[#allocation5 + $0xe58] sm:$0xff] }
 0x17a   :  { %7512 = vmatpush2.bf16.msra.mxu0 %v18736_v13  ;;  %v946_v13 = vld [vmem:[#allocation5 + $0x1a58] sm:$0xff] }
 0x17b   :  { %7555 = vmatpush2.bf16.msra.mxu1 %v17970_v14  ;;  %7513 = vmatprep.subr.bf16.mxu0 %v18713_v15 }
 0x17c   :  { %7556 = vmatprep.subr.bf16.mxu1 %v17947_v20  ;;  %v18210_v20 = vcombine.low %v586_v0, %v598_v1  ;;  %v850_v1 = vld [vmem:[#allocation5 + $0x1758] sm:$0xff] }
 0x17e   :  { %7514 = vmatpush2.bf16.msra.mxu0 %v18712_v23  ;;  %v18187_v23 = vcombine.high %v562_v11, %v574_v12 }
 0x17f   :  { %7557 = vmatpush2.bf16.msra.mxu1 %v17946_v24  ;;  %7515 = vmatprep.subr.bf16.mxu0 %v18689_v26  ;;  %v538_v24 = vld [vmem:[#allocation5 + $0xd98] sm:$0xff] }
 0x180   :  { %7558 = vmatprep.subr.bf16.mxu1 %v17923_v33  ;;  %v550_v26 = vld [vmem:[#allocation5 + $0xdf8] sm:$0xff]  ;;  %v18571_v33 = vcombine.high %v946_v13, %v958_v17 }
 0x181   :  { %v18163_v38 = vcombine.high %v538_v24, %v550_v26 }
 0x182   :  { %7516 = vmatpush2.bf16.msra.mxu0 %v18688_v35 }
 0x183   :  { %7559 = vmatpush2.bf16.msra.mxu1 %v17922_v36  ;;  %7571 = vmatprep.subr.bf16.mxu0 %v18283_v37  ;;  %v18186_v36 = vcombine.low %v562_v11, %v574_v12  ;;  %v18570_v37 = vcombine.low %v946_v13, %v958_v17  ;;  %v838_v11 = vld [vmem:[#allocation5 + $0x16f8] sm:$0xff] }
 0x184   :  { %7614 = vmatprep.subr.bf16.mxu1 %v18667_v43  ;;  %v898_v43 = vld [vmem:[#allocation5 + $0x18d8] sm:$0xff] }
 0x185   :  { %v7261_v55 = vpop.f32.mrf.mxu0  ;;  %7518 = vmatmul.mubr.bf16.vlgmr.msra.gmra.mxu0 %v22076_v39  ;;  %v1210_v12 = vld [vmem:[#allocation5 + $0x2298] sm:$0xff] }
 0x186   :  { %v22108_v56 = vadd.f32 %v7261_v55, %v22096_v27  ;;  %7561 = vmatmul.mubr.bf16.vlgmr.msra.gmra.mxu1 %v22066_v21  ;;  %7572 = vmatpush1.bf16.msra.mxu0 %v18282_v45  ;;  %v982_v27 = vld [vmem:[#allocation5 + $0x1b78] sm:$0xff]  ;;  %v18547_v45 = vcombine.high %v922_v29, %v934_v34 }
 0x187   :  { %7615 = vmatpush1.bf16.msra.mxu1 %v18666_v47  ;;  %v22111_v59 = vpop.f32.mrf.mxu0  ;;  %7573 = vmatprep.subr.bf16.mxu0 %v18259_v48  ;;  %v18595_v16 = vcombine.high %v970_v2, %v982_v27  ;;  %v18594_v22 = vcombine.low %v970_v2, %v982_v27  ;;  %v910_v47 = vld [vmem:[#allocation5 + $0x1938] sm:$0xff]  ;;  %v18162_v48 = vcombine.low %v538_v24, %v550_v26 }
 0x188   :  { %v8737_v3 = vmul.f32 %v22108_v56, %v22108_v56  ;;  %7616 = vmatprep.subr.bf16.mxu1 %v18643_v53  ;;  %7603 = vmatprep.mubr.bf16.mxu0 %v22062_v63  ;;  %v502_v53 = vld [vmem:[#allocation5 + $0xc78] sm:$0xff]  ;;  %v18523_v55 = vcombine.high %v898_v43, %v910_v47  ;;  %v8689_v24 = vmul.f32 0.5, %v22108_v56 }
 0x189   :  { %v7265_v5 = vpop.f32.mrf.mxu0  ;;  %7646 = vmatprep.mubr.bf16.mxu1 %v22070_v32  ;;  %v18115_v0 = vcombine.high %v490_v52, %v502_v53  ;;  %v862_v2 = vld [vmem:[#allocation5 + $0x17b8] sm:$0xff] }
 0x18a   :  { %v8785_v6 = vmul.f32 %v8737_v3, %v22108_v56  ;;  %v22119_v7 = vadd.f32 %v7265_v5, %v22102_v42  ;;  %7574 = vmatpush1.bf16.msra.mxu0 %v18258_v57  ;;  %v886_v57 = vld [vmem:[#allocation5 + $0x1878] sm:$0xff]  ;;  %v18114_v5 = vcombine.low %v490_v52, %v502_v53 }
 0x18b   :  { %7617 = vmatpush1.bf16.msra.mxu1 %v18642_v60  ;;  %7575 = vmatprep.subr.bf16.mxu0 %v18235_v62  ;;  %v18138_v60 = vcombine.low %v514_v40, %v526_v41  ;;  %v18522_v62 = vcombine.low %v898_v43, %v910_v47  ;;  %v1234_v3 = vld [vmem:[#allocation5 + $0x2358] sm:$0xff] }
 0x18c   :  { %v8833_v14 = vmul.f32 0.044715, %v8785_v6  ;;  %v8761_v15 = vmul.f32 %v22119_v7, %v22119_v7  ;;  %7618 = vmatprep.subr.bf16.mxu1 %v18619_v4  ;;  %v18499_v4 = vcombine.high %v874_v54, %v886_v57  ;;  %v1246_v27 = vld [vmem:[#allocation5 + $0x23b8] sm:$0xff]  ;;  %v8713_v26 = vmul.f32 0.5, %v22119_v7 }
 0x18d   :  { %v18859_v13 = vcombine.high %v1234_v3, %v1246_v27  ;;  %v790_v40 = vld [vmem:[#allocation5 + $0x1578] sm:$0xff] }
 0x18e   :  { %v8881_v18 = vadd.f32 %v8833_v14, %v22108_v56  ;;  %v8809_v42 = vmul.f32 %v8761_v15, %v22119_v7  ;;  %7576 = vmatpush1.bf16.msra.mxu0 %v18234_v8  ;;  %v18498_v8 = vcombine.low %v874_v54, %v886_v57  ;;  %v1222_v14 = vld [vmem:[#allocation5 + $0x22f8] sm:$0xff]  ;;  %v18474_v15 = vcombine.low %v850_v1, %v862_v2 }
 0x18f   :  { %7619 = vmatpush1.bf16.msra.mxu1 %v18618_v9  ;;  %7577 = vmatprep.subr.bf16.mxu0 %v18211_v10  ;;  %v18475_v9 = vcombine.high %v850_v1, %v862_v2  ;;  %v826_v10 = vld [vmem:[#allocation5 + $0x1698] sm:$0xff]  ;;  %v18835_v29 = vcombine.high %v1210_v12, %v1222_v14 }
 0x190   :  { %v8929_v30 = vmul.f32 0.7978846, %v8881_v18  ;;  %v8857_v31 = vmul.f32 0.044715, %v8809_v42  ;;  %7620 = vmatprep.subr.bf16.mxu1 %v18595_v16  ;;  %v18858_v18 = vcombine.low %v1234_v3, %v1246_v27  ;;  %v18451_v42 = vcombine.high %v826_v10, %v838_v11  ;;  %v1162_v41 = vld [vmem:[#allocation5 + $0x2118] sm:$0xff] }
 0x191   :  { %v1174_v56 = vld [vmem:[#allocation5 + $0x2178] sm:$0xff] }
 0x192   :  { %21768 = vtanh.f32 %v8929_v30  ;;  %v8905_v35 = vadd.f32 %v8857_v31, %v22119_v7  ;;  %7578 = vmatpush1.bf16.msra.mxu0 %v18210_v20  ;;  %v802_v20 = vld [vmem:[#allocation5 + $0x15d8] sm:$0xff]  ;;  %v18787_v52 = vcombine.high %v1162_v41, %v1174_v56 }
 0x193   :  { %7621 = vmatpush1.bf16.msra.mxu1 %v18594_v22  ;;  %7579 = vmatprep.subr.bf16.mxu0 %v18187_v23  ;;  %v814_v22 = vld [vmem:[#allocation5 + $0x1638] sm:$0xff] }
 0x194   :  { %v8953_v44 = vmul.f32 0.7978846, %v8905_v35  ;;  %7622 = vmatprep.subr.bf16.mxu1 %v18571_v33  ;;  %v1186_v23 = vld [vmem:[#allocation5 + $0x21d8] sm:$0xff]  ;;  %v18450_v33 = vcombine.low %v826_v10, %v838_v11  ;;  %v18426_v7 = vcombine.low %v802_v20, %v814_v22  ;;  %v22130_v11 = vpop.f32.mrf.mxu1 }
 0x195   :  { %v1198_v30 = vld [vmem:[#allocation5 + $0x2238] sm:$0xff] }
 0x196   :  { %21770 = vtanh.f32 %v8953_v44  ;;  %7580 = vmatpush1.bf16.msra.mxu0 %v18186_v36  ;;  %v18834_v36 = vcombine.low %v1210_v12, %v1222_v14  ;;  %v18811_v43 = vcombine.high %v1186_v23, %v1198_v30  ;;  %v1150_v53 = vld [vmem:[#allocation5 + $0x20b8] sm:$0xff] }
 0x197   :  { %7623 = vmatpush1.bf16.msra.mxu1 %v18570_v37  ;;  %7581 = vmatprep.subr.bf16.mxu0 %v18163_v38  ;;  %v18427_v37 = vcombine.high %v802_v20, %v814_v22  ;;  %v778_v38 = vld [vmem:[#allocation5 + $0x1518] sm:$0xff] }
 0x198   :  { %7624 = vmatprep.subr.bf16.mxu1 %v18547_v45  ;;  %v18810_v45 = vcombine.low %v1186_v23, %v1198_v30  ;;  %v18403_v47 = vcombine.high %v778_v38, %v790_v40  ;;  %v18402_v54 = vcombine.low %v778_v38, %v790_v40  ;;  %v1126_v2 = vld [vmem:[#allocation5 + $0x1ff8] sm:$0xff]  ;;  %v659_v30 = vld [vmem:[#allocation5 + $0x1160] sm:$0xff] }
 0x199   :  { %v1102_v10 = vld [vmem:[#allocation5 + $0x1f38] sm:$0xff]  ;;  %v251_v40 = vld [vmem:[#allocation5 + $0x4a0] sm:$0xff] }
 0x19a   :  { %7582 = vmatpush1.bf16.msra.mxu0 %v18162_v48  ;;  %v754_v48 = vld [vmem:[#allocation5 + $0x1458] sm:$0xff] }
 0x19b   :  { %7625 = vmatpush1.bf16.msra.mxu1 %v18546_v49  ;;  %7583 = vmatprep.subr.bf16.mxu0 %v18139_v51  ;;  %v766_v49 = vld [vmem:[#allocation5 + $0x14b8] sm:$0xff] }
 0x19c   :  { %7626 = vmatprep.subr.bf16.mxu1 %v18523_v55  ;;  %v1138_v51 = vld [vmem:[#allocation5 + $0x2058] sm:$0xff]  ;;  %v18786_v55 = vcombine.low %v1162_v41, %v1174_v56  ;;  %v18379_v57 = vcombine.high %v754_v48, %v766_v49  ;;  %v18378_v3 = vcombine.low %v754_v48, %v766_v49  ;;  %v263_v41 = vld [vmem:[#allocation5 + $0x500] sm:$0xff] }
 0x19d   :  { %v18763_v1 = vcombine.high %v1138_v51, %v1150_v53  ;;  %v1078_v20 = vld [vmem:[#allocation5 + $0x1e78] sm:$0xff]  ;;  %v22137_v56 = vld [vmem:[#allocation7] sm:$0xff] }
 0x19e   :  { %7584 = vmatpush1.bf16.msra.mxu0 %v18138_v60  ;;  %v730_v60 = vld [vmem:[#allocation5 + $0x1398] sm:$0xff]  ;;  %v647_v48 = vld [vmem:[#allocation5 + $0x1100] sm:$0xff] }
 0x19f   :  { %v21769_v6 = vpop.eup %21768  ;;  %7627 = vmatpush1.bf16.msra.mxu1 %v18522_v62  ;;  %7585 = vmatprep.subr.bf16.mxu0 %v18115_v0  ;;  %v742_v62 = vld [vmem:[#allocation5 + $0x13f8] sm:$0xff] }
 0x1a0   :  { %7628 = vmatprep.subr.bf16.mxu1 %v18499_v4  ;;  %v9025_v16 = vadd.f32 1.0, %v21769_v6  ;;  %v1114_v0 = vld [vmem:[#allocation5 + $0x1f98] sm:$0xff]  ;;  %v18762_v4 = vcombine.low %v1138_v51, %v1150_v53  ;;  %v18355_v27 = vcombine.high %v730_v60, %v742_v62  ;;  %v18354_v12 = vcombine.low %v730_v60, %v742_v62  ;;  %v22141_v51 = vpop.f32.mrf.mxu0 }
 0x1a1   :  { %v718_v6 = vld [vmem:[#allocation5 + $0x1338] sm:$0xff]  ;;  %v17877_v53 = vcombine.high %v251_v40, %v263_v41 }
 0x1a2   :  { %7586 = vmatpush1.bf16.msra.mxu0 %v18114_v5  ;;  %v9073_v34 = vmul.f32 %v9025_v16, %v8689_v24  ;;  %v706_v5 = vld [vmem:[#allocation5 + $0x12d8] sm:$0xff] }
 0x1a3   :  { %v21771_v17 = vpop.eup %21770  ;;  %7629 = vmatpush1.bf16.msra.mxu1 %v18498_v8  ;;  %7587 = vmatprep.subr.bf16.mxu0 %v18475_v9  ;;  %v1090_v8 = vld [vmem:[#allocation5 + $0x1ed8] sm:$0xff]  ;;  %v18739_v9 = vcombine.high %v1114_v0, %v1126_v2  ;;  %v18331_v14 = vcombine.high %v706_v5, %v718_v6  ;;  %v18330_v22 = vcombine.low %v706_v5, %v718_v6 }
 0x1a4   :  { %7630 = vmatprep.subr.bf16.mxu1 %v18859_v13  ;;  %v9049_v31 = vadd.f32 1.0, %v21771_v17  ;;  %v18738_v13 = vcombine.low %v1114_v0, %v1126_v2  ;;  %v694_v16 = vld [vmem:[#allocation5 + $0x1278] sm:$0xff]  ;;  %v18714_v23 = vcombine.low %v1090_v8, %v1102_v10 }
 0x1a5   :  { %v1066_v17 = vld [vmem:[#allocation5 + $0x1e18] sm:$0xff] }
 0x1a6   :  { %7588 = vmatpush2.bf16.msra.mxu0 %v18474_v15  ;;  %v9097_v35 = vmul.f32 %v9049_v31, %v8713_v26  ;;  %v682_v15 = vld [vmem:[#allocation5 + $0x1218] sm:$0xff]  ;;  %v275_v26 = vld [vmem:[#allocation5 + $0x560] sm:$0xff]  ;;  %v22133_v31 = vsub.s32 2, %v22086_v50 }
 0x1a7   :  { %7631 = vmatpush2.bf16.msra.mxu1 %v18858_v18  ;;  %7589 = vmatprep.subr.bf16.mxu0 %v18451_v42  ;;  %v7304_v18 = vpop.f32.mrf.mxu1  ;;  %v18715_v42 = vcombine.high %v1090_v8, %v1102_v10  ;;  %v18307_v24 = vcombine.high %v682_v15, %v694_v16  ;;  %v215_v10 = vld [vmem:[#allocation5 + $0x380] sm:$0xff] }
 0x1a8   :  { %7632 = vmatprep.subr.bf16.mxu1 %v18835_v29  ;;  %v22128_v44 = vpack.c.bf16 %v9097_v35, %v9073_v34  ;;  %v287_v29 = vld [vmem:[#allocation5 + $0x5c0] sm:$0xff]  ;;  %23127 = vst [vmem:[#allocation18_spill] sm:$0xff] %v22133_v31  ;;  %v18691_v34 = vcombine.high %v1066_v17, %v1078_v20 }
 0x1a9   :  { %v671_v35 = vld [vmem:[#allocation5 + $0x11c0] sm:$0xff]  ;;  %v17901_v38 = vcombine.high %v275_v26, %v287_v29  ;;  %v17900_v49 = vcombine.low %v275_v26, %v287_v29 }
 0x1aa   :  { %23126 = vst [vmem:[#allocation17_spill] sm:$0xff] %v22128_v44  ;;  %7590 = vmatpush2.bf16.msra.mxu0 %v18450_v33  ;;  %v22135_v33 = vpop.f32.mrf.mxu1  ;;  %v179_v29 = vld [vmem:[#allocation5 + $0x260] sm:$0xff]  ;;  %v962_v44 = vld [vmem:[#allocation5 + $0x1ad8] sm:$0xff] }
 0x1ab   :  { %7633 = vmatpush2.bf16.msra.mxu1 %v18834_v36  ;;  %7591 = vmatprep.subr.bf16.mxu0 %v18427_v37  ;;  %v18306_v36 = vcombine.low %v682_v15, %v694_v16  ;;  %v18690_v37 = vcombine.low %v1066_v17, %v1078_v20  ;;  %v599_v17 = vld [vmem:[#allocation5 + $0xf80] sm:$0xff] }
 0x1ac   :  { %7634 = vmatprep.subr.bf16.mxu1 %v18811_v43  ;;  %v635_v43 = vld [vmem:[#allocation5 + $0x10a0] sm:$0xff] }
 0x1ad   :  { %v18261_v0 = vcombine.high %v635_v43, %v647_v48  ;;  %v18260_v6 = vcombine.low %v635_v43, %v647_v48  ;;  %v167_v48 = vld [vmem:[#allocation5 + $0x200] sm:$0xff] }
 0x1ae   :  { %7592 = vmatpush2.bf16.msra.mxu0 %v18426_v7  ;;  %v1272_v7 = vrot.slane %v22137_v56, %v22133_v31 }
 0x1af   :  { %7635 = vmatpush2.bf16.msra.mxu1 %v18810_v45  ;;  %7593 = vmatprep.subr.bf16.mxu0 %v18403_v47  ;;  %v7308_v45 = vpop.f32.mrf.mxu1  ;;  %v18285_v47 = vcombine.high %v659_v30, %v671_v35 }
 0x1b0   :  { %7636 = vmatprep.subr.bf16.mxu1 %v18787_v52  ;;  %v18284_v52 = vcombine.low %v659_v30, %v671_v35  ;;  %v7305_v60 = vadd.f32 %v7304_v18, %v1272_v7  ;;  %v191_v30 = vld [vmem:[#allocation5 + $0x2c0] sm:$0xff] }
 0x1b1   :  { %v22143_v62 = vpop.f32.mrf.mxu1 }
 0x1b2   :  { %7594 = vmatpush2.bf16.msra.mxu0 %v18402_v54  ;;  %v227_v54 = vld [vmem:[#allocation5 + $0x3e0] sm:$0xff] }
 0x1b3   :  { %7637 = vmatpush2.bf16.msra.mxu1 %v18786_v55  ;;  %7595 = vmatprep.subr.bf16.mxu0 %v18379_v57  ;;  %v239_v55 = vld [vmem:[#allocation5 + $0x440] sm:$0xff] }
 0x1b4   :  { %7638 = vmatprep.subr.bf16.mxu1 %v18763_v1  ;;  %v611_v57 = vld [vmem:[#allocation5 + $0xfe0] sm:$0xff]  ;;  %v17853_v8 = vcombine.high %v227_v54, %v239_v55 }
 0x1b5   :  { %v623_v1 = vld [vmem:[#allocation5 + $0x1040] sm:$0xff] }
 0x1b6   :  { %7596 = vmatpush2.bf16.msra.mxu0 %v18378_v3  ;;  %v18237_v16 = vcombine.high %v611_v57, %v623_v1 }
 0x1b7   :  { %7639 = vmatpush2.bf16.msra.mxu1 %v18762_v4  ;;  %7597 = vmatprep.subr.bf16.mxu0 %v18355_v27  ;;  %v17876_v27 = vcombine.low %v251_v40, %v263_v41 }
 0x1b8   :  { %7640 = vmatprep.subr.bf16.mxu1 %v18739_v9  ;;  %v203_v9 = vld [vmem:[#allocation5 + $0x320] sm:$0xff] }
 0x1b9   :  { %v17829_v26 = vcombine.high %v203_v9, %v215_v10  ;;  %v17828_v43 = vcombine.low %v203_v9, %v215_v10  ;;  %v527_v9 = vld [vmem:[#allocation5 + $0xd40] sm:$0xff] }
 0x1ba   :  { %7598 = vmatpush2.bf16.msra.mxu0 %v18354_v12  ;;  %v587_v12 = vld [vmem:[#allocation5 + $0xf20] sm:$0xff] }
 0x1bb   :  { %7641 = vmatpush2.bf16.msra.mxu1 %v18738_v13  ;;  %7599 = vmatprep.subr.bf16.mxu0 %v18331_v14  ;;  %v7309_v13 = vadd.f32 %v7308_v45, %v1272_v7  ;;  %v18212_v7 = vcombine.low %v587_v12, %v599_v17  ;;  %v17805_v45 = vcombine.high %v179_v29, %v191_v30 }
 0x1bc   :  { %7642 = vmatprep.subr.bf16.mxu1 %v18715_v42 }
 0x1be   :  { %7600 = vmatpush2.bf16.msra.mxu0 %v18330_v22  ;;  %v17852_v22 = vcombine.low %v227_v54, %v239_v55  ;;  %v551_v55 = vld [vmem:[#allocation5 + $0xe00] sm:$0xff] }
 0x1bf   :  { %7643 = vmatpush2.bf16.msra.mxu1 %v18714_v23  ;;  %7601 = vmatprep.subr.bf16.mxu0 %v18307_v24  ;;  %v18236_v24 = vcombine.low %v611_v57, %v623_v1 }
 0x1c0   :  { %7644 = vmatprep.subr.bf16.mxu1 %v18691_v34  ;;  %v563_v34 = vld [vmem:[#allocation5 + $0xe60] sm:$0xff] }
 0x1c2   :  { %7602 = vmatpush2.bf16.msra.mxu0 %v18306_v36 }
 0x1c3   :  { %7645 = vmatpush2.bf16.msra.mxu1 %v18690_v37  ;;  %7657 = vmatprep.subr.bf16.mxu0 %v17901_v38  ;;  %v18213_v37 = vcombine.high %v587_v12, %v599_v17  ;;  %v575_v38 = vld [vmem:[#allocation5 + $0xec0] sm:$0xff] }
 0x1c4   :  { %7700 = vmatprep.subr.bf16.mxu1 %v18285_v47  ;;  %v155_v47 = vld [vmem:[#allocation5 + $0x1a0] sm:$0xff]  ;;  %v18189_v54 = vcombine.high %v563_v34, %v575_v38  ;;  %v18188_v1 = vcombine.low %v563_v34, %v575_v38 }
 0x1c5   :  { %v7347_v2 = vpop.f32.mrf.mxu0  ;;  %7604 = vmatmul.mubr.bf16.vlgmr.msra.gmra.mxu0 %v22068_v25  ;;  %v17780_v12 = vcombine.low %v155_v47, %v167_v48  ;;  %v107_v17 = vld [vmem:[#allocation5 + $0x20] sm:$0xff] }
 0x1c6   :  { %v7348_v3 = vadd.f32 %v7347_v2, %v7305_v60  ;;  %v7390_v4 = vpop.f32.mrf.mxu1  ;;  %7647 = vmatmul.mubr.bf16.vlgmr.msra.gmra.mxu1 %v22076_v39  ;;  %7658 = vmatpush1.bf16.msra.mxu0 %v17900_v49  ;;  %v539_v49 = vld [vmem:[#allocation5 + $0xda0] sm:$0xff]  ;;  %v17781_v2 = vcombine.high %v155_v47, %v167_v48 }
 0x1c7   :  { %7701 = vmatpush1.bf16.msra.mxu1 %v18284_v52  ;;  %v22147_v5 = vpop.f32.mrf.mxu0  ;;  %7659 = vmatprep.subr.bf16.mxu0 %v17877_v53  ;;  %v851_v34 = vld [vmem:[#allocation5 + $0x1760] sm:$0xff] }
 0x1c8   :  { %v22149_v14 = vadd.f32 %v7390_v4, %v7348_v3  ;;  %v22151_v15 = vpop.f32.mrf.mxu1  ;;  %7702 = vmatprep.subr.bf16.mxu1 %v18261_v0  ;;  %7689 = vmatprep.mubr.bf16.mxu0 %v22060_v58  ;;  %v17804_v0 = vcombine.low %v179_v29, %v191_v30  ;;  %v131_v3 = vld [vmem:[#allocation5 + $0xe0] sm:$0xff] }
 0x1c9   :  { %v7351_v18 = vpop.f32.mrf.mxu0  ;;  %7732 = vmatprep.mubr.bf16.mxu1 %v22062_v63  ;;  %v143_v4 = vld [vmem:[#allocation5 + $0x140] sm:$0xff] }
 0x1ca   :  { %v8739_v42 = vmul.f32 %v22149_v14, %v22149_v14  ;;  %v7352_v20 = vadd.f32 %v7351_v18, %v7309_v13  ;;  %7660 = vmatpush1.bf16.msra.mxu0 %v17876_v27  ;;  %v7394_v23 = vpop.f32.mrf.mxu1  ;;  %v515_v27 = vld [vmem:[#allocation5 + $0xce0] sm:$0xff]  ;;  %v18164_v13 = vcombine.low %v539_v49, %v551_v55 }
 0x1cb   :  { %7703 = vmatpush1.bf16.msra.mxu1 %v18260_v6  ;;  %7661 = vmatprep.subr.bf16.mxu0 %v17853_v8  ;;  %v18165_v8 = vcombine.high %v539_v49, %v551_v55  ;;  %v119_v18 = vld [vmem:[#allocation5 + $0x80] sm:$0xff] }
 0x1cc   :  { %v8787_v35 = vmul.f32 %v8739_v42, %v22149_v14  ;;  %v22158_v36 = vadd.f32 %v7394_v23, %v7352_v20  ;;  %7704 = vmatprep.subr.bf16.mxu1 %v18237_v16  ;;  %v17757_v16 = vcombine.high %v131_v3, %v143_v4  ;;  %v491_v42 = vld [vmem:[#allocation5 + $0xc20] sm:$0xff]  ;;  %v18141_v20 = vcombine.high %v515_v27, %v527_v9 }
 0x1cd   :  { %v17756_v23 = vcombine.low %v131_v3, %v143_v4  ;;  %v467_v29 = vld [vmem:[#allocation5 + $0xb60] sm:$0xff]  ;;  %v17732_v38 = vcombine.low %v107_v17, %v119_v18  ;;  %v8691_v4 = vmul.f32 0.5, %v22149_v14 }
 0x1ce   :  { %v8835_v40 = vmul.f32 0.044715, %v8787_v35  ;;  %v8763_v41 = vmul.f32 %v22158_v36, %v22158_v36  ;;  %7662 = vmatpush1.bf16.msra.mxu0 %v17852_v22  ;;  %v503_v22 = vld [vmem:[#allocation5 + $0xc80] sm:$0xff] }
 0x1cf   :  { %7705 = vmatpush1.bf16.msra.mxu1 %v18236_v24  ;;  %7663 = vmatprep.subr.bf16.mxu0 %v17829_v26  ;;  %v18140_v24 = vcombine.low %v515_v27, %v527_v9  ;;  %v17733_v26 = vcombine.high %v107_v17, %v119_v18  ;;  %v479_v30 = vld [vmem:[#allocation5 + $0xbc0] sm:$0xff]  ;;  %v18117_v35 = vcombine.high %v491_v42, %v503_v22  ;;  %v8715_v27 = vmul.f32 0.5, %v22158_v36 }
 0x1d0   :  { %v8883_v52 = vadd.f32 %v8835_v40, %v22149_v14  ;;  %v8811_v53 = vmul.f32 %v8763_v41, %v22158_v36  ;;  %7706 = vmatprep.subr.bf16.mxu1 %v18213_v37  ;;  %v863_v37 = vld [vmem:[#allocation5 + $0x17c0] sm:$0xff]  ;;  %v18116_v40 = vcombine.low %v491_v42, %v503_v22  ;;  %v18093_v41 = vcombine.high %v467_v29, %v479_v30 }
 0x1d1   :  { %v18477_v47 = vcombine.high %v851_v34, %v863_v37  ;;  %v839_v48 = vld [vmem:[#allocation5 + $0x1700] sm:$0xff] }
 0x1d2   :  { %v8931_v57 = vmul.f32 0.7978846, %v8883_v52  ;;  %v8859_v60 = vmul.f32 0.044715, %v8811_v53  ;;  %7664 = vmatpush1.bf16.msra.mxu0 %v17828_v43  ;;  %v443_v43 = vld [vmem:[#allocation5 + $0xaa0] sm:$0xff]  ;;  %v18092_v52 = vcombine.low %v467_v29, %v479_v30  ;;  %v18476_v53 = vcombine.low %v851_v34, %v863_v37 }
 0x1d3   :  { %7707 = vmatpush1.bf16.msra.mxu1 %v18212_v7  ;;  %7665 = vmatprep.subr.bf16.mxu0 %v17805_v45  ;;  %v455_v7 = vld [vmem:[#allocation5 + $0xb00] sm:$0xff] }
 0x1d4   :  { %21772 = vtanh.f32 %v8931_v57  ;;  %v8907_v6 = vadd.f32 %v8859_v60, %v22158_v36  ;;  %7708 = vmatprep.subr.bf16.mxu1 %v18189_v54  ;;  %v827_v45 = vld [vmem:[#allocation5 + $0x16a0] sm:$0xff]  ;;  %v18069_v54 = vcombine.high %v443_v43, %v455_v7 }
 0x1d5   :  { %v419_v55 = vld [vmem:[#allocation5 + $0x9e0] sm:$0xff]  ;;  %v18452_v9 = vcombine.low %v827_v45, %v839_v48 }
 0x1d6   :  { %v8955_v10 = vmul.f32 0.7978846, %v8907_v6  ;;  %7666 = vmatpush1.bf16.msra.mxu0 %v17804_v0  ;;  %v431_v57 = vld [vmem:[#allocation5 + $0xa40] sm:$0xff]  ;;  %v18453_v0 = vcombine.high %v827_v45, %v839_v48  ;;  %v18068_v6 = vcombine.low %v443_v43, %v455_v7 }
 0x1d7   :  { %7709 = vmatpush1.bf16.msra.mxu1 %v18188_v1  ;;  %7667 = vmatprep.subr.bf16.mxu0 %v17781_v2  ;;  %v803_v60 = vld [vmem:[#allocation5 + $0x15e0] sm:$0xff]  ;;  %v18044_v22 = vcombine.low %v419_v55, %v431_v57 }
 0x1d8   :  { %21774 = vtanh.f32 %v8955_v10  ;;  %7710 = vmatprep.subr.bf16.mxu1 %v18165_v8  ;;  %v815_v1 = vld [vmem:[#allocation5 + $0x1640] sm:$0xff]  ;;  %v18045_v10 = vcombine.high %v419_v55, %v431_v57 }
 0x1d9   :  { %v18429_v17 = vcombine.high %v803_v60, %v815_v1  ;;  %v791_v18 = vld [vmem:[#allocation5 + $0x1580] sm:$0xff]  ;;  %v18428_v36 = vcombine.low %v803_v60, %v815_v1 }
 0x1da   :  { %7668 = vmatpush1.bf16.msra.mxu0 %v17780_v12  ;;  %v395_v12 = vld [vmem:[#allocation5 + $0x920] sm:$0xff] }
 0x1db   :  { %7711 = vmatpush1.bf16.msra.mxu1 %v18164_v13  ;;  %7669 = vmatprep.subr.bf16.mxu0 %v17757_v16  ;;  %v407_v13 = vld [vmem:[#allocation5 + $0x980] sm:$0xff] }
 0x1dc   :  { %7712 = vmatprep.subr.bf16.mxu1 %v18141_v20  ;;  %v779_v16 = vld [vmem:[#allocation5 + $0x1520] sm:$0xff] }
 0x1dd   :  { %v755_v29 = vld [vmem:[#allocation5 + $0x1460] sm:$0xff]  ;;  %v18405_v30 = vcombine.high %v779_v16, %v791_v18  ;;  %v18404_v37 = vcombine.low %v779_v16, %v791_v18  ;;  %v276_v16 = vld [vmem:[#allocation5 + $0x568] sm:$0xff] }
 0x1de   :  { %7670 = vmatpush1.bf16.msra.mxu0 %v17756_v23  ;;  %v18021_v23 = vcombine.high %v395_v12, %v407_v13  ;;  %v767_v34 = vld [vmem:[#allocation5 + $0x14c0] sm:$0xff]  ;;  %v288_v18 = vld [vmem:[#allocation5 + $0x5c8] sm:$0xff] }
 0x1df   :  { %7713 = vmatpush1.bf16.msra.mxu1 %v18140_v24  ;;  %7671 = vmatprep.subr.bf16.mxu0 %v17733_v26  ;;  %v371_v24 = vld [vmem:[#allocation5 + $0x860] sm:$0xff]  ;;  %v18381_v7 = vcombine.high %v755_v29, %v767_v34  ;;  %v18380_v48 = vcombine.low %v755_v29, %v767_v34  ;;  %v17903_v29 = vcombine.high %v276_v16, %v288_v18 }
 0x1e0   :  { %7714 = vmatprep.subr.bf16.mxu1 %v18117_v35  ;;  %v383_v26 = vld [vmem:[#allocation5 + $0x8c0] sm:$0xff]  ;;  %v18020_v35 = vcombine.low %v395_v12, %v407_v13 }
 0x1e1   :  { %v21773_v49 = vpop.eup %21772  ;;  %v731_v43 = vld [vmem:[#allocation5 + $0x13a0] sm:$0xff] }
 0x1e2   :  { %7672 = vmatpush1.bf16.msra.mxu0 %v17732_v38  ;;  %v9027_v2 = vadd.f32 1.0, %v21773_v49  ;;  %v17997_v38 = vcombine.high %v371_v24, %v383_v26  ;;  %v743_v45 = vld [vmem:[#allocation5 + $0x1400] sm:$0xff] }
 0x1e3   :  { %7715 = vmatpush1.bf16.msra.mxu1 %v18116_v40  ;;  %7673 = vmatprep.subr.bf16.mxu0 %v18093_v41  ;;  %v347_v40 = vld [vmem:[#allocation5 + $0x7a0] sm:$0xff]  ;;  %v18357_v55 = vcombine.high %v731_v43, %v743_v45 }
 0x1e4   :  { %7716 = vmatprep.subr.bf16.mxu1 %v18477_v47  ;;  %v9075_v42 = vmul.f32 %v9027_v2, %v8691_v4  ;;  %v359_v41 = vld [vmem:[#allocation5 + $0x800] sm:$0xff]  ;;  %v17996_v47 = vcombine.low %v371_v24, %v383_v26  ;;  %v252_v26 = vld [vmem:[#allocation5 + $0x4a8] sm:$0xff] }
 0x1e5   :  { %v21775_v3 = vpop.eup %21774  ;;  %v17973_v49 = vcombine.high %v347_v40, %v359_v41  ;;  %v719_v57 = vld [vmem:[#allocation5 + $0x1340] sm:$0xff]  ;;  %v17972_v60 = vcombine.low %v347_v40, %v359_v41 }
 0x1e6   :  { %7674 = vmatpush2.bf16.msra.mxu0 %v18092_v52  ;;  %v9051_v8 = vadd.f32 1.0, %v21775_v3  ;;  %v323_v52 = vld [vmem:[#allocation5 + $0x6e0] sm:$0xff] }
 0x1e7   :  { %7717 = vmatpush2.bf16.msra.mxu1 %v18476_v53  ;;  %7675 = vmatprep.subr.bf16.mxu0 %v18069_v54  ;;  %v335_v53 = vld [vmem:[#allocation5 + $0x740] sm:$0xff] }
 0x1e8   :  { %7718 = vmatprep.subr.bf16.mxu1 %v18453_v0  ;;  %v9099_v20 = vmul.f32 %v9051_v8, %v8715_v27  ;;  %v707_v54 = vld [vmem:[#allocation5 + $0x12e0] sm:$0xff]  ;;  %v18356_v0 = vcombine.low %v731_v43, %v743_v45  ;;  %v17949_v1 = vcombine.high %v323_v52, %v335_v53  ;;  %v17948_v8 = vcombine.low %v323_v52, %v335_v53  ;;  %v22176_v45 = vpop.f32.mrf.mxu1 }
 0x1e9   :  { %v299_v2 = vld [vmem:[#allocation5 + $0x620] sm:$0xff]  ;;  %v18333_v27 = vcombine.high %v707_v54, %v719_v57 }
 0x1ea   :  { %7676 = vmatpush2.bf16.msra.mxu0 %v18068_v6  ;;  %v22167_v14 = vpack.c.bf16 %v9099_v20, %v9075_v42  ;;  %v311_v3 = vld [vmem:[#allocation5 + $0x680] sm:$0xff]  ;;  %v22170_v20 = vsub.s32 4, %v22086_v50 }
 0x1eb   :  { %7719 = vmatpush2.bf16.msra.mxu1 %v18452_v9  ;;  %7677 = vmatprep.subr.bf16.mxu0 %v18045_v10  ;;  %v683_v4 = vld [vmem:[#allocation5 + $0x1220] sm:$0xff]  ;;  %v18332_v9 = vcombine.low %v707_v54, %v719_v57  ;;  %v17925_v10 = vcombine.high %v299_v2, %v311_v3  ;;  %v17924_v42 = vcombine.low %v299_v2, %v311_v3 }
 0x1ec   :  { %23128 = vst [vmem:[#allocation19_spill] sm:$0xff] %v22167_v14  ;;  %7720 = vmatprep.subr.bf16.mxu1 %v18429_v17  ;;  %v695_v6 = vld [vmem:[#allocation5 + $0x1280] sm:$0xff]  ;;  %23129 = vst [vmem:[#allocation20_spill] sm:$0xff] %v22170_v20  ;;  %v1280_v34 = vrot.slane %v22137_v56, %v22170_v20 }
 0x1ed   :  { %v1043_v12 = vld [vmem:[#allocation5 + $0x1d60] sm:$0xff]  ;;  %v18309_v17 = vcombine.high %v683_v4, %v695_v6 }
 0x1ee   :  { %7678 = vmatpush2.bf16.msra.mxu0 %v18044_v22  ;;  %v1055_v13 = vld [vmem:[#allocation5 + $0x1dc0] sm:$0xff]  ;;  %v18308_v22 = vcombine.low %v683_v4, %v695_v6 }
 0x1ef   :  { %7721 = vmatpush2.bf16.msra.mxu1 %v18428_v36  ;;  %7679 = vmatprep.subr.bf16.mxu0 %v18021_v23  ;;  %v18669_v36 = vcombine.high %v1043_v12, %v1055_v13  ;;  %v1019_v23 = vld [vmem:[#allocation5 + $0x1ca0] sm:$0xff] }
 0x1f0   :  { %7722 = vmatprep.subr.bf16.mxu1 %v18405_v30  ;;  %v1031_v24 = vld [vmem:[#allocation5 + $0x1d00] sm:$0xff]  ;;  %v264_v30 = vld [vmem:[#allocation5 + $0x508] sm:$0xff] }
 0x1f1   :  { %v18645_v40 = vcombine.high %v1019_v23, %v1031_v24  ;;  %v995_v41 = vld [vmem:[#allocation5 + $0x1be0] sm:$0xff]  ;;  %v18644_v53 = vcombine.low %v1019_v23, %v1031_v24 }
 0x1f2   :  { %7680 = vmatpush2.bf16.msra.mxu0 %v18020_v35  ;;  %v18668_v35 = vcombine.low %v1043_v12, %v1055_v13  ;;  %v1007_v43 = vld [vmem:[#allocation5 + $0x1c40] sm:$0xff] }
 0x1f3   :  { %7723 = vmatpush2.bf16.msra.mxu1 %v18404_v37  ;;  %7681 = vmatprep.subr.bf16.mxu0 %v17997_v38  ;;  %v22174_v37 = vpop.f32.mrf.mxu0  ;;  %v17902_v38 = vcombine.low %v276_v16, %v288_v18  ;;  %v18621_v57 = vcombine.high %v995_v41, %v1007_v43  ;;  %v947_v16 = vld [vmem:[#allocation5 + $0x1a60] sm:$0xff]  ;;  %v180_v18 = vld [vmem:[#allocation5 + $0x268] sm:$0xff] }
 0x1f4   :  { %7724 = vmatprep.subr.bf16.mxu1 %v18381_v7  ;;  %v228_v7 = vld [vmem:[#allocation5 + $0x3e8] sm:$0xff] }
 0x1f6   :  { %7682 = vmatpush2.bf16.msra.mxu0 %v17996_v47  ;;  %v17879_v47 = vcombine.high %v252_v26, %v264_v30 }
 0x1f7   :  { %7725 = vmatpush2.bf16.msra.mxu1 %v18380_v48  ;;  %7683 = vmatprep.subr.bf16.mxu0 %v17973_v49  ;;  %v240_v48 = vld [vmem:[#allocation5 + $0x448] sm:$0xff] }
 0x1f8   :  { %7726 = vmatprep.subr.bf16.mxu1 %v18357_v55  ;;  %v17878_v55 = vcombine.low %v252_v26, %v264_v30  ;;  %v17855_v4 = vcombine.high %v228_v7, %v240_v48  ;;  %v17854_v12 = vcombine.low %v228_v7, %v240_v48  ;;  %v935_v30 = vld [vmem:[#allocation5 + $0x1a00] sm:$0xff]  ;;  %v132_v48 = vld [vmem:[#allocation5 + $0xe8] sm:$0xff] }
 0x1f9   :  { %v899_v7 = vld [vmem:[#allocation5 + $0x18e0] sm:$0xff] }
 0x1fa   :  { %7684 = vmatpush2.bf16.msra.mxu0 %v17972_v60  ;;  %v971_v60 = vld [vmem:[#allocation5 + $0x1b20] sm:$0xff] }
 0x1fb   :  { %7727 = vmatpush2.bf16.msra.mxu1 %v18356_v0  ;;  %7685 = vmatprep.subr.bf16.mxu0 %v17949_v1  ;;  %v983_v0 = vld [vmem:[#allocation5 + $0x1b80] sm:$0xff]  ;;  %v204_v1 = vld [vmem:[#allocation5 + $0x328] sm:$0xff] }
 0x1fc   :  { %7728 = vmatprep.subr.bf16.mxu1 %v18333_v27  ;;  %v216_v27 = vld [vmem:[#allocation5 + $0x388] sm:$0xff]  ;;  %v18597_v13 = vcombine.high %v971_v60, %v983_v0  ;;  %v18596_v23 = vcombine.low %v971_v60, %v983_v0  ;;  %v887_v60 = vld [vmem:[#allocation5 + $0x1880] sm:$0xff] }
 0x1fd   :  { %v17830_v24 = vcombine.low %v204_v1, %v216_v27  ;;  %v108_v0 = vld [vmem:[#allocation5 + $0x28] sm:$0xff] }
 0x1fe   :  { %7686 = vmatpush2.bf16.msra.mxu0 %v17948_v8 }
 0x1ff   :  { %7729 = vmatpush2.bf16.msra.mxu1 %v18332_v9  ;;  %7687 = vmatprep.subr.bf16.mxu0 %v17925_v10  ;;  %v18620_v9 = vcombine.low %v995_v41, %v1007_v43 }
 0x200   :  { %7730 = vmatprep.subr.bf16.mxu1 %v18309_v17  ;;  %v959_v17 = vld [vmem:[#allocation5 + $0x1ac0] sm:$0xff] }
 0x201   :  { %v18573_v26 = vcombine.high %v947_v16, %v959_v17 }
 0x202   :  { %7688 = vmatpush2.bf16.msra.mxu0 %v17924_v42 }
 0x203   :  { %7731 = vmatpush2.bf16.msra.mxu1 %v18308_v22  ;;  %7743 = vmatprep.subr.bf16.mxu0 %v18669_v36  ;;  %v17831_v22 = vcombine.high %v204_v1, %v216_v27  ;;  %v192_v36 = vld [vmem:[#allocation5 + $0x2c8] sm:$0xff] }
 0x204   :  { %7786 = vmatprep.subr.bf16.mxu1 %v17903_v29  ;;  %v923_v29 = vld [vmem:[#allocation5 + $0x19a0] sm:$0xff]  ;;  %v17806_v41 = vcombine.low %v180_v18, %v192_v36 }
 0x205   :  { %v7433_v49 = vpop.f32.mrf.mxu0  ;;  %7690 = vmatmul.mubr.bf16.vlgmr.msra.gmra.mxu0 %v22066_v21  ;;  %v18549_v43 = vcombine.high %v923_v29, %v935_v30 }
 0x206   :  { %v7434_v52 = vadd.f32 %v7433_v49, %v1280_v34  ;;  %v7476_v56 = vpop.f32.mrf.mxu1  ;;  %7733 = vmatmul.mubr.bf16.vlgmr.msra.gmra.mxu1 %v22068_v25  ;;  %7744 = vmatpush1.bf16.msra.mxu0 %v18668_v35  ;;  %v17807_v35 = vcombine.high %v180_v18, %v192_v36  ;;  %v1211_v36 = vld [vmem:[#allocation5 + $0x22a0] sm:$0xff] }
 0x207   :  { %7787 = vmatpush1.bf16.msra.mxu1 %v17902_v38  ;;  %v22180_v54 = vpop.f32.mrf.mxu0  ;;  %7745 = vmatprep.subr.bf16.mxu0 %v18645_v40  ;;  %v168_v38 = vld [vmem:[#allocation5 + $0x208] sm:$0xff]  ;;  %v18572_v40 = vcombine.low %v947_v16, %v959_v17 }
 0x208   :  { %v22182_v2 = vadd.f32 %v7476_v56, %v7434_v52  ;;  %v22184_v3 = vpop.f32.mrf.mxu1  ;;  %7788 = vmatprep.subr.bf16.mxu1 %v17879_v47  ;;  %7775 = vmatprep.mubr.bf16.mxu0 %v22070_v32  ;;  %v911_v47 = vld [vmem:[#allocation5 + $0x1940] sm:$0xff]  ;;  %v144_v52 = vld [vmem:[#allocation5 + $0x148] sm:$0xff]  ;;  %v18548_v56 = vcombine.low %v923_v29, %v935_v30 }
 0x209   :  { %v7437_v6 = vpop.f32.mrf.mxu0  ;;  %7818 = vmatprep.mubr.bf16.mxu1 %v22060_v58  ;;  %v17759_v1 = vcombine.high %v132_v48, %v144_v52  ;;  %v18524_v27 = vcombine.low %v899_v7, %v911_v47  ;;  %v480_v16 = vld [vmem:[#allocation5 + $0xbc8] sm:$0xff] }
 0x20a   :  { %v7438_v8 = vadd.f32 %v7437_v6, %v1280_v34  ;;  %7746 = vmatpush1.bf16.msra.mxu0 %v18644_v53  ;;  %v7480_v10 = vpop.f32.mrf.mxu1  ;;  %v156_v34 = vld [vmem:[#allocation5 + $0x1a8] sm:$0xff]  ;;  %v17758_v6 = vcombine.low %v132_v48, %v144_v52  ;;  %v1163_v52 = vld [vmem:[#allocation5 + $0x2120] sm:$0xff] }
 0x20b   :  { %7789 = vmatpush1.bf16.msra.mxu1 %v17878_v55  ;;  %7747 = vmatprep.subr.bf16.mxu0 %v18621_v57  ;;  %v17783_v49 = vcombine.high %v156_v34, %v168_v38  ;;  %v17782_v53 = vcombine.low %v156_v34, %v168_v38  ;;  %v18525_v55 = vcombine.high %v899_v7, %v911_v47  ;;  %v875_v57 = vld [vmem:[#allocation5 + $0x1820] sm:$0xff]  ;;  %v456_v29 = vld [vmem:[#allocation5 + $0xb08] sm:$0xff] }
 0x20c   :  { %v22188_v42 = vadd.f32 %v7480_v10, %v7438_v8  ;;  %7790 = vmatprep.subr.bf16.mxu1 %v17855_v4  ;;  %v120_v4 = vld [vmem:[#allocation5 + $0x88] sm:$0xff]  ;;  %v18501_v8 = vcombine.high %v875_v57, %v887_v60  ;;  %v1247_v10 = vld [vmem:[#allocation5 + $0x23c0] sm:$0xff]  ;;  %v18500_v17 = vcombine.low %v875_v57, %v887_v60 }
 0x20d   :  { %v17734_v18 = vcombine.low %v108_v0, %v120_v4  ;;  %v1187_v38 = vld [vmem:[#allocation5 + $0x21e0] sm:$0xff]  ;;  %v432_v7 = vld [vmem:[#allocation5 + $0xa48] sm:$0xff] }
 0x20e   :  { %7748 = vmatpush1.bf16.msra.mxu0 %v18620_v9  ;;  %v1235_v9 = vld [vmem:[#allocation5 + $0x2360] sm:$0xff]  ;;  %v408_v57 = vld [vmem:[#allocation5 + $0x988] sm:$0xff] }
 0x20f   :  { %7791 = vmatpush1.bf16.msra.mxu1 %v17854_v12  ;;  %7749 = vmatprep.subr.bf16.mxu0 %v18597_v13  ;;  %v468_v12 = vld [vmem:[#allocation5 + $0xb68] sm:$0xff]  ;;  %v17735_v13 = vcombine.high %v108_v0, %v120_v4  ;;  %v18860_v30 = vcombine.low %v1235_v9, %v1247_v10  ;;  %v1139_v4 = vld [vmem:[#allocation5 + $0x2060] sm:$0xff] }
 0x210   :  { %7792 = vmatprep.subr.bf16.mxu1 %v17831_v22  ;;  %v18861_v22 = vcombine.high %v1235_v9, %v1247_v10  ;;  %v18094_v34 = vcombine.low %v468_v12, %v480_v16  ;;  %v384_v9 = vld [vmem:[#allocation5 + $0x8c8] sm:$0xff] }
 0x212   :  { %7750 = vmatpush1.bf16.msra.mxu0 %v18596_v23  ;;  %v1223_v23 = vld [vmem:[#allocation5 + $0x2300] sm:$0xff] }
 0x213   :  { %7793 = vmatpush1.bf16.msra.mxu1 %v17830_v24  ;;  %7751 = vmatprep.subr.bf16.mxu0 %v18573_v26  ;;  %v444_v24 = vld [vmem:[#allocation5 + $0xaa8] sm:$0xff]  ;;  %v18095_v26 = vcombine.high %v468_v12, %v480_v16  ;;  %v18836_v47 = vcombine.low %v1211_v36, %v1223_v23  ;;  %v1115_v16 = vld [vmem:[#allocation5 + $0x1fa0] sm:$0xff] }
 0x214   :  { %7794 = vmatprep.subr.bf16.mxu1 %v17807_v35  ;;  %v18837_v35 = vcombine.high %v1211_v36, %v1223_v23  ;;  %v18070_v48 = vcombine.low %v444_v24, %v456_v29  ;;  %v360_v36 = vld [vmem:[#allocation5 + $0x808] sm:$0xff] }
 0x216   :  { %7752 = vmatpush1.bf16.msra.mxu0 %v18572_v40  ;;  %v1199_v40 = vld [vmem:[#allocation5 + $0x2240] sm:$0xff] }
 0x217   :  { %7795 = vmatpush1.bf16.msra.mxu1 %v17806_v41  ;;  %7753 = vmatprep.subr.bf16.mxu0 %v18549_v43  ;;  %v420_v41 = vld [vmem:[#allocation5 + $0x9e8] sm:$0xff]  ;;  %v18071_v43 = vcombine.high %v444_v24, %v456_v29  ;;  %v18812_v60 = vcombine.low %v1187_v38, %v1199_v40  ;;  %v1091_v29 = vld [vmem:[#allocation5 + $0x1ee0] sm:$0xff] }
 0x218   :  { %7796 = vmatprep.subr.bf16.mxu1 %v17783_v49  ;;  %v18813_v49 = vcombine.high %v1187_v38, %v1199_v40  ;;  %v18046_v0 = vcombine.low %v420_v41, %v432_v7  ;;  %v336_v38 = vld [vmem:[#allocation5 + $0x748] sm:$0xff] }
 0x21a   :  { %7754 = vmatpush1.bf16.msra.mxu0 %v18548_v56  ;;  %v1175_v56 = vld [vmem:[#allocation5 + $0x2180] sm:$0xff] }
 0x21b   :  { %7797 = vmatpush1.bf16.msra.mxu1 %v17782_v53  ;;  %7755 = vmatprep.subr.bf16.mxu0 %v18525_v55  ;;  %v396_v53 = vld [vmem:[#allocation5 + $0x928] sm:$0xff]  ;;  %v18047_v55 = vcombine.high %v420_v41, %v432_v7  ;;  %v18788_v10 = vcombine.low %v1163_v52, %v1175_v56  ;;  %v1067_v7 = vld [vmem:[#allocation5 + $0x1e20] sm:$0xff] }
 0x21c   :  { %7798 = vmatprep.subr.bf16.mxu1 %v17759_v1  ;;  %v18789_v1 = vcombine.high %v1163_v52, %v1175_v56  ;;  %v18022_v12 = vcombine.low %v396_v53, %v408_v57  ;;  %v312_v52 = vld [vmem:[#allocation5 + $0x688] sm:$0xff] }
 0x21e   :  { %7756 = vmatpush1.bf16.msra.mxu0 %v18524_v27  ;;  %v1151_v27 = vld [vmem:[#allocation5 + $0x20c0] sm:$0xff] }
 0x21f   :  { %7799 = vmatpush1.bf16.msra.mxu1 %v17758_v6  ;;  %7757 = vmatprep.subr.bf16.mxu0 %v18501_v8  ;;  %v372_v6 = vld [vmem:[#allocation5 + $0x868] sm:$0xff]  ;;  %v18023_v8 = vcombine.high %v396_v53, %v408_v57  ;;  %v18764_v23 = vcombine.low %v1139_v4, %v1151_v27 }
 0x220   :  { %7800 = vmatprep.subr.bf16.mxu1 %v17735_v13  ;;  %v18765_v13 = vcombine.high %v1139_v4, %v1151_v27  ;;  %v17998_v24 = vcombine.low %v372_v6, %v384_v9  ;;  %v660_v57 = vld [vmem:[#allocation5 + $0x1168] sm:$0xff] }
 0x221   :  { %v1056_v4 = vld [vmem:[#allocation5 + $0x1dc8] sm:$0xff] }
 0x222   :  { %7758 = vmatpush1.bf16.msra.mxu0 %v18500_v17  ;;  %v1127_v17 = vld [vmem:[#allocation5 + $0x2000] sm:$0xff] }
 0x223   :  { %7801 = vmatpush1.bf16.msra.mxu1 %v17734_v18  ;;  %7759 = vmatprep.subr.bf16.mxu0 %v18861_v22  ;;  %v348_v18 = vld [vmem:[#allocation5 + $0x7a8] sm:$0xff]  ;;  %v17999_v22 = vcombine.high %v372_v6, %v384_v9  ;;  %v18740_v40 = vcombine.low %v1115_v16, %v1127_v17 }
 0x224   :  { %7802 = vmatprep.subr.bf16.mxu1 %v18095_v26  ;;  %v18741_v26 = vcombine.high %v1115_v16, %v1127_v17  ;;  %v17974_v41 = vcombine.low %v348_v18, %v360_v36  ;;  %v636_v9 = vld [vmem:[#allocation5 + $0x10a8] sm:$0xff] }
 0x225   :  { %v1032_v16 = vld [vmem:[#allocation5 + $0x1d08] sm:$0xff] }
 0x226   :  { %7760 = vmatpush2.bf16.msra.mxu0 %v18860_v30  ;;  %v1103_v30 = vld [vmem:[#allocation5 + $0x1f40] sm:$0xff] }
 0x227   :  { %7803 = vmatpush2.bf16.msra.mxu1 %v18094_v34  ;;  %7761 = vmatprep.subr.bf16.mxu0 %v18837_v35  ;;  %v324_v34 = vld [vmem:[#allocation5 + $0x6e8] sm:$0xff]  ;;  %v17975_v35 = vcombine.high %v348_v18, %v360_v36  ;;  %v18716_v56 = vcombine.low %v1091_v29, %v1103_v30  ;;  %v22190_v18 = vpop.f32.mrf.mxu0 }
 0x228   :  { %7804 = vmatprep.subr.bf16.mxu1 %v18071_v43  ;;  %v18717_v43 = vcombine.high %v1091_v29, %v1103_v30  ;;  %v17950_v53 = vcombine.low %v324_v34, %v336_v38  ;;  %v996_v29 = vld [vmem:[#allocation5 + $0x1be8] sm:$0xff] }
 0x229   :  { %v1008_v30 = vld [vmem:[#allocation5 + $0x1c48] sm:$0xff] }
 0x22a   :  { %7762 = vmatpush2.bf16.msra.mxu0 %v18836_v47  ;;  %v1079_v47 = vld [vmem:[#allocation5 + $0x1e80] sm:$0xff] }
 0x22b   :  { %7805 = vmatpush2.bf16.msra.mxu1 %v18070_v48  ;;  %7763 = vmatprep.subr.bf16.mxu0 %v18813_v49  ;;  %v300_v48 = vld [vmem:[#allocation5 + $0x628] sm:$0xff]  ;;  %v17951_v49 = vcombine.high %v324_v34, %v336_v38  ;;  %v18692_v27 = vcombine.low %v1067_v7, %v1079_v47 }
 0x22c   :  { %7806 = vmatprep.subr.bf16.mxu1 %v18047_v55  ;;  %v18693_v55 = vcombine.high %v1067_v7, %v1079_v47  ;;  %v17926_v6 = vcombine.low %v300_v48, %v312_v52  ;;  %v588_v7 = vld [vmem:[#allocation5 + $0xf28] sm:$0xff] }
 0x22d   :  { %v600_v47 = vld [vmem:[#allocation5 + $0xf88] sm:$0xff] }
 0x22e   :  { %7764 = vmatpush2.bf16.msra.mxu0 %v18812_v60  ;;  %v672_v60 = vld [vmem:[#allocation5 + $0x11c8] sm:$0xff] }
 0x22f   :  { %7807 = vmatpush2.bf16.msra.mxu1 %v18046_v0  ;;  %7765 = vmatprep.subr.bf16.mxu0 %v18789_v1  ;;  %v1044_v0 = vld [vmem:[#allocation5 + $0x1d68] sm:$0xff]  ;;  %v17927_v1 = vcombine.high %v300_v48, %v312_v52  ;;  %v18286_v17 = vcombine.low %v660_v57, %v672_v60  ;;  %v18623_v52 = vcombine.high %v996_v29, %v1008_v30 }
 0x230   :  { %7808 = vmatprep.subr.bf16.mxu1 %v18023_v8  ;;  %v18287_v8 = vcombine.high %v660_v57, %v672_v60  ;;  %v972_v48 = vld [vmem:[#allocation5 + $0x1b28] sm:$0xff]  ;;  %v18622_v60 = vcombine.low %v996_v29, %v1008_v30 }
 0x231   :  { %v936_v30 = vld [vmem:[#allocation5 + $0x1a08] sm:$0xff] }
 0x232   :  { %7766 = vmatpush2.bf16.msra.mxu0 %v18788_v10  ;;  %v648_v10 = vld [vmem:[#allocation5 + $0x1108] sm:$0xff] }
 0x233   :  { %7809 = vmatpush2.bf16.msra.mxu1 %v18022_v12  ;;  %7767 = vmatprep.subr.bf16.mxu0 %v18765_v13  ;;  %v1020_v12 = vld [vmem:[#allocation5 + $0x1ca8] sm:$0xff]  ;;  %v18671_v13 = vcombine.high %v1044_v0, %v1056_v4  ;;  %v18263_v36 = vcombine.high %v636_v9, %v648_v10  ;;  %v18262_v38 = vcombine.low %v636_v9, %v648_v10 }
 0x234   :  { %7810 = vmatprep.subr.bf16.mxu1 %v17999_v22  ;;  %v18670_v22 = vcombine.low %v1044_v0, %v1056_v4  ;;  %v18215_v0 = vcombine.high %v588_v7, %v600_v47  ;;  %v576_v4 = vld [vmem:[#allocation5 + $0xec8] sm:$0xff] }
 0x235   :  { %v960_v10 = vld [vmem:[#allocation5 + $0x1ac8] sm:$0xff] }
 0x236   :  { %7768 = vmatpush2.bf16.msra.mxu0 %v18764_v23  ;;  %v612_v23 = vld [vmem:[#allocation5 + $0xfe8] sm:$0xff] }
 0x237   :  { %7811 = vmatpush2.bf16.msra.mxu1 %v17998_v24  ;;  %7769 = vmatprep.subr.bf16.mxu0 %v18741_v26  ;;  %v624_v24 = vld [vmem:[#allocation5 + $0x1048] sm:$0xff]  ;;  %v18647_v26 = vcombine.high %v1020_v12, %v1032_v16 }
 0x238   :  { %7812 = vmatprep.subr.bf16.mxu1 %v17975_v35  ;;  %v18238_v57 = vcombine.low %v612_v23, %v624_v24 }
 0x23a   :  { %7770 = vmatpush2.bf16.msra.mxu0 %v18740_v40 }
 0x23b   :  { %7813 = vmatpush2.bf16.msra.mxu1 %v17974_v41  ;;  %7771 = vmatprep.subr.bf16.mxu0 %v18717_v43  ;;  %v18646_v41 = vcombine.low %v1020_v12, %v1032_v16  ;;  %v18239_v43 = vcombine.high %v612_v23, %v624_v24  ;;  %v924_v23 = vld [vmem:[#allocation5 + $0x19a8] sm:$0xff] }
 0x23c   :  { %7814 = vmatprep.subr.bf16.mxu1 %v17951_v49 }
 0x23e   :  { %7772 = vmatpush2.bf16.msra.mxu0 %v18716_v56 }
 0x23f   :  { %7815 = vmatpush2.bf16.msra.mxu1 %v17950_v53  ;;  %7773 = vmatprep.subr.bf16.mxu0 %v18693_v55 }
 0x240   :  { %7816 = vmatprep.subr.bf16.mxu1 %v17927_v1  ;;  %v564_v1 = vld [vmem:[#allocation5 + $0xe68] sm:$0xff] }
 0x242   :  { %7774 = vmatpush2.bf16.msra.mxu0 %v18692_v27  ;;  %v948_v27 = vld [vmem:[#allocation5 + $0x1a68] sm:$0xff] }
 0x243   :  { %7817 = vmatpush2.bf16.msra.mxu1 %v17926_v6  ;;  %7829 = vmatprep.subr.bf16.mxu0 %v18287_v8  ;;  %v18575_v29 = vcombine.high %v948_v27, %v960_v10 }
 0x244   :  { %7872 = vmatprep.subr.bf16.mxu1 %v18671_v13  ;;  %v18214_v13 = vcombine.low %v588_v7, %v600_v47  ;;  %v516_v7 = vld [vmem:[#allocation5 + $0xce8] sm:$0xff] }
 0x245   :  { %v7519_v34 = vpop.f32.mrf.mxu0  ;;  %7776 = vmatmul.mubr.bf16.vlgmr.msra.gmra.mxu0 %v22076_v39  ;;  %v528_v47 = vld [vmem:[#allocation5 + $0xd48] sm:$0xff] }
 0x246   :  { %v22194_v35 = vadd.f32 %v7519_v34, %v22182_v2  ;;  %7819 = vmatmul.mubr.bf16.vlgmr.msra.gmra.mxu1 %v22066_v21  ;;  %7830 = vmatpush1.bf16.msra.mxu0 %v18286_v17  ;;  %v984_v2 = vld [vmem:[#allocation5 + $0x1b88] sm:$0xff]  ;;  %v18191_v17 = vcombine.high %v564_v1, %v576_v4 }
 0x247   :  { %7873 = vmatpush1.bf16.msra.mxu1 %v18670_v22  ;;  %v22197_v40 = vpop.f32.mrf.mxu0  ;;  %7831 = vmatprep.subr.bf16.mxu0 %v18263_v36  ;;  %v18599_v9 = vcombine.high %v972_v48, %v984_v2  ;;  %v18598_v16 = vcombine.low %v972_v48, %v984_v2  ;;  %v540_v22 = vld [vmem:[#allocation5 + $0xda8] sm:$0xff] }
 0x248   :  { %v8741_v49 = vmul.f32 %v22194_v35, %v22194_v35  ;;  %7874 = vmatprep.subr.bf16.mxu1 %v18647_v26  ;;  %7861 = vmatprep.mubr.bf16.mxu0 %v22062_v63  ;;  %v552_v36 = vld [vmem:[#allocation5 + $0xe08] sm:$0xff] }
 0x249   :  { %v7523_v56 = vpop.f32.mrf.mxu0  ;;  %7904 = vmatprep.mubr.bf16.mxu1 %v22070_v32  ;;  %v900_v48 = vld [vmem:[#allocation5 + $0x18e8] sm:$0xff] }
 0x24a   :  { %v8789_v53 = vmul.f32 %v8741_v49, %v22194_v35  ;;  %v22205_v55 = vadd.f32 %v7523_v56, %v22188_v42  ;;  %7832 = vmatpush1.bf16.msra.mxu0 %v18262_v38  ;;  %v18190_v38 = vcombine.low %v564_v1, %v576_v4  ;;  %v912_v2 = vld [vmem:[#allocation5 + $0x1948] sm:$0xff]  ;;  %v18166_v56 = vcombine.low %v540_v22, %v552_v36 }
 0x24b   :  { %7875 = vmatpush1.bf16.msra.mxu1 %v18646_v41  ;;  %7833 = vmatprep.subr.bf16.mxu0 %v18239_v43  ;;  %v18574_v41 = vcombine.low %v948_v27, %v960_v10  ;;  %v18167_v43 = vcombine.high %v540_v22, %v552_v36  ;;  %v876_v1 = vld [vmem:[#allocation5 + $0x1828] sm:$0xff]  ;;  %v18527_v4 = vcombine.high %v900_v48, %v912_v2 }
 0x24c   :  { %v8837_v6 = vmul.f32 0.044715, %v8789_v53  ;;  %v8765_v8 = vmul.f32 %v22205_v55, %v22205_v55  ;;  %7876 = vmatprep.subr.bf16.mxu1 %v18623_v52  ;;  %v18551_v52 = vcombine.high %v924_v23, %v936_v30  ;;  %v18550_v53 = vcombine.low %v924_v23, %v936_v30  ;;  %v888_v27 = vld [vmem:[#allocation5 + $0x1888] sm:$0xff] }
 0x24d   :  { %v852_v10 = vld [vmem:[#allocation5 + $0x1768] sm:$0xff]  ;;  %v18502_v36 = vcombine.low %v876_v1, %v888_v27 }
 0x24e   :  { %v8885_v12 = vadd.f32 %v8837_v6, %v22194_v35  ;;  %v8813_v42 = vmul.f32 %v8765_v8, %v22205_v55  ;;  %7834 = vmatpush1.bf16.msra.mxu0 %v18238_v57  ;;  %v18143_v57 = vcombine.high %v516_v7, %v528_v47  ;;  %v18142_v6 = vcombine.low %v516_v7, %v528_v47 }
 0x24f   :  { %7877 = vmatpush1.bf16.msra.mxu1 %v18622_v60  ;;  %7835 = vmatprep.subr.bf16.mxu0 %v18215_v0  ;;  %v492_v60 = vld [vmem:[#allocation5 + $0xc28] sm:$0xff]  ;;  %v18526_v8 = vcombine.low %v900_v48, %v912_v2  ;;  %v8693_v2 = vmul.f32 0.5, %v22194_v35 }
 0x250   :  { %v8933_v24 = vmul.f32 0.7978846, %v8885_v12  ;;  %v8861_v26 = vmul.f32 0.044715, %v8813_v42  ;;  %7878 = vmatprep.subr.bf16.mxu1 %v18599_v9  ;;  %v504_v0 = vld [vmem:[#allocation5 + $0xc88] sm:$0xff] }
 0x251   :  { %v18119_v9 = vcombine.high %v492_v60, %v504_v0  ;;  %v864_v12 = vld [vmem:[#allocation5 + $0x17c8] sm:$0xff] }
 0x252   :  { %21776 = vtanh.f32 %v8933_v24  ;;  %v8909_v34 = vadd.f32 %v8861_v26, %v22205_v55  ;;  %7836 = vmatpush1.bf16.msra.mxu0 %v18214_v13  ;;  %v1236_v42 = vld [vmem:[#allocation5 + $0x2368] sm:$0xff]  ;;  %v18503_v13 = vcombine.high %v876_v1, %v888_v27  ;;  %v18479_v23 = vcombine.high %v852_v10, %v864_v12 }
 0x253   :  { %7879 = vmatpush1.bf16.msra.mxu1 %v18598_v16  ;;  %7837 = vmatprep.subr.bf16.mxu0 %v18191_v17  ;;  %v1248_v16 = vld [vmem:[#allocation5 + $0x23c8] sm:$0xff]  ;;  %v18118_v17 = vcombine.low %v492_v60, %v504_v0 }
 0x254   :  { %v8957_v49 = vmul.f32 0.7978846, %v8909_v34  ;;  %7880 = vmatprep.subr.bf16.mxu1 %v18575_v29  ;;  %v828_v24 = vld [vmem:[#allocation5 + $0x16a8] sm:$0xff]  ;;  %v18863_v30 = vcombine.high %v1236_v42, %v1248_v16  ;;  %v18862_v7 = vcombine.low %v1236_v42, %v1248_v16 }
 0x255   :  { %v840_v26 = vld [vmem:[#allocation5 + $0x1708] sm:$0xff] }
 0x256   :  { %21778 = vtanh.f32 %v8957_v49  ;;  %7838 = vmatpush1.bf16.msra.mxu0 %v18190_v38  ;;  %v1212_v29 = vld [vmem:[#allocation5 + $0x22a8] sm:$0xff]  ;;  %v18478_v38 = vcombine.low %v852_v10, %v864_v12  ;;  %v18455_v47 = vcombine.high %v828_v24, %v840_v26  ;;  %v18454_v0 = vcombine.low %v828_v24, %v840_v26 }
 0x257   :  { %7881 = vmatpush1.bf16.msra.mxu1 %v18574_v41  ;;  %7839 = vmatprep.subr.bf16.mxu0 %v18167_v43  ;;  %v1224_v34 = vld [vmem:[#allocation5 + $0x2308] sm:$0xff] }
 0x258   :  { %7882 = vmatprep.subr.bf16.mxu1 %v18551_v52  ;;  %v804_v48 = vld [vmem:[#allocation5 + $0x15e8] sm:$0xff]  ;;  %v18838_v27 = vcombine.low %v1212_v29, %v1224_v34 }
 0x259   :  { %v816_v49 = vld [vmem:[#allocation5 + $0x1648] sm:$0xff] }
 0x25a   :  { %7840 = vmatpush1.bf16.msra.mxu0 %v18166_v56  ;;  %v1188_v52 = vld [vmem:[#allocation5 + $0x21e8] sm:$0xff]  ;;  %v8717_v56 = vmul.f32 0.5, %v22205_v55  ;;  %v18430_v55 = vcombine.low %v804_v48, %v816_v49 }
 0x25b   :  { %7883 = vmatpush1.bf16.msra.mxu1 %v18550_v53  ;;  %7841 = vmatprep.subr.bf16.mxu0 %v18143_v57  ;;  %v18839_v53 = vcombine.high %v1212_v29, %v1224_v34  ;;  %v1200_v57 = vld [vmem:[#allocation5 + $0x2248] sm:$0xff] }
 0x25c   :  { %7884 = vmatprep.subr.bf16.mxu1 %v18527_v4  ;;  %v1164_v10 = vld [vmem:[#allocation5 + $0x2128] sm:$0xff]  ;;  %v18815_v12 = vcombine.high %v1188_v52, %v1200_v57 }
 0x25d   :  { %v1176_v35 = vld [vmem:[#allocation5 + $0x2188] sm:$0xff] }
 0x25e   :  { %7842 = vmatpush1.bf16.msra.mxu0 %v18142_v6  ;;  %v18431_v6 = vcombine.high %v804_v48, %v816_v49  ;;  %v1152_v24 = vld [vmem:[#allocation5 + $0x20c8] sm:$0xff]  ;;  %v18790_v29 = vcombine.low %v1164_v10, %v1176_v35 }
 0x25f   :  { %v21777_v22 = vpop.eup %21776  ;;  %7885 = vmatpush1.bf16.msra.mxu1 %v18526_v8  ;;  %7843 = vmatprep.subr.bf16.mxu0 %v18119_v9  ;;  %v780_v8 = vld [vmem:[#allocation5 + $0x1528] sm:$0xff] }
 0x260   :  { %7886 = vmatprep.subr.bf16.mxu1 %v18503_v13  ;;  %v9029_v41 = vadd.f32 1.0, %v21777_v22  ;;  %v792_v9 = vld [vmem:[#allocation5 + $0x1588] sm:$0xff]  ;;  %v18814_v13 = vcombine.low %v1188_v52, %v1200_v57 }
 0x261   :  { %v18407_v16 = vcombine.high %v780_v8, %v792_v9  ;;  %v768_v22 = vld [vmem:[#allocation5 + $0x14c8] sm:$0xff]  ;;  %v18406_v26 = vcombine.low %v780_v8, %v792_v9 }
 0x262   :  { %7844 = vmatpush1.bf16.msra.mxu0 %v18118_v17  ;;  %v9077_v1 = vmul.f32 %v9029_v41, %v8693_v2  ;;  %v756_v17 = vld [vmem:[#allocation5 + $0x1468] sm:$0xff] }
 0x263   :  { %v21779_v43 = vpop.eup %21778  ;;  %7887 = vmatpush1.bf16.msra.mxu1 %v18502_v36  ;;  %7845 = vmatprep.subr.bf16.mxu0 %v18479_v23  ;;  %v1140_v36 = vld [vmem:[#allocation5 + $0x2068] sm:$0xff]  ;;  %v18791_v23 = vcombine.high %v1164_v10, %v1176_v35 }
 0x264   :  { %7888 = vmatprep.subr.bf16.mxu1 %v18863_v30  ;;  %v9053_v60 = vadd.f32 1.0, %v21779_v43  ;;  %v18383_v30 = vcombine.high %v756_v17, %v768_v22  ;;  %v732_v34 = vld [vmem:[#allocation5 + $0x13a8] sm:$0xff]  ;;  %v18767_v43 = vcombine.high %v1140_v36, %v1152_v24  ;;  %v18766_v48 = vcombine.low %v1140_v36, %v1152_v24 }
 0x265   :  { %v1116_v41 = vld [vmem:[#allocation5 + $0x1fa8] sm:$0xff]  ;;  %v22219_v36 = vsub.s32 6, %v22086_v50 }
 0x266   :  { %7846 = vmatpush2.bf16.msra.mxu0 %v18478_v38  ;;  %v9101_v4 = vmul.f32 %v9053_v60, %v8717_v56  ;;  %v744_v38 = vld [vmem:[#allocation5 + $0x1408] sm:$0xff]  ;;  %v22216_v60 = vpop.f32.mrf.mxu1 }
 0x267   :  { %7889 = vmatpush2.bf16.msra.mxu1 %v18862_v7  ;;  %7847 = vmatprep.subr.bf16.mxu0 %v18455_v47  ;;  %v1128_v7 = vld [vmem:[#allocation5 + $0x2008] sm:$0xff]  ;;  %v18382_v47 = vcombine.low %v756_v17, %v768_v22  ;;  %v18359_v49 = vcombine.high %v732_v34, %v744_v38  ;;  %v289_v17 = vld [vmem:[#allocation5 + $0x5d0] sm:$0xff]  ;;  %23131 = vst [vmem:[#allocation22_spill] sm:$0xff] %v22219_v36 }
 0x268   :  { %7890 = vmatprep.subr.bf16.mxu1 %v18839_v53  ;;  %v22214_v42 = vpack.c.bf16 %v9101_v4, %v9077_v1  ;;  %v708_v52 = vld [vmem:[#allocation5 + $0x12e8] sm:$0xff]  ;;  %v18743_v53 = vcombine.high %v1116_v41, %v1128_v7  ;;  %v18742_v1 = vcombine.low %v1116_v41, %v1128_v7  ;;  %v7562_v9 = vpop.f32.mrf.mxu1  ;;  %v661_v22 = vld [vmem:[#allocation5 + $0x1170] sm:$0xff]  ;;  %v21865_v7 = vld [vmem:[#allocation7] sm:$0xff] }
 0x269   :  { %v720_v2 = vld [vmem:[#allocation5 + $0x1348] sm:$0xff]  ;;  %v265_v41 = vld [vmem:[#allocation5 + $0x510] sm:$0xff] }
 0x26a   :  { %23130 = vst [vmem:[#allocation21_spill] sm:$0xff] %v22214_v42  ;;  %7848 = vmatpush2.bf16.msra.mxu0 %v18454_v0  ;;  %v1092_v56 = vld [vmem:[#allocation5 + $0x1ee8] sm:$0xff]  ;;  %v18358_v0 = vcombine.low %v732_v34, %v744_v38  ;;  %v18335_v4 = vcombine.high %v708_v52, %v720_v2  ;;  %v18334_v35 = vcombine.low %v708_v52, %v720_v2  ;;  %v253_v38 = vld [vmem:[#allocation5 + $0x4b0] sm:$0xff] }
 0x26b   :  { %7891 = vmatpush2.bf16.msra.mxu1 %v18838_v27  ;;  %7849 = vmatprep.subr.bf16.mxu0 %v18431_v6  ;;  %v1104_v57 = vld [vmem:[#allocation5 + $0x1f48] sm:$0xff]  ;;  %v649_v52 = vld [vmem:[#allocation5 + $0x1110] sm:$0xff] }
 0x26c   :  { %7892 = vmatprep.subr.bf16.mxu1 %v18815_v12  ;;  %v684_v27 = vld [vmem:[#allocation5 + $0x1228] sm:$0xff]  ;;  %v18719_v10 = vcombine.high %v1092_v56, %v1104_v57 }
 0x26d   :  { %v696_v6 = vld [vmem:[#allocation5 + $0x1288] sm:$0xff] }
 0x26e   :  { %7850 = vmatpush2.bf16.msra.mxu0 %v18430_v55  ;;  %v1068_v8 = vld [vmem:[#allocation5 + $0x1e28] sm:$0xff]  ;;  %v18718_v55 = vcombine.low %v1092_v56, %v1104_v57  ;;  %v22224_v56 = vpop.f32.mrf.mxu0  ;;  %v17881_v57 = vcombine.high %v253_v38, %v265_v41 }
 0x26f   :  { %7893 = vmatpush2.bf16.msra.mxu1 %v18814_v13  ;;  %7851 = vmatprep.subr.bf16.mxu0 %v18407_v16  ;;  %v1080_v12 = vld [vmem:[#allocation5 + $0x1e88] sm:$0xff]  ;;  %v18311_v13 = vcombine.high %v684_v27, %v696_v6  ;;  %v277_v16 = vld [vmem:[#allocation5 + $0x570] sm:$0xff] }
 0x270   :  { %7894 = vmatprep.subr.bf16.mxu1 %v18791_v23  ;;  %v22221_v23 = vpop.f32.mrf.mxu1  ;;  %v18695_v24 = vcombine.high %v1068_v8, %v1080_v12  ;;  %v17905_v34 = vcombine.high %v277_v16, %v289_v17  ;;  %v17904_v2 = vcombine.low %v277_v16, %v289_v17 }
 0x272   :  { %7852 = vmatpush2.bf16.msra.mxu0 %v18406_v26  ;;  %v673_v26 = vld [vmem:[#allocation5 + $0x11d0] sm:$0xff] }
 0x273   :  { %7895 = vmatpush2.bf16.msra.mxu1 %v18790_v29  ;;  %7853 = vmatprep.subr.bf16.mxu0 %v18383_v30  ;;  %v18310_v29 = vcombine.low %v684_v27, %v696_v6  ;;  %v18694_v30 = vcombine.low %v1068_v8, %v1080_v12 }
 0x274   :  { %7896 = vmatprep.subr.bf16.mxu1 %v18767_v43  ;;  %v637_v43 = vld [vmem:[#allocation5 + $0x10b0] sm:$0xff] }
 0x275   :  { %v18265_v8 = vcombine.high %v637_v43, %v649_v52  ;;  %v18264_v17 = vcombine.low %v637_v43, %v649_v52 }
 0x276   :  { %7854 = vmatpush2.bf16.msra.mxu0 %v18382_v47  ;;  %v1288_v47 = vrot.slane %v21865_v7, %v22219_v36 }
 0x277   :  { %7897 = vmatpush2.bf16.msra.mxu1 %v18766_v48  ;;  %7855 = vmatprep.subr.bf16.mxu0 %v18359_v49  ;;  %v7566_v48 = vpop.f32.mrf.mxu1  ;;  %v18289_v49 = vcombine.high %v661_v22, %v673_v26 }
 0x278   :  { %7898 = vmatprep.subr.bf16.mxu1 %v18743_v53  ;;  %v18288_v53 = vcombine.low %v661_v22, %v673_v26  ;;  %v7563_v27 = vadd.f32 %v7562_v9, %v1288_v47  ;;  %v205_v22 = vld [vmem:[#allocation5 + $0x330] sm:$0xff] }
 0x279   :  { %v22226_v6 = vpop.f32.mrf.mxu1  ;;  %v589_v26 = vld [vmem:[#allocation5 + $0xf30] sm:$0xff] }
 0x27a   :  { %7856 = vmatpush2.bf16.msra.mxu0 %v18358_v0  ;;  %v229_v0 = vld [vmem:[#allocation5 + $0x3f0] sm:$0xff] }
 0x27b   :  { %7899 = vmatpush2.bf16.msra.mxu1 %v18742_v1  ;;  %7857 = vmatprep.subr.bf16.mxu0 %v18335_v4  ;;  %v241_v1 = vld [vmem:[#allocation5 + $0x450] sm:$0xff] }
 0x27c   :  { %7900 = vmatprep.subr.bf16.mxu1 %v18719_v10  ;;  %v613_v4 = vld [vmem:[#allocation5 + $0xff0] sm:$0xff]  ;;  %v17857_v9 = vcombine.high %v229_v0, %v241_v1  ;;  %v17856_v52 = vcombine.low %v229_v0, %v241_v1 }
 0x27d   :  { %v625_v10 = vld [vmem:[#allocation5 + $0x1050] sm:$0xff] }
 0x27e   :  { %7858 = vmatpush2.bf16.msra.mxu0 %v18334_v35  ;;  %v18241_v7 = vcombine.high %v613_v4, %v625_v10 }
 0x27f   :  { %7901 = vmatpush2.bf16.msra.mxu1 %v18718_v55  ;;  %7859 = vmatprep.subr.bf16.mxu0 %v18311_v13  ;;  %v17880_v13 = vcombine.low %v253_v38, %v265_v41 }
 0x280   :  { %7902 = vmatprep.subr.bf16.mxu1 %v18695_v24  ;;  %v217_v24 = vld [vmem:[#allocation5 + $0x390] sm:$0xff] }
 0x281   :  { %v17832_v0 = vcombine.low %v205_v22, %v217_v24 }
 0x282   :  { %7860 = vmatpush2.bf16.msra.mxu0 %v18310_v29  ;;  %v7567_v29 = vadd.f32 %v7566_v48, %v1288_v47  ;;  %v18240_v47 = vcombine.low %v613_v4, %v625_v10  ;;  %v17833_v48 = vcombine.high %v205_v22, %v217_v24  ;;  %v157_v10 = vld [vmem:[#allocation5 + $0x1b0] sm:$0xff] }
 0x283   :  { %7903 = vmatpush2.bf16.msra.mxu1 %v18694_v30  ;;  %7915 = vmatprep.subr.bf16.mxu0 %v17905_v34 }
 0x284   :  { %7958 = vmatprep.subr.bf16.mxu1 %v18289_v49  ;;  %v601_v49 = vld [vmem:[#allocation5 + $0xf90] sm:$0xff] }
 0x285   :  { %v7605_v12 = vpop.f32.mrf.mxu0  ;;  %7862 = vmatmul.mubr.bf16.vlgmr.msra.gmra.mxu0 %v22068_v25  ;;  %v18216_v1 = vcombine.low %v589_v26, %v601_v49 }
 0x286   :  { %v7606_v35 = vadd.f32 %v7605_v12, %v7563_v27  ;;  %v7648_v55 = vpop.f32.mrf.mxu1  ;;  %7905 = vmatmul.mubr.bf16.vlgmr.msra.gmra.mxu1 %v22076_v39  ;;  %7916 = vmatpush1.bf16.msra.mxu0 %v17904_v2  ;;  %v565_v27 = vld [vmem:[#allocation5 + $0xe70] sm:$0xff] }
 0x287   :  { %7959 = vmatpush1.bf16.msra.mxu1 %v18288_v53  ;;  %v22230_v16 = vpop.f32.mrf.mxu0  ;;  %7917 = vmatprep.subr.bf16.mxu0 %v17881_v57  ;;  %v181_v53 = vld [vmem:[#allocation5 + $0x270] sm:$0xff] }
 0x288   :  { %v22232_v30 = vadd.f32 %v7648_v55, %v7606_v35  ;;  %v22234_v34 = vpop.f32.mrf.mxu1  ;;  %7960 = vmatprep.subr.bf16.mxu1 %v18265_v8  ;;  %7947 = vmatprep.mubr.bf16.mxu0 %v22060_v58  ;;  %v193_v57 = vld [vmem:[#allocation5 + $0x2d0] sm:$0xff]  ;;  %v18217_v35 = vcombine.high %v589_v26, %v601_v49 }
 0x289   :  { %23132 = vst [vmem:[#allocation23_spill] sm:$0xff] %v22234_v34  ;;  %v7609_v38 = vpop.f32.mrf.mxu0  ;;  %7990 = vmatprep.mubr.bf16.mxu1 %v22062_v63  ;;  %v577_v55 = vld [vmem:[#allocation5 + $0xed0] sm:$0xff]  ;;  %v17809_v4 = vcombine.high %v181_v53, %v193_v57 }
 0x28a   :  { %v8743_v41 = vmul.f32 %v22232_v30, %v22232_v30  ;;  %v7610_v43 = vadd.f32 %v7609_v38, %v7567_v29  ;;  %7918 = vmatpush1.bf16.msra.mxu0 %v17880_v13  ;;  %v7652_v2 = vpop.f32.mrf.mxu1  ;;  %v18192_v22 = vcombine.low %v565_v27, %v577_v55  ;;  %v133_v26 = vld [vmem:[#allocation5 + $0xf0] sm:$0xff] }
 0x28b   :  { %7961 = vmatpush1.bf16.msra.mxu1 %v18264_v17  ;;  %7919 = vmatprep.subr.bf16.mxu0 %v17857_v9  ;;  %v169_v17 = vld [vmem:[#allocation5 + $0x210] sm:$0xff] }
 0x28c   :  { %v8791_v8 = vmul.f32 %v8743_v41, %v22232_v30  ;;  %v22241_v12 = vadd.f32 %v7652_v2, %v7610_v43  ;;  %7962 = vmatprep.subr.bf16.mxu1 %v18241_v7  ;;  %v541_v9 = vld [vmem:[#allocation5 + $0xdb0] sm:$0xff]  ;;  %v18193_v7 = vcombine.high %v565_v27, %v577_v55  ;;  %v17785_v24 = vcombine.high %v157_v10, %v169_v17 }
 0x28d   :  { %v553_v41 = vld [vmem:[#allocation5 + $0xe10] sm:$0xff] }
 0x28e   :  { %v8839_v42 = vmul.f32 0.044715, %v8791_v8  ;;  %v8767_v13 = vmul.f32 %v22241_v12, %v22241_v12  ;;  %7920 = vmatpush1.bf16.msra.mxu0 %v17856_v52  ;;  %v17808_v8 = vcombine.low %v181_v53, %v193_v57  ;;  %v145_v49 = vld [vmem:[#allocation5 + $0x150] sm:$0xff] }
 0x28f   :  { %7963 = vmatpush1.bf16.msra.mxu1 %v18240_v47  ;;  %7921 = vmatprep.subr.bf16.mxu0 %v17833_v48  ;;  %v517_v52 = vld [vmem:[#allocation5 + $0xcf0] sm:$0xff]  ;;  %v17761_v53 = vcombine.high %v133_v26, %v145_v49 }
 0x290   :  { %v8887_v29 = vadd.f32 %v8839_v42, %v22232_v30  ;;  %v8815_v38 = vmul.f32 %v8767_v13, %v22241_v12  ;;  %7964 = vmatprep.subr.bf16.mxu1 %v18217_v35  ;;  %v18169_v42 = vcombine.high %v541_v9, %v553_v41  ;;  %v529_v48 = vld [vmem:[#allocation5 + $0xd50] sm:$0xff]  ;;  %v17784_v13 = vcombine.low %v157_v10, %v169_v17 }
 0x291   :  { %v109_v57 = vld [vmem:[#allocation5 + $0x30] sm:$0xff]  ;;  %v18145_v55 = vcombine.high %v517_v52, %v529_v48 }
 0x292   :  { %v8935_v43 = vmul.f32 0.7978846, %v8887_v29  ;;  %v8863_v2 = vmul.f32 0.044715, %v8815_v38  ;;  %7922 = vmatpush1.bf16.msra.mxu0 %v17832_v0  ;;  %v18168_v0 = vcombine.low %v541_v9, %v553_v41  ;;  %v493_v27 = vld [vmem:[#allocation5 + $0xc30] sm:$0xff]  ;;  %v17760_v29 = vcombine.low %v133_v26, %v145_v49 }
 0x293   :  { %7965 = vmatpush1.bf16.msra.mxu1 %v18216_v1  ;;  %7923 = vmatprep.subr.bf16.mxu0 %v17809_v4  ;;  %v121_v1 = vld [vmem:[#allocation5 + $0x90] sm:$0xff]  ;;  %v18144_v38 = vcombine.low %v517_v52, %v529_v48 }
 0x294   :  { %21780 = vtanh.f32 %v8935_v43  ;;  %v8911_v47 = vadd.f32 %v8863_v2, %v22241_v12  ;;  %7966 = vmatprep.subr.bf16.mxu1 %v18193_v7  ;;  %v505_v4 = vld [vmem:[#allocation5 + $0xc90] sm:$0xff]  ;;  %v17737_v7 = vcombine.high %v109_v57, %v121_v1  ;;  %v17736_v41 = vcombine.low %v109_v57, %v121_v1 }
 0x295   :  { %v469_v43 = vld [vmem:[#allocation5 + $0xb70] sm:$0xff]  ;;  %v18121_v17 = vcombine.high %v493_v27, %v505_v4 }
 0x296   :  { %v8959_v35 = vmul.f32 0.7978846, %v8911_v47  ;;  %7924 = vmatpush1.bf16.msra.mxu0 %v17808_v8  ;;  %v481_v2 = vld [vmem:[#allocation5 + $0xbd0] sm:$0xff]  ;;  %v18120_v8 = vcombine.low %v493_v27, %v505_v4 }
 0x297   :  { %7967 = vmatpush1.bf16.msra.mxu1 %v18192_v22  ;;  %7925 = vmatprep.subr.bf16.mxu0 %v17785_v24  ;;  %v853_v10 = vld [vmem:[#allocation5 + $0x1770] sm:$0xff]  ;;  %v18097_v22 = vcombine.high %v469_v43, %v481_v2  ;;  %v18096_v48 = vcombine.low %v469_v43, %v481_v2 }
 0x298   :  { %21782 = vtanh.f32 %v8959_v35  ;;  %7968 = vmatprep.subr.bf16.mxu1 %v18169_v42  ;;  %v865_v9 = vld [vmem:[#allocation5 + $0x17d0] sm:$0xff] }
 0x299   :  { %v445_v24 = vld [vmem:[#allocation5 + $0xab0] sm:$0xff]  ;;  %v18481_v26 = vcombine.high %v853_v10, %v865_v9  ;;  %v18480_v35 = vcombine.low %v853_v10, %v865_v9 }
 0x29a   :  { %7926 = vmatpush1.bf16.msra.mxu0 %v17784_v13  ;;  %v457_v47 = vld [vmem:[#allocation5 + $0xb10] sm:$0xff] }
 0x29b   :  { %7969 = vmatpush1.bf16.msra.mxu1 %v18168_v0  ;;  %7927 = vmatprep.subr.bf16.mxu0 %v17761_v53  ;;  %v829_v42 = vld [vmem:[#allocation5 + $0x16b0] sm:$0xff]  ;;  %v18073_v13 = vcombine.high %v445_v24, %v457_v47 }
 0x29c   :  { %7970 = vmatprep.subr.bf16.mxu1 %v18145_v55  ;;  %v841_v49 = vld [vmem:[#allocation5 + $0x1710] sm:$0xff] }
 0x29d   :  { %v421_v0 = vld [vmem:[#allocation5 + $0x9f0] sm:$0xff]  ;;  %v18457_v1 = vcombine.high %v829_v42, %v841_v49  ;;  %v18456_v43 = vcombine.low %v829_v42, %v841_v49 }
 0x29e   :  { %7928 = vmatpush1.bf16.msra.mxu0 %v17760_v29  ;;  %v433_v53 = vld [vmem:[#allocation5 + $0xa50] sm:$0xff]  ;;  %v8695_v29 = vmul.f32 0.5, %v22232_v30 }
 0x29f   :  { %7971 = vmatpush1.bf16.msra.mxu1 %v18144_v38  ;;  %7929 = vmatprep.subr.bf16.mxu0 %v17737_v7  ;;  %v805_v57 = vld [vmem:[#allocation5 + $0x15f0] sm:$0xff]  ;;  %v8719_v38 = vmul.f32 0.5, %v22241_v12  ;;  %v18072_v7 = vcombine.low %v445_v24, %v457_v47  ;;  %v18049_v2 = vcombine.high %v421_v0, %v433_v53  ;;  %v18048_v14 = vcombine.low %v421_v0, %v433_v53 }
 0x2a0   :  { %7972 = vmatprep.subr.bf16.mxu1 %v18121_v17  ;;  %v817_v27 = vld [vmem:[#allocation5 + $0x1650] sm:$0xff] }
 0x2a1   :  { %v21781_v52 = vpop.eup %21780  ;;  %v397_v10 = vld [vmem:[#allocation5 + $0x930] sm:$0xff]  ;;  %v18432_v12 = vcombine.low %v805_v57, %v817_v27 }
 0x2a2   :  { %7930 = vmatpush1.bf16.msra.mxu0 %v17736_v41  ;;  %v9031_v55 = vadd.f32 1.0, %v21781_v52  ;;  %v409_v9 = vld [vmem:[#allocation5 + $0x990] sm:$0xff] }
 0x2a3   :  { %7973 = vmatpush1.bf16.msra.mxu1 %v18120_v8  ;;  %7931 = vmatprep.subr.bf16.mxu0 %v18097_v22  ;;  %v781_v41 = vld [vmem:[#allocation5 + $0x1530] sm:$0xff]  ;;  %v18433_v8 = vcombine.high %v805_v57, %v817_v27  ;;  %v18025_v24 = vcombine.high %v397_v10, %v409_v9 }
 0x2a4   :  { %7974 = vmatprep.subr.bf16.mxu1 %v18481_v26  ;;  %v793_v22 = vld [vmem:[#allocation5 + $0x1590] sm:$0xff]  ;;  %v9079_v26 = vmul.f32 %v9031_v55, %v8695_v29 }
 0x2a5   :  { %v21783_v4 = vpop.eup %21782  ;;  %v373_v47 = vld [vmem:[#allocation5 + $0x870] sm:$0xff]  ;;  %v18409_v49 = vcombine.high %v781_v41, %v793_v22 }
 0x2a6   :  { %7932 = vmatpush2.bf16.msra.mxu0 %v18096_v48  ;;  %v9055_v17 = vadd.f32 1.0, %v21783_v4  ;;  %v385_v48 = vld [vmem:[#allocation5 + $0x8d0] sm:$0xff] }
 0x2a7   :  { %7975 = vmatpush2.bf16.msra.mxu1 %v18480_v35  ;;  %7933 = vmatprep.subr.bf16.mxu0 %v18073_v13  ;;  %v757_v42 = vld [vmem:[#allocation5 + $0x1470] sm:$0xff]  ;;  %v18024_v13 = vcombine.low %v397_v10, %v409_v9  ;;  %v18001_v55 = vcombine.high %v373_v47, %v385_v48  ;;  %v18000_v57 = vcombine.low %v373_v47, %v385_v48 }
 0x2a8   :  { %7976 = vmatprep.subr.bf16.mxu1 %v18457_v1  ;;  %v9103_v52 = vmul.f32 %v9055_v17, %v8719_v38  ;;  %v769_v35 = vld [vmem:[#allocation5 + $0x14d0] sm:$0xff]  ;;  %v18408_v1 = vcombine.low %v781_v41, %v793_v22 }
 0x2a9   :  { %v349_v4 = vld [vmem:[#allocation5 + $0x7b0] sm:$0xff]  ;;  %v18385_v29 = vcombine.high %v757_v42, %v769_v35  ;;  %v18384_v27 = vcombine.low %v757_v42, %v769_v35 }
 0x2aa   :  { %7934 = vmatpush2.bf16.msra.mxu0 %v18072_v7  ;;  %v22250_v30 = vpack.c.bf16 %v9103_v52, %v9079_v26  ;;  %v361_v0 = vld [vmem:[#allocation5 + $0x810] sm:$0xff] }
 0x2ab   :  { %7977 = vmatpush2.bf16.msra.mxu1 %v18456_v43  ;;  %7935 = vmatprep.subr.bf16.mxu0 %v18049_v2  ;;  %v733_v53 = vld [vmem:[#allocation5 + $0x13b0] sm:$0xff]  ;;  %v17977_v7 = vcombine.high %v349_v4, %v361_v0  ;;  %v17976_v9 = vcombine.low %v349_v4, %v361_v0  ;;  %v22252_v4 = vld [vmem:[#allocation7 + $0x8] sm:$0xff] }
 0x2ac   :  { %23133 = vst [vmem:[#allocation24_spill] sm:$0xff] %v22250_v30  ;;  %7978 = vmatprep.subr.bf16.mxu1 %v18433_v8  ;;  %v745_v38 = vld [vmem:[#allocation5 + $0x1410] sm:$0xff]  ;;  %v182_v30 = vld [vmem:[#allocation5 + $0x278] sm:$0xff] }
 0x2ad   :  { %v325_v17 = vld [vmem:[#allocation5 + $0x6f0] sm:$0xff]  ;;  %v18361_v2 = vcombine.high %v733_v53, %v745_v38  ;;  %v18360_v41 = vcombine.low %v733_v53, %v745_v38 }
 0x2ae   :  { %7936 = vmatpush2.bf16.msra.mxu0 %v18048_v14  ;;  %v337_v43 = vld [vmem:[#allocation5 + $0x750] sm:$0xff] }
 0x2af   :  { %7979 = vmatpush2.bf16.msra.mxu1 %v18432_v12  ;;  %7937 = vmatprep.subr.bf16.mxu0 %v18025_v24  ;;  %v709_v14 = vld [vmem:[#allocation5 + $0x12f0] sm:$0xff]  ;;  %v17953_v8 = vcombine.high %v325_v17, %v337_v43  ;;  %v17952_v47 = vcombine.low %v325_v17, %v337_v43  ;;  %v266_v17 = vld [vmem:[#allocation5 + $0x518] sm:$0xff]  ;;  %v1296_v43 = vrot.slane %v22252_v4, %v22089_v61 }
 0x2b0   :  { %7980 = vmatprep.subr.bf16.mxu1 %v18409_v49  ;;  %v721_v10 = vld [vmem:[#allocation5 + $0x1350] sm:$0xff] }
 0x2b1   :  { %v301_v22 = vld [vmem:[#allocation5 + $0x630] sm:$0xff]  ;;  %v18337_v12 = vcombine.high %v709_v14, %v721_v10  ;;  %v18336_v48 = vcombine.low %v709_v14, %v721_v10 }
 0x2b2   :  { %7938 = vmatpush2.bf16.msra.mxu0 %v18024_v13  ;;  %v313_v26 = vld [vmem:[#allocation5 + $0x690] sm:$0xff]  ;;  %v278_v13 = vld [vmem:[#allocation5 + $0x578] sm:$0xff] }
 0x2b3   :  { %7981 = vmatpush2.bf16.msra.mxu1 %v18408_v1  ;;  %7939 = vmatprep.subr.bf16.mxu0 %v18001_v55  ;;  %v685_v52 = vld [vmem:[#allocation5 + $0x1230] sm:$0xff]  ;;  %v17929_v42 = vcombine.high %v301_v22, %v313_v26  ;;  %v290_v55 = vld [vmem:[#allocation5 + $0x5d8] sm:$0xff]  ;;  %v17928_v0 = vcombine.low %v301_v22, %v313_v26  ;;  %v22258_v26 = vpop.f32.mrf.mxu1 }
 0x2b4   :  { %7982 = vmatprep.subr.bf16.mxu1 %v18385_v29  ;;  %v697_v24 = vld [vmem:[#allocation5 + $0x1290] sm:$0xff]  ;;  %v17906_v10 = vcombine.low %v278_v13, %v290_v55  ;;  %v230_v22 = vld [vmem:[#allocation5 + $0x3f8] sm:$0xff] }
 0x2b5   :  { %v1045_v49 = vld [vmem:[#allocation5 + $0x1d70] sm:$0xff]  ;;  %v18313_v1 = vcombine.high %v685_v52, %v697_v24  ;;  %v18312_v53 = vcombine.low %v685_v52, %v697_v24 }
 0x2b6   :  { %7940 = vmatpush2.bf16.msra.mxu0 %v18000_v57  ;;  %v1057_v35 = vld [vmem:[#allocation5 + $0x1dd0] sm:$0xff] }
 0x2b7   :  { %7983 = vmatpush2.bf16.msra.mxu1 %v18384_v27  ;;  %7941 = vmatprep.subr.bf16.mxu0 %v17977_v7  ;;  %v18673_v29 = vcombine.high %v1045_v49, %v1057_v35  ;;  %v1021_v38 = vld [vmem:[#allocation5 + $0x1cb0] sm:$0xff]  ;;  %v254_v27 = vld [vmem:[#allocation5 + $0x4b8] sm:$0xff]  ;;  %v17907_v7 = vcombine.high %v278_v13, %v290_v55  ;;  %v18672_v14 = vcombine.low %v1045_v49, %v1057_v35 }
 0x2b8   :  { %7984 = vmatprep.subr.bf16.mxu1 %v18361_v2  ;;  %v1033_v57 = vld [vmem:[#allocation5 + $0x1d10] sm:$0xff]  ;;  %v22256_v2 = vpop.f32.mrf.mxu0  ;;  %v17883_v52 = vcombine.high %v254_v27, %v266_v17  ;;  %v17882_v35 = vcombine.low %v254_v27, %v266_v17 }
 0x2b9   :  { %v985_v55 = vld [vmem:[#allocation5 + $0x1b90] sm:$0xff] }
 0x2ba   :  { %7942 = vmatpush2.bf16.msra.mxu0 %v17976_v9  ;;  %v18649_v9 = vcombine.high %v1021_v38, %v1033_v57 }
 0x2bb   :  { %7985 = vmatpush2.bf16.msra.mxu1 %v18360_v41  ;;  %7943 = vmatprep.subr.bf16.mxu0 %v17953_v8  ;;  %v997_v41 = vld [vmem:[#allocation5 + $0x1bf0] sm:$0xff] }
 0x2bc   :  { %7986 = vmatprep.subr.bf16.mxu1 %v18337_v12  ;;  %v1009_v8 = vld [vmem:[#allocation5 + $0x1c50] sm:$0xff]  ;;  %v242_v12 = vld [vmem:[#allocation5 + $0x458] sm:$0xff] }
 0x2bd   :  { %v18625_v13 = vcombine.high %v997_v41, %v1009_v8  ;;  %v17858_v17 = vcombine.low %v230_v22, %v242_v12 }
 0x2be   :  { %7944 = vmatpush2.bf16.msra.mxu0 %v17952_v47 }
 0x2bf   :  { %7987 = vmatpush2.bf16.msra.mxu1 %v18336_v48  ;;  %7945 = vmatprep.subr.bf16.mxu0 %v17929_v42  ;;  %v18648_v42 = vcombine.low %v1021_v38, %v1033_v57  ;;  %v18624_v57 = vcombine.low %v997_v41, %v1009_v8  ;;  %v925_v8 = vld [vmem:[#allocation5 + $0x19b0] sm:$0xff] }
 0x2c0   :  { %7988 = vmatprep.subr.bf16.mxu1 %v18313_v1  ;;  %v973_v1 = vld [vmem:[#allocation5 + $0x1b30] sm:$0xff] }
 0x2c2   :  { %7946 = vmatpush2.bf16.msra.mxu0 %v17928_v0  ;;  %v206_v0 = vld [vmem:[#allocation5 + $0x338] sm:$0xff] }
 0x2c3   :  { %7989 = vmatpush2.bf16.msra.mxu1 %v18312_v53  ;;  %8001 = vmatprep.subr.bf16.mxu0 %v18673_v29 }
 0x2c4   :  { %8044 = vmatprep.subr.bf16.mxu1 %v17907_v7  ;;  %v17859_v7 = vcombine.high %v230_v22, %v242_v12  ;;  %v158_v22 = vld [vmem:[#allocation5 + $0x1b8] sm:$0xff] }
 0x2c5   :  { %v7691_v24 = vpop.f32.mrf.mxu0  ;;  %7948 = vmatmul.mubr.bf16.vlgmr.msra.gmra.mxu0 %v22066_v21  ;;  %v170_v12 = vld [vmem:[#allocation5 + $0x218] sm:$0xff] }
 0x2c6   :  { %v7692_v47 = vadd.f32 %v7691_v24, %v1296_v43  ;;  %v7734_v48 = vpop.f32.mrf.mxu1  ;;  %7991 = vmatmul.mubr.bf16.vlgmr.msra.gmra.mxu1 %v22068_v25  ;;  %8002 = vmatpush1.bf16.msra.mxu0 %v18672_v14  ;;  %v218_v24 = vld [vmem:[#allocation5 + $0x398] sm:$0xff] }
 0x2c7   :  { %8045 = vmatpush1.bf16.msra.mxu1 %v17906_v10  ;;  %v22262_v49 = vpop.f32.mrf.mxu0  ;;  %8003 = vmatprep.subr.bf16.mxu0 %v18649_v9  ;;  %v18601_v10 = vcombine.high %v973_v1, %v985_v55 }
 0x2c8   :  { %23134 = vst [vmem:[#allocation25_spill] sm:$0xff] %v22262_v49  ;;  %v22264_v53 = vadd.f32 %v7734_v48, %v7692_v47  ;;  %v22266_v29 = vpop.f32.mrf.mxu1  ;;  %8046 = vmatprep.subr.bf16.mxu1 %v17883_v52  ;;  %8033 = vmatprep.mubr.bf16.mxu0 %v22070_v32  ;;  %v17835_v47 = vcombine.high %v206_v0, %v218_v24  ;;  %v949_v52 = vld [vmem:[#allocation5 + $0x1a70] sm:$0xff] }
 0x2c9   :  { %23135 = vst [vmem:[#allocation26_spill] sm:$0xff] %v22266_v29  ;;  %v7695_v14 = vpop.f32.mrf.mxu0  ;;  %8076 = vmatprep.mubr.bf16.mxu1 %v22060_v58  ;;  %v961_v48 = vld [vmem:[#allocation5 + $0x1ad0] sm:$0xff]  ;;  %v194_v29 = vld [vmem:[#allocation5 + $0x2d8] sm:$0xff]  ;;  %v18600_v49 = vcombine.low %v973_v1, %v985_v55 }
 0x2ca   :  { %v7696_v38 = vadd.f32 %v7695_v14, %v1296_v43  ;;  %8004 = vmatpush1.bf16.msra.mxu0 %v18648_v42  ;;  %v7738_v27 = vpop.f32.mrf.mxu1  ;;  %v17834_v43 = vcombine.low %v206_v0, %v218_v24  ;;  %v18577_v42 = vcombine.high %v949_v52, %v961_v48  ;;  %v17811_v41 = vcombine.high %v182_v30, %v194_v29  ;;  %v913_v1 = vld [vmem:[#allocation5 + $0x1950] sm:$0xff]  ;;  %v134_v55 = vld [vmem:[#allocation5 + $0xf8] sm:$0xff] }
 0x2cb   :  { %8047 = vmatpush1.bf16.msra.mxu1 %v17882_v35  ;;  %8005 = vmatprep.subr.bf16.mxu0 %v18625_v13  ;;  %v937_v35 = vld [vmem:[#allocation5 + $0x1a10] sm:$0xff]  ;;  %v18576_v13 = vcombine.low %v949_v52, %v961_v48  ;;  %v17786_v24 = vcombine.low %v158_v22, %v170_v12  ;;  %v110_v52 = vld [vmem:[#allocation5 + $0x38] sm:$0xff] }
 0x2cc   :  { %v22270_v9 = vadd.f32 %v7738_v27, %v7696_v38  ;;  %8048 = vmatprep.subr.bf16.mxu1 %v17859_v7  ;;  %v17810_v7 = vcombine.low %v182_v30, %v194_v29  ;;  %v18553_v14 = vcombine.high %v925_v8, %v937_v35  ;;  %v17787_v38 = vcombine.high %v158_v22, %v170_v12  ;;  %v146_v27 = vld [vmem:[#allocation5 + $0x158] sm:$0xff] }
 0x2cd   :  { %v18552_v0 = vcombine.low %v925_v8, %v937_v35  ;;  %v122_v48 = vld [vmem:[#allocation5 + $0x98] sm:$0xff]  ;;  %v17762_v29 = vcombine.low %v134_v55, %v146_v27  ;;  %v1249_v8 = vld [vmem:[#allocation5 + $0x23d0] sm:$0xff] }
 0x2ce   :  { %8006 = vmatpush1.bf16.msra.mxu0 %v18624_v57  ;;  %v901_v57 = vld [vmem:[#allocation5 + $0x18f0] sm:$0xff]  ;;  %v470_v35 = vld [vmem:[#allocation5 + $0xb78] sm:$0xff]  ;;  %v17738_v12 = vcombine.low %v110_v52, %v122_v48 }
 0x2cf   :  { %8049 = vmatpush1.bf16.msra.mxu1 %v17858_v17  ;;  %8007 = vmatprep.subr.bf16.mxu0 %v18601_v10  ;;  %v18529_v17 = vcombine.high %v901_v57, %v913_v1  ;;  %v17763_v10 = vcombine.high %v134_v55, %v146_v27  ;;  %v18528_v30 = vcombine.low %v901_v57, %v913_v1  ;;  %v1225_v57 = vld [vmem:[#allocation5 + $0x2310] sm:$0xff]  ;;  %v446_v1 = vld [vmem:[#allocation5 + $0xab8] sm:$0xff] }
 0x2d0   :  { %8050 = vmatprep.subr.bf16.mxu1 %v17835_v47  ;;  %v889_v47 = vld [vmem:[#allocation5 + $0x1890] sm:$0xff] }
 0x2d2   :  { %8008 = vmatpush1.bf16.msra.mxu0 %v18600_v49  ;;  %v877_v49 = vld [vmem:[#allocation5 + $0x1830] sm:$0xff] }
 0x2d3   :  { %8051 = vmatpush1.bf16.msra.mxu1 %v17834_v43  ;;  %8009 = vmatprep.subr.bf16.mxu0 %v18577_v42  ;;  %v18505_v43 = vcombine.high %v877_v49, %v889_v47  ;;  %v17739_v42 = vcombine.high %v110_v52, %v122_v48  ;;  %v18504_v22 = vcombine.low %v877_v49, %v889_v47  ;;  %v1201_v49 = vld [vmem:[#allocation5 + $0x2250] sm:$0xff]  ;;  %v422_v47 = vld [vmem:[#allocation5 + $0x9f8] sm:$0xff] }
 0x2d4   :  { %8052 = vmatprep.subr.bf16.mxu1 %v17811_v41  ;;  %v1237_v41 = vld [vmem:[#allocation5 + $0x2370] sm:$0xff] }
 0x2d5   :  { %v18864_v55 = vcombine.low %v1237_v41, %v1249_v8 }
 0x2d6   :  { %8010 = vmatpush1.bf16.msra.mxu0 %v18576_v13  ;;  %v482_v13 = vld [vmem:[#allocation5 + $0xbd8] sm:$0xff] }
 0x2d7   :  { %8053 = vmatpush1.bf16.msra.mxu1 %v17810_v7  ;;  %8011 = vmatprep.subr.bf16.mxu0 %v18553_v14  ;;  %v18865_v7 = vcombine.high %v1237_v41, %v1249_v8  ;;  %v18099_v14 = vcombine.high %v470_v35, %v482_v13  ;;  %v18098_v27 = vcombine.low %v470_v35, %v482_v13  ;;  %v1177_v41 = vld [vmem:[#allocation5 + $0x2190] sm:$0xff]  ;;  %v398_v8 = vld [vmem:[#allocation5 + $0x938] sm:$0xff] }
 0x2d8   :  { %8054 = vmatprep.subr.bf16.mxu1 %v17787_v38  ;;  %v1213_v38 = vld [vmem:[#allocation5 + $0x22b0] sm:$0xff] }
 0x2d9   :  { %v18840_v52 = vcombine.low %v1213_v38, %v1225_v57 }
 0x2da   :  { %8012 = vmatpush1.bf16.msra.mxu0 %v18552_v0  ;;  %v458_v0 = vld [vmem:[#allocation5 + $0xb18] sm:$0xff] }
 0x2db   :  { %8055 = vmatpush1.bf16.msra.mxu1 %v17786_v24  ;;  %8013 = vmatprep.subr.bf16.mxu0 %v18529_v17  ;;  %v18841_v24 = vcombine.high %v1213_v38, %v1225_v57  ;;  %v18075_v17 = vcombine.high %v446_v1, %v458_v0  ;;  %v18074_v48 = vcombine.low %v446_v1, %v458_v0  ;;  %v1153_v38 = vld [vmem:[#allocation5 + $0x20d0] sm:$0xff]  ;;  %v374_v57 = vld [vmem:[#allocation5 + $0x878] sm:$0xff] }
 0x2dc   :  { %8056 = vmatprep.subr.bf16.mxu1 %v17763_v10  ;;  %v1189_v10 = vld [vmem:[#allocation5 + $0x21f0] sm:$0xff] }
 0x2dd   :  { %v18816_v35 = vcombine.low %v1189_v10, %v1201_v49 }
 0x2de   :  { %8014 = vmatpush1.bf16.msra.mxu0 %v18528_v30  ;;  %v434_v30 = vld [vmem:[#allocation5 + $0xa58] sm:$0xff] }
 0x2df   :  { %8057 = vmatpush1.bf16.msra.mxu1 %v17762_v29  ;;  %8015 = vmatprep.subr.bf16.mxu0 %v18505_v43  ;;  %v18817_v29 = vcombine.high %v1189_v10, %v1201_v49  ;;  %v18051_v43 = vcombine.high %v422_v47, %v434_v30  ;;  %v18050_v13 = vcombine.low %v422_v47, %v434_v30  ;;  %v1129_v10 = vld [vmem:[#allocation5 + $0x2010] sm:$0xff]  ;;  %v350_v49 = vld [vmem:[#allocation5 + $0x7b8] sm:$0xff] }
 0x2e0   :  { %8058 = vmatprep.subr.bf16.mxu1 %v17739_v42  ;;  %v1165_v42 = vld [vmem:[#allocation5 + $0x2130] sm:$0xff] }
 0x2e1   :  { %v18792_v1 = vcombine.low %v1165_v42, %v1177_v41 }
 0x2e2   :  { %8016 = vmatpush1.bf16.msra.mxu0 %v18504_v22  ;;  %v410_v22 = vld [vmem:[#allocation5 + $0x998] sm:$0xff] }
 0x2e3   :  { %8059 = vmatpush1.bf16.msra.mxu1 %v17738_v12  ;;  %8017 = vmatprep.subr.bf16.mxu0 %v18865_v7  ;;  %v18793_v12 = vcombine.high %v1165_v42, %v1177_v41  ;;  %v18027_v7 = vcombine.high %v398_v8, %v410_v22  ;;  %v18026_v0 = vcombine.low %v398_v8, %v410_v22  ;;  %v1105_v42 = vld [vmem:[#allocation5 + $0x1f50] sm:$0xff]  ;;  %v326_v41 = vld [vmem:[#allocation5 + $0x6f8] sm:$0xff] }
 0x2e4   :  { %8060 = vmatprep.subr.bf16.mxu1 %v18099_v14  ;;  %v1141_v14 = vld [vmem:[#allocation5 + $0x2070] sm:$0xff] }
 0x2e5   :  { %v18768_v47 = vcombine.low %v1141_v14, %v1153_v38 }
 0x2e6   :  { %8018 = vmatpush2.bf16.msra.mxu0 %v18864_v55  ;;  %v386_v55 = vld [vmem:[#allocation5 + $0x8d8] sm:$0xff] }
 0x2e7   :  { %8061 = vmatpush2.bf16.msra.mxu1 %v18098_v27  ;;  %8019 = vmatprep.subr.bf16.mxu0 %v18841_v24  ;;  %v18769_v27 = vcombine.high %v1141_v14, %v1153_v38  ;;  %v18003_v24 = vcombine.high %v374_v57, %v386_v55  ;;  %v18002_v30 = vcombine.low %v374_v57, %v386_v55  ;;  %v1081_v14 = vld [vmem:[#allocation5 + $0x1e90] sm:$0xff]  ;;  %v302_v38 = vld [vmem:[#allocation5 + $0x638] sm:$0xff] }
 0x2e8   :  { %8062 = vmatprep.subr.bf16.mxu1 %v18075_v17  ;;  %v1117_v17 = vld [vmem:[#allocation5 + $0x1fb0] sm:$0xff] }
 0x2e9   :  { %v18744_v8 = vcombine.low %v1117_v17, %v1129_v10 }
 0x2ea   :  { %8020 = vmatpush2.bf16.msra.mxu0 %v18840_v52  ;;  %v362_v52 = vld [vmem:[#allocation5 + $0x818] sm:$0xff] }
 0x2eb   :  { %8063 = vmatpush2.bf16.msra.mxu1 %v18074_v48  ;;  %8021 = vmatprep.subr.bf16.mxu0 %v18817_v29  ;;  %v18745_v48 = vcombine.high %v1117_v17, %v1129_v10  ;;  %v17979_v29 = vcombine.high %v350_v49, %v362_v52  ;;  %v17978_v22 = vcombine.low %v350_v49, %v362_v52  ;;  %v674_v17 = vld [vmem:[#allocation5 + $0x11d8] sm:$0xff] }
 0x2ec   :  { %8064 = vmatprep.subr.bf16.mxu1 %v18051_v43  ;;  %v1093_v43 = vld [vmem:[#allocation5 + $0x1ef0] sm:$0xff]  ;;  %v1046_v10 = vld [vmem:[#allocation5 + $0x1d78] sm:$0xff] }
 0x2ed   :  { %v18720_v57 = vcombine.low %v1093_v43, %v1105_v42 }
 0x2ee   :  { %8022 = vmatpush2.bf16.msra.mxu0 %v18816_v35  ;;  %v338_v35 = vld [vmem:[#allocation5 + $0x758] sm:$0xff] }
 0x2ef   :  { %8065 = vmatpush2.bf16.msra.mxu1 %v18050_v13  ;;  %8023 = vmatprep.subr.bf16.mxu0 %v18793_v12  ;;  %v18721_v13 = vcombine.high %v1093_v43, %v1105_v42  ;;  %v17955_v12 = vcombine.high %v326_v41, %v338_v35  ;;  %v17954_v55 = vcombine.low %v326_v41, %v338_v35  ;;  %v650_v43 = vld [vmem:[#allocation5 + $0x1118] sm:$0xff]  ;;  %v22272_v35 = vpop.f32.mrf.mxu0 }
 0x2f0   :  { %8066 = vmatprep.subr.bf16.mxu1 %v18027_v7  ;;  %v1069_v7 = vld [vmem:[#allocation5 + $0x1e30] sm:$0xff]  ;;  %v1022_v42 = vld [vmem:[#allocation5 + $0x1cb8] sm:$0xff]  ;;  %23136 = vst [vmem:[#allocation27_spill] sm:$0xff] %v22272_v35 }
 0x2f1   :  { %v18696_v49 = vcombine.low %v1069_v7, %v1081_v14  ;;  %v950_v35 = vld [vmem:[#allocation5 + $0x1a78] sm:$0xff] }
 0x2f2   :  { %8024 = vmatpush2.bf16.msra.mxu0 %v18792_v1  ;;  %v314_v1 = vld [vmem:[#allocation5 + $0x698] sm:$0xff] }
 0x2f3   :  { %8067 = vmatpush2.bf16.msra.mxu1 %v18026_v0  ;;  %8025 = vmatprep.subr.bf16.mxu0 %v18769_v27  ;;  %v18697_v0 = vcombine.high %v1069_v7, %v1081_v14  ;;  %v17931_v27 = vcombine.high %v302_v38, %v314_v1  ;;  %v17930_v52 = vcombine.low %v302_v38, %v314_v1  ;;  %v614_v7 = vld [vmem:[#allocation5 + $0xff8] sm:$0xff] }
 0x2f4   :  { %8068 = vmatprep.subr.bf16.mxu1 %v18003_v24  ;;  %v662_v24 = vld [vmem:[#allocation5 + $0x1178] sm:$0xff] }
 0x2f5   :  { %v18290_v41 = vcombine.low %v662_v24, %v674_v17  ;;  %v626_v14 = vld [vmem:[#allocation5 + $0x1058] sm:$0xff] }
 0x2f6   :  { %8026 = vmatpush2.bf16.msra.mxu0 %v18768_v47  ;;  %v1058_v47 = vld [vmem:[#allocation5 + $0x1dd8] sm:$0xff] }
 0x2f7   :  { %8069 = vmatpush2.bf16.msra.mxu1 %v18002_v30  ;;  %8027 = vmatprep.subr.bf16.mxu0 %v18745_v48  ;;  %v18291_v30 = vcombine.high %v662_v24, %v674_v17  ;;  %v18675_v48 = vcombine.high %v1046_v10, %v1058_v47  ;;  %v998_v1 = vld [vmem:[#allocation5 + $0x1bf8] sm:$0xff]  ;;  %v18243_v17 = vcombine.high %v614_v7, %v626_v14 }
 0x2f8   :  { %8070 = vmatprep.subr.bf16.mxu1 %v17979_v29  ;;  %v638_v29 = vld [vmem:[#allocation5 + $0x10b8] sm:$0xff] }
 0x2fa   :  { %8028 = vmatpush2.bf16.msra.mxu0 %v18744_v8  ;;  %v1034_v8 = vld [vmem:[#allocation5 + $0x1d18] sm:$0xff] }
 0x2fb   :  { %8071 = vmatpush2.bf16.msra.mxu1 %v17978_v22  ;;  %8029 = vmatprep.subr.bf16.mxu0 %v18721_v13  ;;  %v18674_v22 = vcombine.low %v1046_v10, %v1058_v47  ;;  %v18267_v13 = vcombine.high %v638_v29, %v650_v43  ;;  %v18650_v24 = vcombine.low %v1022_v42, %v1034_v8 }
 0x2fc   :  { %8072 = vmatprep.subr.bf16.mxu1 %v17955_v12  ;;  %v18651_v12 = vcombine.high %v1022_v42, %v1034_v8  ;;  %v18242_v42 = vcombine.low %v614_v7, %v626_v14 }
 0x2fe   :  { %8030 = vmatpush2.bf16.msra.mxu0 %v18720_v57  ;;  %v1010_v57 = vld [vmem:[#allocation5 + $0x1c58] sm:$0xff] }
 0x2ff   :  { %8073 = vmatpush2.bf16.msra.mxu1 %v17954_v55  ;;  %8031 = vmatprep.subr.bf16.mxu0 %v18697_v0  ;;  %v18266_v0 = vcombine.low %v638_v29, %v650_v43  ;;  %v18627_v47 = vcombine.high %v998_v1, %v1010_v57  ;;  %v18626_v8 = vcombine.low %v998_v1, %v1010_v57 }
 0x300   :  { %8074 = vmatprep.subr.bf16.mxu1 %v17931_v27 }
 0x302   :  { %8032 = vmatpush2.bf16.msra.mxu0 %v18696_v49  ;;  %v590_v49 = vld [vmem:[#allocation5 + $0xf38] sm:$0xff] }
 0x303   :  { %8075 = vmatpush2.bf16.msra.mxu1 %v17930_v52  ;;  %8087 = vmatprep.subr.bf16.mxu0 %v18291_v30  ;;  %v602_v52 = vld [vmem:[#allocation5 + $0xf98] sm:$0xff] }
 0x304   :  { %8130 = vmatprep.subr.bf16.mxu1 %v18675_v48  ;;  %v974_v30 = vld [vmem:[#allocation5 + $0x1b38] sm:$0xff]  ;;  %v18218_v7 = vcombine.low %v590_v49, %v602_v52 }
 0x305   :  { %v7777_v38 = vpop.f32.mrf.mxu0  ;;  %8034 = vmatmul.mubr.bf16.vlgmr.msra.gmra.mxu0 %v22076_v39  ;;  %v986_v48 = vld [vmem:[#allocation5 + $0x1b98] sm:$0xff] }
 0x306   :  { %v22276_v55 = vadd.f32 %v7777_v38, %v22264_v53  ;;  %8077 = vmatmul.mubr.bf16.vlgmr.msra.gmra.mxu1 %v22066_v21  ;;  %8088 = vmatpush1.bf16.msra.mxu0 %v18290_v41  ;;  %v18219_v41 = vcombine.high %v590_v49, %v602_v52  ;;  %v566_v38 = vld [vmem:[#allocation5 + $0xe78] sm:$0xff]  ;;  %v18602_v14 = vcombine.low %v974_v30, %v986_v48 }
 0x307   :  { %8131 = vmatpush1.bf16.msra.mxu1 %v18674_v22  ;;  %v22279_v27 = vpop.f32.mrf.mxu0  ;;  %8089 = vmatprep.subr.bf16.mxu0 %v18267_v13  ;;  %v18578_v49 = vcombine.low %v950_v35, %v962_v44 }
 0x308   :  { %23137 = vst [vmem:[#allocation28_spill] sm:$0xff] %v22279_v27  ;;  %v8745_v10 = vmul.f32 %v22276_v55, %v22276_v55  ;;  %8132 = vmatprep.subr.bf16.mxu1 %v18651_v12  ;;  %8119 = vmatprep.mubr.bf16.mxu0 %v22062_v63  ;;  %v18603_v12 = vcombine.high %v974_v30, %v986_v48  ;;  %v578_v27 = vld [vmem:[#allocation5 + $0xed8] sm:$0xff] }
 0x309   :  { %v7781_v53 = vpop.f32.mrf.mxu0  ;;  %8162 = vmatprep.mubr.bf16.mxu1 %v22070_v32  ;;  %v18195_v1 = vcombine.high %v566_v38, %v578_v27  ;;  %v518_v48 = vld [vmem:[#allocation5 + $0xcf8] sm:$0xff] }
 0x30a   :  { %v8793_v29 = vmul.f32 %v8745_v10, %v22276_v55  ;;  %v22287_v43 = vadd.f32 %v7781_v53, %v22270_v9  ;;  %8090 = vmatpush1.bf16.msra.mxu0 %v18266_v0  ;;  %v926_v53 = vld [vmem:[#allocation5 + $0x19b8] sm:$0xff] }
 0x30b   :  { %8133 = vmatpush1.bf16.msra.mxu1 %v18650_v24  ;;  %8091 = vmatprep.subr.bf16.mxu0 %v18243_v17  ;;  %v18579_v24 = vcombine.high %v950_v35, %v962_v44  ;;  %v542_v17 = vld [vmem:[#allocation5 + $0xdb8] sm:$0xff] }
 0x30c   :  { %v8841_v22 = vmul.f32 0.044715, %v8793_v29  ;;  %v8769_v13 = vmul.f32 %v22287_v43, %v22287_v43  ;;  %8134 = vmatprep.subr.bf16.mxu1 %v18627_v47  ;;  %v554_v47 = vld [vmem:[#allocation5 + $0xe18] sm:$0xff] }
 0x30d   :  { %v938_v29 = vld [vmem:[#allocation5 + $0x1a18] sm:$0xff]  ;;  %v18171_v52 = vcombine.high %v542_v17, %v554_v47 }
 0x30e   :  { %v8889_v10 = vadd.f32 %v8841_v22, %v22276_v55  ;;  %v8817_v9 = vmul.f32 %v8769_v13, %v22287_v43  ;;  %8092 = vmatpush1.bf16.msra.mxu0 %v18242_v42  ;;  %v18194_v22 = vcombine.low %v566_v38, %v578_v27  ;;  %v18555_v30 = vcombine.high %v926_v53, %v938_v29  ;;  %v914_v13 = vld [vmem:[#allocation5 + $0x1958] sm:$0xff] }
 0x30f   :  { %8135 = vmatpush1.bf16.msra.mxu1 %v18626_v8  ;;  %8093 = vmatprep.subr.bf16.mxu0 %v18219_v41  ;;  %v530_v8 = vld [vmem:[#allocation5 + $0xd58] sm:$0xff] }
 0x310   :  { %v8937_v57 = vmul.f32 0.7978846, %v8889_v10  ;;  %v8865_v0 = vmul.f32 0.044715, %v8817_v9  ;;  %8136 = vmatprep.subr.bf16.mxu1 %v18603_v12  ;;  %v902_v41 = vld [vmem:[#allocation5 + $0x18f8] sm:$0xff]  ;;  %v18170_v12 = vcombine.low %v542_v17, %v554_v47  ;;  %v18554_v10 = vcombine.low %v926_v53, %v938_v29 }
 0x311   :  { %v18147_v9 = vcombine.high %v518_v48, %v530_v8  ;;  %v18531_v27 = vcombine.high %v902_v41, %v914_v13  ;;  %v494_v38 = vld [vmem:[#allocation5 + $0xc38] sm:$0xff] }
 0x312   :  { %21784 = vtanh.f32 %v8937_v57  ;;  %v8913_v34 = vadd.f32 %v8865_v0, %v22287_v43  ;;  %8094 = vmatpush1.bf16.msra.mxu0 %v18218_v7  ;;  %v506_v7 = vld [vmem:[#allocation5 + $0xc98] sm:$0xff] }
 0x313   :  { %8137 = vmatpush1.bf16.msra.mxu1 %v18602_v14  ;;  %8095 = vmatprep.subr.bf16.mxu0 %v18195_v1  ;;  %v878_v44 = vld [vmem:[#allocation5 + $0x1838] sm:$0xff]  ;;  %v18530_v14 = vcombine.low %v902_v41, %v914_v13  ;;  %v18123_v1 = vcombine.high %v494_v38, %v506_v7  ;;  %v18122_v53 = vcombine.low %v494_v38, %v506_v7  ;;  %v8721_v38 = vmul.f32 0.5, %v22287_v43 }
 0x314   :  { %v8961_v42 = vmul.f32 0.7978846, %v8913_v34  ;;  %8138 = vmatprep.subr.bf16.mxu1 %v18579_v24  ;;  %v890_v35 = vld [vmem:[#allocation5 + $0x1898] sm:$0xff]  ;;  %v18146_v34 = vcombine.low %v518_v48, %v530_v8 }
 0x315   :  { %v18507_v57 = vcombine.high %v878_v44, %v890_v35  ;;  %v854_v0 = vld [vmem:[#allocation5 + $0x1778] sm:$0xff] }
 0x316   :  { %21786 = vtanh.f32 %v8961_v42  ;;  %8096 = vmatpush1.bf16.msra.mxu0 %v18194_v22  ;;  %v866_v24 = vld [vmem:[#allocation5 + $0x17d8] sm:$0xff]  ;;  %v18506_v22 = vcombine.low %v878_v44, %v890_v35 }
 0x317   :  { %8139 = vmatpush1.bf16.msra.mxu1 %v18578_v49  ;;  %8097 = vmatprep.subr.bf16.mxu0 %v18171_v52  ;;  %v1238_v17 = vld [vmem:[#allocation5 + $0x2378] sm:$0xff]  ;;  %v18483_v49 = vcombine.high %v854_v0, %v866_v24  ;;  %v18482_v41 = vcombine.low %v854_v0, %v866_v24 }
 0x318   :  { %8140 = vmatprep.subr.bf16.mxu1 %v18555_v30  ;;  %v1250_v47 = vld [vmem:[#allocation5 + $0x23d8] sm:$0xff] }
 0x319   :  { %v18867_v52 = vcombine.high %v1238_v17, %v1250_v47  ;;  %v830_v42 = vld [vmem:[#allocation5 + $0x16b8] sm:$0xff] }
 0x31a   :  { %8098 = vmatpush1.bf16.msra.mxu0 %v18170_v12  ;;  %v842_v30 = vld [vmem:[#allocation5 + $0x1718] sm:$0xff] }
 0x31b   :  { %8141 = vmatpush1.bf16.msra.mxu1 %v18554_v10  ;;  %8099 = vmatprep.subr.bf16.mxu0 %v18147_v9  ;;  %v1214_v48 = vld [vmem:[#allocation5 + $0x22b8] sm:$0xff]  ;;  %v18866_v10 = vcombine.low %v1238_v17, %v1250_v47  ;;  %v18459_v9 = vcombine.high %v830_v42, %v842_v30 }
 0x31c   :  { %8142 = vmatprep.subr.bf16.mxu1 %v18531_v27  ;;  %v1226_v8 = vld [vmem:[#allocation5 + $0x2318] sm:$0xff]  ;;  %v8697_v27 = vmul.f32 0.5, %v22276_v55 }
 0x31d   :  { %v18843_v7 = vcombine.high %v1214_v48, %v1226_v8  ;;  %v806_v44 = vld [vmem:[#allocation5 + $0x15f8] sm:$0xff] }
 0x31e   :  { %8100 = vmatpush1.bf16.msra.mxu0 %v18146_v34  ;;  %v818_v35 = vld [vmem:[#allocation5 + $0x1658] sm:$0xff] }
 0x31f   :  { %v21785_v29 = vpop.eup %21784  ;;  %8143 = vmatpush1.bf16.msra.mxu1 %v18530_v14  ;;  %8101 = vmatprep.subr.bf16.mxu0 %v18123_v1  ;;  %v1190_v14 = vld [vmem:[#allocation5 + $0x21f8] sm:$0xff]  ;;  %v18435_v17 = vcombine.high %v806_v44, %v818_v35 }
 0x320   :  { %8144 = vmatprep.subr.bf16.mxu1 %v18507_v57  ;;  %v9033_v13 = vadd.f32 1.0, %v21785_v29  ;;  %v1202_v1 = vld [vmem:[#allocation5 + $0x2258] sm:$0xff]  ;;  %v18458_v57 = vcombine.low %v830_v42, %v842_v30 }
 0x321   :  { %v18819_v47 = vcombine.high %v1190_v14, %v1202_v1  ;;  %v782_v55 = vld [vmem:[#allocation5 + $0x1538] sm:$0xff] }
 0x322   :  { %8102 = vmatpush1.bf16.msra.mxu0 %v18122_v53  ;;  %v9081_v0 = vmul.f32 %v9033_v13, %v8697_v27  ;;  %v18842_v53 = vcombine.low %v1214_v48, %v1226_v8  ;;  %v794_v29 = vld [vmem:[#allocation5 + $0x1598] sm:$0xff] }
 0x323   :  { %v21787_v12 = vpop.eup %21786  ;;  %8145 = vmatpush1.bf16.msra.mxu1 %v18506_v22  ;;  %8103 = vmatprep.subr.bf16.mxu0 %v18483_v49  ;;  %v1166_v22 = vld [vmem:[#allocation5 + $0x2138] sm:$0xff]  ;;  %v18411_v42 = vcombine.high %v782_v55, %v794_v29 }
 0x324   :  { %8146 = vmatprep.subr.bf16.mxu1 %v18867_v52  ;;  %v9057_v34 = vadd.f32 1.0, %v21787_v12  ;;  %v1178_v49 = vld [vmem:[#allocation5 + $0x2198] sm:$0xff]  ;;  %v18434_v52 = vcombine.low %v806_v44, %v818_v35 }
 0x325   :  { %v18795_v30 = vcombine.high %v1166_v22, %v1178_v49  ;;  %v758_v13 = vld [vmem:[#allocation5 + $0x1478] sm:$0xff] }
 0x326   :  { %8104 = vmatpush2.bf16.msra.mxu0 %v18482_v41  ;;  %v9105_v24 = vmul.f32 %v9057_v34, %v8721_v38  ;;  %v18818_v41 = vcombine.low %v1190_v14, %v1202_v1  ;;  %v770_v12 = vld [vmem:[#allocation5 + $0x14d8] sm:$0xff] }
 0x327   :  { %8147 = vmatpush2.bf16.msra.mxu1 %v18866_v10  ;;  %8105 = vmatprep.subr.bf16.mxu0 %v18459_v9  ;;  %v1142_v48 = vld [vmem:[#allocation5 + $0x2078] sm:$0xff]  ;;  %v18410_v10 = vcombine.low %v782_v55, %v794_v29  ;;  %v18794_v9 = vcombine.low %v1166_v22, %v1178_v49  ;;  %v18387_v27 = vcombine.high %v758_v13, %v770_v12  ;;  %v22298_v55 = vpop.f32.mrf.mxu1 }
 0x328   :  { %8148 = vmatprep.subr.bf16.mxu1 %v18843_v7  ;;  %v22296_v43 = vpack.c.bf16 %v9105_v24, %v9081_v0  ;;  %v1154_v8 = vld [vmem:[#allocation5 + $0x20d8] sm:$0xff]  ;;  %v18386_v14 = vcombine.low %v758_v13, %v770_v12  ;;  %23139 = vst [vmem:[#allocation30_spill] sm:$0xff] %v22298_v55  ;;  %v579_v55 = vld [vmem:[#allocation5 + $0xee0] sm:$0xff] }
 0x329   :  { %v18771_v38 = vcombine.high %v1142_v48, %v1154_v8  ;;  %v734_v7 = vld [vmem:[#allocation5 + $0x13b8] sm:$0xff]  ;;  %v18770_v1 = vcombine.low %v1142_v48, %v1154_v8 }
 0x32a   :  { %23138 = vst [vmem:[#allocation29_spill] sm:$0xff] %v22296_v43  ;;  %8106 = vmatpush2.bf16.msra.mxu0 %v18458_v57  ;;  %v746_v44 = vld [vmem:[#allocation5 + $0x1418] sm:$0xff] }
 0x32b   :  { %8149 = vmatpush2.bf16.msra.mxu1 %v18842_v53  ;;  %8107 = vmatprep.subr.bf16.mxu0 %v18435_v17  ;;  %v1118_v35 = vld [vmem:[#allocation5 + $0x1fb8] sm:$0xff]  ;;  %v18363_v57 = vcombine.high %v734_v7, %v746_v44  ;;  %v18362_v29 = vcombine.low %v734_v7, %v746_v44  ;;  %v291_v7 = vld [vmem:[#allocation5 + $0x5e0] sm:$0xff] }
 0x32c   :  { %8150 = vmatprep.subr.bf16.mxu1 %v18819_v47  ;;  %v1130_v34 = vld [vmem:[#allocation5 + $0x2018] sm:$0xff]  ;;  %v663_v44 = vld [vmem:[#allocation5 + $0x1180] sm:$0xff] }
 0x32d   :  { %v18747_v0 = vcombine.high %v1118_v35, %v1130_v34  ;;  %v710_v24 = vld [vmem:[#allocation5 + $0x12f8] sm:$0xff]  ;;  %v18746_v22 = vcombine.low %v1118_v35, %v1130_v34  ;;  %v675_v35 = vld [vmem:[#allocation5 + $0x11e0] sm:$0xff] }
 0x32e   :  { %8108 = vmatpush2.bf16.msra.mxu0 %v18434_v52  ;;  %v722_v53 = vld [vmem:[#allocation5 + $0x1358] sm:$0xff]  ;;  %v7820_v52 = vpop.f32.mrf.mxu1 }
 0x32f   :  { %8151 = vmatpush2.bf16.msra.mxu1 %v18818_v41  ;;  %8109 = vmatprep.subr.bf16.mxu0 %v18411_v42  ;;  %v1094_v17 = vld [vmem:[#allocation5 + $0x1ef8] sm:$0xff]  ;;  %v18339_v49 = vcombine.high %v710_v24, %v722_v53  ;;  %v18338_v48 = vcombine.low %v710_v24, %v722_v53  ;;  %v18293_v24 = vcombine.high %v663_v44, %v675_v35  ;;  %v255_v53 = vld [vmem:[#allocation5 + $0x4c0] sm:$0xff] }
 0x330   :  { %8152 = vmatprep.subr.bf16.mxu1 %v18795_v30  ;;  %v1106_v47 = vld [vmem:[#allocation5 + $0x1f58] sm:$0xff] }
 0x331   :  { %v18723_v41 = vcombine.high %v1094_v17, %v1106_v47  ;;  %v686_v42 = vld [vmem:[#allocation5 + $0x1238] sm:$0xff]  ;;  %v18722_v8 = vcombine.low %v1094_v17, %v1106_v47  ;;  %v267_v17 = vld [vmem:[#allocation5 + $0x520] sm:$0xff] }
 0x332   :  { %8110 = vmatpush2.bf16.msra.mxu0 %v18410_v10  ;;  %v698_v30 = vld [vmem:[#allocation5 + $0x1298] sm:$0xff]  ;;  %v639_v47 = vld [vmem:[#allocation5 + $0x10c0] sm:$0xff] }
 0x333   :  { %8153 = vmatpush2.bf16.msra.mxu1 %v18794_v9  ;;  %8111 = vmatprep.subr.bf16.mxu0 %v18387_v27  ;;  %v1070_v13 = vld [vmem:[#allocation5 + $0x1e38] sm:$0xff]  ;;  %v18315_v10 = vcombine.high %v686_v42, %v698_v30  ;;  %v22300_v9 = vpop.f32.mrf.mxu1  ;;  %v18314_v34 = vcombine.low %v686_v42, %v698_v30  ;;  %v17885_v42 = vcombine.high %v255_v53, %v267_v17 }
 0x334   :  { %8154 = vmatprep.subr.bf16.mxu1 %v18771_v38  ;;  %v1082_v12 = vld [vmem:[#allocation5 + $0x1e98] sm:$0xff]  ;;  %23140 = vst [vmem:[#allocation31_spill] sm:$0xff] %v22300_v9  ;;  %v279_v38 = vld [vmem:[#allocation5 + $0x580] sm:$0xff] }
 0x335   :  { %v18699_v27 = vcombine.high %v1070_v13, %v1082_v12 }
 0x336   :  { %8112 = vmatpush2.bf16.msra.mxu0 %v18386_v14  ;;  %v18698_v14 = vcombine.low %v1070_v13, %v1082_v12  ;;  %v231_v12 = vld [vmem:[#allocation5 + $0x400] sm:$0xff] }
 0x337   :  { %8155 = vmatpush2.bf16.msra.mxu1 %v18770_v1  ;;  %8113 = vmatprep.subr.bf16.mxu0 %v18363_v57  ;;  %v17909_v1 = vcombine.high %v279_v38, %v291_v7  ;;  %v1304_v57 = vrot.slane %v22252_v4, %v22133_v31 }
 0x338   :  { %8156 = vmatprep.subr.bf16.mxu1 %v18747_v0  ;;  %v7824_v0 = vpop.f32.mrf.mxu1 }
 0x339   :  { %v7821_v30 = vadd.f32 %v7820_v52, %v1304_v57 }
 0x33a   :  { %8114 = vmatpush2.bf16.msra.mxu0 %v18362_v29  ;;  %v651_v29 = vld [vmem:[#allocation5 + $0x1120] sm:$0xff]  ;;  %v22306_v13 = vpop.f32.mrf.mxu1 }
 0x33b   :  { %8157 = vmatpush2.bf16.msra.mxu1 %v18746_v22  ;;  %8115 = vmatprep.subr.bf16.mxu0 %v18339_v49  ;;  %v17908_v22 = vcombine.low %v279_v38, %v291_v7  ;;  %v22304_v49 = vpop.f32.mrf.mxu0  ;;  %23142 = vst [vmem:[#allocation33_spill] sm:$0xff] %v22306_v13  ;;  %v18269_v4 = vcombine.high %v639_v47, %v651_v29 }
 0x33c   :  { %8158 = vmatprep.subr.bf16.mxu1 %v18723_v41  ;;  %23141 = vst [vmem:[#allocation32_spill] sm:$0xff] %v22304_v49  ;;  %v18292_v41 = vcombine.low %v663_v44, %v675_v35  ;;  %v17884_v7 = vcombine.low %v255_v53, %v267_v17  ;;  %v18268_v52 = vcombine.low %v639_v47, %v651_v29  ;;  %v207_v49 = vld [vmem:[#allocation5 + $0x340] sm:$0xff] }
 0x33d   :  { %v603_v53 = vld [vmem:[#allocation5 + $0xfa0] sm:$0xff] }
 0x33e   :  { %8116 = vmatpush2.bf16.msra.mxu0 %v18338_v48  ;;  %v243_v48 = vld [vmem:[#allocation5 + $0x460] sm:$0xff] }
 0x33f   :  { %8159 = vmatpush2.bf16.msra.mxu1 %v18722_v8  ;;  %8117 = vmatprep.subr.bf16.mxu0 %v18315_v10  ;;  %v615_v10 = vld [vmem:[#allocation5 + $0x1000] sm:$0xff]  ;;  %v17861_v35 = vcombine.high %v231_v12, %v243_v48 }
 0x340   :  { %8160 = vmatprep.subr.bf16.mxu1 %v18699_v27  ;;  %v627_v27 = vld [vmem:[#allocation5 + $0x1060] sm:$0xff] }
 0x341   :  { %v18245_v43 = vcombine.high %v615_v10, %v627_v27  ;;  %v18244_v29 = vcombine.low %v615_v10, %v627_v27 }
 0x342   :  { %8118 = vmatpush2.bf16.msra.mxu0 %v18314_v34 }
 0x343   :  { %8161 = vmatpush2.bf16.msra.mxu1 %v18698_v14  ;;  %8173 = vmatprep.subr.bf16.mxu0 %v17909_v1  ;;  %v7825_v14 = vadd.f32 %v7824_v0, %v1304_v57  ;;  %v17860_v57 = vcombine.low %v231_v12, %v243_v48 }
 0x344   :  { %8216 = vmatprep.subr.bf16.mxu1 %v18293_v24 }
 0x345   :  { %v7863_v8 = vpop.f32.mrf.mxu0  ;;  %8120 = vmatmul.mubr.bf16.vlgmr.msra.gmra.mxu0 %v22068_v25 }
 0x346   :  { %v7864_v34 = vadd.f32 %v7863_v8, %v7821_v30  ;;  %v7906_v38 = vpop.f32.mrf.mxu1  ;;  %8163 = vmatmul.mubr.bf16.vlgmr.msra.gmra.mxu1 %v22076_v39  ;;  %8174 = vmatpush1.bf16.msra.mxu0 %v17908_v22  ;;  %v219_v30 = vld [vmem:[#allocation5 + $0x3a0] sm:$0xff] }
 0x347   :  { %8217 = vmatpush1.bf16.msra.mxu1 %v18292_v41  ;;  %v22310_v44 = vpop.f32.mrf.mxu0  ;;  %8175 = vmatprep.subr.bf16.mxu0 %v17885_v42  ;;  %v591_v22 = vld [vmem:[#allocation5 + $0xf40] sm:$0xff]  ;;  %v17837_v41 = vcombine.high %v207_v49, %v219_v30  ;;  %v17836_v12 = vcombine.low %v207_v49, %v219_v30 }
 0x348   :  { %23143 = vst [vmem:[#allocation34_spill] sm:$0xff] %v22310_v44  ;;  %v22312_v1 = vadd.f32 %v7906_v38, %v7864_v34  ;;  %v22314_v24 = vpop.f32.mrf.mxu1  ;;  %8218 = vmatprep.subr.bf16.mxu1 %v18269_v4  ;;  %8205 = vmatprep.mubr.bf16.mxu0 %v22060_v58  ;;  %v18221_v34 = vcombine.high %v591_v22, %v603_v53  ;;  %v183_v38 = vld [vmem:[#allocation5 + $0x280] sm:$0xff] }
 0x349   :  { %23144 = vst [vmem:[#allocation35_spill] sm:$0xff] %v22314_v24  ;;  %v7867_v8 = vpop.f32.mrf.mxu0  ;;  %8248 = vmatprep.mubr.bf16.mxu1 %v22062_v63  ;;  %v195_v24 = vld [vmem:[#allocation5 + $0x2e0] sm:$0xff]  ;;  %v18220_v48 = vcombine.low %v591_v22, %v603_v53 }
 0x34a   :  { %v8747_v17 = vmul.f32 %v22312_v1, %v22312_v1  ;;  %v7868_v47 = vadd.f32 %v7867_v8, %v7825_v14  ;;  %8176 = vmatpush1.bf16.msra.mxu0 %v17884_v7  ;;  %v7910_v0 = vpop.f32.mrf.mxu1  ;;  %v567_v44 = vld [vmem:[#allocation5 + $0xe80] sm:$0xff]  ;;  %v17813_v10 = vcombine.high %v183_v38, %v195_v24 }
 0x34b   :  { %8219 = vmatpush1.bf16.msra.mxu1 %v18268_v52  ;;  %8177 = vmatprep.subr.bf16.mxu0 %v17861_v35  ;;  %v159_v35 = vld [vmem:[#allocation5 + $0x1c0] sm:$0xff]  ;;  %v18196_v49 = vcombine.low %v567_v44, %v579_v55 }
 0x34c   :  { %v8795_v42 = vmul.f32 %v8747_v17, %v22312_v1  ;;  %v22321_v4 = vadd.f32 %v7910_v0, %v7868_v47  ;;  %8220 = vmatprep.subr.bf16.mxu1 %v18245_v43  ;;  %v18197_v43 = vcombine.high %v567_v44, %v579_v55  ;;  %v171_v14 = vld [vmem:[#allocation5 + $0x220] sm:$0xff] }
 0x34d   :  { %v543_v8 = vld [vmem:[#allocation5 + $0xdc0] sm:$0xff]  ;;  %v17789_v30 = vcombine.high %v159_v35, %v171_v14 }
 0x34e   :  { %v8843_v9 = vmul.f32 0.044715, %v8795_v42  ;;  %v8771_v7 = vmul.f32 %v22321_v4, %v22321_v4  ;;  %8178 = vmatpush1.bf16.msra.mxu0 %v17860_v57  ;;  %v555_v17 = vld [vmem:[#allocation5 + $0xe20] sm:$0xff]  ;;  %v17812_v42 = vcombine.low %v183_v38, %v195_v24 }
 0x34f   :  { %8221 = vmatpush1.bf16.msra.mxu1 %v18244_v29  ;;  %8179 = vmatprep.subr.bf16.mxu0 %v17837_v41  ;;  %v135_v53 = vld [vmem:[#allocation5 + $0x100] sm:$0xff] }
 0x350   :  { %v8891_v27 = vadd.f32 %v8843_v9, %v22312_v1  ;;  %v8819_v52 = vmul.f32 %v8771_v7, %v22321_v4  ;;  %8222 = vmatprep.subr.bf16.mxu1 %v18221_v34  ;;  %v18173_v9 = vcombine.high %v543_v8, %v555_v17  ;;  %v147_v57 = vld [vmem:[#allocation5 + $0x160] sm:$0xff]  ;;  %v17788_v7 = vcombine.low %v159_v35, %v171_v14 }
 0x351   :  { %v519_v29 = vld [vmem:[#allocation5 + $0xd00] sm:$0xff]  ;;  %v17765_v24 = vcombine.high %v135_v53, %v147_v57 }
 0x352   :  { %v8939_v47 = vmul.f32 0.7978846, %v8891_v27  ;;  %v8867_v0 = vmul.f32 0.044715, %v8819_v52  ;;  %8180 = vmatpush1.bf16.msra.mxu0 %v17836_v12  ;;  %v531_v41 = vld [vmem:[#allocation5 + $0xd60] sm:$0xff]  ;;  %v18172_v12 = vcombine.low %v543_v8, %v555_v17  ;;  %v17764_v27 = vcombine.low %v135_v53, %v147_v57 }
 0x353   :  { %8223 = vmatpush1.bf16.msra.mxu1 %v18220_v48  ;;  %8181 = vmatprep.subr.bf16.mxu0 %v17813_v10  ;;  %v18149_v55 = vcombine.high %v519_v29, %v531_v41  ;;  %v111_v44 = vld [vmem:[#allocation5 + $0x40] sm:$0xff]  ;;  %v18148_v52 = vcombine.low %v519_v29, %v531_v41 }
 0x354   :  { %21788 = vtanh.f32 %v8939_v47  ;;  %v8915_v22 = vadd.f32 %v8867_v0, %v22321_v4  ;;  %8224 = vmatprep.subr.bf16.mxu1 %v18197_v43  ;;  %v123_v38 = vld [vmem:[#allocation5 + $0xa0] sm:$0xff] }
 0x355   :  { %v495_v48 = vld [vmem:[#allocation5 + $0xc40] sm:$0xff]  ;;  %v17741_v43 = vcombine.high %v111_v44, %v123_v38  ;;  %v17740_v17 = vcombine.low %v111_v44, %v123_v38 }
 0x356   :  { %v8963_v34 = vmul.f32 0.7978846, %v8915_v22  ;;  %8182 = vmatpush1.bf16.msra.mxu0 %v17812_v42  ;;  %v507_v10 = vld [vmem:[#allocation5 + $0xca0] sm:$0xff] }
 0x357   :  { %8225 = vmatpush1.bf16.msra.mxu1 %v18196_v49  ;;  %8183 = vmatprep.subr.bf16.mxu0 %v17789_v30  ;;  %v18125_v47 = vcombine.high %v495_v48, %v507_v10  ;;  %v471_v35 = vld [vmem:[#allocation5 + $0xb80] sm:$0xff]  ;;  %v18124_v42 = vcombine.low %v495_v48, %v507_v10 }
 0x358   :  { %21790 = vtanh.f32 %v8963_v34  ;;  %8226 = vmatprep.subr.bf16.mxu1 %v18173_v9  ;;  %v483_v14 = vld [vmem:[#allocation5 + $0xbe0] sm:$0xff] }
 0x359   :  { %v855_v0 = vld [vmem:[#allocation5 + $0x1780] sm:$0xff]  ;;  %v18101_v49 = vcombine.high %v471_v35, %v483_v14  ;;  %v18100_v41 = vcombine.low %v471_v35, %v483_v14 }
 0x35a   :  { %8184 = vmatpush1.bf16.msra.mxu0 %v17788_v7  ;;  %v867_v8 = vld [vmem:[#allocation5 + $0x17e0] sm:$0xff] }
 0x35b   :  { %8227 = vmatpush1.bf16.msra.mxu1 %v18172_v12  ;;  %8185 = vmatprep.subr.bf16.mxu0 %v17765_v24  ;;  %v18485_v30 = vcombine.high %v855_v0, %v867_v8  ;;  %v447_v22 = vld [vmem:[#allocation5 + $0xac0] sm:$0xff]  ;;  %v18484_v34 = vcombine.low %v855_v0, %v867_v8 }
 0x35c   :  { %8228 = vmatprep.subr.bf16.mxu1 %v18149_v55  ;;  %v459_v9 = vld [vmem:[#allocation5 + $0xb20] sm:$0xff] }
 0x35d   :  { %v831_v57 = vld [vmem:[#allocation5 + $0x16c0] sm:$0xff]  ;;  %v18077_v7 = vcombine.high %v447_v22, %v459_v9 }
 0x35e   :  { %8186 = vmatpush1.bf16.msra.mxu0 %v17764_v27  ;;  %v843_v29 = vld [vmem:[#allocation5 + $0x1720] sm:$0xff]  ;;  %v8699_v27 = vmul.f32 0.5, %v22312_v1 }
 0x35f   :  { %8229 = vmatpush1.bf16.msra.mxu1 %v18148_v52  ;;  %8187 = vmatprep.subr.bf16.mxu0 %v17741_v43  ;;  %v18461_v12 = vcombine.high %v831_v57, %v843_v29  ;;  %v423_v24 = vld [vmem:[#allocation5 + $0xa00] sm:$0xff]  ;;  %v8723_v52 = vmul.f32 0.5, %v22321_v4  ;;  %v18076_v43 = vcombine.low %v447_v22, %v459_v9  ;;  %v18460_v35 = vcombine.low %v831_v57, %v843_v29 }
 0x360   :  { %8230 = vmatprep.subr.bf16.mxu1 %v18125_v47  ;;  %v435_v55 = vld [vmem:[#allocation5 + $0xa60] sm:$0xff] }
 0x361   :  { %v21789_v53 = vpop.eup %21788  ;;  %v807_v48 = vld [vmem:[#allocation5 + $0x1600] sm:$0xff]  ;;  %v18053_v14 = vcombine.high %v423_v24, %v435_v55  ;;  %v18052_v13 = vcombine.low %v423_v24, %v435_v55 }
 0x362   :  { %8188 = vmatpush1.bf16.msra.mxu0 %v17740_v17  ;;  %v9035_v44 = vadd.f32 1.0, %v21789_v53  ;;  %v819_v10 = vld [vmem:[#allocation5 + $0x1660] sm:$0xff] }
 0x363   :  { %8231 = vmatpush1.bf16.msra.mxu1 %v18124_v42  ;;  %8189 = vmatprep.subr.bf16.mxu0 %v18101_v49  ;;  %v18437_v0 = vcombine.high %v807_v48, %v819_v10  ;;  %v399_v8 = vld [vmem:[#allocation5 + $0x940] sm:$0xff]  ;;  %v18436_v4 = vcombine.low %v807_v48, %v819_v10 }
 0x364   :  { %8232 = vmatprep.subr.bf16.mxu1 %v18485_v30  ;;  %v411_v17 = vld [vmem:[#allocation5 + $0x9a0] sm:$0xff]  ;;  %v9083_v42 = vmul.f32 %v9035_v44, %v8699_v27 }
 0x365   :  { %v21791_v38 = vpop.eup %21790  ;;  %v783_v30 = vld [vmem:[#allocation5 + $0x1540] sm:$0xff]  ;;  %v18029_v22 = vcombine.high %v399_v8, %v411_v17 }
 0x366   :  { %8190 = vmatpush2.bf16.msra.mxu0 %v18100_v41  ;;  %v9059_v47 = vadd.f32 1.0, %v21791_v38  ;;  %v795_v53 = vld [vmem:[#allocation5 + $0x15a0] sm:$0xff] }
 0x367   :  { %8233 = vmatpush2.bf16.msra.mxu1 %v18484_v34  ;;  %8191 = vmatprep.subr.bf16.mxu0 %v18077_v7  ;;  %v18413_v9 = vcombine.high %v783_v30, %v795_v53  ;;  %v375_v57 = vld [vmem:[#allocation5 + $0x880] sm:$0xff]  ;;  %v18028_v7 = vcombine.low %v399_v8, %v411_v17 }
 0x368   :  { %8234 = vmatprep.subr.bf16.mxu1 %v18461_v12  ;;  %v9107_v49 = vmul.f32 %v9059_v47, %v8723_v52  ;;  %v387_v29 = vld [vmem:[#allocation5 + $0x8e0] sm:$0xff]  ;;  %v18412_v12 = vcombine.low %v783_v30, %v795_v53 }
 0x369   :  { %v759_v41 = vld [vmem:[#allocation5 + $0x1480] sm:$0xff]  ;;  %v18005_v44 = vcombine.high %v375_v57, %v387_v29  ;;  %v18004_v48 = vcombine.low %v375_v57, %v387_v29 }
 0x36a   :  { %8192 = vmatpush2.bf16.msra.mxu0 %v18076_v43  ;;  %v22330_v1 = vpack.c.bf16 %v9107_v49, %v9083_v42  ;;  %v771_v34 = vld [vmem:[#allocation5 + $0x14e0] sm:$0xff] }
 0x36b   :  { %8235 = vmatpush2.bf16.msra.mxu1 %v18460_v35  ;;  %8193 = vmatprep.subr.bf16.mxu0 %v18053_v14  ;;  %v18389_v24 = vcombine.high %v759_v41, %v771_v34  ;;  %v351_v55 = vld [vmem:[#allocation5 + $0x7c0] sm:$0xff]  ;;  %v18388_v10 = vcombine.low %v759_v41, %v771_v34 }
 0x36c   :  { %23145 = vst [vmem:[#allocation36_spill] sm:$0xff] %v22330_v1  ;;  %8236 = vmatprep.subr.bf16.mxu1 %v18437_v0  ;;  %v363_v38 = vld [vmem:[#allocation5 + $0x820] sm:$0xff]  ;;  %v184_v1 = vld [vmem:[#allocation5 + $0x288] sm:$0xff] }
 0x36d   :  { %v735_v27 = vld [vmem:[#allocation5 + $0x13c0] sm:$0xff]  ;;  %v17981_v43 = vcombine.high %v351_v55, %v363_v38  ;;  %v17980_v8 = vcombine.low %v351_v55, %v363_v38 }
 0x36e   :  { %8194 = vmatpush2.bf16.msra.mxu0 %v18052_v13  ;;  %v747_v52 = vld [vmem:[#allocation5 + $0x1420] sm:$0xff] }
 0x36f   :  { %8237 = vmatpush2.bf16.msra.mxu1 %v18436_v4  ;;  %8195 = vmatprep.subr.bf16.mxu0 %v18029_v22  ;;  %v18365_v47 = vcombine.high %v735_v27, %v747_v52  ;;  %v327_v13 = vld [vmem:[#allocation5 + $0x700] sm:$0xff]  ;;  %v18364_v17 = vcombine.low %v735_v27, %v747_v52 }
 0x370   :  { %8238 = vmatprep.subr.bf16.mxu1 %v18413_v9  ;;  %v339_v35 = vld [vmem:[#allocation5 + $0x760] sm:$0xff] }
 0x371   :  { %v711_v14 = vld [vmem:[#allocation5 + $0x1300] sm:$0xff]  ;;  %v17957_v42 = vcombine.high %v327_v13, %v339_v35  ;;  %v17956_v9 = vcombine.low %v327_v13, %v339_v35 }
 0x372   :  { %8196 = vmatpush2.bf16.msra.mxu0 %v18028_v7  ;;  %v723_v0 = vld [vmem:[#allocation5 + $0x1360] sm:$0xff] }
 0x373   :  { %8239 = vmatpush2.bf16.msra.mxu1 %v18412_v12  ;;  %8197 = vmatprep.subr.bf16.mxu0 %v18005_v44  ;;  %v18341_v49 = vcombine.high %v711_v14, %v723_v0  ;;  %v303_v30 = vld [vmem:[#allocation5 + $0x640] sm:$0xff]  ;;  %v18340_v57 = vcombine.low %v711_v14, %v723_v0  ;;  %v280_v12 = vld [vmem:[#allocation5 + $0x588] sm:$0xff]  ;;  %v22336_v14 = vpop.f32.mrf.mxu0 }
 0x374   :  { %8240 = vmatprep.subr.bf16.mxu1 %v18389_v24  ;;  %v315_v53 = vld [vmem:[#allocation5 + $0x6a0] sm:$0xff]  ;;  %v292_v44 = vld [vmem:[#allocation5 + $0x5e8] sm:$0xff]  ;;  %23146 = vst [vmem:[#allocation37_spill] sm:$0xff] %v22336_v14 }
 0x375   :  { %v687_v4 = vld [vmem:[#allocation5 + $0x1240] sm:$0xff]  ;;  %v17933_v29 = vcombine.high %v303_v30, %v315_v53  ;;  %v17932_v24 = vcombine.low %v303_v30, %v315_v53  ;;  %v17911_v27 = vcombine.high %v280_v12, %v292_v44  ;;  %v17910_v0 = vcombine.low %v280_v12, %v292_v44 }
 0x376   :  { %8198 = vmatpush2.bf16.msra.mxu0 %v18004_v48  ;;  %v699_v22 = vld [vmem:[#allocation5 + $0x12a0] sm:$0xff] }
 0x377   :  { %8241 = vmatpush2.bf16.msra.mxu1 %v18388_v10  ;;  %8199 = vmatprep.subr.bf16.mxu0 %v17981_v43  ;;  %v18317_v41 = vcombine.high %v687_v4, %v699_v22  ;;  %v1047_v34 = vld [vmem:[#allocation5 + $0x1d80] sm:$0xff]  ;;  %v18316_v55 = vcombine.low %v687_v4, %v699_v22  ;;  %v256_v10 = vld [vmem:[#allocation5 + $0x4c8] sm:$0xff] }
 0x378   :  { %8242 = vmatprep.subr.bf16.mxu1 %v18365_v47  ;;  %v1059_v7 = vld [vmem:[#allocation5 + $0x1de0] sm:$0xff]  ;;  %v268_v43 = vld [vmem:[#allocation5 + $0x528] sm:$0xff] }
 0x379   :  { %v18677_v38 = vcombine.high %v1047_v34, %v1059_v7  ;;  %v1023_v52 = vld [vmem:[#allocation5 + $0x1cc0] sm:$0xff]  ;;  %v22332_v47 = vld [vmem:[#allocation7 + $0x8] sm:$0xff]  ;;  %v18676_v35 = vcombine.low %v1047_v34, %v1059_v7  ;;  %v17886_v34 = vcombine.low %v256_v10, %v268_v43 }
 0x37a   :  { %8200 = vmatpush2.bf16.msra.mxu0 %v17980_v8  ;;  %v1035_v48 = vld [vmem:[#allocation5 + $0x1d20] sm:$0xff]  ;;  %v1312_v13 = vrot.slane %v22332_v47, %v22170_v20  ;;  %v232_v4 = vld [vmem:[#allocation5 + $0x408] sm:$0xff] }
 0x37b   :  { %8243 = vmatpush2.bf16.msra.mxu1 %v18364_v17  ;;  %8201 = vmatprep.subr.bf16.mxu0 %v17957_v42  ;;  %v18653_v8 = vcombine.high %v1023_v52, %v1035_v48  ;;  %v22338_v17 = vpop.f32.mrf.mxu1  ;;  %v17887_v42 = vcombine.high %v256_v10, %v268_v43  ;;  %v1011_v30 = vld [vmem:[#allocation5 + $0x1c60] sm:$0xff]  ;;  %v244_v22 = vld [vmem:[#allocation5 + $0x468] sm:$0xff] }
 0x37c   :  { %8244 = vmatprep.subr.bf16.mxu1 %v18341_v49  ;;  %23147 = vst [vmem:[#allocation38_spill] sm:$0xff] %v22338_v17  ;;  %v999_v49 = vld [vmem:[#allocation5 + $0x1c00] sm:$0xff]  ;;  %v17862_v43 = vcombine.low %v232_v4, %v244_v22  ;;  %v964_v17 = vld [vmem:[#allocation5 + $0x1ae8] sm:$0xff] }
 0x37d   :  { %v18629_v7 = vcombine.high %v999_v49, %v1011_v30 }
 0x37e   :  { %8202 = vmatpush2.bf16.msra.mxu0 %v17956_v9 }
 0x37f   :  { %8245 = vmatpush2.bf16.msra.mxu1 %v18340_v57  ;;  %8203 = vmatprep.subr.bf16.mxu0 %v17933_v29  ;;  %v18652_v29 = vcombine.low %v1023_v52, %v1035_v48  ;;  %v18628_v48 = vcombine.low %v999_v49, %v1011_v30  ;;  %v927_v30 = vld [vmem:[#allocation5 + $0x19c0] sm:$0xff] }
 0x380   :  { %8246 = vmatprep.subr.bf16.mxu1 %v18317_v41 }
 0x382   :  { %8204 = vmatpush2.bf16.msra.mxu0 %v17932_v24  ;;  %v17863_v24 = vcombine.high %v232_v4, %v244_v22  ;;  %v160_v4 = vld [vmem:[#allocation5 + $0x1c8] sm:$0xff] }
 0x383   :  { %8247 = vmatpush2.bf16.msra.mxu1 %v18316_v55  ;;  %8259 = vmatprep.subr.bf16.mxu0 %v18677_v38  ;;  %v975_v55 = vld [vmem:[#allocation5 + $0x1b40] sm:$0xff]  ;;  %v172_v22 = vld [vmem:[#allocation5 + $0x228] sm:$0xff] }
 0x384   :  { %8302 = vmatprep.subr.bf16.mxu1 %v17911_v27  ;;  %v987_v38 = vld [vmem:[#allocation5 + $0x1ba0] sm:$0xff] }
 0x385   :  { %v7949_v53 = vpop.f32.mrf.mxu0  ;;  %8206 = vmatmul.mubr.bf16.vlgmr.msra.gmra.mxu0 %v22066_v21 }
 0x386   :  { %v7950_v9 = vadd.f32 %v7949_v53, %v1312_v13  ;;  %v7992_v57 = vpop.f32.mrf.mxu1  ;;  %8249 = vmatmul.mubr.bf16.vlgmr.msra.gmra.mxu1 %v22068_v25  ;;  %8260 = vmatpush1.bf16.msra.mxu0 %v18676_v35  ;;  %v208_v53 = vld [vmem:[#allocation5 + $0x348] sm:$0xff] }
 0x387   :  { %8303 = vmatpush1.bf16.msra.mxu1 %v17910_v0  ;;  %v22342_v41 = vpop.f32.mrf.mxu0  ;;  %8261 = vmatprep.subr.bf16.mxu0 %v18653_v8  ;;  %v220_v35 = vld [vmem:[#allocation5 + $0x3a8] sm:$0xff]  ;;  %v18605_v0 = vcombine.high %v975_v55, %v987_v38 }
 0x388   :  { %23148 = vst [vmem:[#allocation39_spill] sm:$0xff] %v22342_v41  ;;  %v22344_v12 = vadd.f32 %v7992_v57, %v7950_v9  ;;  %v22346_v44 = vpop.f32.mrf.mxu1  ;;  %8304 = vmatprep.subr.bf16.mxu1 %v17887_v42  ;;  %8291 = vmatprep.mubr.bf16.mxu0 %v22070_v32  ;;  %v17839_v42 = vcombine.high %v208_v53, %v220_v35  ;;  %v951_v9 = vld [vmem:[#allocation5 + $0x1a80] sm:$0xff] }
 0x389   :  { %23149 = vst [vmem:[#allocation40_spill] sm:$0xff] %v22346_v44  ;;  %v7953_v27 = vpop.f32.mrf.mxu0  ;;  %8334 = vmatprep.mubr.bf16.mxu1 %v22060_v58  ;;  %v963_v57 = vld [vmem:[#allocation5 + $0x1ae0] sm:$0xff]  ;;  %v196_v44 = vld [vmem:[#allocation5 + $0x2e8] sm:$0xff]  ;;  %v18604_v41 = vcombine.low %v975_v55, %v987_v38 }
 0x38a   :  { %v7954_v52 = vadd.f32 %v7953_v27, %v1312_v13  ;;  %8262 = vmatpush1.bf16.msra.mxu0 %v18652_v29  ;;  %v7996_v10 = vpop.f32.mrf.mxu1  ;;  %v17838_v13 = vcombine.low %v208_v53, %v220_v35  ;;  %v18581_v29 = vcombine.high %v951_v9, %v963_v57  ;;  %v17815_v49 = vcombine.high %v184_v1, %v196_v44  ;;  %v915_v55 = vld [vmem:[#allocation5 + $0x1960] sm:$0xff]  ;;  %v136_v38 = vld [vmem:[#allocation5 + $0x108] sm:$0xff] }
 0x38b   :  { %8305 = vmatpush1.bf16.msra.mxu1 %v17886_v34  ;;  %8263 = vmatprep.subr.bf16.mxu0 %v18629_v7  ;;  %v939_v34 = vld [vmem:[#allocation5 + $0x1a20] sm:$0xff]  ;;  %v18580_v7 = vcombine.low %v951_v9, %v963_v57  ;;  %v17790_v35 = vcombine.low %v160_v4, %v172_v22  ;;  %v112_v9 = vld [vmem:[#allocation5 + $0x48] sm:$0xff] }
 0x38c   :  { %v22350_v8 = vadd.f32 %v7996_v10, %v7954_v52  ;;  %8306 = vmatprep.subr.bf16.mxu1 %v17863_v24  ;;  %v17814_v24 = vcombine.low %v184_v1, %v196_v44  ;;  %v18557_v27 = vcombine.high %v927_v30, %v939_v34  ;;  %v17791_v52 = vcombine.high %v160_v4, %v172_v22  ;;  %v148_v10 = vld [vmem:[#allocation5 + $0x168] sm:$0xff] }
 0x38d   :  { %v18556_v53 = vcombine.low %v927_v30, %v939_v34  ;;  %v124_v57 = vld [vmem:[#allocation5 + $0xa8] sm:$0xff]  ;;  %v17766_v44 = vcombine.low %v136_v38, %v148_v10  ;;  %v1251_v30 = vld [vmem:[#allocation5 + $0x23e0] sm:$0xff] }
 0x38e   :  { %8264 = vmatpush1.bf16.msra.mxu0 %v18628_v48  ;;  %v903_v48 = vld [vmem:[#allocation5 + $0x1900] sm:$0xff]  ;;  %v472_v34 = vld [vmem:[#allocation5 + $0xb88] sm:$0xff]  ;;  %v17742_v22 = vcombine.low %v112_v9, %v124_v57 }
 0x38f   :  { %8307 = vmatpush1.bf16.msra.mxu1 %v17862_v43  ;;  %8265 = vmatprep.subr.bf16.mxu0 %v18605_v0  ;;  %v18533_v43 = vcombine.high %v903_v48, %v915_v55  ;;  %v17767_v0 = vcombine.high %v136_v38, %v148_v10  ;;  %v18532_v1 = vcombine.low %v903_v48, %v915_v55  ;;  %v1227_v48 = vld [vmem:[#allocation5 + $0x2320] sm:$0xff]  ;;  %v448_v55 = vld [vmem:[#allocation5 + $0xac8] sm:$0xff] }
 0x390   :  { %8308 = vmatprep.subr.bf16.mxu1 %v17839_v42  ;;  %v891_v42 = vld [vmem:[#allocation5 + $0x18a0] sm:$0xff] }
 0x392   :  { %8266 = vmatpush1.bf16.msra.mxu0 %v18604_v41  ;;  %v879_v41 = vld [vmem:[#allocation5 + $0x1840] sm:$0xff] }
 0x393   :  { %8309 = vmatpush1.bf16.msra.mxu1 %v17838_v13  ;;  %8267 = vmatprep.subr.bf16.mxu0 %v18581_v29  ;;  %v18509_v13 = vcombine.high %v879_v41, %v891_v42  ;;  %v17743_v29 = vcombine.high %v112_v9, %v124_v57  ;;  %v18508_v4 = vcombine.low %v879_v41, %v891_v42  ;;  %v1203_v41 = vld [vmem:[#allocation5 + $0x2260] sm:$0xff]  ;;  %v424_v42 = vld [vmem:[#allocation5 + $0xa08] sm:$0xff] }
 0x394   :  { %8310 = vmatprep.subr.bf16.mxu1 %v17815_v49  ;;  %v1239_v49 = vld [vmem:[#allocation5 + $0x2380] sm:$0xff] }
 0x395   :  { %v18868_v38 = vcombine.low %v1239_v49, %v1251_v30 }
 0x396   :  { %8268 = vmatpush1.bf16.msra.mxu0 %v18580_v7  ;;  %v484_v7 = vld [vmem:[#allocation5 + $0xbe8] sm:$0xff] }
 0x397   :  { %8311 = vmatpush1.bf16.msra.mxu1 %v17814_v24  ;;  %8269 = vmatprep.subr.bf16.mxu0 %v18557_v27  ;;  %v18869_v24 = vcombine.high %v1239_v49, %v1251_v30  ;;  %v18103_v27 = vcombine.high %v472_v34, %v484_v7  ;;  %v18102_v10 = vcombine.low %v472_v34, %v484_v7  ;;  %v1179_v49 = vld [vmem:[#allocation5 + $0x21a0] sm:$0xff]  ;;  %v400_v30 = vld [vmem:[#allocation5 + $0x948] sm:$0xff] }
 0x398   :  { %8312 = vmatprep.subr.bf16.mxu1 %v17791_v52  ;;  %v1215_v52 = vld [vmem:[#allocation5 + $0x22c0] sm:$0xff] }
 0x399   :  { %v18844_v9 = vcombine.low %v1215_v52, %v1227_v48 }
 0x39a   :  { %8270 = vmatpush1.bf16.msra.mxu0 %v18556_v53  ;;  %v460_v53 = vld [vmem:[#allocation5 + $0xb28] sm:$0xff] }
 0x39b   :  { %8313 = vmatpush1.bf16.msra.mxu1 %v17790_v35  ;;  %8271 = vmatprep.subr.bf16.mxu0 %v18533_v43  ;;  %v18845_v35 = vcombine.high %v1215_v52, %v1227_v48  ;;  %v18079_v43 = vcombine.high %v448_v55, %v460_v53  ;;  %v18078_v57 = vcombine.low %v448_v55, %v460_v53  ;;  %v1155_v52 = vld [vmem:[#allocation5 + $0x20e0] sm:$0xff]  ;;  %v376_v48 = vld [vmem:[#allocation5 + $0x888] sm:$0xff] }
 0x39c   :  { %8314 = vmatprep.subr.bf16.mxu1 %v17767_v0  ;;  %v1191_v0 = vld [vmem:[#allocation5 + $0x2200] sm:$0xff] }
 0x39d   :  { %v18820_v34 = vcombine.low %v1191_v0, %v1203_v41 }
 0x39e   :  { %8272 = vmatpush1.bf16.msra.mxu0 %v18532_v1  ;;  %v436_v1 = vld [vmem:[#allocation5 + $0xa68] sm:$0xff] }
 0x39f   :  { %8315 = vmatpush1.bf16.msra.mxu1 %v17766_v44  ;;  %8273 = vmatprep.subr.bf16.mxu0 %v18509_v13  ;;  %v18821_v44 = vcombine.high %v1191_v0, %v1203_v41  ;;  %v18055_v13 = vcombine.high %v424_v42, %v436_v1  ;;  %v18054_v7 = vcombine.low %v424_v42, %v436_v1  ;;  %v1131_v0 = vld [vmem:[#allocation5 + $0x2020] sm:$0xff]  ;;  %v352_v41 = vld [vmem:[#allocation5 + $0x7c8] sm:$0xff] }
 0x3a0   :  { %8316 = vmatprep.subr.bf16.mxu1 %v17743_v29  ;;  %v1167_v29 = vld [vmem:[#allocation5 + $0x2140] sm:$0xff] }
 0x3a1   :  { %v18796_v55 = vcombine.low %v1167_v29, %v1179_v49 }
 0x3a2   :  { %8274 = vmatpush1.bf16.msra.mxu0 %v18508_v4  ;;  %v412_v4 = vld [vmem:[#allocation5 + $0x9a8] sm:$0xff] }
 0x3a3   :  { %8317 = vmatpush1.bf16.msra.mxu1 %v17742_v22  ;;  %8275 = vmatprep.subr.bf16.mxu0 %v18869_v24  ;;  %v18797_v22 = vcombine.high %v1167_v29, %v1179_v49  ;;  %v18031_v24 = vcombine.high %v400_v30, %v412_v4  ;;  %v18030_v53 = vcombine.low %v400_v30, %v412_v4  ;;  %v1107_v29 = vld [vmem:[#allocation5 + $0x1f60] sm:$0xff]  ;;  %v328_v49 = vld [vmem:[#allocation5 + $0x708] sm:$0xff] }
 0x3a4   :  { %8318 = vmatprep.subr.bf16.mxu1 %v18103_v27  ;;  %v1143_v27 = vld [vmem:[#allocation5 + $0x2080] sm:$0xff] }
 0x3a5   :  { %v18772_v42 = vcombine.low %v1143_v27, %v1155_v52 }
 0x3a6   :  { %8276 = vmatpush2.bf16.msra.mxu0 %v18868_v38  ;;  %v388_v38 = vld [vmem:[#allocation5 + $0x8e8] sm:$0xff] }
 0x3a7   :  { %8319 = vmatpush2.bf16.msra.mxu1 %v18102_v10  ;;  %8277 = vmatprep.subr.bf16.mxu0 %v18845_v35  ;;  %v18773_v10 = vcombine.high %v1143_v27, %v1155_v52  ;;  %v18007_v35 = vcombine.high %v376_v48, %v388_v38  ;;  %v18006_v1 = vcombine.low %v376_v48, %v388_v38  ;;  %v1083_v27 = vld [vmem:[#allocation5 + $0x1ea0] sm:$0xff]  ;;  %v304_v52 = vld [vmem:[#allocation5 + $0x648] sm:$0xff] }
 0x3a8   :  { %8320 = vmatprep.subr.bf16.mxu1 %v18079_v43  ;;  %v1119_v43 = vld [vmem:[#allocation5 + $0x1fc0] sm:$0xff] }
 0x3a9   :  { %v18748_v30 = vcombine.low %v1119_v43, %v1131_v0 }
 0x3aa   :  { %8278 = vmatpush2.bf16.msra.mxu0 %v18844_v9  ;;  %v364_v9 = vld [vmem:[#allocation5 + $0x828] sm:$0xff] }
 0x3ab   :  { %8321 = vmatpush2.bf16.msra.mxu1 %v18078_v57  ;;  %8279 = vmatprep.subr.bf16.mxu0 %v18821_v44  ;;  %v18749_v57 = vcombine.high %v1119_v43, %v1131_v0  ;;  %v17983_v44 = vcombine.high %v352_v41, %v364_v9  ;;  %v17982_v4 = vcombine.low %v352_v41, %v364_v9  ;;  %v676_v43 = vld [vmem:[#allocation5 + $0x11e8] sm:$0xff] }
 0x3ac   :  { %8322 = vmatprep.subr.bf16.mxu1 %v18055_v13  ;;  %v1095_v13 = vld [vmem:[#allocation5 + $0x1f00] sm:$0xff]  ;;  %v1048_v0 = vld [vmem:[#allocation5 + $0x1d88] sm:$0xff] }
 0x3ad   :  { %v18724_v48 = vcombine.low %v1095_v13, %v1107_v29 }
 0x3ae   :  { %8280 = vmatpush2.bf16.msra.mxu0 %v18820_v34  ;;  %v340_v34 = vld [vmem:[#allocation5 + $0x768] sm:$0xff] }
 0x3af   :  { %8323 = vmatpush2.bf16.msra.mxu1 %v18054_v7  ;;  %8281 = vmatprep.subr.bf16.mxu0 %v18797_v22  ;;  %v18725_v7 = vcombine.high %v1095_v13, %v1107_v29  ;;  %v17959_v22 = vcombine.high %v328_v49, %v340_v34  ;;  %v17958_v38 = vcombine.low %v328_v49, %v340_v34  ;;  %v652_v13 = vld [vmem:[#allocation5 + $0x1128] sm:$0xff]  ;;  %v22352_v34 = vpop.f32.mrf.mxu0 }
 0x3b0   :  { %8324 = vmatprep.subr.bf16.mxu1 %v18031_v24  ;;  %v1071_v24 = vld [vmem:[#allocation5 + $0x1e40] sm:$0xff]  ;;  %v1024_v29 = vld [vmem:[#allocation5 + $0x1cc8] sm:$0xff]  ;;  %23150 = vst [vmem:[#allocation41_spill] sm:$0xff] %v22352_v34 }
 0x3b1   :  { %v18700_v41 = vcombine.low %v1071_v24, %v1083_v27  ;;  %v952_v34 = vld [vmem:[#allocation5 + $0x1a88] sm:$0xff] }
 0x3b2   :  { %8282 = vmatpush2.bf16.msra.mxu0 %v18796_v55  ;;  %v316_v55 = vld [vmem:[#allocation5 + $0x6a8] sm:$0xff] }
 0x3b3   :  { %8325 = vmatpush2.bf16.msra.mxu1 %v18030_v53  ;;  %8283 = vmatprep.subr.bf16.mxu0 %v18773_v10  ;;  %v18701_v53 = vcombine.high %v1071_v24, %v1083_v27  ;;  %v17935_v10 = vcombine.high %v304_v52, %v316_v55  ;;  %v17934_v9 = vcombine.low %v304_v52, %v316_v55  ;;  %v616_v24 = vld [vmem:[#allocation5 + $0x1008] sm:$0xff] }
 0x3b4   :  { %8326 = vmatprep.subr.bf16.mxu1 %v18007_v35  ;;  %v664_v35 = vld [vmem:[#allocation5 + $0x1188] sm:$0xff] }
 0x3b5   :  { %v18294_v49 = vcombine.low %v664_v35, %v676_v43  ;;  %v628_v27 = vld [vmem:[#allocation5 + $0x1068] sm:$0xff] }
 0x3b6   :  { %8284 = vmatpush2.bf16.msra.mxu0 %v18772_v42  ;;  %v1060_v42 = vld [vmem:[#allocation5 + $0x1de8] sm:$0xff] }
 0x3b7   :  { %8327 = vmatpush2.bf16.msra.mxu1 %v18006_v1  ;;  %8285 = vmatprep.subr.bf16.mxu0 %v18749_v57  ;;  %v18295_v1 = vcombine.high %v664_v35, %v676_v43  ;;  %v18679_v57 = vcombine.high %v1048_v0, %v1060_v42  ;;  %v1000_v55 = vld [vmem:[#allocation5 + $0x1c08] sm:$0xff]  ;;  %v18247_v43 = vcombine.high %v616_v24, %v628_v27 }
 0x3b8   :  { %8328 = vmatprep.subr.bf16.mxu1 %v17983_v44  ;;  %v640_v44 = vld [vmem:[#allocation5 + $0x10c8] sm:$0xff] }
 0x3ba   :  { %8286 = vmatpush2.bf16.msra.mxu0 %v18748_v30  ;;  %v1036_v30 = vld [vmem:[#allocation5 + $0x1d28] sm:$0xff] }
 0x3bb   :  { %8329 = vmatpush2.bf16.msra.mxu1 %v17982_v4  ;;  %8287 = vmatprep.subr.bf16.mxu0 %v18725_v7  ;;  %v18678_v4 = vcombine.low %v1048_v0, %v1060_v42  ;;  %v18271_v7 = vcombine.high %v640_v44, %v652_v13  ;;  %v18654_v35 = vcombine.low %v1024_v29, %v1036_v30 }
 0x3bc   :  { %8330 = vmatprep.subr.bf16.mxu1 %v17959_v22  ;;  %v18655_v22 = vcombine.high %v1024_v29, %v1036_v30  ;;  %v18246_v29 = vcombine.low %v616_v24, %v628_v27 }
 0x3be   :  { %8288 = vmatpush2.bf16.msra.mxu0 %v18724_v48  ;;  %v1012_v48 = vld [vmem:[#allocation5 + $0x1c68] sm:$0xff] }
 0x3bf   :  { %8331 = vmatpush2.bf16.msra.mxu1 %v17958_v38  ;;  %8289 = vmatprep.subr.bf16.mxu0 %v18701_v53  ;;  %v18270_v53 = vcombine.low %v640_v44, %v652_v13  ;;  %v18631_v42 = vcombine.high %v1000_v55, %v1012_v48  ;;  %v18630_v30 = vcombine.low %v1000_v55, %v1012_v48 }
 0x3c0   :  { %8332 = vmatprep.subr.bf16.mxu1 %v17935_v10 }
 0x3c2   :  { %8290 = vmatpush2.bf16.msra.mxu0 %v18700_v41  ;;  %v592_v41 = vld [vmem:[#allocation5 + $0xf48] sm:$0xff] }
 0x3c3   :  { %8333 = vmatpush2.bf16.msra.mxu1 %v17934_v9  ;;  %8345 = vmatprep.subr.bf16.mxu0 %v18295_v1  ;;  %v604_v9 = vld [vmem:[#allocation5 + $0xfa8] sm:$0xff] }
 0x3c4   :  { %8388 = vmatprep.subr.bf16.mxu1 %v18679_v57  ;;  %v976_v1 = vld [vmem:[#allocation5 + $0x1b48] sm:$0xff]  ;;  %v18222_v24 = vcombine.low %v592_v41, %v604_v9 }
 0x3c5   :  { %v8035_v52 = vpop.f32.mrf.mxu0  ;;  %8292 = vmatmul.mubr.bf16.vlgmr.msra.gmra.mxu0 %v22076_v39  ;;  %v988_v57 = vld [vmem:[#allocation5 + $0x1ba8] sm:$0xff] }
 0x3c6   :  { %v22356_v38 = vadd.f32 %v8035_v52, %v22344_v12  ;;  %8335 = vmatmul.mubr.bf16.vlgmr.msra.gmra.mxu1 %v22066_v21  ;;  %8346 = vmatpush1.bf16.msra.mxu0 %v18294_v49  ;;  %v18223_v49 = vcombine.high %v592_v41, %v604_v9  ;;  %v568_v52 = vld [vmem:[#allocation5 + $0xe88] sm:$0xff]  ;;  %v18606_v27 = vcombine.low %v976_v1, %v988_v57 }
 0x3c7   :  { %8389 = vmatpush1.bf16.msra.mxu1 %v18678_v4  ;;  %v22359_v10 = vpop.f32.mrf.mxu0  ;;  %8347 = vmatprep.subr.bf16.mxu0 %v18271_v7  ;;  %v18582_v41 = vcombine.low %v952_v34, %v964_v17 }
 0x3c8   :  { %23151 = vst [vmem:[#allocation42_spill] sm:$0xff] %v22359_v10  ;;  %v8749_v0 = vmul.f32 %v22356_v38, %v22356_v38  ;;  %8390 = vmatprep.subr.bf16.mxu1 %v18655_v22  ;;  %8377 = vmatprep.mubr.bf16.mxu0 %v22062_v63  ;;  %v18607_v22 = vcombine.high %v976_v1, %v988_v57  ;;  %v580_v10 = vld [vmem:[#allocation5 + $0xee8] sm:$0xff] }
 0x3c9   :  { %v8039_v12 = vpop.f32.mrf.mxu0  ;;  %8420 = vmatprep.mubr.bf16.mxu1 %v22070_v32  ;;  %v18199_v55 = vcombine.high %v568_v52, %v580_v10  ;;  %v520_v57 = vld [vmem:[#allocation5 + $0xd08] sm:$0xff] }
 0x3ca   :  { %v8797_v44 = vmul.f32 %v8749_v0, %v22356_v38  ;;  %v22367_v13 = vadd.f32 %v8039_v12, %v22350_v8  ;;  %8348 = vmatpush1.bf16.msra.mxu0 %v18270_v53  ;;  %v928_v12 = vld [vmem:[#allocation5 + $0x19c8] sm:$0xff] }
 0x3cb   :  { %8391 = vmatpush1.bf16.msra.mxu1 %v18654_v35  ;;  %8349 = vmatprep.subr.bf16.mxu0 %v18247_v43  ;;  %v18583_v35 = vcombine.high %v952_v34, %v964_v17  ;;  %v544_v43 = vld [vmem:[#allocation5 + $0xdc8] sm:$0xff] }
 0x3cc   :  { %v8845_v4 = vmul.f32 0.044715, %v8797_v44  ;;  %v8773_v7 = vmul.f32 %v22367_v13, %v22367_v13  ;;  %8392 = vmatprep.subr.bf16.mxu1 %v18631_v42  ;;  %v556_v42 = vld [vmem:[#allocation5 + $0xe28] sm:$0xff] }
 0x3cd   :  { %v940_v44 = vld [vmem:[#allocation5 + $0x1a28] sm:$0xff]  ;;  %v18175_v9 = vcombine.high %v544_v43, %v556_v42 }
 0x3ce   :  { %v8893_v0 = vadd.f32 %v8845_v4, %v22356_v38  ;;  %v8821_v8 = vmul.f32 %v8773_v7, %v22367_v13  ;;  %8350 = vmatpush1.bf16.msra.mxu0 %v18246_v29  ;;  %v18198_v4 = vcombine.low %v568_v52, %v580_v10  ;;  %v18559_v1 = vcombine.high %v928_v12, %v940_v44  ;;  %v916_v7 = vld [vmem:[#allocation5 + $0x1968] sm:$0xff] }
 0x3cf   :  { %8393 = vmatpush1.bf16.msra.mxu1 %v18630_v30  ;;  %8351 = vmatprep.subr.bf16.mxu0 %v18223_v49  ;;  %v532_v30 = vld [vmem:[#allocation5 + $0xd68] sm:$0xff] }
 0x3d0   :  { %v8941_v48 = vmul.f32 0.7978846, %v8893_v0  ;;  %v8869_v53 = vmul.f32 0.044715, %v8821_v8  ;;  %8394 = vmatprep.subr.bf16.mxu1 %v18607_v22  ;;  %v904_v49 = vld [vmem:[#allocation5 + $0x1908] sm:$0xff]  ;;  %v18174_v22 = vcombine.low %v544_v43, %v556_v42  ;;  %v18558_v0 = vcombine.low %v928_v12, %v940_v44 }
 0x3d1   :  { %v18151_v8 = vcombine.high %v520_v57, %v532_v30  ;;  %v18535_v10 = vcombine.high %v904_v49, %v916_v7  ;;  %v496_v52 = vld [vmem:[#allocation5 + $0xc48] sm:$0xff] }
 0x3d2   :  { %21792 = vtanh.f32 %v8941_v48  ;;  %v8917_v14 = vadd.f32 %v8869_v53, %v22367_v13  ;;  %8352 = vmatpush1.bf16.msra.mxu0 %v18222_v24  ;;  %v508_v24 = vld [vmem:[#allocation5 + $0xca8] sm:$0xff] }
 0x3d3   :  { %8395 = vmatpush1.bf16.msra.mxu1 %v18606_v27  ;;  %8353 = vmatprep.subr.bf16.mxu0 %v18199_v55  ;;  %v880_v17 = vld [vmem:[#allocation5 + $0x1848] sm:$0xff]  ;;  %v18534_v27 = vcombine.low %v904_v49, %v916_v7  ;;  %v18127_v55 = vcombine.high %v496_v52, %v508_v24  ;;  %v18126_v12 = vcombine.low %v496_v52, %v508_v24  ;;  %v8725_v52 = vmul.f32 0.5, %v22367_v13 }
 0x3d4   :  { %v8965_v29 = vmul.f32 0.7978846, %v8917_v14  ;;  %8396 = vmatprep.subr.bf16.mxu1 %v18583_v35  ;;  %v892_v34 = vld [vmem:[#allocation5 + $0x18a8] sm:$0xff]  ;;  %v18150_v14 = vcombine.low %v520_v57, %v532_v30 }
 0x3d5   :  { %v18511_v48 = vcombine.high %v880_v17, %v892_v34  ;;  %v856_v53 = vld [vmem:[#allocation5 + $0x1788] sm:$0xff] }
 0x3d6   :  { %21794 = vtanh.f32 %v8965_v29  ;;  %8354 = vmatpush1.bf16.msra.mxu0 %v18198_v4  ;;  %v868_v35 = vld [vmem:[#allocation5 + $0x17e8] sm:$0xff]  ;;  %v18510_v4 = vcombine.low %v880_v17, %v892_v34 }
 0x3d7   :  { %8397 = vmatpush1.bf16.msra.mxu1 %v18582_v41  ;;  %8355 = vmatprep.subr.bf16.mxu0 %v18175_v9  ;;  %v1240_v43 = vld [vmem:[#allocation5 + $0x2388] sm:$0xff]  ;;  %v18487_v41 = vcombine.high %v856_v53, %v868_v35  ;;  %v18486_v49 = vcombine.low %v856_v53, %v868_v35 }
 0x3d8   :  { %8398 = vmatprep.subr.bf16.mxu1 %v18559_v1  ;;  %v1252_v42 = vld [vmem:[#allocation5 + $0x23e8] sm:$0xff] }
 0x3d9   :  { %v18871_v9 = vcombine.high %v1240_v43, %v1252_v42  ;;  %v832_v29 = vld [vmem:[#allocation5 + $0x16c8] sm:$0xff] }
 0x3da   :  { %8356 = vmatpush1.bf16.msra.mxu0 %v18174_v22  ;;  %v844_v1 = vld [vmem:[#allocation5 + $0x1728] sm:$0xff] }
 0x3db   :  { %8399 = vmatpush1.bf16.msra.mxu1 %v18558_v0  ;;  %8357 = vmatprep.subr.bf16.mxu0 %v18151_v8  ;;  %v1216_v57 = vld [vmem:[#allocation5 + $0x22c8] sm:$0xff]  ;;  %v18870_v0 = vcombine.low %v1240_v43, %v1252_v42  ;;  %v18463_v8 = vcombine.high %v832_v29, %v844_v1 }
 0x3dc   :  { %8400 = vmatprep.subr.bf16.mxu1 %v18535_v10  ;;  %v1228_v30 = vld [vmem:[#allocation5 + $0x2328] sm:$0xff]  ;;  %v8701_v10 = vmul.f32 0.5, %v22356_v38 }
 0x3dd   :  { %v18847_v24 = vcombine.high %v1216_v57, %v1228_v30  ;;  %v808_v17 = vld [vmem:[#allocation5 + $0x1608] sm:$0xff] }
 0x3de   :  { %8358 = vmatpush1.bf16.msra.mxu0 %v18150_v14  ;;  %v820_v34 = vld [vmem:[#allocation5 + $0x1668] sm:$0xff] }
 0x3df   :  { %v21793_v44 = vpop.eup %21792  ;;  %8401 = vmatpush1.bf16.msra.mxu1 %v18534_v27  ;;  %8359 = vmatprep.subr.bf16.mxu0 %v18127_v55  ;;  %v1192_v27 = vld [vmem:[#allocation5 + $0x2208] sm:$0xff]  ;;  %v18439_v43 = vcombine.high %v808_v17, %v820_v34 }
 0x3e0   :  { %8402 = vmatprep.subr.bf16.mxu1 %v18511_v48  ;;  %v9037_v7 = vadd.f32 1.0, %v21793_v44  ;;  %v1204_v55 = vld [vmem:[#allocation5 + $0x2268] sm:$0xff]  ;;  %v18462_v48 = vcombine.low %v832_v29, %v844_v1 }
 0x3e1   :  { %v18823_v42 = vcombine.high %v1192_v27, %v1204_v55  ;;  %v784_v38 = vld [vmem:[#allocation5 + $0x1548] sm:$0xff] }
 0x3e2   :  { %8360 = vmatpush1.bf16.msra.mxu0 %v18126_v12  ;;  %v9085_v53 = vmul.f32 %v9037_v7, %v8701_v10  ;;  %v18846_v12 = vcombine.low %v1216_v57, %v1228_v30  ;;  %v796_v44 = vld [vmem:[#allocation5 + $0x15a8] sm:$0xff] }
 0x3e3   :  { %v21795_v22 = vpop.eup %21794  ;;  %8403 = vmatpush1.bf16.msra.mxu1 %v18510_v4  ;;  %8361 = vmatprep.subr.bf16.mxu0 %v18487_v41  ;;  %v1168_v4 = vld [vmem:[#allocation5 + $0x2148] sm:$0xff]  ;;  %v18415_v29 = vcombine.high %v784_v38, %v796_v44 }
 0x3e4   :  { %8404 = vmatprep.subr.bf16.mxu1 %v18871_v9  ;;  %v9061_v14 = vadd.f32 1.0, %v21795_v22  ;;  %v1180_v41 = vld [vmem:[#allocation5 + $0x21a8] sm:$0xff]  ;;  %v18438_v9 = vcombine.low %v808_v17, %v820_v34 }
 0x3e5   :  { %v18799_v1 = vcombine.high %v1168_v4, %v1180_v41  ;;  %v760_v7 = vld [vmem:[#allocation5 + $0x1488] sm:$0xff] }
 0x3e6   :  { %8362 = vmatpush2.bf16.msra.mxu0 %v18486_v49  ;;  %v9109_v35 = vmul.f32 %v9061_v14, %v8725_v52  ;;  %v18822_v49 = vcombine.low %v1192_v27, %v1204_v55  ;;  %v772_v22 = vld [vmem:[#allocation5 + $0x14e8] sm:$0xff] }
 0x3e7   :  { %8405 = vmatpush2.bf16.msra.mxu1 %v18870_v0  ;;  %8363 = vmatprep.subr.bf16.mxu0 %v18463_v8  ;;  %v1144_v57 = vld [vmem:[#allocation5 + $0x2088] sm:$0xff]  ;;  %v18414_v0 = vcombine.low %v784_v38, %v796_v44  ;;  %v18798_v8 = vcombine.low %v1168_v4, %v1180_v41  ;;  %v18391_v10 = vcombine.high %v760_v7, %v772_v22  ;;  %v22378_v38 = vpop.f32.mrf.mxu1 }
 0x3e8   :  { %8406 = vmatprep.subr.bf16.mxu1 %v18847_v24  ;;  %v22376_v13 = vpack.c.bf16 %v9109_v35, %v9085_v53  ;;  %v1156_v30 = vld [vmem:[#allocation5 + $0x20e8] sm:$0xff]  ;;  %v18390_v27 = vcombine.low %v760_v7, %v772_v22  ;;  %23153 = vst [vmem:[#allocation44_spill] sm:$0xff] %v22378_v38 }
 0x3e9   :  { %v18775_v52 = vcombine.high %v1144_v57, %v1156_v30  ;;  %v736_v24 = vld [vmem:[#allocation5 + $0x13c8] sm:$0xff]  ;;  %v18774_v55 = vcombine.low %v1144_v57, %v1156_v30 }
 0x3ea   :  { %23152 = vst [vmem:[#allocation43_spill] sm:$0xff] %v22376_v13  ;;  %8364 = vmatpush2.bf16.msra.mxu0 %v18462_v48  ;;  %v748_v17 = vld [vmem:[#allocation5 + $0x1428] sm:$0xff] }
 0x3eb   :  { %8407 = vmatpush2.bf16.msra.mxu1 %v18846_v12  ;;  %8365 = vmatprep.subr.bf16.mxu0 %v18439_v43  ;;  %v1120_v34 = vld [vmem:[#allocation5 + $0x1fc8] sm:$0xff]  ;;  %v18367_v48 = vcombine.high %v736_v24, %v748_v17  ;;  %v18366_v44 = vcombine.low %v736_v24, %v748_v17  ;;  %v293_v24 = vld [vmem:[#allocation5 + $0x5f0] sm:$0xff] }
 0x3ec   :  { %8408 = vmatprep.subr.bf16.mxu1 %v18823_v42  ;;  %v1132_v14 = vld [vmem:[#allocation5 + $0x2028] sm:$0xff]  ;;  %v665_v17 = vld [vmem:[#allocation5 + $0x1190] sm:$0xff] }
 0x3ed   :  { %v18751_v53 = vcombine.high %v1120_v34, %v1132_v14  ;;  %v712_v35 = vld [vmem:[#allocation5 + $0x1308] sm:$0xff]  ;;  %v18750_v4 = vcombine.low %v1120_v34, %v1132_v14  ;;  %v677_v34 = vld [vmem:[#allocation5 + $0x11f0] sm:$0xff] }
 0x3ee   :  { %8366 = vmatpush2.bf16.msra.mxu0 %v18438_v9  ;;  %v724_v12 = vld [vmem:[#allocation5 + $0x1368] sm:$0xff]  ;;  %v8078_v9 = vpop.f32.mrf.mxu1 }
 0x3ef   :  { %8409 = vmatpush2.bf16.msra.mxu1 %v18822_v49  ;;  %8367 = vmatprep.subr.bf16.mxu0 %v18415_v29  ;;  %v1096_v43 = vld [vmem:[#allocation5 + $0x1f08] sm:$0xff]  ;;  %v18343_v41 = vcombine.high %v712_v35, %v724_v12  ;;  %v18342_v57 = vcombine.low %v712_v35, %v724_v12  ;;  %v18297_v35 = vcombine.high %v665_v17, %v677_v34  ;;  %v257_v12 = vld [vmem:[#allocation5 + $0x4d0] sm:$0xff] }
 0x3f0   :  { %8410 = vmatprep.subr.bf16.mxu1 %v18799_v1  ;;  %v1108_v42 = vld [vmem:[#allocation5 + $0x1f68] sm:$0xff] }
 0x3f1   :  { %v18727_v49 = vcombine.high %v1096_v43, %v1108_v42  ;;  %v688_v29 = vld [vmem:[#allocation5 + $0x1248] sm:$0xff]  ;;  %v18726_v30 = vcombine.low %v1096_v43, %v1108_v42  ;;  %v269_v43 = vld [vmem:[#allocation5 + $0x530] sm:$0xff] }
 0x3f2   :  { %8368 = vmatpush2.bf16.msra.mxu0 %v18414_v0  ;;  %v700_v1 = vld [vmem:[#allocation5 + $0x12a8] sm:$0xff]  ;;  %v641_v42 = vld [vmem:[#allocation5 + $0x10d0] sm:$0xff] }
 0x3f3   :  { %8411 = vmatpush2.bf16.msra.mxu1 %v18798_v8  ;;  %8369 = vmatprep.subr.bf16.mxu0 %v18391_v10  ;;  %v1072_v7 = vld [vmem:[#allocation5 + $0x1e48] sm:$0xff]  ;;  %v18319_v0 = vcombine.high %v688_v29, %v700_v1  ;;  %v22380_v8 = vpop.f32.mrf.mxu1  ;;  %v18318_v14 = vcombine.low %v688_v29, %v700_v1  ;;  %v17889_v29 = vcombine.high %v257_v12, %v269_v43 }
 0x3f4   :  { %8412 = vmatprep.subr.bf16.mxu1 %v18775_v52  ;;  %v1084_v22 = vld [vmem:[#allocation5 + $0x1ea8] sm:$0xff]  ;;  %23154 = vst [vmem:[#allocation45_spill] sm:$0xff] %v22380_v8  ;;  %v281_v52 = vld [vmem:[#allocation5 + $0x590] sm:$0xff] }
 0x3f5   :  { %v18703_v10 = vcombine.high %v1072_v7, %v1084_v22 }
 0x3f6   :  { %8370 = vmatpush2.bf16.msra.mxu0 %v18390_v27  ;;  %v18702_v27 = vcombine.low %v1072_v7, %v1084_v22  ;;  %v233_v22 = vld [vmem:[#allocation5 + $0x410] sm:$0xff] }
 0x3f7   :  { %8413 = vmatpush2.bf16.msra.mxu1 %v18774_v55  ;;  %8371 = vmatprep.subr.bf16.mxu0 %v18367_v48  ;;  %v17913_v55 = vcombine.high %v281_v52, %v293_v24  ;;  %v1320_v48 = vrot.slane %v22332_v47, %v22219_v36  ;;  %v209_v36 = vld [vmem:[#allocation5 + $0x350] sm:$0xff] }
 0x3f8   :  { %8414 = vmatprep.subr.bf16.mxu1 %v18751_v53  ;;  %v8082_v53 = vpop.f32.mrf.mxu1 }
 0x3f9   :  { %v8079_v1 = vadd.f32 %v8078_v9, %v1320_v48 }
 0x3fa   :  { %8372 = vmatpush2.bf16.msra.mxu0 %v18366_v44  ;;  %v653_v44 = vld [vmem:[#allocation5 + $0x1130] sm:$0xff]  ;;  %v22386_v7 = vpop.f32.mrf.mxu1 }
 0x3fb   :  { %8415 = vmatpush2.bf16.msra.mxu1 %v18750_v4  ;;  %8373 = vmatprep.subr.bf16.mxu0 %v18343_v41  ;;  %v17912_v4 = vcombine.low %v281_v52, %v293_v24  ;;  %v22384_v41 = vpop.f32.mrf.mxu0  ;;  %v18273_v47 = vcombine.high %v641_v42, %v653_v44  ;;  %v17888_v24 = vcombine.low %v257_v12, %v269_v43  ;;  %v605_v12 = vld [vmem:[#allocation5 + $0xfb0] sm:$0xff] }
 0x3fc   :  { %8416 = vmatprep.subr.bf16.mxu1 %v18727_v49  ;;  %23155 = vst [vmem:[#allocation46_spill] sm:$0xff] %v22384_v41  ;;  %v18296_v49 = vcombine.low %v665_v17, %v677_v34  ;;  %v18272_v9 = vcombine.low %v641_v42, %v653_v44  ;;  %v569_v41 = vld [vmem:[#allocation5 + $0xe90] sm:$0xff] }
 0x3fe   :  { %8374 = vmatpush2.bf16.msra.mxu0 %v18342_v57  ;;  %v245_v57 = vld [vmem:[#allocation5 + $0x470] sm:$0xff] }
 0x3ff   :  { %8417 = vmatpush2.bf16.msra.mxu1 %v18726_v30  ;;  %8375 = vmatprep.subr.bf16.mxu0 %v18319_v0  ;;  %v617_v0 = vld [vmem:[#allocation5 + $0x1010] sm:$0xff]  ;;  %v17865_v34 = vcombine.high %v233_v22, %v245_v57 }
 0x400   :  { %8418 = vmatprep.subr.bf16.mxu1 %v18703_v10  ;;  %v629_v10 = vld [vmem:[#allocation5 + $0x1070] sm:$0xff] }
 0x401   :  { %v18249_v13 = vcombine.high %v617_v0, %v629_v10  ;;  %v18248_v44 = vcombine.low %v617_v0, %v629_v10 }
 0x402   :  { %8376 = vmatpush2.bf16.msra.mxu0 %v18318_v14 }
 0x403   :  { %8419 = vmatpush2.bf16.msra.mxu1 %v18702_v27  ;;  %8431 = vmatprep.subr.bf16.mxu0 %v17913_v55  ;;  %v8083_v27 = vadd.f32 %v8082_v53, %v1320_v48  ;;  %v17864_v48 = vcombine.low %v233_v22, %v245_v57 }
 0x404   :  { %8474 = vmatprep.subr.bf16.mxu1 %v18297_v35 }
 0x405   :  { %v8121_v30 = vpop.f32.mrf.mxu0  ;;  %8378 = vmatmul.mubr.bf16.vlgmr.msra.gmra.mxu0 %v22068_v25 }
 0x406   :  { %v8122_v14 = vadd.f32 %v8121_v30, %v8079_v1  ;;  %v8164_v52 = vpop.f32.mrf.mxu1  ;;  %8421 = vmatmul.mubr.bf16.vlgmr.msra.gmra.mxu1 %v22076_v39  ;;  %8432 = vmatpush1.bf16.msra.mxu0 %v17912_v4  ;;  %v221_v1 = vld [vmem:[#allocation5 + $0x3b0] sm:$0xff] }
 0x407   :  { %8475 = vmatpush1.bf16.msra.mxu1 %v18296_v49  ;;  %v22390_v17 = vpop.f32.mrf.mxu0  ;;  %8433 = vmatprep.subr.bf16.mxu0 %v17889_v29  ;;  %v593_v4 = vld [vmem:[#allocation5 + $0xf50] sm:$0xff]  ;;  %v17841_v49 = vcombine.high %v209_v36, %v221_v1  ;;  %v17840_v22 = vcombine.low %v209_v36, %v221_v1 }
 0x408   :  { %23156 = vst [vmem:[#allocation47_spill] sm:$0xff] %v22390_v17  ;;  %v22392_v55 = vadd.f32 %v8164_v52, %v8122_v14  ;;  %v22394_v35 = vpop.f32.mrf.mxu1  ;;  %8476 = vmatprep.subr.bf16.mxu1 %v18273_v47  ;;  %8463 = vmatprep.mubr.bf16.mxu0 %v22060_v58  ;;  %v18225_v14 = vcombine.high %v593_v4, %v605_v12  ;;  %v185_v52 = vld [vmem:[#allocation5 + $0x290] sm:$0xff] }
 0x409   :  { %23157 = vst [vmem:[#allocation48_spill] sm:$0xff] %v22394_v35  ;;  %v8125_v30 = vpop.f32.mrf.mxu0  ;;  %8506 = vmatprep.mubr.bf16.mxu1 %v22062_v63  ;;  %v197_v35 = vld [vmem:[#allocation5 + $0x2f0] sm:$0xff]  ;;  %v18224_v57 = vcombine.low %v593_v4, %v605_v12 }
 0x40a   :  { %v8751_v43 = vmul.f32 %v22392_v55, %v22392_v55  ;;  %v8126_v42 = vadd.f32 %v8125_v30, %v8083_v27  ;;  %8434 = vmatpush1.bf16.msra.mxu0 %v17888_v24  ;;  %v8168_v53 = vpop.f32.mrf.mxu1  ;;  %v581_v17 = vld [vmem:[#allocation5 + $0xef0] sm:$0xff]  ;;  %v17817_v0 = vcombine.high %v185_v52, %v197_v35 }
 0x40b   :  { %8477 = vmatpush1.bf16.msra.mxu1 %v18272_v9  ;;  %8435 = vmatprep.subr.bf16.mxu0 %v17865_v34  ;;  %v161_v34 = vld [vmem:[#allocation5 + $0x1d0] sm:$0xff]  ;;  %v18200_v36 = vcombine.low %v569_v41, %v581_v17 }
 0x40c   :  { %v8799_v29 = vmul.f32 %v8751_v43, %v22392_v55  ;;  %v22401_v47 = vadd.f32 %v8168_v53, %v8126_v42  ;;  %8478 = vmatprep.subr.bf16.mxu1 %v18249_v13  ;;  %v18201_v13 = vcombine.high %v569_v41, %v581_v17  ;;  %v173_v27 = vld [vmem:[#allocation5 + $0x230] sm:$0xff] }
 0x40d   :  { %v545_v30 = vld [vmem:[#allocation5 + $0xdd0] sm:$0xff]  ;;  %v17793_v1 = vcombine.high %v161_v34, %v173_v27 }
 0x40e   :  { %v8847_v38 = vmul.f32 0.044715, %v8799_v29  ;;  %v8775_v24 = vmul.f32 %v22401_v47, %v22401_v47  ;;  %8436 = vmatpush1.bf16.msra.mxu0 %v17864_v48  ;;  %v557_v43 = vld [vmem:[#allocation5 + $0xe30] sm:$0xff]  ;;  %v17816_v29 = vcombine.low %v185_v52, %v197_v35 }
 0x40f   :  { %8479 = vmatpush1.bf16.msra.mxu1 %v18248_v44  ;;  %8437 = vmatprep.subr.bf16.mxu0 %v17841_v49  ;;  %v137_v12 = vld [vmem:[#allocation5 + $0x110] sm:$0xff] }
 0x410   :  { %v8895_v10 = vadd.f32 %v8847_v38, %v22392_v55  ;;  %v8823_v9 = vmul.f32 %v8775_v24, %v22401_v47  ;;  %8480 = vmatprep.subr.bf16.mxu1 %v18225_v14  ;;  %v18177_v38 = vcombine.high %v545_v30, %v557_v43  ;;  %v149_v48 = vld [vmem:[#allocation5 + $0x170] sm:$0xff]  ;;  %v17792_v24 = vcombine.low %v161_v34, %v173_v27 }
 0x411   :  { %v521_v44 = vld [vmem:[#allocation5 + $0xd10] sm:$0xff]  ;;  %v17769_v35 = vcombine.high %v137_v12, %v149_v48 }
 0x412   :  { %v8943_v42 = vmul.f32 0.7978846, %v8895_v10  ;;  %v8871_v53 = vmul.f32 0.044715, %v8823_v9  ;;  %8438 = vmatpush1.bf16.msra.mxu0 %v17840_v22  ;;  %v533_v49 = vld [vmem:[#allocation5 + $0xd70] sm:$0xff]  ;;  %v18176_v22 = vcombine.low %v545_v30, %v557_v43  ;;  %v17768_v10 = vcombine.low %v137_v12, %v149_v48 }
 0x413   :  { %8481 = vmatpush1.bf16.msra.mxu1 %v18224_v57  ;;  %8439 = vmatprep.subr.bf16.mxu0 %v17817_v0  ;;  %v18153_v41 = vcombine.high %v521_v44, %v533_v49  ;;  %v113_v17 = vld [vmem:[#allocation5 + $0x50] sm:$0xff]  ;;  %v18152_v9 = vcombine.low %v521_v44, %v533_v49 }
 0x414   :  { %21796 = vtanh.f32 %v8943_v42  ;;  %v8919_v4 = vadd.f32 %v8871_v53, %v22401_v47  ;;  %8482 = vmatprep.subr.bf16.mxu1 %v18201_v13  ;;  %v125_v52 = vld [vmem:[#allocation5 + $0xb0] sm:$0xff] }
 0x415   :  { %v497_v57 = vld [vmem:[#allocation5 + $0xc50] sm:$0xff]  ;;  %v17745_v13 = vcombine.high %v113_v17, %v125_v52  ;;  %v17744_v43 = vcombine.low %v113_v17, %v125_v52 }
 0x416   :  { %v8967_v14 = vmul.f32 0.7978846, %v8919_v4  ;;  %8440 = vmatpush1.bf16.msra.mxu0 %v17816_v29  ;;  %v509_v0 = vld [vmem:[#allocation5 + $0xcb0] sm:$0xff] }
 0x417   :  { %8483 = vmatpush1.bf16.msra.mxu1 %v18200_v36  ;;  %8441 = vmatprep.subr.bf16.mxu0 %v17793_v1  ;;  %v18129_v42 = vcombine.high %v497_v57, %v509_v0  ;;  %v473_v34 = vld [vmem:[#allocation5 + $0xb90] sm:$0xff]  ;;  %v18128_v29 = vcombine.low %v497_v57, %v509_v0 }
 0x418   :  { %21798 = vtanh.f32 %v8967_v14  ;;  %8484 = vmatprep.subr.bf16.mxu1 %v18177_v38  ;;  %v485_v27 = vld [vmem:[#allocation5 + $0xbf0] sm:$0xff] }
 0x419   :  { %v857_v53 = vld [vmem:[#allocation5 + $0x1790] sm:$0xff]  ;;  %v18105_v36 = vcombine.high %v473_v34, %v485_v27  ;;  %v18104_v49 = vcombine.low %v473_v34, %v485_v27 }
 0x41a   :  { %8442 = vmatpush1.bf16.msra.mxu0 %v17792_v24  ;;  %v869_v30 = vld [vmem:[#allocation5 + $0x17f0] sm:$0xff] }
 0x41b   :  { %8485 = vmatpush1.bf16.msra.mxu1 %v18176_v22  ;;  %8443 = vmatprep.subr.bf16.mxu0 %v17769_v35  ;;  %v18489_v1 = vcombine.high %v857_v53, %v869_v30  ;;  %v449_v4 = vld [vmem:[#allocation5 + $0xad0] sm:$0xff]  ;;  %v18488_v14 = vcombine.low %v857_v53, %v869_v30 }
 0x41c   :  { %8486 = vmatprep.subr.bf16.mxu1 %v18153_v41  ;;  %v461_v38 = vld [vmem:[#allocation5 + $0xb30] sm:$0xff] }
 0x41d   :  { %v833_v48 = vld [vmem:[#allocation5 + $0x16d0] sm:$0xff]  ;;  %v18081_v24 = vcombine.high %v449_v4, %v461_v38 }
 0x41e   :  { %8444 = vmatpush1.bf16.msra.mxu0 %v17768_v10  ;;  %v845_v44 = vld [vmem:[#allocation5 + $0x1730] sm:$0xff]  ;;  %v8703_v10 = vmul.f32 0.5, %v22392_v55 }
 0x41f   :  { %8487 = vmatpush1.bf16.msra.mxu1 %v18152_v9  ;;  %8445 = vmatprep.subr.bf16.mxu0 %v17745_v13  ;;  %v18465_v22 = vcombine.high %v833_v48, %v845_v44  ;;  %v425_v35 = vld [vmem:[#allocation5 + $0xa10] sm:$0xff]  ;;  %v8727_v9 = vmul.f32 0.5, %v22401_v47  ;;  %v18080_v13 = vcombine.low %v449_v4, %v461_v38  ;;  %v18464_v34 = vcombine.low %v833_v48, %v845_v44 }
 0x420   :  { %8488 = vmatprep.subr.bf16.mxu1 %v18129_v42  ;;  %v437_v41 = vld [vmem:[#allocation5 + $0xa70] sm:$0xff] }
 0x421   :  { %v21797_v12 = vpop.eup %21796  ;;  %v809_v57 = vld [vmem:[#allocation5 + $0x1610] sm:$0xff]  ;;  %v18057_v27 = vcombine.high %v425_v35, %v437_v41  ;;  %v18056_v8 = vcombine.low %v425_v35, %v437_v41 }
 0x422   :  { %8446 = vmatpush1.bf16.msra.mxu0 %v17744_v43  ;;  %v9039_v17 = vadd.f32 1.0, %v21797_v12  ;;  %v821_v0 = vld [vmem:[#allocation5 + $0x1670] sm:$0xff] }
 0x423   :  { %8489 = vmatpush1.bf16.msra.mxu1 %v18128_v29  ;;  %8447 = vmatprep.subr.bf16.mxu0 %v18105_v36  ;;  %v18441_v53 = vcombine.high %v809_v57, %v821_v0  ;;  %v401_v30 = vld [vmem:[#allocation5 + $0x950] sm:$0xff]  ;;  %v18440_v47 = vcombine.low %v809_v57, %v821_v0 }
 0x424   :  { %8490 = vmatprep.subr.bf16.mxu1 %v18489_v1  ;;  %v413_v43 = vld [vmem:[#allocation5 + $0x9b0] sm:$0xff]  ;;  %v9087_v29 = vmul.f32 %v9039_v17, %v8703_v10 }
 0x425   :  { %v21799_v52 = vpop.eup %21798  ;;  %v785_v1 = vld [vmem:[#allocation5 + $0x1550] sm:$0xff]  ;;  %v18033_v4 = vcombine.high %v401_v30, %v413_v43 }
 0x426   :  { %8448 = vmatpush2.bf16.msra.mxu0 %v18104_v49  ;;  %v9063_v42 = vadd.f32 1.0, %v21799_v52  ;;  %v797_v12 = vld [vmem:[#allocation5 + $0x15b0] sm:$0xff] }
 0x427   :  { %8491 = vmatpush2.bf16.msra.mxu1 %v18488_v14  ;;  %8449 = vmatprep.subr.bf16.mxu0 %v18081_v24  ;;  %v18417_v38 = vcombine.high %v785_v1, %v797_v12  ;;  %v377_v48 = vld [vmem:[#allocation5 + $0x890] sm:$0xff]  ;;  %v18032_v24 = vcombine.low %v401_v30, %v413_v43 }
 0x428   :  { %8492 = vmatprep.subr.bf16.mxu1 %v18465_v22  ;;  %v9111_v36 = vmul.f32 %v9063_v42, %v8727_v9  ;;  %v389_v44 = vld [vmem:[#allocation5 + $0x8f0] sm:$0xff]  ;;  %v18416_v22 = vcombine.low %v785_v1, %v797_v12 }
 0x429   :  { %v761_v49 = vld [vmem:[#allocation5 + $0x1490] sm:$0xff]  ;;  %v18009_v17 = vcombine.high %v377_v48, %v389_v44  ;;  %v18008_v57 = vcombine.low %v377_v48, %v389_v44 }
 0x42a   :  { %8450 = vmatpush2.bf16.msra.mxu0 %v18080_v13  ;;  %v22410_v55 = vpack.c.bf16 %v9111_v36, %v9087_v29  ;;  %v773_v14 = vld [vmem:[#allocation5 + $0x14f0] sm:$0xff] }
 0x42b   :  { %8493 = vmatpush2.bf16.msra.mxu1 %v18464_v34  ;;  %8451 = vmatprep.subr.bf16.mxu0 %v18057_v27  ;;  %v18393_v35 = vcombine.high %v761_v49, %v773_v14  ;;  %v353_v41 = vld [vmem:[#allocation5 + $0x7d0] sm:$0xff]  ;;  %v18392_v0 = vcombine.low %v761_v49, %v773_v14 }
 0x42c   :  { %23158 = vst [vmem:[#allocation49_spill] sm:$0xff] %v22410_v55  ;;  %8494 = vmatprep.subr.bf16.mxu1 %v18441_v53  ;;  %v365_v52 = vld [vmem:[#allocation5 + $0x830] sm:$0xff]  ;;  %v198_v55 = vld [vmem:[#allocation5 + $0x2f8] sm:$0xff] }
 0x42d   :  { %v737_v10 = vld [vmem:[#allocation5 + $0x13d0] sm:$0xff]  ;;  %v17985_v13 = vcombine.high %v353_v41, %v365_v52  ;;  %v17984_v30 = vcombine.low %v353_v41, %v365_v52 }
 0x42e   :  { %8452 = vmatpush2.bf16.msra.mxu0 %v18056_v8  ;;  %v749_v9 = vld [vmem:[#allocation5 + $0x1430] sm:$0xff] }
 0x42f   :  { %8495 = vmatpush2.bf16.msra.mxu1 %v18440_v47  ;;  %8453 = vmatprep.subr.bf16.mxu0 %v18033_v4  ;;  %v18369_v42 = vcombine.high %v737_v10, %v749_v9  ;;  %v329_v8 = vld [vmem:[#allocation5 + $0x710] sm:$0xff]  ;;  %v18368_v43 = vcombine.low %v737_v10, %v749_v9 }
 0x430   :  { %8496 = vmatprep.subr.bf16.mxu1 %v18417_v38  ;;  %v341_v34 = vld [vmem:[#allocation5 + $0x770] sm:$0xff] }
 0x431   :  { %v713_v27 = vld [vmem:[#allocation5 + $0x1310] sm:$0xff]  ;;  %v17961_v29 = vcombine.high %v329_v8, %v341_v34  ;;  %v17960_v38 = vcombine.low %v329_v8, %v341_v34 }
 0x432   :  { %8454 = vmatpush2.bf16.msra.mxu0 %v18032_v24  ;;  %v725_v53 = vld [vmem:[#allocation5 + $0x1370] sm:$0xff] }
 0x433   :  { %8497 = vmatpush2.bf16.msra.mxu1 %v18416_v22  ;;  %8455 = vmatprep.subr.bf16.mxu0 %v18009_v17  ;;  %v18345_v36 = vcombine.high %v713_v27, %v725_v53  ;;  %v305_v1 = vld [vmem:[#allocation5 + $0x650] sm:$0xff]  ;;  %v18344_v48 = vcombine.low %v713_v27, %v725_v53  ;;  %v282_v22 = vld [vmem:[#allocation5 + $0x598] sm:$0xff]  ;;  %v22416_v27 = vpop.f32.mrf.mxu0 }
 0x434   :  { %8498 = vmatprep.subr.bf16.mxu1 %v18393_v35  ;;  %v317_v12 = vld [vmem:[#allocation5 + $0x6b0] sm:$0xff]  ;;  %v294_v17 = vld [vmem:[#allocation5 + $0x5f8] sm:$0xff] }
 0x435   :  { %v689_v47 = vld [vmem:[#allocation5 + $0x1250] sm:$0xff]  ;;  %v17937_v44 = vcombine.high %v305_v1, %v317_v12  ;;  %v17936_v35 = vcombine.low %v305_v1, %v317_v12  ;;  %v17915_v9 = vcombine.high %v282_v22, %v294_v17  ;;  %v17914_v53 = vcombine.low %v282_v22, %v294_v17 }
 0x436   :  { %8456 = vmatpush2.bf16.msra.mxu0 %v18008_v57  ;;  %v701_v4 = vld [vmem:[#allocation5 + $0x12b0] sm:$0xff] }
 0x437   :  { %8499 = vmatpush2.bf16.msra.mxu1 %v18392_v0  ;;  %8457 = vmatprep.subr.bf16.mxu0 %v17985_v13  ;;  %v18321_v49 = vcombine.high %v689_v47, %v701_v4  ;;  %v1049_v14 = vld [vmem:[#allocation5 + $0x1d90] sm:$0xff]  ;;  %v18320_v41 = vcombine.low %v689_v47, %v701_v4  ;;  %v258_v13 = vld [vmem:[#allocation5 + $0x4d8] sm:$0xff] }
 0x438   :  { %8500 = vmatprep.subr.bf16.mxu1 %v18369_v42  ;;  %v1061_v24 = vld [vmem:[#allocation5 + $0x1df0] sm:$0xff]  ;;  %v270_v42 = vld [vmem:[#allocation5 + $0x538] sm:$0xff] }
 0x439   :  { %v22412_v52 = vld [vmem:[#allocation7 + $0x10] sm:$0xff]  ;;  %v18681_v10 = vcombine.high %v1049_v14, %v1061_v24  ;;  %v18680_v34 = vcombine.low %v1049_v14, %v1061_v24  ;;  %v234_v47 = vld [vmem:[#allocation5 + $0x418] sm:$0xff]  ;;  %v17890_v14 = vcombine.low %v258_v13, %v270_v42 }
 0x43a   :  { %8458 = vmatpush2.bf16.msra.mxu0 %v17984_v30  ;;  %v1025_v57 = vld [vmem:[#allocation5 + $0x1cd0] sm:$0xff]  ;;  %v1328_v8 = vrot.slane %v22412_v52, %v22089_v61  ;;  %v246_v4 = vld [vmem:[#allocation5 + $0x478] sm:$0xff] }
 0x43b   :  { %8501 = vmatpush2.bf16.msra.mxu1 %v18368_v43  ;;  %8459 = vmatprep.subr.bf16.mxu0 %v17961_v29  ;;  %v1037_v0 = vld [vmem:[#allocation5 + $0x1d30] sm:$0xff]  ;;  %v22418_v43 = vpop.f32.mrf.mxu1  ;;  %v17891_v29 = vcombine.high %v258_v13, %v270_v42  ;;  %v17866_v42 = vcombine.low %v234_v47, %v246_v4  ;;  %v186_v61 = vld [vmem:[#allocation5 + $0x298] sm:$0xff] }
 0x43c   :  { %8502 = vmatprep.subr.bf16.mxu1 %v18345_v36  ;;  %v18657_v30 = vcombine.high %v1025_v57, %v1037_v0  ;;  %23159 = vst [vmem:[#allocation50_spill] sm:$0xff] %v22418_v43  ;;  %v1001_v36 = vld [vmem:[#allocation5 + $0x1c10] sm:$0xff]  ;;  %v558_v43 = vld [vmem:[#allocation5 + $0xe38] sm:$0xff] }
 0x43d   :  { %v1013_v1 = vld [vmem:[#allocation5 + $0x1c70] sm:$0xff] }
 0x43e   :  { %8460 = vmatpush2.bf16.msra.mxu0 %v17960_v38  ;;  %v18633_v24 = vcombine.high %v1001_v36, %v1013_v1 }
 0x43f   :  { %8503 = vmatpush2.bf16.msra.mxu1 %v18344_v48  ;;  %8461 = vmatprep.subr.bf16.mxu0 %v17937_v44  ;;  %v18656_v44 = vcombine.low %v1025_v57, %v1037_v0  ;;  %v18632_v0 = vcombine.low %v1001_v36, %v1013_v1  ;;  %v17819_v36 = vcombine.high %v186_v61, %v198_v55  ;;  %v929_v1 = vld [vmem:[#allocation5 + $0x19d0] sm:$0xff] }
 0x440   :  { %8504 = vmatprep.subr.bf16.mxu1 %v18321_v49 }
 0x442   :  { %8462 = vmatpush2.bf16.msra.mxu0 %v17936_v35  ;;  %v17867_v35 = vcombine.high %v234_v47, %v246_v4  ;;  %v162_v47 = vld [vmem:[#allocation5 + $0x1d8] sm:$0xff] }
 0x443   :  { %8505 = vmatpush2.bf16.msra.mxu1 %v18320_v41  ;;  %8517 = vmatprep.subr.bf16.mxu0 %v18681_v10  ;;  %v977_v41 = vld [vmem:[#allocation5 + $0x1b50] sm:$0xff]  ;;  %v174_v4 = vld [vmem:[#allocation5 + $0x238] sm:$0xff] }
 0x444   :  { %8560 = vmatprep.subr.bf16.mxu1 %v17915_v9  ;;  %v989_v10 = vld [vmem:[#allocation5 + $0x1bb0] sm:$0xff] }
 0x445   :  { %v8207_v12 = vpop.f32.mrf.mxu0  ;;  %8464 = vmatmul.mubr.bf16.vlgmr.msra.gmra.mxu0 %v22066_v21 }
 0x446   :  { %v8208_v38 = vadd.f32 %v8207_v12, %v1328_v8  ;;  %v8250_v48 = vpop.f32.mrf.mxu1  ;;  %8507 = vmatmul.mubr.bf16.vlgmr.msra.gmra.mxu1 %v22068_v25  ;;  %8518 = vmatpush1.bf16.msra.mxu0 %v18680_v34  ;;  %v210_v12 = vld [vmem:[#allocation5 + $0x358] sm:$0xff] }
 0x447   :  { %8561 = vmatpush1.bf16.msra.mxu1 %v17914_v53  ;;  %v22422_v49 = vpop.f32.mrf.mxu0  ;;  %8519 = vmatprep.subr.bf16.mxu0 %v18657_v30  ;;  %v222_v34 = vld [vmem:[#allocation5 + $0x3b8] sm:$0xff]  ;;  %v18609_v53 = vcombine.high %v977_v41, %v989_v10 }
 0x448   :  { %23160 = vst [vmem:[#allocation51_spill] sm:$0xff] %v22422_v49  ;;  %v22424_v22 = vadd.f32 %v8250_v48, %v8208_v38  ;;  %v22426_v17 = vpop.f32.mrf.mxu1  ;;  %8562 = vmatprep.subr.bf16.mxu1 %v17891_v29  ;;  %8549 = vmatprep.mubr.bf16.mxu0 %v22070_v32  ;;  %v17843_v29 = vcombine.high %v210_v12, %v222_v34  ;;  %v953_v38 = vld [vmem:[#allocation5 + $0x1a90] sm:$0xff] }
 0x449   :  { %23161 = vst [vmem:[#allocation52_spill] sm:$0xff] %v22426_v17  ;;  %v8211_v9 = vpop.f32.mrf.mxu0  ;;  %8592 = vmatprep.mubr.bf16.mxu1 %v22060_v58  ;;  %v965_v48 = vld [vmem:[#allocation5 + $0x1af0] sm:$0xff]  ;;  %v18608_v17 = vcombine.low %v977_v41, %v989_v10  ;;  %v17842_v58 = vcombine.low %v210_v12, %v222_v34  ;;  %v138_v10 = vld [vmem:[#allocation5 + $0x118] sm:$0xff]  ;;  %v17794_v34 = vcombine.low %v162_v47, %v174_v4 }
 0x44a   :  { %v8212_v57 = vadd.f32 %v8211_v9, %v1328_v8  ;;  %8520 = vmatpush1.bf16.msra.mxu0 %v18656_v44  ;;  %v8254_v13 = vpop.f32.mrf.mxu1  ;;  %v18585_v8 = vcombine.high %v953_v38, %v965_v48  ;;  %v941_v44 = vld [vmem:[#allocation5 + $0x1a30] sm:$0xff]  ;;  %v17795_v9 = vcombine.high %v162_v47, %v174_v4 }
 0x44b   :  { %8563 = vmatpush1.bf16.msra.mxu1 %v17890_v14  ;;  %8521 = vmatprep.subr.bf16.mxu0 %v18633_v24  ;;  %v18584_v14 = vcombine.low %v953_v38, %v965_v48  ;;  %v17818_v24 = vcombine.low %v186_v61, %v198_v55  ;;  %v917_v41 = vld [vmem:[#allocation5 + $0x1970] sm:$0xff]  ;;  %v18560_v12 = vcombine.low %v929_v1, %v941_v44  ;;  %v126_v38 = vld [vmem:[#allocation5 + $0xb8] sm:$0xff] }
 0x44c   :  { %v22430_v30 = vadd.f32 %v8254_v13, %v8212_v57  ;;  %8564 = vmatprep.subr.bf16.mxu1 %v17867_v35  ;;  %v18561_v35 = vcombine.high %v929_v1, %v941_v44  ;;  %v905_v57 = vld [vmem:[#allocation5 + $0x1910] sm:$0xff]  ;;  %v474_v1 = vld [vmem:[#allocation5 + $0xb98] sm:$0xff] }
 0x44d   :  { %v18537_v13 = vcombine.high %v905_v57, %v917_v41  ;;  %v18536_v61 = vcombine.low %v905_v57, %v917_v41  ;;  %v486_v44 = vld [vmem:[#allocation5 + $0xbf8] sm:$0xff] }
 0x44e   :  { %8522 = vmatpush1.bf16.msra.mxu0 %v18632_v0  ;;  %v150_v0 = vld [vmem:[#allocation5 + $0x178] sm:$0xff] }
 0x44f   :  { %8565 = vmatpush1.bf16.msra.mxu1 %v17866_v42  ;;  %8523 = vmatprep.subr.bf16.mxu0 %v18609_v53  ;;  %v17771_v42 = vcombine.high %v138_v10, %v150_v0  ;;  %v893_v53 = vld [vmem:[#allocation5 + $0x18b0] sm:$0xff]  ;;  %v17770_v55 = vcombine.low %v138_v10, %v150_v0  ;;  %v450_v57 = vld [vmem:[#allocation5 + $0xad8] sm:$0xff]  ;;  %v18106_v0 = vcombine.low %v474_v1, %v486_v44 }
 0x450   :  { %8566 = vmatprep.subr.bf16.mxu1 %v17843_v29  ;;  %v114_v29 = vld [vmem:[#allocation5 + $0x58] sm:$0xff] }
 0x451   :  { %v17746_v4 = vcombine.low %v114_v29, %v126_v38  ;;  %v462_v41 = vld [vmem:[#allocation5 + $0xb38] sm:$0xff] }
 0x452   :  { %8524 = vmatpush1.bf16.msra.mxu0 %v18608_v17  ;;  %v881_v17 = vld [vmem:[#allocation5 + $0x1850] sm:$0xff] }
 0x453   :  { %8567 = vmatpush1.bf16.msra.mxu1 %v17842_v58  ;;  %8525 = vmatprep.subr.bf16.mxu0 %v18585_v8  ;;  %v18513_v48 = vcombine.high %v881_v17, %v893_v53  ;;  %v17747_v58 = vcombine.high %v114_v29, %v126_v38  ;;  %v1241_v8 = vld [vmem:[#allocation5 + $0x2390] sm:$0xff]  ;;  %v18512_v47 = vcombine.low %v881_v17, %v893_v53  ;;  %v426_v17 = vld [vmem:[#allocation5 + $0xa18] sm:$0xff] }
 0x454   :  { %8568 = vmatprep.subr.bf16.mxu1 %v17819_v36  ;;  %v1253_v36 = vld [vmem:[#allocation5 + $0x23f0] sm:$0xff]  ;;  %v438_v53 = vld [vmem:[#allocation5 + $0xa78] sm:$0xff]  ;;  %v18082_v38 = vcombine.low %v450_v57, %v462_v41 }
 0x455   :  { %v18872_v10 = vcombine.low %v1241_v8, %v1253_v36 }
 0x456   :  { %8526 = vmatpush1.bf16.msra.mxu0 %v18584_v14  ;;  %v18873_v14 = vcombine.high %v1241_v8, %v1253_v36  ;;  %v402_v8 = vld [vmem:[#allocation5 + $0x958] sm:$0xff] }
 0x457   :  { %8569 = vmatpush1.bf16.msra.mxu1 %v17818_v24  ;;  %8527 = vmatprep.subr.bf16.mxu0 %v18561_v35  ;;  %v18107_v24 = vcombine.high %v474_v1, %v486_v44  ;;  %v1217_v35 = vld [vmem:[#allocation5 + $0x22d0] sm:$0xff]  ;;  %v414_v36 = vld [vmem:[#allocation5 + $0x9b8] sm:$0xff]  ;;  %v18058_v44 = vcombine.low %v426_v17, %v438_v53 }
 0x458   :  { %8570 = vmatprep.subr.bf16.mxu1 %v17795_v9  ;;  %v1229_v9 = vld [vmem:[#allocation5 + $0x2330] sm:$0xff] }
 0x459   :  { %v18848_v29 = vcombine.low %v1217_v35, %v1229_v9 }
 0x45a   :  { %8528 = vmatpush1.bf16.msra.mxu0 %v18560_v12  ;;  %v18849_v12 = vcombine.high %v1217_v35, %v1229_v9  ;;  %v378_v35 = vld [vmem:[#allocation5 + $0x898] sm:$0xff] }
 0x45b   :  { %8571 = vmatpush1.bf16.msra.mxu1 %v17794_v34  ;;  %8529 = vmatprep.subr.bf16.mxu0 %v18537_v13  ;;  %v18083_v34 = vcombine.high %v450_v57, %v462_v41  ;;  %v1193_v13 = vld [vmem:[#allocation5 + $0x2210] sm:$0xff]  ;;  %v390_v9 = vld [vmem:[#allocation5 + $0x8f8] sm:$0xff]  ;;  %v18034_v41 = vcombine.low %v402_v8, %v414_v36 }
 0x45c   :  { %8572 = vmatprep.subr.bf16.mxu1 %v17771_v42  ;;  %v1205_v42 = vld [vmem:[#allocation5 + $0x2270] sm:$0xff] }
 0x45d   :  { %v18824_v1 = vcombine.low %v1193_v13, %v1205_v42 }
 0x45e   :  { %8530 = vmatpush1.bf16.msra.mxu0 %v18536_v61  ;;  %v18825_v61 = vcombine.high %v1193_v13, %v1205_v42  ;;  %v354_v13 = vld [vmem:[#allocation5 + $0x7d8] sm:$0xff] }
 0x45f   :  { %8573 = vmatpush1.bf16.msra.mxu1 %v17770_v55  ;;  %8531 = vmatprep.subr.bf16.mxu0 %v18513_v48  ;;  %v18059_v55 = vcombine.high %v426_v17, %v438_v53  ;;  %v1169_v48 = vld [vmem:[#allocation5 + $0x2150] sm:$0xff]  ;;  %v366_v42 = vld [vmem:[#allocation5 + $0x838] sm:$0xff]  ;;  %v18010_v53 = vcombine.low %v378_v35, %v390_v9 }
 0x460   :  { %8574 = vmatprep.subr.bf16.mxu1 %v17747_v58  ;;  %v1181_v58 = vld [vmem:[#allocation5 + $0x21b0] sm:$0xff] }
 0x461   :  { %v18800_v57 = vcombine.low %v1169_v48, %v1181_v58 }
 0x462   :  { %8532 = vmatpush1.bf16.msra.mxu0 %v18512_v47  ;;  %v18801_v47 = vcombine.high %v1169_v48, %v1181_v58  ;;  %v330_v48 = vld [vmem:[#allocation5 + $0x718] sm:$0xff] }
 0x463   :  { %8575 = vmatpush1.bf16.msra.mxu1 %v17746_v4  ;;  %8533 = vmatprep.subr.bf16.mxu0 %v18873_v14  ;;  %v18035_v4 = vcombine.high %v402_v8, %v414_v36  ;;  %v1145_v14 = vld [vmem:[#allocation5 + $0x2090] sm:$0xff]  ;;  %v342_v58 = vld [vmem:[#allocation5 + $0x778] sm:$0xff]  ;;  %v17986_v36 = vcombine.low %v354_v13, %v366_v42 }
 0x464   :  { %8576 = vmatprep.subr.bf16.mxu1 %v18107_v24  ;;  %v1157_v24 = vld [vmem:[#allocation5 + $0x20f0] sm:$0xff] }
 0x465   :  { %v18776_v17 = vcombine.low %v1145_v14, %v1157_v24 }
 0x466   :  { %8534 = vmatpush2.bf16.msra.mxu0 %v18872_v10  ;;  %v18777_v10 = vcombine.high %v1145_v14, %v1157_v24  ;;  %v306_v14 = vld [vmem:[#allocation5 + $0x658] sm:$0xff] }
 0x467   :  { %8577 = vmatpush2.bf16.msra.mxu1 %v18106_v0  ;;  %8535 = vmatprep.subr.bf16.mxu0 %v18849_v12  ;;  %v18011_v0 = vcombine.high %v378_v35, %v390_v9  ;;  %v1121_v12 = vld [vmem:[#allocation5 + $0x1fd0] sm:$0xff]  ;;  %v318_v24 = vld [vmem:[#allocation5 + $0x6b8] sm:$0xff]  ;;  %v17962_v9 = vcombine.low %v330_v48, %v342_v58 }
 0x468   :  { %8578 = vmatprep.subr.bf16.mxu1 %v18083_v34  ;;  %v1133_v34 = vld [vmem:[#allocation5 + $0x2030] sm:$0xff] }
 0x469   :  { %v18752_v8 = vcombine.low %v1121_v12, %v1133_v34 }
 0x46a   :  { %8536 = vmatpush2.bf16.msra.mxu0 %v18848_v29  ;;  %v18753_v29 = vcombine.high %v1121_v12, %v1133_v34  ;;  %v1050_v12 = vld [vmem:[#allocation5 + $0x1d98] sm:$0xff] }
 0x46b   :  { %8579 = vmatpush2.bf16.msra.mxu1 %v18082_v38  ;;  %8537 = vmatprep.subr.bf16.mxu0 %v18825_v61  ;;  %v17987_v38 = vcombine.high %v354_v13, %v366_v42  ;;  %v1097_v61 = vld [vmem:[#allocation5 + $0x1f10] sm:$0xff]  ;;  %v1062_v34 = vld [vmem:[#allocation5 + $0x1df8] sm:$0xff]  ;;  %v17938_v42 = vcombine.low %v306_v14, %v318_v24 }
 0x46c   :  { %8580 = vmatprep.subr.bf16.mxu1 %v18059_v55  ;;  %v1109_v55 = vld [vmem:[#allocation5 + $0x1f70] sm:$0xff] }
 0x46d   :  { %v18728_v35 = vcombine.low %v1097_v61, %v1109_v55 }
 0x46e   :  { %8538 = vmatpush2.bf16.msra.mxu0 %v18824_v1  ;;  %v18729_v1 = vcombine.high %v1097_v61, %v1109_v55  ;;  %v1026_v61 = vld [vmem:[#allocation5 + $0x1cd8] sm:$0xff] }
 0x46f   :  { %8581 = vmatpush2.bf16.msra.mxu1 %v18058_v44  ;;  %8539 = vmatprep.subr.bf16.mxu0 %v18801_v47  ;;  %v17963_v44 = vcombine.high %v330_v48, %v342_v58  ;;  %v1073_v47 = vld [vmem:[#allocation5 + $0x1e50] sm:$0xff]  ;;  %v1038_v55 = vld [vmem:[#allocation5 + $0x1d38] sm:$0xff]  ;;  %v22432_v58 = vpop.f32.mrf.mxu0 }
 0x470   :  { %8582 = vmatprep.subr.bf16.mxu1 %v18035_v4  ;;  %v1085_v4 = vld [vmem:[#allocation5 + $0x1eb0] sm:$0xff]  ;;  %23162 = vst [vmem:[#allocation53_spill] sm:$0xff] %v22432_v58  ;;  %v546_v58 = vld [vmem:[#allocation5 + $0xdd8] sm:$0xff] }
 0x471   :  { %v18704_v13 = vcombine.low %v1073_v47, %v1085_v4 }
 0x472   :  { %8540 = vmatpush2.bf16.msra.mxu0 %v18800_v57  ;;  %v18705_v57 = vcombine.high %v1073_v47, %v1085_v4  ;;  %v630_v47 = vld [vmem:[#allocation5 + $0x1078] sm:$0xff] }
 0x473   :  { %8583 = vmatpush2.bf16.msra.mxu1 %v18034_v41  ;;  %8541 = vmatprep.subr.bf16.mxu0 %v18777_v10  ;;  %v17939_v41 = vcombine.high %v306_v14, %v318_v24  ;;  %v666_v10 = vld [vmem:[#allocation5 + $0x1198] sm:$0xff] }
 0x474   :  { %8584 = vmatprep.subr.bf16.mxu1 %v18011_v0  ;;  %v678_v0 = vld [vmem:[#allocation5 + $0x11f8] sm:$0xff] }
 0x475   :  { %v18298_v48 = vcombine.low %v666_v10, %v678_v0  ;;  %v1002_v14 = vld [vmem:[#allocation5 + $0x1c18] sm:$0xff] }
 0x476   :  { %8542 = vmatpush2.bf16.msra.mxu0 %v18776_v17  ;;  %v18299_v17 = vcombine.high %v666_v10, %v678_v0  ;;  %v1014_v24 = vld [vmem:[#allocation5 + $0x1c78] sm:$0xff]  ;;  %v18658_v10 = vcombine.low %v1026_v61, %v1038_v55 }
 0x477   :  { %8585 = vmatpush2.bf16.msra.mxu1 %v18010_v53  ;;  %8543 = vmatprep.subr.bf16.mxu0 %v18753_v29  ;;  %v18683_v53 = vcombine.high %v1050_v12, %v1062_v34  ;;  %v642_v29 = vld [vmem:[#allocation5 + $0x10d8] sm:$0xff] }
 0x478   :  { %8586 = vmatprep.subr.bf16.mxu1 %v17987_v38  ;;  %v654_v38 = vld [vmem:[#allocation5 + $0x1138] sm:$0xff] }
 0x47a   :  { %8544 = vmatpush2.bf16.msra.mxu0 %v18752_v8  ;;  %v18682_v8 = vcombine.low %v1050_v12, %v1062_v34  ;;  %v18635_v34 = vcombine.high %v1002_v14, %v1014_v24 }
 0x47b   :  { %8587 = vmatpush2.bf16.msra.mxu1 %v17986_v36  ;;  %8545 = vmatprep.subr.bf16.mxu0 %v18729_v1  ;;  %v18275_v36 = vcombine.high %v642_v29, %v654_v38  ;;  %v18659_v1 = vcombine.high %v1026_v61, %v1038_v55  ;;  %v22455_v55 = vld [vmem:[#allocation7] sm:$0xff] }
 0x47c   :  { %8588 = vmatprep.subr.bf16.mxu1 %v17963_v44  ;;  %v618_v44 = vld [vmem:[#allocation5 + $0x1018] sm:$0xff] }
 0x47d   :  { %v18251_v0 = vcombine.high %v618_v44, %v630_v47  ;;  %v18250_v61 = vcombine.low %v618_v44, %v630_v47  ;;  %v954_v47 = vld [vmem:[#allocation5 + $0x1a98] sm:$0xff] }
 0x47e   :  { %8546 = vmatpush2.bf16.msra.mxu0 %v18728_v35 }
 0x47f   :  { %8589 = vmatpush2.bf16.msra.mxu1 %v17962_v9  ;;  %8547 = vmatprep.subr.bf16.mxu0 %v18705_v57  ;;  %v18274_v9 = vcombine.low %v642_v29, %v654_v38  ;;  %v22440_v57 = vsub.s32 1, %v22086_v50 }
 0x480   :  { %8590 = vmatprep.subr.bf16.mxu1 %v17939_v41 }
 0x482   :  { %8548 = vmatpush2.bf16.msra.mxu0 %v18704_v13  ;;  %v606_v13 = vld [vmem:[#allocation5 + $0xfb8] sm:$0xff] }
 0x483   :  { %8591 = vmatpush2.bf16.msra.mxu1 %v17938_v42  ;;  %8603 = vmatprep.subr.bf16.mxu0 %v18299_v17  ;;  %v978_v17 = vld [vmem:[#allocation5 + $0x1b58] sm:$0xff] }
 0x484   :  { %8646 = vmatprep.subr.bf16.mxu1 %v18683_v53  ;;  %v990_v53 = vld [vmem:[#allocation5 + $0x1bb8] sm:$0xff] }
 0x485   :  { %v8293_v4 = vpop.f32.mrf.mxu0  ;;  %8550 = vmatmul.mubr.bf16.vlgmr.msra.gmra.mxu0 %v22076_v39 }
 0x486   :  { %v22436_v35 = vadd.f32 %v8293_v4, %v22424_v22  ;;  %8593 = vmatmul.mubr.bf16.vlgmr.msra.gmra.mxu1 %v22066_v21  ;;  %8604 = vmatpush1.bf16.msra.mxu0 %v18298_v48  ;;  %v594_v22 = vld [vmem:[#allocation5 + $0xf58] sm:$0xff]  ;;  %v22448_v21 = vsub.s32 3, %v22086_v50  ;;  %v18634_v48 = vcombine.low %v1002_v14, %v1014_v24 }
 0x487   :  { %8647 = vmatpush1.bf16.msra.mxu1 %v18682_v8  ;;  %v22442_v41 = vpop.f32.mrf.mxu0  ;;  %8605 = vmatprep.subr.bf16.mxu0 %v18275_v36  ;;  %v18227_v8 = vcombine.high %v594_v22, %v606_v13  ;;  %v570_v4 = vld [vmem:[#allocation5 + $0xe98] sm:$0xff]  ;;  %v18226_v24 = vcombine.low %v594_v22, %v606_v13 }
 0x488   :  { %23163 = vst [vmem:[#allocation54_spill] sm:$0xff] %v22442_v41  ;;  %v8753_v12 = vmul.f32 %v22436_v35, %v22436_v35  ;;  %8648 = vmatprep.subr.bf16.mxu1 %v18659_v1  ;;  %8635 = vmatprep.mubr.bf16.mxu0 %v22062_v63  ;;  %23164 = vst [vmem:[#allocation55_spill] sm:$0xff] %v22448_v21  ;;  %v1268_v63 = vrot.slane %v22455_v55, %v22440_v57  ;;  %v942_v22 = vld [vmem:[#allocation5 + $0x1a38] sm:$0xff] }
 0x489   :  { %v8297_v42 = vpop.f32.mrf.mxu0  ;;  %8678 = vmatprep.mubr.bf16.mxu1 %v22070_v32  ;;  %v18611_v1 = vcombine.high %v978_v17, %v990_v53  ;;  %v1276_v44 = vrot.slane %v22455_v55, %v22448_v21 }
 0x48a   :  { %v8801_v29 = vmul.f32 %v8753_v12, %v22436_v35  ;;  %v22453_v38 = vadd.f32 %v8297_v42, %v22430_v30  ;;  %8606 = vmatpush1.bf16.msra.mxu0 %v18274_v9  ;;  %v582_v30 = vld [vmem:[#allocation5 + $0xef8] sm:$0xff]  ;;  %v7182_v9 = vadd.f32 %v22104_v46, %v1268_v63 }
 0x48b   :  { %8649 = vmatpush1.bf16.msra.mxu1 %v18658_v10  ;;  %8607 = vmatprep.subr.bf16.mxu0 %v18251_v0  ;;  %v966_v12 = vld [vmem:[#allocation5 + $0x1af8] sm:$0xff]  ;;  %v7178_v0 = vadd.f32 %v22094_v19, %v1268_v63  ;;  %v18203_v42 = vcombine.high %v570_v4, %v582_v30  ;;  %v18179_v63 = vcombine.high %v546_v58, %v558_v43 }
 0x48c   :  { %v8849_v36 = vmul.f32 0.044715, %v8801_v29  ;;  %v8777_v32 = vmul.f32 %v22453_v38, %v22453_v38  ;;  %8650 = vmatprep.subr.bf16.mxu1 %v18635_v34  ;;  %v18610_v34 = vcombine.low %v978_v17, %v990_v53  ;;  %v7311_v29 = vadd.f32 %v22143_v62, %v1276_v44 }
 0x48d   :  { %v18587_v49 = vcombine.high %v954_v47, %v966_v12  ;;  %v18202_v17 = vcombine.low %v570_v4, %v582_v30  ;;  %v18586_v53 = vcombine.low %v954_v47, %v966_v12  ;;  %v18178_v30 = vcombine.low %v546_v58, %v558_v43  ;;  %v498_v47 = vld [vmem:[#allocation5 + $0xc58] sm:$0xff] }
 0x48e   :  { %v8897_v10 = vadd.f32 %v8849_v36, %v22436_v35  ;;  %v8825_v14 = vmul.f32 %v8777_v32, %v22453_v38  ;;  %8608 = vmatpush1.bf16.msra.mxu0 %v18250_v61  ;;  %v7225_v36 = vadd.f32 %v22130_v11, %v7182_v9  ;;  %v7307_v32 = vadd.f32 %v22135_v33, %v1276_v44  ;;  %v930_v61 = vld [vmem:[#allocation5 + $0x19d8] sm:$0xff] }
 0x48f   :  { %8651 = vmatpush1.bf16.msra.mxu1 %v18634_v48  ;;  %8609 = vmatprep.subr.bf16.mxu0 %v18227_v8  ;;  %v7354_v19 = vadd.f32 %v22174_v37, %v7311_v29  ;;  %v7221_v48 = vadd.f32 %v22098_v28, %v7178_v0  ;;  %v18563_v33 = vcombine.high %v930_v61, %v942_v22  ;;  %v522_v8 = vld [vmem:[#allocation5 + $0xd18] sm:$0xff] }
 0x490   :  { %v8945_v46 = vmul.f32 0.7978846, %v8897_v10  ;;  %v8873_v41 = vmul.f32 0.044715, %v8825_v14  ;;  %8652 = vmatprep.subr.bf16.mxu1 %v18611_v1  ;;  %v7350_v62 = vadd.f32 %v22147_v5, %v7307_v32  ;;  %v534_v1 = vld [vmem:[#allocation5 + $0xd78] sm:$0xff]  ;;  %v22475_v37 = vadd.f32 %v22141_v51, %v7225_v36 }
 0x491   :  { %v906_v9 = vld [vmem:[#allocation5 + $0x1918] sm:$0xff]  ;;  %v22478_v4 = vadd.f32 %v22111_v59, %v7221_v48  ;;  %v22481_v5 = vadd.f32 %v22176_v45, %v7354_v19  ;;  %v18155_v44 = vcombine.high %v522_v8, %v534_v1  ;;  %v18154_v43 = vcombine.low %v522_v8, %v534_v1 }
 0x492   :  { %21800 = vtanh.f32 %v8945_v46  ;;  %v8921_v13 = vadd.f32 %v8873_v41, %v22453_v38  ;;  %8610 = vmatpush1.bf16.msra.mxu0 %v18226_v24  ;;  %v918_v41 = vld [vmem:[#allocation5 + $0x1978] sm:$0xff]  ;;  %v22484_v28 = vadd.f32 %v22151_v15, %v7350_v62  ;;  %v8762_v59 = vmul.f32 %v22475_v37, %v22475_v37 }
 0x493   :  { %8653 = vmatpush1.bf16.msra.mxu1 %v18610_v34  ;;  %8611 = vmatprep.subr.bf16.mxu0 %v18203_v42  ;;  %v18539_v51 = vcombine.high %v906_v9, %v918_v41  ;;  %v510_v12 = vld [vmem:[#allocation5 + $0xcb8] sm:$0xff]  ;;  %v8738_v14 = vmul.f32 %v22478_v4, %v22478_v4  ;;  %v8764_v15 = vmul.f32 %v22481_v5, %v22481_v5 }
 0x494   :  { %v8969_v11 = vmul.f32 0.7978846, %v8921_v13  ;;  %8654 = vmatprep.subr.bf16.mxu1 %v18587_v49  ;;  %v18562_v49 = vcombine.low %v930_v61, %v942_v22  ;;  %v882_v10 = vld [vmem:[#allocation5 + $0x1858] sm:$0xff]  ;;  %v8740_v58 = vmul.f32 %v22484_v28, %v22484_v28  ;;  %v18538_v24 = vcombine.low %v906_v9, %v918_v41 }
 0x495   :  { %v894_v45 = vld [vmem:[#allocation5 + $0x18b8] sm:$0xff]  ;;  %v18131_v0 = vcombine.high %v498_v47, %v510_v12  ;;  %v8810_v46 = vmul.f32 %v8762_v59, %v22475_v37  ;;  %v8786_v61 = vmul.f32 %v8738_v14, %v22478_v4  ;;  %v8812_v22 = vmul.f32 %v8764_v15, %v22481_v5 }
 0x496   :  { %21802 = vtanh.f32 %v8969_v11  ;;  %8612 = vmatpush1.bf16.msra.mxu0 %v18202_v17  ;;  %v18515_v34 = vcombine.high %v882_v10, %v894_v45  ;;  %v858_v42 = vld [vmem:[#allocation5 + $0x1798] sm:$0xff]  ;;  %v18130_v19 = vcombine.low %v498_v47, %v510_v12  ;;  %v8788_v17 = vmul.f32 %v8740_v58, %v22484_v28 }
 0x497   :  { %8655 = vmatpush1.bf16.msra.mxu1 %v18586_v53  ;;  %8613 = vmatprep.subr.bf16.mxu0 %v18179_v63  ;;  %v870_v29 = vld [vmem:[#allocation5 + $0x17f8] sm:$0xff]  ;;  %v18514_v62 = vcombine.low %v882_v10, %v894_v45  ;;  %v8860_v9 = vmul.f32 0.044715, %v8812_v22  ;;  %v8705_v59 = vmul.f32 0.5, %v22436_v35  ;;  %v8729_v10 = vmul.f32 0.5, %v22453_v38 }
 0x498   :  { %8656 = vmatprep.subr.bf16.mxu1 %v18563_v33  ;;  %v1242_v36 = vld [vmem:[#allocation5 + $0x2398] sm:$0xff]  ;;  %v18491_v53 = vcombine.high %v858_v42, %v870_v29  ;;  %v8858_v33 = vmul.f32 0.044715, %v8810_v46  ;;  %v18490_v41 = vcombine.low %v858_v42, %v870_v29 }
 0x499   :  { %v1254_v32 = vld [vmem:[#allocation5 + $0x23f8] sm:$0xff] }
 0x49a   :  { %8614 = vmatpush1.bf16.msra.mxu0 %v18178_v30  ;;  %v18875_v63 = vcombine.high %v1242_v36, %v1254_v32  ;;  %v834_v48 = vld [vmem:[#allocation5 + $0x16d8] sm:$0xff]  ;;  %v18874_v47 = vcombine.low %v1242_v36, %v1254_v32  ;;  %v8906_v58 = vadd.f32 %v8858_v33, %v22475_v37 }
 0x49b   :  { %8657 = vmatpush1.bf16.msra.mxu1 %v18562_v49  ;;  %8615 = vmatprep.subr.bf16.mxu0 %v18155_v44  ;;  %v846_v11 = vld [vmem:[#allocation5 + $0x1738] sm:$0xff]  ;;  %v8834_v44 = vmul.f32 0.044715, %v8786_v61 }
 0x49c   :  { %8658 = vmatprep.subr.bf16.mxu1 %v18539_v51  ;;  %v1218_v8 = vld [vmem:[#allocation5 + $0x22d8] sm:$0xff]  ;;  %v8836_v51 = vmul.f32 0.044715, %v8788_v17  ;;  %v18467_v12 = vcombine.high %v834_v48, %v846_v11  ;;  %v18466_v42 = vcombine.low %v834_v48, %v846_v11  ;;  %v8954_v17 = vmul.f32 0.7978846, %v8906_v58 }
 0x49d   :  { %v1230_v1 = vld [vmem:[#allocation5 + $0x2338] sm:$0xff]  ;;  %v8882_v36 = vadd.f32 %v8834_v44, %v22478_v4 }
 0x49e   :  { %8616 = vmatpush1.bf16.msra.mxu0 %v18154_v43  ;;  %v18851_v45 = vcombine.high %v1218_v8, %v1230_v1  ;;  %v810_v14 = vld [vmem:[#allocation5 + $0x1618] sm:$0xff]  ;;  %v18850_v35 = vcombine.low %v1218_v8, %v1230_v1  ;;  %v8884_v32 = vadd.f32 %v8836_v51, %v22484_v28  ;;  %21804 = vtanh.f32 %v8954_v17 }
 0x49f   :  { %v21801_v13 = vpop.eup %21800  ;;  %8659 = vmatpush1.bf16.msra.mxu1 %v18538_v24  ;;  %8617 = vmatprep.subr.bf16.mxu0 %v18131_v0  ;;  %v822_v15 = vld [vmem:[#allocation5 + $0x1678] sm:$0xff]  ;;  %v8930_v11 = vmul.f32 0.7978846, %v8882_v36  ;;  %v22506_v36 = vpop.f32.mrf.mxu1 }
 0x4a0   :  { %8660 = vmatprep.subr.bf16.mxu1 %v18515_v34  ;;  %v9041_v30 = vadd.f32 1.0, %v21801_v13  ;;  %v1194_v24 = vld [vmem:[#allocation5 + $0x2218] sm:$0xff]  ;;  %v8908_v34 = vadd.f32 %v8860_v9, %v22481_v5  ;;  %v18443_v38 = vcombine.high %v810_v14, %v822_v15  ;;  %v18442_v48 = vcombine.low %v810_v14, %v822_v15 }
 0x4a1   :  { %v1206_v0 = vld [vmem:[#allocation5 + $0x2278] sm:$0xff]  ;;  %v8932_v1 = vmul.f32 0.7978846, %v8884_v32 }
 0x4a2   :  { %8618 = vmatpush1.bf16.msra.mxu0 %v18130_v19  ;;  %v9089_v29 = vmul.f32 %v9041_v30, %v8705_v59  ;;  %v18827_v61 = vcombine.high %v1194_v24, %v1206_v0  ;;  %v786_v22 = vld [vmem:[#allocation5 + $0x1558] sm:$0xff]  ;;  %v18826_v33 = vcombine.low %v1194_v24, %v1206_v0 }
 0x4a3   :  { %v21803_v49 = vpop.eup %21802  ;;  %8661 = vmatpush1.bf16.msra.mxu1 %v18514_v62  ;;  %8619 = vmatprep.subr.bf16.mxu0 %v18491_v53  ;;  %v798_v19 = vld [vmem:[#allocation5 + $0x15b8] sm:$0xff] }
 0x4a4   :  { %8662 = vmatprep.subr.bf16.mxu1 %v18875_v63  ;;  %v9065_v43 = vadd.f32 1.0, %v21803_v49  ;;  %v1170_v62 = vld [vmem:[#allocation5 + $0x2158] sm:$0xff]  ;;  %v8956_v63 = vmul.f32 0.7978846, %v8908_v34  ;;  %v18419_v8 = vcombine.high %v786_v22, %v798_v19  ;;  %v18418_v51 = vcombine.low %v786_v22, %v798_v19 }
 0x4a5   :  { %v1182_v53 = vld [vmem:[#allocation5 + $0x21b8] sm:$0xff] }
 0x4a6   :  { %8620 = vmatpush2.bf16.msra.mxu0 %v18490_v41  ;;  %v9113_v46 = vmul.f32 %v9065_v43, %v8729_v10  ;;  %v18803_v9 = vcombine.high %v1170_v62, %v1182_v53  ;;  %v762_v41 = vld [vmem:[#allocation5 + $0x1498] sm:$0xff]  ;;  %21806 = vtanh.f32 %v8956_v63 }
 0x4a7   :  { %8663 = vmatpush2.bf16.msra.mxu1 %v18874_v47  ;;  %8621 = vmatprep.subr.bf16.mxu0 %v18467_v12  ;;  %v774_v30 = vld [vmem:[#allocation5 + $0x14f8] sm:$0xff]  ;;  %21808 = vtanh.f32 %v8930_v11  ;;  %v18802_v47 = vcombine.low %v1170_v62, %v1182_v53 }
 0x4a8   :  { %8664 = vmatprep.subr.bf16.mxu1 %v18851_v45  ;;  %v22504_v13 = vpack.c.bf16 %v9113_v46, %v9089_v29  ;;  %v1146_v49 = vld [vmem:[#allocation5 + $0x2098] sm:$0xff]  ;;  %v18395_v12 = vcombine.high %v762_v41, %v774_v30  ;;  %21810 = vtanh.f32 %v8932_v1  ;;  %v18394_v43 = vcombine.low %v762_v41, %v774_v30 }
 0x4a9   :  { %v1158_v44 = vld [vmem:[#allocation5 + $0x20f8] sm:$0xff] }
 0x4aa   :  { %8622 = vmatpush2.bf16.msra.mxu0 %v18466_v42  ;;  %v18779_v59 = vcombine.high %v1146_v49, %v1158_v44  ;;  %v738_v10 = vld [vmem:[#allocation5 + $0x13d8] sm:$0xff]  ;;  %v18778_v58 = vcombine.low %v1146_v49, %v1158_v44 }
 0x4ab   :  { %8665 = vmatpush2.bf16.msra.mxu1 %v18850_v35  ;;  %8623 = vmatprep.subr.bf16.mxu0 %v18443_v38  ;;  %v750_v45 = vld [vmem:[#allocation5 + $0x1438] sm:$0xff]  ;;  %v21805_v63 = vpop.eup %21804 }
 0x4ac   :  { %8666 = vmatprep.subr.bf16.mxu1 %v18827_v61  ;;  %v1122_v14 = vld [vmem:[#allocation5 + $0x1fd8] sm:$0xff]  ;;  %v18371_v24 = vcombine.high %v738_v10, %v750_v45  ;;  %v18370_v35 = vcombine.low %v738_v10, %v750_v45  ;;  %v8336_v61 = vpop.f32.mrf.mxu1  ;;  %v9050_v49 = vadd.f32 1.0, %v21805_v63  ;;  %v1336_v45 = vrot.slane %v22412_v52, %v22133_v31 }
 0x4ad   :  { %v1134_v15 = vld [vmem:[#allocation5 + $0x2038] sm:$0xff] }
 0x4ae   :  { %8624 = vmatpush2.bf16.msra.mxu0 %v18442_v48  ;;  %v18755_v0 = vcombine.high %v1122_v14, %v1134_v15  ;;  %v714_v34 = vld [vmem:[#allocation5 + $0x1318] sm:$0xff]  ;;  %v18754_v38 = vcombine.low %v1122_v14, %v1134_v15  ;;  %v20045_v15 = vld [vmem:[#allocation8 + $0x454] ss:$24 sps:$4 sm:$0xff]  }
 0x4af   :  { %8667 = vmatpush2.bf16.msra.mxu1 %v18826_v33  ;;  %8625 = vmatprep.subr.bf16.mxu0 %v18419_v8  ;;  %v726_v42 = vld [vmem:[#allocation5 + $0x1378] sm:$0xff] }
 0x4b0   :  { %8668 = vmatprep.subr.bf16.mxu1 %v18803_v9  ;;  %v1098_v29 = vld [vmem:[#allocation5 + $0x1f18] sm:$0xff]  ;;  %v18347_v32 = vcombine.high %v714_v34, %v726_v42  ;;  %v18346_v48 = vcombine.low %v714_v34, %v726_v42  ;;  %v22508_v9 = vpop.f32.mrf.mxu1  ;;  %v20040_v34 = vld [vmem:[#allocation8 + $0x150] ss:$24 sps:$4 sm:$0xff]   ;;  %v8692_v42 = vmul.f32 0.5, %v22484_v28 }
 0x4b1   :  { %v1110_v46 = vld [vmem:[#allocation5 + $0x1f78] sm:$0xff] }
 0x4b2   :  { %8626 = vmatpush2.bf16.msra.mxu0 %v18418_v51  ;;  %v18731_v22 = vcombine.high %v1098_v29, %v1110_v46  ;;  %v690_v19 = vld [vmem:[#allocation5 + $0x1258] sm:$0xff]  ;;  %v18730_v33 = vcombine.low %v1098_v29, %v1110_v46  ;;  %v8340_v14 = vpop.f32.mrf.mxu1  ;;  %v22516_v46 = vpop.f32.mrf.mxu0 }
 0x4b3   :  { %8669 = vmatpush2.bf16.msra.mxu1 %v18802_v47  ;;  %8627 = vmatprep.subr.bf16.mxu0 %v18395_v12  ;;  %v702_v17 = vld [vmem:[#allocation5 + $0x12b8] sm:$0xff]  ;;  %v21807_v11 = vpop.eup %21806  ;;  %v20042_v12 = vld [vmem:[#allocation8 + $0x154] ss:$24 sps:$4 sm:$0xff]  }
 0x4b4   :  { %8670 = vmatprep.subr.bf16.mxu1 %v18779_v59  ;;  %v1074_v62 = vld [vmem:[#allocation5 + $0x1e58] sm:$0xff]  ;;  %v18323_v8 = vcombine.high %v690_v19, %v702_v17  ;;  %v21809_v1 = vpop.eup %21808  ;;  %v18322_v44 = vcombine.low %v690_v19, %v702_v17  ;;  %v9052_v51 = vadd.f32 1.0, %v21807_v11  ;;  %v8714_v59 = vmul.f32 0.5, %v22475_v37  ;;  %v20043_v37 = vld [vmem:[#allocation8 + $0x450] ss:$24 sps:$4 sm:$0xff]  }
 0x4b5   :  { %v1086_v53 = vld [vmem:[#allocation5 + $0x1eb8] sm:$0xff]  ;;  %v21811_v30 = vpop.eup %21810  ;;  %v9026_v10 = vadd.f32 1.0, %v21809_v1  ;;  %v8341_v11 = vadd.f32 %v8340_v14, %v1336_v45 }
 0x4b6   :  { %8628 = vmatpush2.bf16.msra.mxu0 %v18394_v43  ;;  %v18707_v41 = vcombine.high %v1074_v62, %v1086_v53  ;;  %v18706_v47 = vcombine.low %v1074_v62, %v1086_v53  ;;  %v8716_v43 = vmul.f32 0.5, %v22481_v5  ;;  %v20051_v19 = vld [vmem:[#allocation8 + $0x424] ss:$24 sps:$4 sm:$0xff]   ;;  %v20046_v53 = vld [vmem:[#allocation8 + $0x120] ss:$24 sps:$4 sm:$0xff]  }
 0x4b7   :  { %8671 = vmatpush2.bf16.msra.mxu1 %v18778_v58  ;;  %8629 = vmatprep.subr.bf16.mxu0 %v18371_v24  ;;  %v9028_v58 = vadd.f32 1.0, %v21811_v30  ;;  %v8690_v24 = vmul.f32 0.5, %v22478_v4  ;;  %v20049_v63 = vld [vmem:[#allocation8 + $0x420] ss:$24 sps:$4 sm:$0xff]  }
 0x4b8   :  { %8672 = vmatprep.subr.bf16.mxu1 %v18755_v0  ;;  %v9098_v0 = vmul.f32 %v9050_v49, %v8714_v59  ;;  %v9100_v29 = vmul.f32 %v9052_v51, %v8716_v43 }
 0x4b9   :  { %v9074_v52 = vmul.f32 %v9026_v10, %v8690_v24  ;;  %v9076_v5 = vmul.f32 %v9028_v58, %v8692_v42  ;;  %v20058_v58 = vld [vmem:[#allocation8 + $0xc0] ss:$24 sps:$4 sm:$0xff]  }
 0x4ba   :  { %8630 = vmatpush2.bf16.msra.mxu0 %v18370_v35  ;;  %v8337_v35 = vadd.f32 %v8336_v61, %v1336_v45  ;;  %v20063_v45 = vld [vmem:[#allocation8 + $0x3c4] ss:$24 sps:$4 sm:$0xff]  }
 0x4bb   :  { %8673 = vmatpush2.bf16.msra.mxu1 %v18754_v38  ;;  %8631 = vmatprep.subr.bf16.mxu0 %v18347_v32  ;;  %v22518_v38 = vpop.f32.mrf.mxu1  ;;  %v20048_v32 = vld [vmem:[#allocation8 + $0x124] ss:$24 sps:$4 sm:$0xff]   ;;  %v22521_v4 = vpack.c.bf16 %v9098_v0, %v9074_v52  ;;  %v22524_v62 = vpack.c.bf16 %v9100_v29, %v9076_v5  ;;  %v20061_v0 = vld [vmem:[#allocation8 + $0x3c0] ss:$24 sps:$4 sm:$0xff]  }
 0x4bc   :  { %8674 = vmatprep.subr.bf16.mxu1 %v18731_v22 }
 0x4be   :  { %8632 = vmatpush2.bf16.msra.mxu0 %v18346_v48  ;;  %v20054_v48 = vld [vmem:[#allocation8 + $0xf4] ss:$24 sps:$4 sm:$0xff]  }
 0x4bf   :  { %8675 = vmatpush2.bf16.msra.mxu1 %v18730_v33  ;;  %8633 = vmatprep.subr.bf16.mxu0 %v18323_v8  ;;  %v22535_v8 = vsub.s32 5, %v22086_v50 }
 0x4c0   :  { %8676 = vmatprep.subr.bf16.mxu1 %v18707_v41  ;;  %v22538_v41 = vsub.s32 7, %v22086_v50 }
 0x4c1   :  { %23165 = vst [vmem:[#allocation56_spill] sm:$0xff] %v22535_v8  ;;  %v1284_v50 = vrot.slane %v22455_v55, %v22535_v8 }
 0x4c2   :  { %8634 = vmatpush2.bf16.msra.mxu0 %v18322_v44  ;;  %v20052_v44 = vld [vmem:[#allocation8 + $0xf0] ss:$24 sps:$4 sm:$0xff]   ;;  %v1292_v14 = vrot.slane %v22455_v55, %v22538_v41  ;;  %v20069_v55 = vld [vmem:[#allocation8 + $0x394] ss:$24 sps:$4 sm:$0xff]  }
 0x4c3   :  { %8677 = vmatpush2.bf16.msra.mxu1 %v18706_v47  ;;  %16057 = vmatprep.subr.bf16.mxu0 %v20042_v12  ;;  %v20055_v47 = vld [vmem:[#allocation8 + $0x3f0] ss:$24 sps:$4 sm:$0xff]   ;;  %v20060_v12 = vld [vmem:[#allocation8 + $0xc4] ss:$24 sps:$4 sm:$0xff]   ;;  %v7440_v24 = vadd.f32 %v22190_v18, %v1284_v50  ;;  %v7436_v52 = vadd.f32 %v22180_v54, %v1284_v50  ;;  %v20082_v50 = vld [vmem:[#allocation8] ss:$24 sps:$4 sm:$0xff]  }
 0x4c4   :  { %16100 = vmatprep.subr.bf16.mxu1 %v20045_v15  ;;  %v7569_v42 = vadd.f32 %v22226_v6, %v1292_v14  ;;  %v20067_v6 = vld [vmem:[#allocation8 + $0x390] ss:$24 sps:$4 sm:$0xff]   ;;  %v20075_v54 = vld [vmem:[#allocation8 + $0x364] ss:$24 sps:$4 sm:$0xff]  }
 0x4c5   :  { %v8379_v22 = vpop.f32.mrf.mxu0  ;;  %8636 = vmatmul.mubr.bf16.vlgmr.msra.gmra.mxu0 %v22068_v25 }
 0x4c6   :  { %v8380_v28 = vadd.f32 %v8379_v22, %v8337_v35  ;;  %v8422_v17 = vpop.f32.mrf.mxu1  ;;  %8679 = vmatmul.mubr.bf16.vlgmr.msra.gmra.mxu1 %v22076_v39  ;;  %16058 = vmatpush1.bf16.msra.mxu0 %v20040_v34  ;;  %v20057_v39 = vld [vmem:[#allocation8 + $0x3f4] ss:$24 sps:$4 sm:$0xff]   ;;  %v7565_v35 = vadd.f32 %v22221_v23, %v1292_v14  ;;  %v7612_v5 = vadd.f32 %v22256_v2, %v7569_v42  ;;  %v20064_v22 = vld [vmem:[#allocation8 + $0x90] ss:$24 sps:$4 sm:$0xff]  }
 0x4c7   :  { %16089 = vmatprep.mubr.bf16.mxu0 %v22521_v4  ;;  %16101 = vmatpush1.bf16.msra.mxu1 %v20043_v37  ;;  %v22527_v61 = vpop.f32.mrf.mxu0  ;;  %v20066_v34 = vld [vmem:[#allocation8 + $0x94] ss:$24 sps:$4 sm:$0xff]   ;;  %v7479_v23 = vadd.f32 %v22184_v3, %v7436_v52  ;;  %v20096_v52 = vld [vmem:[#allocation8 + $0x2a4] ss:$24 sps:$4 sm:$0xff]  }
 0x4c8   :  { %v22529_v25 = vadd.f32 %v8422_v17, %v8380_v28  ;;  %16132 = vmatprep.mubr.bf16.mxu1 %v22524_v62  ;;  %v22532_v33 = vpop.f32.mrf.mxu1  ;;  %16059 = vmatprep.subr.bf16.mxu0 %v20048_v32  ;;  %v20072_v28 = vld [vmem:[#allocation8 + $0x64] ss:$24 sps:$4 sm:$0xff]   ;;  %v7608_v17 = vadd.f32 %v22230_v16, %v7565_v35  ;;  %v20073_v16 = vld [vmem:[#allocation8 + $0x360] ss:$24 sps:$4 sm:$0xff]   ;;  %v20081_v3 = vld [vmem:[#allocation8 + $0x334] ss:$24 sps:$4 sm:$0xff]  }
 0x4c9   :  { %v8383_v1 = vpop.f32.mrf.mxu0  ;;  %16102 = vmatprep.subr.bf16.mxu1 %v20051_v19  ;;  %v7483_v19 = vadd.f32 %v22216_v60, %v7440_v24  ;;  %v20093_v24 = vld [vmem:[#allocation8 + $0x5d4] ss:$24 sps:$4 sm:$0xff]  }
 0x4ca   :  { %v8755_v30 = vmul.f32 %v22529_v25, %v22529_v25  ;;  %v8384_v49 = vadd.f32 %v8383_v1, %v8341_v11  ;;  %16060 = vmatpush1.bf16.msra.mxu0 %v20046_v53  ;;  %v8426_v51 = vpop.f32.mrf.mxu1  ;;  %v22569_v11 = vadd.f32 %v22197_v40, %v7479_v23  ;;  %v23166_v1 = vld [vmem:[#allocation23_spill] sm:$0xff] }
 0x4cb   :  { %16103 = vmatpush1.bf16.msra.mxu1 %v20049_v63  ;;  %16061 = vmatprep.subr.bf16.mxu0 %v20054_v48  ;;  %v22563_v2 = vadd.f32 %v22224_v56, %v7483_v19  ;;  %v22566_v63 = vadd.f32 %v22258_v26, %v7612_v5  ;;  %v20070_v48 = vld [vmem:[#allocation8 + $0x60] ss:$24 sps:$4 sm:$0xff]   ;;  %v20099_v5 = vld [vmem:[#allocation8 + $0x5a4] ss:$24 sps:$4 sm:$0xff]  }
 0x4cc   :  { %v8803_v59 = vmul.f32 %v8755_v30, %v22529_v25  ;;  %v22543_v10 = vadd.f32 %v8426_v51, %v8384_v49  ;;  %16104 = vmatprep.subr.bf16.mxu1 %v20057_v39  ;;  %v20078_v39 = vld [vmem:[#allocation8 + $0x34] ss:$24 sps:$4 sm:$0xff]   ;;  %v22572_v30 = vadd.f32 %v23166_v1, %v7608_v17  ;;  %v20076_v49 = vld [vmem:[#allocation8 + $0x30] ss:$24 sps:$4 sm:$0xff]   ;;  %v8742_v40 = vmul.f32 %v22569_v11, %v22569_v11  ;;  %v20084_v51 = vld [vmem:[#allocation8 + $0x4] ss:$24 sps:$4 sm:$0xff]  }
 0x4cd   :  { %v8766_v56 = vmul.f32 %v22563_v2, %v22563_v2  ;;  %v8768_v26 = vmul.f32 %v22566_v63, %v22566_v63  ;;  %v20094_v17 = vld [vmem:[#allocation8 + $0x2a0] ss:$24 sps:$4 sm:$0xff]  }
 0x4ce   :  { %v8851_v15 = vmul.f32 0.044715, %v8803_v59  ;;  %v8779_v43 = vmul.f32 %v22543_v10, %v22543_v10  ;;  %16062 = vmatpush1.bf16.msra.mxu0 %v20052_v44  ;;  %v20079_v44 = vld [vmem:[#allocation8 + $0x330] ss:$24 sps:$4 sm:$0xff]   ;;  %v8790_v14 = vmul.f32 %v8742_v40, %v22569_v11  ;;  %v20097_v23 = vld [vmem:[#allocation8 + $0x5a0] ss:$24 sps:$4 sm:$0xff]  }
 0x4cf   :  { %16105 = vmatpush1.bf16.msra.mxu1 %v20055_v47  ;;  %16063 = vmatprep.subr.bf16.mxu0 %v20060_v12  ;;  %v8744_v47 = vmul.f32 %v22572_v30, %v22572_v30  ;;  %v20087_v12 = vld [vmem:[#allocation8 + $0x304] ss:$24 sps:$4 sm:$0xff]   ;;  %v8814_v59 = vmul.f32 %v8766_v56, %v22563_v2 }
 0x4d0   :  { %v8899_v29 = vadd.f32 %v8851_v15, %v22529_v25  ;;  %v8827_v37 = vmul.f32 %v8779_v43, %v22543_v10  ;;  %16106 = vmatprep.subr.bf16.mxu1 %v20063_v45  ;;  %v8816_v45 = vmul.f32 %v8768_v26, %v22566_v63  ;;  %v20085_v15 = vld [vmem:[#allocation8 + $0x300] ss:$24 sps:$4 sm:$0xff]   ;;  %v20090_v43 = vld [vmem:[#allocation8 + $0x2d4] ss:$24 sps:$4 sm:$0xff]   ;;  %v20108_v40 = vld [vmem:[#allocation8 + $0x244] ss:$24 sps:$4 sm:$0xff]  }
 0x4d2   :  { %v8947_v32 = vmul.f32 0.7978846, %v8899_v29  ;;  %v8875_v18 = vmul.f32 0.044715, %v8827_v37  ;;  %16064 = vmatpush1.bf16.msra.mxu0 %v20058_v58  ;;  %v8792_v58 = vmul.f32 %v8744_v47, %v22572_v30  ;;  %v8864_v42 = vmul.f32 0.044715, %v8816_v45 }
 0x4d3   :  { %16107 = vmatpush1.bf16.msra.mxu1 %v20061_v0  ;;  %16065 = vmatprep.subr.bf16.mxu0 %v20066_v34  ;;  %v8862_v34 = vmul.f32 0.044715, %v8814_v59  ;;  %v20088_v29 = vld [vmem:[#allocation8 + $0x2d0] ss:$24 sps:$4 sm:$0xff]   ;;  %v8838_v37 = vmul.f32 0.044715, %v8790_v14 }
 0x4d4   :  { %21812 = vtanh.f32 %v8947_v32  ;;  %v8923_v53 = vadd.f32 %v8875_v18, %v22543_v10  ;;  %16108 = vmatprep.subr.bf16.mxu1 %v20069_v55  ;;  %v20091_v55 = vld [vmem:[#allocation8 + $0x5d0] ss:$24 sps:$4 sm:$0xff]   ;;  %v8840_v35 = vmul.f32 0.044715, %v8792_v58  ;;  %v8912_v19 = vadd.f32 %v8864_v42, %v22566_v63  ;;  %v20106_v47 = vld [vmem:[#allocation8 + $0x240] ss:$24 sps:$4 sm:$0xff]  }
 0x4d5   :  { %v20114_v59 = vld [vmem:[#allocation8 + $0x214] ss:$24 sps:$4 sm:$0xff]   ;;  %v20115_v14 = vld [vmem:[#allocation8 + $0x510] ss:$24 sps:$4 sm:$0xff]   ;;  %v20118_v58 = vld [vmem:[#allocation8 + $0x1e0] ss:$24 sps:$4 sm:$0xff]  }
 0x4d6   :  { %v8971_v60 = vmul.f32 0.7978846, %v8923_v53  ;;  %16066 = vmatpush1.bf16.msra.mxu0 %v20064_v22  ;;  %v8910_v22 = vadd.f32 %v8862_v34, %v22563_v2  ;;  %v8960_v56 = vmul.f32 0.7978846, %v8912_v19  ;;  %v20117_v45 = vld [vmem:[#allocation8 + $0x514] ss:$24 sps:$4 sm:$0xff]  }
 0x4d7   :  { %16109 = vmatpush1.bf16.msra.mxu1 %v20067_v6  ;;  %16067 = vmatprep.subr.bf16.mxu0 %v20072_v28  ;;  %v8707_v6 = vmul.f32 0.5, %v22529_v25  ;;  %v8731_v28 = vmul.f32 0.5, %v22543_v10  ;;  %v20100_v25 = vld [vmem:[#allocation8 + $0x270] ss:$24 sps:$4 sm:$0xff]   ;;  %v20129_v34 = vld [vmem:[#allocation8 + $0x4b4] ss:$24 sps:$4 sm:$0xff]  }
 0x4d8   :  { %21814 = vtanh.f32 %v8971_v60  ;;  %16110 = vmatprep.subr.bf16.mxu1 %v20075_v54  ;;  %v8886_v54 = vadd.f32 %v8838_v37, %v22569_v11  ;;  %v20102_v60 = vld [vmem:[#allocation8 + $0x274] ss:$24 sps:$4 sm:$0xff]  }
 0x4da   :  { %16068 = vmatpush1.bf16.msra.mxu0 %v20070_v48  ;;  %v8888_v48 = vadd.f32 %v8840_v35, %v22572_v30  ;;  %v8934_v26 = vmul.f32 0.7978846, %v8886_v54  ;;  %v20141_v54 = vld [vmem:[#allocation8 + $0xa54] ss:$24 sps:$4 sm:$0xff]  }
 0x4db   :  { %16111 = vmatpush1.bf16.msra.mxu1 %v20073_v16  ;;  %16069 = vmatprep.subr.bf16.mxu0 %v20078_v39  ;;  %v20105_v16 = vld [vmem:[#allocation8 + $0x574] ss:$24 sps:$4 sm:$0xff]  }
 0x4dc   :  { %16112 = vmatprep.subr.bf16.mxu1 %v20081_v3  ;;  %v8958_v3 = vmul.f32 0.7978846, %v8910_v22  ;;  %v20130_v22 = vld [vmem:[#allocation8 + $0x180] ss:$24 sps:$4 sm:$0xff]  }
 0x4de   :  { %16070 = vmatpush1.bf16.msra.mxu0 %v20076_v49  ;;  %v20103_v49 = vld [vmem:[#allocation8 + $0x570] ss:$24 sps:$4 sm:$0xff]   ;;  %21816 = vtanh.f32 %v8958_v3 }
 0x4df   :  { %16113 = vmatpush1.bf16.msra.mxu1 %v20079_v44  ;;  %16071 = vmatprep.subr.bf16.mxu0 %v20084_v51  ;;  %v8936_v44 = vmul.f32 0.7978846, %v8888_v48  ;;  %v20111_v51 = vld [vmem:[#allocation8 + $0x544] ss:$24 sps:$4 sm:$0xff]   ;;  %21818 = vtanh.f32 %v8960_v56  ;;  %v8694_v48 = vmul.f32 0.5, %v22569_v11  ;;  %v8696_v56 = vmul.f32 0.5, %v22572_v30 }
 0x4e0   :  { %16114 = vmatprep.subr.bf16.mxu1 %v20087_v12  ;;  %21820 = vtanh.f32 %v8934_v26  ;;  %v20109_v12 = vld [vmem:[#allocation8 + $0x540] ss:$24 sps:$4 sm:$0xff]   ;;  %v20136_v3 = vld [vmem:[#allocation8 + $0x750] ss:$24 sps:$4 sm:$0xff]  }
 0x4e1   :  { %v21813_v0 = vpop.eup %21812  ;;  %21822 = vtanh.f32 %v8936_v44  ;;  %v20139_v26 = vld [vmem:[#allocation8 + $0xa50] ss:$24 sps:$4 sm:$0xff]  }
 0x4e2   :  { %16072 = vmatpush1.bf16.msra.mxu0 %v20082_v50  ;;  %v9043_v32 = vadd.f32 1.0, %v21813_v0  ;;  %v20112_v50 = vld [vmem:[#allocation8 + $0x210] ss:$24 sps:$4 sm:$0xff]   ;;  %v20126_v0 = vld [vmem:[#allocation8 + $0x1b4] ss:$24 sps:$4 sm:$0xff]  }
 0x4e3   :  { %16115 = vmatpush1.bf16.msra.mxu1 %v20085_v15  ;;  %16073 = vmatprep.subr.bf16.mxu0 %v20090_v43  ;;  %v20120_v15 = vld [vmem:[#allocation8 + $0x1e4] ss:$24 sps:$4 sm:$0xff]  }
 0x4e4   :  { %16116 = vmatprep.subr.bf16.mxu1 %v20093_v24  ;;  %v9091_v39 = vmul.f32 %v9043_v32, %v8707_v6  ;;  %v20123_v43 = vld [vmem:[#allocation8 + $0x4e4] ss:$24 sps:$4 sm:$0xff]   ;;  %v20121_v24 = vld [vmem:[#allocation8 + $0x4e0] ss:$24 sps:$4 sm:$0xff]  }
 0x4e5   :  { %v21815_v18 = vpop.eup %21814  ;;  %v20133_v6 = vld [vmem:[#allocation8 + $0x480] ss:$24 sps:$4 sm:$0xff]  }
 0x4e6   :  { %16074 = vmatpush2.bf16.msra.mxu0 %v20088_v29  ;;  %v9067_v53 = vadd.f32 1.0, %v21815_v18  ;;  %v20124_v29 = vld [vmem:[#allocation8 + $0x1b0] ss:$24 sps:$4 sm:$0xff]  }
 0x4e7   :  { %16117 = vmatpush2.bf16.msra.mxu1 %v20091_v55  ;;  %16075 = vmatprep.subr.bf16.mxu0 %v20096_v52  ;;  %v20127_v55 = vld [vmem:[#allocation8 + $0x4b0] ss:$24 sps:$4 sm:$0xff]   ;;  %v20132_v52 = vld [vmem:[#allocation8 + $0x184] ss:$24 sps:$4 sm:$0xff]  }
 0x4e8   :  { %16118 = vmatprep.subr.bf16.mxu1 %v20099_v5  ;;  %v9115_v1 = vmul.f32 %v9067_v53, %v8731_v28  ;;  %v20135_v5 = vld [vmem:[#allocation8 + $0x484] ss:$24 sps:$4 sm:$0xff]   ;;  %v20138_v28 = vld [vmem:[#allocation8 + $0x754] ss:$24 sps:$4 sm:$0xff]  }
 0x4ea   :  { %16076 = vmatpush2.bf16.msra.mxu0 %v20094_v17  ;;  %v22592_v10 = vpack.c.bf16 %v9115_v1, %v9091_v39  ;;  %v8718_v17 = vmul.f32 0.5, %v22563_v2  ;;  %v22597_v39 = vld [vmem:[#allocation7 + $0x10] sm:$0xff]  ;;  %v22602_v2 = vpop.f32.mrf.mxu0 }
 0x4eb   :  { %16119 = vmatpush2.bf16.msra.mxu1 %v20097_v23  ;;  %16077 = vmatprep.subr.bf16.mxu0 %v20102_v60  ;;  %v21817_v42 = vpop.eup %21816  ;;  %v8720_v23 = vmul.f32 0.5, %v22566_v63  ;;  %v1344_v1 = vrot.slane %v22597_v39, %v22170_v20 }
 0x4ec   :  { %16120 = vmatprep.subr.bf16.mxu1 %v20105_v16  ;;  %v21819_v37 = vpop.eup %21818  ;;  %v9054_v18 = vadd.f32 1.0, %v21817_v42 }
 0x4ed   :  { %v21821_v35 = vpop.eup %21820  ;;  %v9056_v19 = vadd.f32 1.0, %v21819_v37  ;;  %v20148_v37 = vld [vmem:[#allocation8 + $0x6f0] ss:$24 sps:$4 sm:$0xff]  }
 0x4ee   :  { %16078 = vmatpush2.bf16.msra.mxu0 %v20100_v25  ;;  %v21823_v32 = vpop.eup %21822  ;;  %v9030_v53 = vadd.f32 1.0, %v21821_v35  ;;  %v9102_v16 = vmul.f32 %v9054_v18, %v8718_v17  ;;  %v20156_v35 = vld [vmem:[#allocation8 + $0x6c4] ss:$24 sps:$4 sm:$0xff]   ;;  %v22622_v18 = vld [vmem:[#allocation7 + $0x8] sm:$0xff] }
 0x4ef   :  { %16121 = vmatpush2.bf16.msra.mxu1 %v20103_v49  ;;  %16079 = vmatprep.subr.bf16.mxu0 %v20108_v40  ;;  %v9032_v60 = vadd.f32 1.0, %v21823_v32  ;;  %v9104_v25 = vmul.f32 %v9056_v19, %v8720_v23  ;;  %v22604_v49 = vpop.f32.mrf.mxu1  ;;  %v20144_v40 = vld [vmem:[#allocation8 + $0x724] ss:$24 sps:$4 sm:$0xff]   ;;  %v1308_v19 = vrot.slane %v22622_v18, %v22448_v21  ;;  %v23170_v23 = vld [vmem:[#allocation33_spill] sm:$0xff] }
 0x4f0   :  { %16122 = vmatprep.subr.bf16.mxu1 %v20111_v51  ;;  %v9078_v63 = vmul.f32 %v9030_v53, %v8694_v48  ;;  %v23167_v51 = vld [vmem:[#allocation17_spill] sm:$0xff]  ;;  %v20159_v32 = vld [vmem:[#allocation8 + $0x9c4] ss:$24 sps:$4 sm:$0xff]   ;;  %v20157_v53 = vld [vmem:[#allocation8 + $0x9c0] ss:$24 sps:$4 sm:$0xff]  }
 0x4f1   :  { %v9080_v11 = vmul.f32 %v9032_v60, %v8696_v56  ;;  %v7827_v60 = vadd.f32 %v23170_v23, %v1308_v19  ;;  %v20165_v48 = vld [vmem:[#allocation8 + $0x994] ss:$24 sps:$4 sm:$0xff]  }
 0x4f2   :  { %16080 = vmatpush2.bf16.msra.mxu0 %v20106_v47  ;;  %v22607_v47 = vpack.c.bf16 %v9102_v16, %v9078_v63  ;;  %v23171_v16 = vld [vmem:[#allocation25_spill] sm:$0xff] }
 0x4f3   :  { %16123 = vmatpush2.bf16.msra.mxu1 %v20109_v12  ;;  %16081 = vmatprep.subr.bf16.mxu0 %v20114_v59  ;;  %v20147_v12 = vld [vmem:[#allocation8 + $0xa24] ss:$24 sps:$4 sm:$0xff]   ;;  %v20160_v63 = vld [vmem:[#allocation8 + $0x690] ss:$24 sps:$4 sm:$0xff]  }
 0x4f4   :  { %16124 = vmatprep.subr.bf16.mxu1 %v20117_v45  ;;  %v23168_v45 = vld [vmem:[#allocation19_spill] sm:$0xff] }
 0x4f6   :  { %16082 = vmatpush2.bf16.msra.mxu0 %v20112_v50  ;;  %v22610_v50 = vpack.c.bf16 %v9104_v25, %v9080_v11  ;;  %v23173_v25 = vld [vmem:[#allocation37_spill] sm:$0xff]  ;;  %v23174_v11 = vld [vmem:[#allocation30_spill] sm:$0xff] }
 0x4f7   :  { %16125 = vmatpush2.bf16.msra.mxu1 %v20115_v14  ;;  %16083 = vmatprep.subr.bf16.mxu0 %v20120_v15  ;;  %v20142_v14 = vld [vmem:[#allocation8 + $0x720] ss:$24 sps:$4 sm:$0xff]  }
 0x4f8   :  { %16126 = vmatprep.subr.bf16.mxu1 %v20123_v43  ;;  %v20145_v43 = vld [vmem:[#allocation8 + $0xa20] ss:$24 sps:$4 sm:$0xff]  }
 0x4fa   :  { %16084 = vmatpush2.bf16.msra.mxu0 %v20118_v58  ;;  %v20150_v58 = vld [vmem:[#allocation8 + $0x6f4] ss:$24 sps:$4 sm:$0xff]  }
 0x4fb   :  { %16127 = vmatpush2.bf16.msra.mxu1 %v20121_v24  ;;  %16085 = vmatprep.subr.bf16.mxu0 %v20126_v0 }
 0x4fc   :  { %16128 = vmatprep.subr.bf16.mxu1 %v20129_v34  ;;  %v20153_v34 = vld [vmem:[#allocation8 + $0x9f4] ss:$24 sps:$4 sm:$0xff]  }
 0x4fe   :  { %16086 = vmatpush2.bf16.msra.mxu0 %v20124_v29 }
 0x4ff   :  { %16129 = vmatpush2.bf16.msra.mxu1 %v20127_v55  ;;  %16087 = vmatprep.subr.bf16.mxu0 %v20132_v52  ;;  %v20151_v52 = vld [vmem:[#allocation8 + $0x9f0] ss:$24 sps:$4 sm:$0xff]  }
 0x500   :  { %16130 = vmatprep.subr.bf16.mxu1 %v20135_v5 }
 0x502   :  { %16088 = vmatpush2.bf16.msra.mxu0 %v20130_v22  ;;  %v1300_v22 = vrot.slane %v22622_v18, %v22440_v57 }
 0x503   :  { %16131 = vmatpush2.bf16.msra.mxu1 %v20133_v6  ;;  %16143 = vmatprep.subr.bf16.mxu0 %v20138_v28  ;;  %v20154_v6 = vld [vmem:[#allocation8 + $0x6c0] ss:$24 sps:$4 sm:$0xff]  }
 0x504   :  { %16186 = vmatprep.subr.bf16.mxu1 %v20141_v54  ;;  %v23169_v28 = vld [vmem:[#allocation27_spill] sm:$0xff]  ;;  %v20162_v54 = vld [vmem:[#allocation8 + $0x694] ss:$24 sps:$4 sm:$0xff]  }
 0x505   :  { %v8465_v44 = vpop.f32.mrf.mxu0  ;;  %16090 = vmatmul.mubr.bf16.vlgmr.msra.gmra.mxu0 %v23167_v51  ;;  %v7698_v17 = vadd.f32 %v23169_v28, %v1300_v22  ;;  %v20177_v28 = vld [vmem:[#allocation8 + $0x934] ss:$24 sps:$4 sm:$0xff]  }
 0x506   :  { %v8466_v59 = vadd.f32 %v8465_v44, %v1344_v1  ;;  %v8508_v30 = vpop.f32.mrf.mxu1  ;;  %16133 = vmatmul.mubr.bf16.vlgmr.msra.gmra.mxu1 %v23168_v45  ;;  %16144 = vmatpush1.bf16.msra.mxu0 %v20136_v3  ;;  %v23172_v3 = vld [vmem:[#allocation31_spill] sm:$0xff]  ;;  %v20163_v44 = vld [vmem:[#allocation8 + $0x990] ss:$24 sps:$4 sm:$0xff]  }
 0x507   :  { %16175 = vmatprep.mubr.bf16.mxu0 %v22607_v47  ;;  %16187 = vmatpush1.bf16.msra.mxu1 %v20139_v26  ;;  %v22613_v15 = vpop.f32.mrf.mxu0  ;;  %v7823_v56 = vadd.f32 %v23172_v3, %v1308_v19  ;;  %v7870_v26 = vadd.f32 %v23173_v25, %v7827_v60  ;;  %v23180_v19 = vld [vmem:[#allocation35_spill] sm:$0xff]  ;;  %v20175_v60 = vld [vmem:[#allocation8 + $0x930] ss:$24 sps:$4 sm:$0xff]  }
 0x508   :  { %v22615_v24 = vadd.f32 %v8508_v30, %v8466_v59  ;;  %16218 = vmatprep.mubr.bf16.mxu1 %v22610_v50  ;;  %v22618_v0 = vpop.f32.mrf.mxu1  ;;  %16145 = vmatprep.subr.bf16.mxu0 %v20144_v40  ;;  %v7741_v40 = vadd.f32 %v23174_v11, %v7698_v17  ;;  %v23175_v59 = vld [vmem:[#allocation34_spill] sm:$0xff] }
 0x509   :  { %v8469_v42 = vpop.f32.mrf.mxu0  ;;  %16188 = vmatprep.subr.bf16.mxu1 %v20147_v12  ;;  %v20168_v12 = vld [vmem:[#allocation8 + $0x664] ss:$24 sps:$4 sm:$0xff]   ;;  %v7866_v30 = vadd.f32 %v23175_v59, %v7823_v56  ;;  %v20178_v25 = vld [vmem:[#allocation8 + $0x600] ss:$24 sps:$4 sm:$0xff]   ;;  %v20186_v11 = vld [vmem:[#allocation8 + $0x8d4] ss:$24 sps:$4 sm:$0xff]  }
 0x50a   :  { %v8470_v29 = vadd.f32 %v8469_v42, %v1344_v1  ;;  %16146 = vmatpush1.bf16.msra.mxu0 %v20142_v14  ;;  %v8512_v55 = vpop.f32.mrf.mxu1  ;;  %v7694_v1 = vadd.f32 %v23171_v16, %v1300_v22  ;;  %v20171_v14 = vld [vmem:[#allocation8 + $0x964] ss:$24 sps:$4 sm:$0xff]   ;;  %v20174_v22 = vld [vmem:[#allocation8 + $0x634] ss:$24 sps:$4 sm:$0xff]  }
 0x50b   :  { %16189 = vmatpush1.bf16.msra.mxu1 %v20145_v43  ;;  %16147 = vmatprep.subr.bf16.mxu0 %v20150_v58  ;;  %v23176_v43 = vld [vmem:[#allocation26_spill] sm:$0xff] }
 0x50c   :  { %v22620_v5 = vadd.f32 %v8512_v55, %v8470_v29  ;;  %16190 = vmatprep.subr.bf16.mxu1 %v20153_v34  ;;  %v7737_v58 = vadd.f32 %v23176_v43, %v7694_v1  ;;  %v23177_v34 = vld [vmem:[#allocation32_spill] sm:$0xff]  ;;  %v23178_v29 = vld [vmem:[#allocation38_spill] sm:$0xff] }
 0x50d   :  { %v22637_v42 = vadd.f32 %v23177_v34, %v7741_v40  ;;  %v20166_v55 = vld [vmem:[#allocation8 + $0x660] ss:$24 sps:$4 sm:$0xff]   ;;  %v20183_v1 = vld [vmem:[#allocation8 + $0x904] ss:$24 sps:$4 sm:$0xff]   ;;  %v20187_v43 = vld [vmem:[#allocation8 + $0xbd0] ss:$24 sps:$4 sm:$0xff]  }
 0x50e   :  { %16148 = vmatpush1.bf16.msra.mxu0 %v20148_v37  ;;  %v22640_v37 = vadd.f32 %v23178_v29, %v7870_v26  ;;  %v20195_v29 = vld [vmem:[#allocation8 + $0xba4] ss:$24 sps:$4 sm:$0xff]  }
 0x50f   :  { %16191 = vmatpush1.bf16.msra.mxu1 %v20151_v52  ;;  %16149 = vmatprep.subr.bf16.mxu0 %v20156_v35  ;;  %v23179_v52 = vld [vmem:[#allocation28_spill] sm:$0xff]  ;;  %v8770_v17 = vmul.f32 %v22637_v42, %v22637_v42 }
 0x510   :  { %16192 = vmatprep.subr.bf16.mxu1 %v20159_v32  ;;  %v22643_v35 = vadd.f32 %v23179_v52, %v7737_v58  ;;  %v20169_v32 = vld [vmem:[#allocation8 + $0x960] ss:$24 sps:$4 sm:$0xff]   ;;  %v20192_v58 = vld [vmem:[#allocation8 + $0x8a4] ss:$24 sps:$4 sm:$0xff]  }
 0x511   :  { %v8818_v3 = vmul.f32 %v8770_v17, %v22637_v42 }
 0x512   :  { %16150 = vmatpush1.bf16.msra.mxu0 %v20154_v6  ;;  %v22646_v6 = vadd.f32 %v23180_v19, %v7866_v30  ;;  %v8746_v23 = vmul.f32 %v22643_v35, %v22643_v35  ;;  %v20184_v30 = vld [vmem:[#allocation8 + $0x8d0] ss:$24 sps:$4 sm:$0xff]   ;;  %v20193_v19 = vld [vmem:[#allocation8 + $0xba0] ss:$24 sps:$4 sm:$0xff]  }
 0x513   :  { %16193 = vmatpush1.bf16.msra.mxu1 %v20157_v53  ;;  %16151 = vmatprep.subr.bf16.mxu0 %v20162_v54  ;;  %v8772_v53 = vmul.f32 %v22640_v37, %v22640_v37  ;;  %v20172_v54 = vld [vmem:[#allocation8 + $0x630] ss:$24 sps:$4 sm:$0xff]  }
 0x514   :  { %16194 = vmatprep.subr.bf16.mxu1 %v20165_v48  ;;  %v20180_v48 = vld [vmem:[#allocation8 + $0x604] ss:$24 sps:$4 sm:$0xff]   ;;  %v8748_v16 = vmul.f32 %v22646_v6, %v22646_v6  ;;  %v8794_v26 = vmul.f32 %v8746_v23, %v22643_v35 }
 0x515   :  { %v8820_v56 = vmul.f32 %v8772_v53, %v22640_v37  ;;  %v20201_v53 = vld [vmem:[#allocation8 + $0xb74] ss:$24 sps:$4 sm:$0xff]  }
 0x516   :  { %16152 = vmatpush1.bf16.msra.mxu0 %v20160_v63  ;;  %v20181_v63 = vld [vmem:[#allocation8 + $0x900] ss:$24 sps:$4 sm:$0xff]   ;;  %v8796_v40 = vmul.f32 %v8748_v16, %v22646_v6  ;;  %v20199_v16 = vld [vmem:[#allocation8 + $0xb70] ss:$24 sps:$4 sm:$0xff]  }
 0x517   :  { %16195 = vmatpush1.bf16.msra.mxu1 %v20163_v44  ;;  %16153 = vmatprep.subr.bf16.mxu0 %v20168_v12  ;;  %v20189_v44 = vld [vmem:[#allocation8 + $0xbd4] ss:$24 sps:$4 sm:$0xff]   ;;  %v8866_v12 = vmul.f32 0.044715, %v8818_v3  ;;  %v8868_v59 = vmul.f32 0.044715, %v8820_v56 }
 0x518   :  { %16196 = vmatprep.subr.bf16.mxu1 %v20171_v14  ;;  %v8842_v14 = vmul.f32 0.044715, %v8794_v26  ;;  %v8844_v34 = vmul.f32 0.044715, %v8796_v40  ;;  %v20207_v56 = vld [vmem:[#allocation8 + $0xb44] ss:$24 sps:$4 sm:$0xff]  }
 0x519   :  { %v8916_v52 = vadd.f32 %v8868_v59, %v22640_v37  ;;  %v20205_v26 = vld [vmem:[#allocation8 + $0xb40] ss:$24 sps:$4 sm:$0xff]   ;;  %v20208_v40 = vld [vmem:[#allocation8 + $0x810] ss:$24 sps:$4 sm:$0xff]   ;;  %v20219_v59 = vld [vmem:[#allocation8 + $0xae4] ss:$24 sps:$4 sm:$0xff]  }
 0x51a   :  { %16154 = vmatpush1.bf16.msra.mxu0 %v20166_v55  ;;  %v8914_v55 = vadd.f32 %v8866_v12, %v22637_v42  ;;  %v8892_v17 = vadd.f32 %v8844_v34, %v22646_v6  ;;  %v20216_v12 = vld [vmem:[#allocation8 + $0x7e4] ss:$24 sps:$4 sm:$0xff]  }
 0x51b   :  { %16197 = vmatpush1.bf16.msra.mxu1 %v20169_v32  ;;  %16155 = vmatprep.subr.bf16.mxu0 %v20174_v22  ;;  %v20190_v32 = vld [vmem:[#allocation8 + $0x8a0] ss:$24 sps:$4 sm:$0xff]   ;;  %v8890_v22 = vadd.f32 %v8842_v14, %v22643_v35  ;;  %v8964_v23 = vmul.f32 0.7978846, %v8916_v52  ;;  %v20223_v52 = vld [vmem:[#allocation8 + $0xab0] ss:$24 sps:$4 sm:$0xff]  }
 0x51c   :  { %16198 = vmatprep.subr.bf16.mxu1 %v20177_v28  ;;  %v20198_v28 = vld [vmem:[#allocation8 + $0x874] ss:$24 sps:$4 sm:$0xff]   ;;  %v8940_v3 = vmul.f32 0.7978846, %v8892_v17  ;;  %v20217_v14 = vld [vmem:[#allocation8 + $0xae0] ss:$24 sps:$4 sm:$0xff]  }
 0x51e   :  { %16156 = vmatpush1.bf16.msra.mxu0 %v20172_v54  ;;  %v8962_v54 = vmul.f32 0.7978846, %v8914_v55 }
 0x51f   :  { %16199 = vmatpush1.bf16.msra.mxu1 %v20175_v60  ;;  %16157 = vmatprep.subr.bf16.mxu0 %v20180_v48  ;;  %v20196_v60 = vld [vmem:[#allocation8 + $0x870] ss:$24 sps:$4 sm:$0xff]   ;;  %v8938_v48 = vmul.f32 0.7978846, %v8890_v22 }
 0x520   :  { %16200 = vmatprep.subr.bf16.mxu1 %v20183_v1  ;;  %v20204_v1 = vld [vmem:[#allocation8 + $0x844] ss:$24 sps:$4 sm:$0xff]   ;;  %21824 = vtanh.f32 %v8962_v54 }
 0x521   :  { %21826 = vtanh.f32 %v8964_v23  ;;  %v20229_v23 = vld [vmem:[#allocation8 + $0xa80] ss:$24 sps:$4 sm:$0xff]  }
 0x522   :  { %16158 = vmatpush1.bf16.msra.mxu0 %v20178_v25  ;;  %v20202_v25 = vld [vmem:[#allocation8 + $0x840] ss:$24 sps:$4 sm:$0xff]   ;;  %21828 = vtanh.f32 %v8938_v48  ;;  %v8722_v48 = vmul.f32 0.5, %v22637_v42 }
 0x523   :  { %16201 = vmatpush1.bf16.msra.mxu1 %v20181_v63  ;;  %16159 = vmatprep.subr.bf16.mxu0 %v20186_v11  ;;  %v20210_v63 = vld [vmem:[#allocation8 + $0x814] ss:$24 sps:$4 sm:$0xff]   ;;  %21830 = vtanh.f32 %v8940_v3  ;;  %v8724_v3 = vmul.f32 0.5, %v22640_v37 }
 0x524   :  { %16202 = vmatprep.subr.bf16.mxu1 %v20189_v44  ;;  %v20213_v11 = vld [vmem:[#allocation8 + $0xb14] ss:$24 sps:$4 sm:$0xff]   ;;  %v20211_v44 = vld [vmem:[#allocation8 + $0xb10] ss:$24 sps:$4 sm:$0xff]  }
 0x525   :  { %v23181_v37 = vld [vmem:[#allocation21_spill] sm:$0xff] }
 0x526   :  { %16160 = vmatpush2.bf16.msra.mxu0 %v20184_v30  ;;  %v20214_v30 = vld [vmem:[#allocation8 + $0x7e0] ss:$24 sps:$4 sm:$0xff]  }
 0x527   :  { %16203 = vmatpush2.bf16.msra.mxu1 %v20187_v43  ;;  %16161 = vmatprep.subr.bf16.mxu0 %v20192_v58  ;;  %v20222_v43 = vld [vmem:[#allocation8 + $0x7b4] ss:$24 sps:$4 sm:$0xff]  }
 0x528   :  { %16204 = vmatprep.subr.bf16.mxu1 %v20195_v29  ;;  %v20225_v58 = vld [vmem:[#allocation8 + $0xab4] ss:$24 sps:$4 sm:$0xff]   ;;  %v20220_v29 = vld [vmem:[#allocation8 + $0x7b0] ss:$24 sps:$4 sm:$0xff]  }
 0x52a   :  { %16162 = vmatpush2.bf16.msra.mxu0 %v20190_v32  ;;  %v20228_v32 = vld [vmem:[#allocation8 + $0x784] ss:$24 sps:$4 sm:$0xff]  }
 0x52b   :  { %16205 = vmatpush2.bf16.msra.mxu1 %v20193_v19  ;;  %16163 = vmatprep.subr.bf16.mxu0 %v20198_v28  ;;  %v20231_v19 = vld [vmem:[#allocation8 + $0xa84] ss:$24 sps:$4 sm:$0xff]  }
 0x52c   :  { %16206 = vmatprep.subr.bf16.mxu1 %v20201_v53  ;;  %v20226_v53 = vld [vmem:[#allocation8 + $0x780] ss:$24 sps:$4 sm:$0xff]  }
 0x52d   :  { %v21825_v34 = vpop.eup %21824 }
 0x52e   :  { %16164 = vmatpush2.bf16.msra.mxu0 %v20196_v60  ;;  %v21827_v55 = vpop.eup %21826  ;;  %v9058_v17 = vadd.f32 1.0, %v21825_v34  ;;  %v20234_v60 = vld [vmem:[#allocation8 + $0xd54] ss:$24 sps:$4 sm:$0xff]  }
 0x52f   :  { %16207 = vmatpush2.bf16.msra.mxu1 %v20199_v16  ;;  %16165 = vmatprep.subr.bf16.mxu0 %v20204_v1  ;;  %v21829_v22 = vpop.eup %21828  ;;  %v9060_v54 = vadd.f32 1.0, %v21827_v55  ;;  %v20237_v1 = vld [vmem:[#allocation8 + $0x1054] ss:$24 sps:$4 sm:$0xff]  }
 0x530   :  { %16208 = vmatprep.subr.bf16.mxu1 %v20207_v56  ;;  %v21831_v28 = vpop.eup %21830  ;;  %v9034_v16 = vadd.f32 1.0, %v21829_v22 }
 0x531   :  { %v9036_v56 = vadd.f32 1.0, %v21831_v28 }
 0x532   :  { %16166 = vmatpush2.bf16.msra.mxu0 %v20202_v25  ;;  %v8698_v25 = vmul.f32 0.5, %v22643_v35  ;;  %v20243_v35 = vld [vmem:[#allocation8 + $0x1024] ss:$24 sps:$4 sm:$0xff]  }
 0x533   :  { %16209 = vmatpush2.bf16.msra.mxu1 %v20205_v26  ;;  %16167 = vmatprep.subr.bf16.mxu0 %v20210_v63  ;;  %v9106_v26 = vmul.f32 %v9058_v17, %v8722_v48  ;;  %v20232_v63 = vld [vmem:[#allocation8 + $0xd50] ss:$24 sps:$4 sm:$0xff]  }
 0x534   :  { %16210 = vmatprep.subr.bf16.mxu1 %v20213_v11  ;;  %v8700_v11 = vmul.f32 0.5, %v22646_v6  ;;  %v9082_v42 = vmul.f32 %v9034_v16, %v8698_v25  ;;  %v23182_v6 = vld [vmem:[#allocation24_spill] sm:$0xff]  ;;  %v20250_v25 = vld [vmem:[#allocation8 + $0xcc0] ss:$24 sps:$4 sm:$0xff]  }
 0x536   :  { %16168 = vmatpush2.bf16.msra.mxu0 %v20208_v40  ;;  %v9108_v40 = vmul.f32 %v9060_v54, %v8724_v3  ;;  %v1316_v54 = vrot.slane %v22622_v18, %v22535_v8  ;;  %v1324_v3 = vrot.slane %v22622_v18, %v22538_v41  ;;  %v20261_v18 = vld [vmem:[#allocation8 + $0xf94] ss:$24 sps:$4 sm:$0xff]  }
 0x537   :  { %16211 = vmatpush2.bf16.msra.mxu1 %v20211_v44  ;;  %16169 = vmatprep.subr.bf16.mxu0 %v20216_v12  ;;  %v22668_v44 = vpop.f32.mrf.mxu0  ;;  %v20235_v12 = vld [vmem:[#allocation8 + $0x1050] ss:$24 sps:$4 sm:$0xff]  }
 0x538   :  { %16212 = vmatprep.subr.bf16.mxu1 %v20219_v59  ;;  %v9084_v59 = vmul.f32 %v9036_v56, %v8700_v11  ;;  %v23185_v11 = vld [vmem:[#allocation41_spill] sm:$0xff] }
 0x53a   :  { %16170 = vmatpush2.bf16.msra.mxu0 %v20214_v30  ;;  %v20240_v30 = vld [vmem:[#allocation8 + $0xd24] ss:$24 sps:$4 sm:$0xff]   ;;  %v22677_v34 = vpack.c.bf16 %v9108_v40, %v9084_v59  ;;  %v7956_v40 = vadd.f32 %v23185_v11, %v1316_v54  ;;  %v8085_v59 = vadd.f32 %v22386_v7, %v1324_v3  ;;  %v20259_v7 = vld [vmem:[#allocation8 + $0xf90] ss:$24 sps:$4 sm:$0xff]  }
 0x53b   :  { %16213 = vmatpush2.bf16.msra.mxu1 %v20217_v14  ;;  %16171 = vmatprep.subr.bf16.mxu0 %v20222_v43  ;;  %v22671_v43 = vpack.c.bf16 %v9106_v26, %v9082_v42  ;;  %v23184_v26 = vld [vmem:[#allocation39_spill] sm:$0xff]  ;;  %v20258_v42 = vld [vmem:[#allocation8 + $0xc94] ss:$24 sps:$4 sm:$0xff]  }
 0x53c   :  { %16214 = vmatprep.subr.bf16.mxu1 %v20225_v58  ;;  %23183 = vst [vmem:[#allocation23_spill] sm:$0xff] %v22677_v34 }
 0x53e   :  { %16172 = vmatpush2.bf16.msra.mxu0 %v20220_v29  ;;  %v20238_v29 = vld [vmem:[#allocation8 + $0xd20] ss:$24 sps:$4 sm:$0xff]  }
 0x53f   :  { %16215 = vmatpush2.bf16.msra.mxu1 %v20223_v52  ;;  %16173 = vmatprep.subr.bf16.mxu0 %v20228_v32  ;;  %v20241_v52 = vld [vmem:[#allocation8 + $0x1020] ss:$24 sps:$4 sm:$0xff]   ;;  %v20246_v32 = vld [vmem:[#allocation8 + $0xcf4] ss:$24 sps:$4 sm:$0xff]  }
 0x540   :  { %16216 = vmatprep.subr.bf16.mxu1 %v20231_v19 }
 0x542   :  { %16174 = vmatpush2.bf16.msra.mxu0 %v20226_v53  ;;  %v20244_v53 = vld [vmem:[#allocation8 + $0xcf0] ss:$24 sps:$4 sm:$0xff]  }
 0x543   :  { %16217 = vmatpush2.bf16.msra.mxu1 %v20229_v23  ;;  %16229 = vmatprep.subr.bf16.mxu0 %v20234_v60  ;;  %v20247_v23 = vld [vmem:[#allocation8 + $0xff0] ss:$24 sps:$4 sm:$0xff]   ;;  %v20252_v60 = vld [vmem:[#allocation8 + $0xcc4] ss:$24 sps:$4 sm:$0xff]  }
 0x544   :  { %16272 = vmatprep.subr.bf16.mxu1 %v20237_v1  ;;  %v20255_v1 = vld [vmem:[#allocation8 + $0xfc4] ss:$24 sps:$4 sm:$0xff]  }
 0x545   :  { %v8551_v14 = vpop.f32.mrf.mxu0  ;;  %16176 = vmatmul.mubr.bf16.vlgmr.msra.gmra.mxu0 %v23181_v37 }
 0x546   :  { %v22674_v58 = vadd.f32 %v8551_v14, %v22615_v24  ;;  %16219 = vmatmul.mubr.bf16.vlgmr.msra.gmra.mxu1 %v23182_v6  ;;  %16230 = vmatpush1.bf16.msra.mxu0 %v20232_v63  ;;  %v20249_v24 = vld [vmem:[#allocation8 + $0xff4] ss:$24 sps:$4 sm:$0xff]   ;;  %v7952_v63 = vadd.f32 %v23184_v26, %v1316_v54  ;;  %v23189_v54 = vld [vmem:[#allocation47_spill] sm:$0xff] }
 0x547   :  { %16261 = vmatprep.mubr.bf16.mxu0 %v22671_v43  ;;  %16273 = vmatpush1.bf16.msra.mxu1 %v20235_v12  ;;  %v22680_v55 = vpop.f32.mrf.mxu0  ;;  %v20253_v12 = vld [vmem:[#allocation8 + $0xfc0] ss:$24 sps:$4 sm:$0xff]  }
 0x548   :  { %v8757_v22 = vmul.f32 %v22674_v58, %v22674_v58  ;;  %16304 = vmatprep.mubr.bf16.mxu1 %v22677_v34  ;;  %16231 = vmatprep.subr.bf16.mxu0 %v20240_v30  ;;  %v20262_v26 = vld [vmem:[#allocation8 + $0xc60] ss:$24 sps:$4 sm:$0xff]  }
 0x549   :  { %v8555_v19 = vpop.f32.mrf.mxu0  ;;  %16274 = vmatprep.subr.bf16.mxu1 %v20243_v35  ;;  %v23186_v35 = vld [vmem:[#allocation45_spill] sm:$0xff] }
 0x54a   :  { %v8805_v28 = vmul.f32 %v8757_v22, %v22674_v58  ;;  %v22687_v17 = vadd.f32 %v8555_v19, %v22620_v5  ;;  %16232 = vmatpush1.bf16.msra.mxu0 %v20238_v29  ;;  %v8081_v29 = vadd.f32 %v23186_v35, %v1324_v3  ;;  %v20256_v22 = vld [vmem:[#allocation8 + $0xc90] ss:$24 sps:$4 sm:$0xff]   ;;  %v23191_v3 = vld [vmem:[#allocation46_spill] sm:$0xff] }
 0x54b   :  { %16275 = vmatpush1.bf16.msra.mxu1 %v20241_v52  ;;  %16233 = vmatprep.subr.bf16.mxu0 %v20246_v32  ;;  %v8128_v52 = vadd.f32 %v22416_v27, %v8085_v59 }
 0x54c   :  { %v8853_v48 = vmul.f32 0.044715, %v8805_v28  ;;  %v8781_v16 = vmul.f32 %v22687_v17, %v22687_v17  ;;  %16276 = vmatprep.subr.bf16.mxu1 %v20249_v24  ;;  %v23187_v24 = vld [vmem:[#allocation40_spill] sm:$0xff] }
 0x54d   :  { %v7995_v19 = vadd.f32 %v23187_v24, %v7952_v63  ;;  %v23188_v28 = vld [vmem:[#allocation44_spill] sm:$0xff] }
 0x54e   :  { %v8901_v5 = vadd.f32 %v8853_v48, %v22674_v58  ;;  %v8829_v56 = vmul.f32 %v8781_v16, %v22687_v17  ;;  %16234 = vmatpush1.bf16.msra.mxu0 %v20244_v53  ;;  %v7999_v53 = vadd.f32 %v23188_v28, %v7956_v40  ;;  %v20267_v16 = vld [vmem:[#allocation8 + $0xf64] ss:$24 sps:$4 sm:$0xff]   ;;  %v20265_v40 = vld [vmem:[#allocation8 + $0xf60] ss:$24 sps:$4 sm:$0xff]  }
 0x54f   :  { %16277 = vmatpush1.bf16.msra.mxu1 %v20247_v23  ;;  %16235 = vmatprep.subr.bf16.mxu0 %v20252_v60  ;;  %v8124_v23 = vadd.f32 %v23189_v54, %v8081_v29  ;;  %v20264_v60 = vld [vmem:[#allocation8 + $0xc64] ss:$24 sps:$4 sm:$0xff]   ;;  %v20271_v29 = vld [vmem:[#allocation8 + $0xf30] ss:$24 sps:$4 sm:$0xff]   ;;  %v20274_v28 = vld [vmem:[#allocation8 + $0xc00] ss:$24 sps:$4 sm:$0xff]  }
 0x550   :  { %v8949_v30 = vmul.f32 0.7978846, %v8901_v5  ;;  %v8877_v14 = vmul.f32 0.044715, %v8829_v56  ;;  %16278 = vmatprep.subr.bf16.mxu1 %v20255_v1  ;;  %v23190_v1 = vld [vmem:[#allocation42_spill] sm:$0xff]  ;;  %v22710_v5 = vadd.f32 %v23191_v3, %v7999_v53  ;;  %v23193_v63 = vld [vmem:[#allocation48_spill] sm:$0xff] }
 0x551   :  { %v22707_v27 = vadd.f32 %v23190_v1, %v7995_v19  ;;  %v23192_v56 = vld [vmem:[#allocation50_spill] sm:$0xff]  ;;  %v22716_v11 = vadd.f32 %v23193_v63, %v8124_v23  ;;  %v20280_v3 = vld [vmem:[#allocation8 + $0xed0] ss:$24 sps:$4 sm:$0xff]  }
 0x552   :  { %21832 = vtanh.f32 %v8949_v30  ;;  %v8925_v32 = vadd.f32 %v8877_v14, %v22687_v17  ;;  %16236 = vmatpush1.bf16.msra.mxu0 %v20250_v25  ;;  %v22713_v25 = vadd.f32 %v23192_v56, %v8128_v52  ;;  %v8774_v30 = vmul.f32 %v22710_v5, %v22710_v5  ;;  %v20276_v52 = vld [vmem:[#allocation8 + $0xc04] ss:$24 sps:$4 sm:$0xff]   ;;  %v20277_v23 = vld [vmem:[#allocation8 + $0xf00] ss:$24 sps:$4 sm:$0xff]  }
 0x553   :  { %16279 = vmatpush1.bf16.msra.mxu1 %v20253_v12  ;;  %16237 = vmatprep.subr.bf16.mxu0 %v20258_v42  ;;  %v20270_v12 = vld [vmem:[#allocation8 + $0xc34] ss:$24 sps:$4 sm:$0xff]   ;;  %v8750_v59 = vmul.f32 %v22707_v27, %v22707_v27  ;;  %v8752_v35 = vmul.f32 %v22716_v11, %v22716_v11 }
 0x554   :  { %v8973_v48 = vmul.f32 0.7978846, %v8925_v32  ;;  %16280 = vmatprep.subr.bf16.mxu1 %v20261_v18  ;;  %v20273_v42 = vld [vmem:[#allocation8 + $0xf34] ss:$24 sps:$4 sm:$0xff]   ;;  %v8776_v14 = vmul.f32 %v22713_v25, %v22713_v25  ;;  %v20268_v18 = vld [vmem:[#allocation8 + $0xc30] ss:$24 sps:$4 sm:$0xff]   ;;  %v8822_v24 = vmul.f32 %v8774_v30, %v22710_v5 }
 0x555   :  { %v20279_v32 = vld [vmem:[#allocation8 + $0xf04] ss:$24 sps:$4 sm:$0xff]   ;;  %v8800_v54 = vmul.f32 %v8752_v35, %v22716_v11 }
 0x556   :  { %21834 = vtanh.f32 %v8973_v48  ;;  %16238 = vmatpush1.bf16.msra.mxu0 %v20256_v22  ;;  %v8798_v22 = vmul.f32 %v8750_v59, %v22707_v27  ;;  %v8824_v19 = vmul.f32 %v8776_v14, %v22713_v25  ;;  %v8733_v59 = vmul.f32 0.5, %v22687_v17  ;;  %v20291_v30 = vld [vmem:[#allocation8 + $0x11a4] ss:$24 sps:$4 sm:$0xff]   ;;  %v20297_v17 = vld [vmem:[#allocation8 + $0x1174] ss:$24 sps:$4 sm:$0xff]  }
 0x557   :  { %16281 = vmatpush1.bf16.msra.mxu1 %v20259_v7  ;;  %16239 = vmatprep.subr.bf16.mxu0 %v20264_v60  ;;  %v20282_v7 = vld [vmem:[#allocation8 + $0xed4] ss:$24 sps:$4 sm:$0xff]   ;;  %v8848_v63 = vmul.f32 0.044715, %v8800_v54 }
 0x558   :  { %16282 = vmatprep.subr.bf16.mxu1 %v20267_v16  ;;  %v20285_v60 = vld [vmem:[#allocation8 + $0x11d4] ss:$24 sps:$4 sm:$0xff]   ;;  %v8846_v48 = vmul.f32 0.044715, %v8798_v22  ;;  %v8870_v16 = vmul.f32 0.044715, %v8822_v24 }
 0x559   :  { %v8872_v1 = vmul.f32 0.044715, %v8824_v19  ;;  %v20289_v24 = vld [vmem:[#allocation8 + $0x11a0] ss:$24 sps:$4 sm:$0xff]   ;;  %v20294_v19 = vld [vmem:[#allocation8 + $0xe74] ss:$24 sps:$4 sm:$0xff]  }
 0x55a   :  { %16240 = vmatpush1.bf16.msra.mxu0 %v20262_v26  ;;  %v8894_v22 = vadd.f32 %v8846_v48, %v22707_v27 }
 0x55b   :  { %16283 = vmatpush1.bf16.msra.mxu1 %v20265_v40  ;;  %16241 = vmatprep.subr.bf16.mxu0 %v20270_v12  ;;  %v20283_v40 = vld [vmem:[#allocation8 + $0x11d0] ss:$24 sps:$4 sm:$0xff]   ;;  %v20288_v12 = vld [vmem:[#allocation8 + $0xea4] ss:$24 sps:$4 sm:$0xff]   ;;  %v8920_v35 = vadd.f32 %v8872_v1, %v22713_v25 }
 0x55c   :  { %16284 = vmatprep.subr.bf16.mxu1 %v20273_v42  ;;  %v8709_v42 = vmul.f32 0.5, %v22674_v58  ;;  %v8896_v58 = vadd.f32 %v8848_v63, %v22716_v11  ;;  %v20303_v1 = vld [vmem:[#allocation8 + $0x1144] ss:$24 sps:$4 sm:$0xff]   ;;  %v20309_v63 = vld [vmem:[#allocation8 + $0x1114] ss:$24 sps:$4 sm:$0xff]  }
 0x55d   :  { %v8968_v54 = vmul.f32 0.7978846, %v8920_v35  ;;  %v20318_v35 = vld [vmem:[#allocation8 + $0xdb4] ss:$24 sps:$4 sm:$0xff]  }
 0x55e   :  { %16242 = vmatpush1.bf16.msra.mxu0 %v20268_v18  ;;  %v8918_v18 = vadd.f32 %v8870_v16, %v22710_v5  ;;  %v20300_v16 = vld [vmem:[#allocation8 + $0xe44] ss:$24 sps:$4 sm:$0xff]   ;;  %v8944_v48 = vmul.f32 0.7978846, %v8896_v58 }
 0x55f   :  { %v21833_v53 = vpop.eup %21832  ;;  %16285 = vmatpush1.bf16.msra.mxu1 %v20271_v29  ;;  %16243 = vmatprep.subr.bf16.mxu0 %v20276_v52  ;;  %v20286_v29 = vld [vmem:[#allocation8 + $0xea0] ss:$24 sps:$4 sm:$0xff]   ;;  %v20324_v58 = vld [vmem:[#allocation8 + $0xd84] ss:$24 sps:$4 sm:$0xff]  }
 0x560   :  { %16286 = vmatprep.subr.bf16.mxu1 %v20279_v32  ;;  %v9045_v56 = vadd.f32 1.0, %v21833_v53  ;;  %v8966_v53 = vmul.f32 0.7978846, %v8918_v18  ;;  %v20313_v18 = vld [vmem:[#allocation8 + $0x10e0] ss:$24 sps:$4 sm:$0xff]  }
 0x562   :  { %16244 = vmatpush1.bf16.msra.mxu0 %v20274_v28  ;;  %v9093_v52 = vmul.f32 %v9045_v56, %v8709_v42  ;;  %21836 = vtanh.f32 %v8966_v53  ;;  %v20301_v56 = vld [vmem:[#allocation8 + $0x1140] ss:$24 sps:$4 sm:$0xff]   ;;  %v20312_v42 = vld [vmem:[#allocation8 + $0xde4] ss:$24 sps:$4 sm:$0xff]  }
 0x563   :  { %v21835_v26 = vpop.eup %21834  ;;  %16287 = vmatpush1.bf16.msra.mxu1 %v20277_v23  ;;  %16245 = vmatprep.subr.bf16.mxu0 %v20282_v7  ;;  %v20292_v23 = vld [vmem:[#allocation8 + $0xe70] ss:$24 sps:$4 sm:$0xff]   ;;  %v8942_v7 = vmul.f32 0.7978846, %v8894_v22  ;;  %21838 = vtanh.f32 %v8968_v54  ;;  %v20327_v54 = vld [vmem:[#allocation8 + $0x1084] ss:$24 sps:$4 sm:$0xff]  }
 0x564   :  { %16288 = vmatprep.subr.bf16.mxu1 %v20285_v60  ;;  %v9069_v14 = vadd.f32 1.0, %v21835_v26  ;;  %v20295_v60 = vld [vmem:[#allocation8 + $0x1170] ss:$24 sps:$4 sm:$0xff]   ;;  %v20306_v26 = vld [vmem:[#allocation8 + $0xe14] ss:$24 sps:$4 sm:$0xff]  }
 0x565   :  { %21840 = vtanh.f32 %v8942_v7  ;;  %v20316_v22 = vld [vmem:[#allocation8 + $0xdb0] ss:$24 sps:$4 sm:$0xff]  }
 0x566   :  { %16246 = vmatpush2.bf16.msra.mxu0 %v20280_v3  ;;  %v9117_v32 = vmul.f32 %v9069_v14, %v8733_v59  ;;  %v20298_v3 = vld [vmem:[#allocation8 + $0xe40] ss:$24 sps:$4 sm:$0xff]   ;;  %21842 = vtanh.f32 %v8944_v48  ;;  %v20315_v59 = vld [vmem:[#allocation8 + $0x10e4] ss:$24 sps:$4 sm:$0xff]  }
 0x567   :  { %16289 = vmatpush2.bf16.msra.mxu1 %v20283_v40  ;;  %16247 = vmatprep.subr.bf16.mxu0 %v20288_v12  ;;  %v20304_v40 = vld [vmem:[#allocation8 + $0xe10] ss:$24 sps:$4 sm:$0xff]   ;;  %v20310_v14 = vld [vmem:[#allocation8 + $0xde0] ss:$24 sps:$4 sm:$0xff]  }
 0x568   :  { %16290 = vmatprep.subr.bf16.mxu1 %v20291_v30  ;;  %v22736_v28 = vpack.c.bf16 %v9117_v32, %v9093_v52  ;;  %v20307_v12 = vld [vmem:[#allocation8 + $0x1110] ss:$24 sps:$4 sm:$0xff]   ;;  %v22738_v30 = vpop.f32.mrf.mxu1  ;;  %v20321_v52 = vld [vmem:[#allocation8 + $0x10b4] ss:$24 sps:$4 sm:$0xff]   ;;  %v20325_v48 = vld [vmem:[#allocation8 + $0x1080] ss:$24 sps:$4 sm:$0xff]  }
 0x56a   :  { %16248 = vmatpush2.bf16.msra.mxu0 %v20286_v29  ;;  %v8594_v29 = vpop.f32.mrf.mxu1 }
 0x56b   :  { %16291 = vmatpush2.bf16.msra.mxu1 %v20289_v24  ;;  %16249 = vmatprep.subr.bf16.mxu0 %v20294_v19  ;;  %v20319_v19 = vld [vmem:[#allocation8 + $0x10b0] ss:$24 sps:$4 sm:$0xff]  }
 0x56c   :  { %16292 = vmatprep.subr.bf16.mxu1 %v20297_v17  ;;  %v22740_v53 = vpop.f32.mrf.mxu1 }
 0x56e   :  { %16250 = vmatpush2.bf16.msra.mxu0 %v20292_v23 }
 0x56f   :  { %16293 = vmatpush2.bf16.msra.mxu1 %v20295_v60  ;;  %16251 = vmatprep.subr.bf16.mxu0 %v20300_v16  ;;  %v21837_v32 = vpop.eup %21836  ;;  %v20322_v60 = vld [vmem:[#allocation8 + $0xd80] ss:$24 sps:$4 sm:$0xff]  }
 0x570   :  { %16294 = vmatprep.subr.bf16.mxu1 %v20303_v1  ;;  %v21839_v24 = vpop.eup %21838  ;;  %v9062_v7 = vadd.f32 1.0, %v21837_v32  ;;  %v20330_v1 = vld [vmem:[#allocation8 + $0x1354] ss:$24 sps:$4 sm:$0xff]  }
 0x571   :  { %v9064_v16 = vadd.f32 1.0, %v21839_v24 }
 0x572   :  { %16252 = vmatpush2.bf16.msra.mxu0 %v20298_v3  ;;  %v21841_v17 = vpop.eup %21840  ;;  %v8726_v3 = vmul.f32 0.5, %v22710_v5  ;;  %v20331_v5 = vld [vmem:[#allocation8 + $0x1650] ss:$24 sps:$4 sm:$0xff]  }
 0x573   :  { %16295 = vmatpush2.bf16.msra.mxu1 %v20301_v56  ;;  %16253 = vmatprep.subr.bf16.mxu0 %v20306_v26  ;;  %v21843_v23 = vpop.eup %21842  ;;  %v9038_v56 = vadd.f32 1.0, %v21841_v17  ;;  %v23194_v26 = vld [vmem:[#allocation22_spill] sm:$0xff] }
 0x574   :  { %16296 = vmatprep.subr.bf16.mxu1 %v20309_v63  ;;  %v1352_v63 = vrot.slane %v22597_v39, %v23194_v26  ;;  %v20336_v17 = vld [vmem:[#allocation8 + $0x1324] ss:$24 sps:$4 sm:$0xff]  }
 0x576   :  { %16254 = vmatpush2.bf16.msra.mxu0 %v20304_v40  ;;  %v8598_v40 = vpop.f32.mrf.mxu1 }
 0x577   :  { %16297 = vmatpush2.bf16.msra.mxu1 %v20307_v12  ;;  %16255 = vmatprep.subr.bf16.mxu0 %v20312_v42  ;;  %v20333_v12 = vld [vmem:[#allocation8 + $0x1654] ss:$24 sps:$4 sm:$0xff]   ;;  %v8728_v42 = vmul.f32 0.5, %v22713_v25  ;;  %v8599_v26 = vadd.f32 %v8598_v40, %v1352_v63  ;;  %v20348_v40 = vld [vmem:[#allocation8 + $0x12c4] ss:$24 sps:$4 sm:$0xff]  }
 0x578   :  { %16298 = vmatprep.subr.bf16.mxu1 %v20315_v59  ;;  %v9040_v59 = vadd.f32 1.0, %v21843_v23 }
 0x579   :  { %v9112_v32 = vmul.f32 %v9064_v16, %v8728_v42  ;;  %v23196_v16 = vld [vmem:[#allocation36_spill] sm:$0xff] }
 0x57a   :  { %16256 = vmatpush2.bf16.msra.mxu0 %v20310_v14  ;;  %v8702_v14 = vmul.f32 0.5, %v22707_v27  ;;  %v23195_v27 = vld [vmem:[#allocation29_spill] sm:$0xff] }
 0x57b   :  { %16299 = vmatpush2.bf16.msra.mxu1 %v20313_v18  ;;  %16257 = vmatprep.subr.bf16.mxu0 %v20318_v35  ;;  %v9110_v18 = vmul.f32 %v9062_v7, %v8726_v3  ;;  %v20328_v35 = vld [vmem:[#allocation8 + $0x1350] ss:$24 sps:$4 sm:$0xff]   ;;  %v20339_v7 = vld [vmem:[#allocation8 + $0x1624] ss:$24 sps:$4 sm:$0xff]   ;;  %v20337_v3 = vld [vmem:[#allocation8 + $0x1620] ss:$24 sps:$4 sm:$0xff]  }
 0x57c   :  { %16300 = vmatprep.subr.bf16.mxu1 %v20321_v52  ;;  %v8704_v52 = vmul.f32 0.5, %v22716_v11  ;;  %v9086_v24 = vmul.f32 %v9038_v56, %v8702_v14  ;;  %v20342_v56 = vld [vmem:[#allocation8 + $0x12f4] ss:$24 sps:$4 sm:$0xff]  }
 0x57e   :  { %16258 = vmatpush2.bf16.msra.mxu0 %v20316_v22  ;;  %v22748_v22 = vpop.f32.mrf.mxu0  ;;  %v9088_v25 = vmul.f32 %v9040_v59, %v8704_v52  ;;  %v22753_v23 = vpack.c.bf16 %v9110_v18, %v9086_v24  ;;  %v20345_v59 = vld [vmem:[#allocation8 + $0x15f4] ss:$24 sps:$4 sm:$0xff]   ;;  %v20340_v52 = vld [vmem:[#allocation8 + $0x12f0] ss:$24 sps:$4 sm:$0xff]  }
 0x57f   :  { %16301 = vmatpush2.bf16.msra.mxu1 %v20319_v19  ;;  %16259 = vmatprep.subr.bf16.mxu0 %v20324_v58  ;;  %v8595_v19 = vadd.f32 %v8594_v29, %v1352_v63  ;;  %v22750_v58 = vpop.f32.mrf.mxu1  ;;  %v20343_v63 = vld [vmem:[#allocation8 + $0x15f0] ss:$24 sps:$4 sm:$0xff]  }
 0x580   :  { %16302 = vmatprep.subr.bf16.mxu1 %v20327_v54 }
 0x582   :  { %16260 = vmatpush2.bf16.msra.mxu0 %v20322_v60 }
 0x583   :  { %16303 = vmatpush2.bf16.msra.mxu1 %v20325_v48  ;;  %16315 = vmatprep.subr.bf16.mxu0 %v20330_v1  ;;  %v22756_v48 = vpack.c.bf16 %v9112_v32, %v9088_v25  ;;  %v20334_v1 = vld [vmem:[#allocation8 + $0x1320] ss:$24 sps:$4 sm:$0xff]   ;;  %v1332_v25 = vrot.slane %v22597_v39, %v22440_v57 }
 0x584   :  { %16358 = vmatprep.subr.bf16.mxu1 %v20333_v12 }
 0x585   :  { %v8637_v54 = vpop.f32.mrf.mxu0  ;;  %16262 = vmatmul.mubr.bf16.vlgmr.msra.gmra.mxu0 %v23195_v27 }
 0x586   :  { %v8638_v11 = vadd.f32 %v8637_v54, %v8595_v19  ;;  %v8680_v60 = vpop.f32.mrf.mxu1  ;;  %16305 = vmatmul.mubr.bf16.vlgmr.msra.gmra.mxu1 %v23196_v16  ;;  %16316 = vmatpush1.bf16.msra.mxu0 %v20328_v35  ;;  %v20351_v19 = vld [vmem:[#allocation8 + $0x15c4] ss:$24 sps:$4 sm:$0xff]  }
 0x587   :  { %16347 = vmatprep.mubr.bf16.mxu0 %v22753_v23  ;;  %16359 = vmatpush1.bf16.msra.mxu1 %v20331_v5  ;;  %v22759_v29 = vpop.f32.mrf.mxu0 }
 0x588   :  { %v22761_v12 = vadd.f32 %v8680_v60, %v8638_v11  ;;  %16390 = vmatprep.mubr.bf16.mxu1 %v22756_v48  ;;  %v22764_v42 = vpop.f32.mrf.mxu1  ;;  %16317 = vmatprep.subr.bf16.mxu0 %v20336_v17  ;;  %v1340_v17 = vrot.slane %v22597_v39, %v22448_v21  ;;  %v20346_v11 = vld [vmem:[#allocation8 + $0x12c0] ss:$24 sps:$4 sm:$0xff]   ;;  %v23197_v60 = vld [vmem:[#allocation53_spill] sm:$0xff] }
 0x589   :  { %v8641_v14 = vpop.f32.mrf.mxu0  ;;  %16360 = vmatprep.subr.bf16.mxu1 %v20339_v7  ;;  %v20357_v39 = vld [vmem:[#allocation8 + $0x1594] ss:$24 sps:$4 sm:$0xff]  }
 0x58a   :  { %v8759_v18 = vmul.f32 %v22761_v12, %v22761_v12  ;;  %v8642_v35 = vadd.f32 %v8641_v14, %v8599_v26  ;;  %16318 = vmatpush1.bf16.msra.mxu0 %v20334_v1  ;;  %v8684_v32 = vpop.f32.mrf.mxu1  ;;  %v8214_v1 = vadd.f32 %v23197_v60, %v1332_v25  ;;  %v8343_v26 = vadd.f32 %v22518_v38, %v1340_v17  ;;  %v20355_v38 = vld [vmem:[#allocation8 + $0x1590] ss:$24 sps:$4 sm:$0xff]  }
 0x58b   :  { %16361 = vmatpush1.bf16.msra.mxu1 %v20337_v3  ;;  %16319 = vmatprep.subr.bf16.mxu0 %v20342_v56  ;;  %v20349_v3 = vld [vmem:[#allocation8 + $0x15c0] ss:$24 sps:$4 sm:$0xff]   ;;  %v20354_v56 = vld [vmem:[#allocation8 + $0x1294] ss:$24 sps:$4 sm:$0xff]  }
 0x58c   :  { %v8807_v5 = vmul.f32 %v8759_v18, %v22761_v12  ;;  %v22769_v24 = vadd.f32 %v8684_v32, %v8642_v35  ;;  %16362 = vmatprep.subr.bf16.mxu1 %v20345_v59  ;;  %v23198_v18 = vld [vmem:[#allocation51_spill] sm:$0xff]  ;;  %v8339_v32 = vadd.f32 %v22508_v9, %v1340_v17  ;;  %v23199_v9 = vld [vmem:[#allocation52_spill] sm:$0xff] }
 0x58d   :  { %v8210_v35 = vadd.f32 %v23198_v18, %v1332_v25  ;;  %v20363_v25 = vld [vmem:[#allocation8 + $0x1564] ss:$24 sps:$4 sm:$0xff]  }
 0x58e   :  { %v8855_v54 = vmul.f32 0.044715, %v8807_v5  ;;  %v8783_v7 = vmul.f32 %v22769_v24, %v22769_v24  ;;  %16320 = vmatpush1.bf16.msra.mxu0 %v20340_v52  ;;  %v8386_v52 = vadd.f32 %v22602_v2, %v8343_v26  ;;  %v20366_v26 = vld [vmem:[#allocation8 + $0x1234] ss:$24 sps:$4 sm:$0xff]  }
 0x58f   :  { %16363 = vmatpush1.bf16.msra.mxu1 %v20343_v63  ;;  %16321 = vmatprep.subr.bf16.mxu0 %v20348_v40  ;;  %v20352_v63 = vld [vmem:[#allocation8 + $0x1290] ss:$24 sps:$4 sm:$0xff]   ;;  %v8257_v40 = vadd.f32 %v22506_v36, %v8214_v1  ;;  %v8253_v17 = vadd.f32 %v23199_v9, %v8210_v35  ;;  %v20358_v1 = vld [vmem:[#allocation8 + $0x1260] ss:$24 sps:$4 sm:$0xff]  }
 0x590   :  { %v8903_v59 = vadd.f32 %v8855_v54, %v22761_v12  ;;  %v8831_v14 = vmul.f32 %v8783_v7, %v22769_v24  ;;  %16364 = vmatprep.subr.bf16.mxu1 %v20351_v19  ;;  %v20360_v54 = vld [vmem:[#allocation8 + $0x1264] ss:$24 sps:$4 sm:$0xff]   ;;  %v8382_v7 = vadd.f32 %v22527_v61, %v8339_v32  ;;  %v20361_v61 = vld [vmem:[#allocation8 + $0x1560] ss:$24 sps:$4 sm:$0xff]   ;;  %v20367_v35 = vld [vmem:[#allocation8 + $0x1530] ss:$24 sps:$4 sm:$0xff]  }
 0x591   :  { %v22789_v2 = vadd.f32 %v22516_v46, %v8257_v40  ;;  %v20369_v46 = vld [vmem:[#allocation8 + $0x1534] ss:$24 sps:$4 sm:$0xff]   ;;  %v20372_v32 = vld [vmem:[#allocation8 + $0x1204] ss:$24 sps:$4 sm:$0xff]  }
 0x592   :  { %v8951_v5 = vmul.f32 0.7978846, %v8903_v59  ;;  %v8879_v60 = vmul.f32 0.044715, %v8831_v14  ;;  %16322 = vmatpush1.bf16.msra.mxu0 %v20346_v11  ;;  %v22792_v11 = vadd.f32 %v22604_v49, %v8386_v52  ;;  %v22798_v59 = vadd.f32 %v22532_v33, %v8382_v7  ;;  %v20375_v52 = vld [vmem:[#allocation8 + $0x1504] ss:$24 sps:$4 sm:$0xff]  }
 0x593   :  { %16365 = vmatpush1.bf16.msra.mxu1 %v20349_v3  ;;  %16323 = vmatprep.subr.bf16.mxu0 %v20354_v56  ;;  %v23200_v3 = vld [vmem:[#allocation54_spill] sm:$0xff]  ;;  %v8778_v49 = vmul.f32 %v22789_v2, %v22789_v2 }
 0x594   :  { %21844 = vtanh.f32 %v8951_v5  ;;  %v8927_v19 = vadd.f32 %v8879_v60, %v22769_v24  ;;  %16366 = vmatprep.subr.bf16.mxu1 %v20357_v39  ;;  %v22795_v56 = vadd.f32 %v23200_v3, %v8253_v17  ;;  %v8780_v14 = vmul.f32 %v22792_v11, %v22792_v11  ;;  %v20364_v39 = vld [vmem:[#allocation8 + $0x1230] ss:$24 sps:$4 sm:$0xff]  }
 0x595   :  { %v8756_v33 = vmul.f32 %v22798_v59, %v22798_v59  ;;  %v8826_v5 = vmul.f32 %v8778_v49, %v22789_v2  ;;  %v20379_v3 = vld [vmem:[#allocation8 + $0x17d0] ss:$24 sps:$4 sm:$0xff]  }
 0x596   :  { %v8975_v36 = vmul.f32 0.7978846, %v8927_v19  ;;  %16324 = vmatpush1.bf16.msra.mxu0 %v20352_v63  ;;  %v8754_v18 = vmul.f32 %v22795_v56, %v22795_v56  ;;  %v8828_v60 = vmul.f32 %v8780_v14, %v22792_v11  ;;  %v20370_v63 = vld [vmem:[#allocation8 + $0x1200] ss:$24 sps:$4 sm:$0xff]   ;;  %v20381_v19 = vld [vmem:[#allocation8 + $0x17d4] ss:$24 sps:$4 sm:$0xff]  }
 0x597   :  { %16367 = vmatpush1.bf16.msra.mxu1 %v20355_v38  ;;  %16325 = vmatprep.subr.bf16.mxu0 %v20360_v54  ;;  %v20373_v38 = vld [vmem:[#allocation8 + $0x1500] ss:$24 sps:$4 sm:$0xff]   ;;  %v20378_v54 = vld [vmem:[#allocation8 + $0x14d4] ss:$24 sps:$4 sm:$0xff]   ;;  %v8804_v7 = vmul.f32 %v8756_v33, %v22798_v59  ;;  %v8874_v9 = vmul.f32 0.044715, %v8826_v5 }
 0x598   :  { %21846 = vtanh.f32 %v8975_v36  ;;  %16368 = vmatprep.subr.bf16.mxu1 %v20363_v25  ;;  %v8802_v40 = vmul.f32 %v8754_v18, %v22795_v56  ;;  %v8876_v17 = vmul.f32 0.044715, %v8828_v60  ;;  %v20376_v36 = vld [vmem:[#allocation8 + $0x14d0] ss:$24 sps:$4 sm:$0xff]   ;;  %v20382_v33 = vld [vmem:[#allocation8 + $0x14a0] ss:$24 sps:$4 sm:$0xff]  }
 0x599   :  { %v20385_v60 = vld [vmem:[#allocation8 + $0x17a0] ss:$24 sps:$4 sm:$0xff]  }
 0x59a   :  { %16326 = vmatpush1.bf16.msra.mxu0 %v20358_v1  ;;  %v8850_v1 = vmul.f32 0.044715, %v8802_v40  ;;  %v8924_v18 = vadd.f32 %v8876_v17, %v22792_v11  ;;  %v20391_v17 = vld [vmem:[#allocation8 + $0x1770] ss:$24 sps:$4 sm:$0xff]  }
 0x59b   :  { %16369 = vmatpush1.bf16.msra.mxu1 %v20361_v61  ;;  %16327 = vmatprep.subr.bf16.mxu0 %v20366_v26  ;;  %v20384_v61 = vld [vmem:[#allocation8 + $0x14a4] ss:$24 sps:$4 sm:$0xff]   ;;  %v8852_v26 = vmul.f32 0.044715, %v8804_v7 }
 0x59c   :  { %16370 = vmatprep.subr.bf16.mxu1 %v20369_v46  ;;  %v20387_v46 = vld [vmem:[#allocation8 + $0x17a4] ss:$24 sps:$4 sm:$0xff]   ;;  %v8898_v5 = vadd.f32 %v8850_v1, %v22795_v56 }
 0x59d   :  { %v8900_v40 = vadd.f32 %v8852_v26, %v22798_v59  ;;  %v20397_v26 = vld [vmem:[#allocation8 + $0x1740] ss:$24 sps:$4 sm:$0xff]  }
 0x59e   :  { %16328 = vmatpush1.bf16.msra.mxu0 %v20364_v39  ;;  %v8922_v39 = vadd.f32 %v8874_v9, %v22789_v2  ;;  %v8946_v9 = vmul.f32 0.7978846, %v8898_v5  ;;  %v20417_v5 = vld [vmem:[#allocation8 + $0x16b4] ss:$24 sps:$4 sm:$0xff]  }
 0x59f   :  { %16371 = vmatpush1.bf16.msra.mxu1 %v20367_v35  ;;  %16329 = vmatprep.subr.bf16.mxu0 %v20372_v32  ;;  %v8711_v35 = vmul.f32 0.5, %v22761_v12  ;;  %v8735_v32 = vmul.f32 0.5, %v22769_v24  ;;  %v20388_v12 = vld [vmem:[#allocation8 + $0x1470] ss:$24 sps:$4 sm:$0xff]   ;;  %v8948_v1 = vmul.f32 0.7978846, %v8900_v40 }
 0x5a0   :  { %16372 = vmatprep.subr.bf16.mxu1 %v20375_v52 }
 0x5a1   :  { %v21845_v25 = vpop.eup %21844 }
 0x5a2   :  { %16330 = vmatpush1.bf16.msra.mxu0 %v20370_v63  ;;  %v9047_v49 = vadd.f32 1.0, %v21845_v25  ;;  %v20390_v63 = vld [vmem:[#allocation8 + $0x1474] ss:$24 sps:$4 sm:$0xff]   ;;  %v8972_v25 = vmul.f32 0.7978846, %v8924_v18 }
 0x5a3   :  { %16373 = vmatpush1.bf16.msra.mxu1 %v20373_v38  ;;  %16331 = vmatprep.subr.bf16.mxu0 %v20378_v54  ;;  %v20393_v38 = vld [vmem:[#allocation8 + $0x1774] ss:$24 sps:$4 sm:$0xff]   ;;  %v20408_v18 = vld [vmem:[#allocation8 + $0x13e4] ss:$24 sps:$4 sm:$0xff]  }
 0x5a4   :  { %16374 = vmatprep.subr.bf16.mxu1 %v20381_v19  ;;  %v9095_v54 = vmul.f32 %v9047_v49, %v8711_v35  ;;  %v8970_v19 = vmul.f32 0.7978846, %v8922_v39  ;;  %v20405_v49 = vld [vmem:[#allocation8 + $0x1714] ss:$24 sps:$4 sm:$0xff]   ;;  %v20403_v39 = vld [vmem:[#allocation8 + $0x1710] ss:$24 sps:$4 sm:$0xff]  }
 0x5a5   :  { %v21847_v14 = vpop.eup %21846  ;;  %v20411_v35 = vld [vmem:[#allocation8 + $0x16e4] ss:$24 sps:$4 sm:$0xff]  }
 0x5a6   :  { %16332 = vmatpush2.bf16.msra.mxu0 %v20376_v36  ;;  %v9071_v52 = vadd.f32 1.0, %v21847_v14  ;;  %v20396_v36 = vld [vmem:[#allocation8 + $0x1444] ss:$24 sps:$4 sm:$0xff]   ;;  %21848 = vtanh.f32 %v8970_v19  ;;  %v20400_v14 = vld [vmem:[#allocation8 + $0x1410] ss:$24 sps:$4 sm:$0xff]  }
 0x5a7   :  { %16375 = vmatpush2.bf16.msra.mxu1 %v20379_v3  ;;  %16333 = vmatprep.subr.bf16.mxu0 %v20384_v61  ;;  %v20399_v3 = vld [vmem:[#allocation8 + $0x1744] ss:$24 sps:$4 sm:$0xff]   ;;  %21850 = vtanh.f32 %v8972_v25  ;;  %v20394_v61 = vld [vmem:[#allocation8 + $0x1440] ss:$24 sps:$4 sm:$0xff]  }
 0x5a8   :  { %16376 = vmatprep.subr.bf16.mxu1 %v20387_v46  ;;  %v9119_v7 = vmul.f32 %v9071_v52, %v8735_v32  ;;  %21852 = vtanh.f32 %v8946_v9  ;;  %v20402_v46 = vld [vmem:[#allocation8 + $0x1414] ss:$24 sps:$4 sm:$0xff]   ;;  %v20406_v32 = vld [vmem:[#allocation8 + $0x13e0] ss:$24 sps:$4 sm:$0xff]   ;;  %v20423_v19 = vld [vmem:[#allocation8 + $0x1684] ss:$24 sps:$4 sm:$0xff]  }
 0x5a9   :  { %21854 = vtanh.f32 %v8948_v1  ;;  %v20414_v52 = vld [vmem:[#allocation8 + $0x13b4] ss:$24 sps:$4 sm:$0xff]   ;;  %v20418_v9 = vld [vmem:[#allocation8 + $0x1380] ss:$24 sps:$4 sm:$0xff]  }
 0x5aa   :  { %16334 = vmatpush2.bf16.msra.mxu0 %v20382_v33  ;;  %v22818_v24 = vpack.c.bf16 %v9119_v7, %v9095_v54  ;;  %v20409_v33 = vld [vmem:[#allocation8 + $0x16e0] ss:$24 sps:$4 sm:$0xff]   ;;  %v20420_v54 = vld [vmem:[#allocation8 + $0x1384] ss:$24 sps:$4 sm:$0xff]   ;;  %v20426_v1 = vld [vmem:[#allocation8 + $0x1954] ss:$24 sps:$4 sm:$0xff]  }
 0x5ab   :  { %16377 = vmatpush2.bf16.msra.mxu1 %v20385_v60  ;;  %16335 = vmatprep.subr.bf16.mxu0 %v20390_v63  ;;  %v20412_v63 = vld [vmem:[#allocation8 + $0x13b0] ss:$24 sps:$4 sm:$0xff]  }
 0x5ac   :  { %16378 = vmatprep.subr.bf16.mxu1 %v20393_v38  ;;  %v20415_v38 = vld [vmem:[#allocation8 + $0x16b0] ss:$24 sps:$4 sm:$0xff]  }
 0x5ae   :  { %16336 = vmatpush2.bf16.msra.mxu0 %v20388_v12 }
 0x5af   :  { %16379 = vmatpush2.bf16.msra.mxu1 %v20391_v17  ;;  %16337 = vmatprep.subr.bf16.mxu0 %v20396_v36  ;;  %v20421_v36 = vld [vmem:[#allocation8 + $0x1680] ss:$24 sps:$4 sm:$0xff]  }
 0x5b0   :  { %16380 = vmatprep.subr.bf16.mxu1 %v20399_v3  ;;  %v8730_v3 = vmul.f32 0.5, %v22789_v2 }
 0x5b2   :  { %16338 = vmatpush2.bf16.msra.mxu0 %v20394_v61 }
 0x5b3   :  { %16381 = vmatpush2.bf16.msra.mxu1 %v20397_v26  ;;  %16339 = vmatprep.subr.bf16.mxu0 %v20402_v46  ;;  %v21849_v60 = vpop.eup %21848  ;;  %v20429_v26 = vld [vmem:[#allocation8 + $0x1c54] ss:$24 sps:$4 sm:$0xff]   ;;  %v8732_v46 = vmul.f32 0.5, %v22792_v11  ;;  %v20435_v11 = vld [vmem:[#allocation8 + $0x1c24] ss:$24 sps:$4 sm:$0xff]  }
 0x5b4   :  { %16382 = vmatprep.subr.bf16.mxu1 %v20405_v49  ;;  %v21851_v40 = vpop.eup %21850  ;;  %v9066_v12 = vadd.f32 1.0, %v21849_v60  ;;  %v23201_v60 = vld [vmem:[#allocation43_spill] sm:$0xff] }
 0x5b5   :  { %v21853_v7 = vpop.eup %21852  ;;  %v9068_v17 = vadd.f32 1.0, %v21851_v40  ;;  %v23202_v40 = vld [vmem:[#allocation49_spill] sm:$0xff] }
 0x5b6   :  { %16340 = vmatpush2.bf16.msra.mxu0 %v20400_v14  ;;  %v21855_v25 = vpop.eup %21854  ;;  %v9042_v61 = vadd.f32 1.0, %v21853_v7  ;;  %v8706_v14 = vmul.f32 0.5, %v22795_v56  ;;  %v20441_v7 = vld [vmem:[#allocation8 + $0x1bf4] ss:$24 sps:$4 sm:$0xff]  }
 0x5b7   :  { %16383 = vmatpush2.bf16.msra.mxu1 %v20403_v39  ;;  %16341 = vmatprep.subr.bf16.mxu0 %v20408_v18  ;;  %v9044_v49 = vadd.f32 1.0, %v21855_v25  ;;  %v9114_v39 = vmul.f32 %v9066_v12, %v8730_v3  ;;  %v20424_v18 = vld [vmem:[#allocation8 + $0x1950] ss:$24 sps:$4 sm:$0xff]   ;;  %v20444_v12 = vld [vmem:[#allocation8 + $0x18c4] ss:$24 sps:$4 sm:$0xff]  }
 0x5b8   :  { %16384 = vmatprep.subr.bf16.mxu1 %v20411_v35  ;;  %v8708_v35 = vmul.f32 0.5, %v22798_v59  ;;  %v20433_v59 = vld [vmem:[#allocation8 + $0x1c20] ss:$24 sps:$4 sm:$0xff]   ;;  %v20439_v25 = vld [vmem:[#allocation8 + $0x1bf0] ss:$24 sps:$4 sm:$0xff]  }
 0x5b9   :  { %v20442_v3 = vld [vmem:[#allocation8 + $0x18c0] ss:$24 sps:$4 sm:$0xff]  }
 0x5ba   :  { %16342 = vmatpush2.bf16.msra.mxu0 %v20406_v32  ;;  %v9116_v32 = vmul.f32 %v9068_v17, %v8732_v46  ;;  %v9092_v2 = vmul.f32 %v9044_v49, %v8708_v35  ;;  %v21870_v17 = vld [vmem:[#allocation7 + $0x10] sm:$0xff]  ;;  %v20450_v49 = vld [vmem:[#allocation8 + $0x1894] ss:$24 sps:$4 sm:$0xff]  }
 0x5bb   :  { %16385 = vmatpush2.bf16.msra.mxu1 %v20409_v33  ;;  %16343 = vmatprep.subr.bf16.mxu0 %v20414_v52  ;;  %v20427_v33 = vld [vmem:[#allocation8 + $0x1c50] ss:$24 sps:$4 sm:$0xff]   ;;  %v9090_v52 = vmul.f32 %v9042_v61, %v8706_v14  ;;  %v20445_v46 = vld [vmem:[#allocation8 + $0x1bc0] ss:$24 sps:$4 sm:$0xff]  }
 0x5bc   :  { %16386 = vmatprep.subr.bf16.mxu1 %v20417_v5  ;;  %v20432_v5 = vld [vmem:[#allocation8 + $0x1924] ss:$24 sps:$4 sm:$0xff]   ;;  %v22828_v56 = vpack.c.bf16 %v9116_v32, %v9092_v2 }
 0x5be   :  { %16344 = vmatpush2.bf16.msra.mxu0 %v20412_v63  ;;  %v22825_v63 = vpack.c.bf16 %v9114_v39, %v9090_v52  ;;  %v20453_v39 = vld [vmem:[#allocation8 + $0x1b94] ss:$24 sps:$4 sm:$0xff]   ;;  %v20456_v52 = vld [vmem:[#allocation8 + $0x1864] ss:$24 sps:$4 sm:$0xff]  }
 0x5bf   :  { %16387 = vmatpush2.bf16.msra.mxu1 %v20415_v38  ;;  %16345 = vmatprep.subr.bf16.mxu0 %v20420_v54  ;;  %v20430_v38 = vld [vmem:[#allocation8 + $0x1920] ss:$24 sps:$4 sm:$0xff]   ;;  %v20438_v54 = vld [vmem:[#allocation8 + $0x18f4] ss:$24 sps:$4 sm:$0xff]  }
 0x5c0   :  { %16388 = vmatprep.subr.bf16.mxu1 %v20423_v19  ;;  %v20436_v19 = vld [vmem:[#allocation8 + $0x18f0] ss:$24 sps:$4 sm:$0xff]  }
 0x5c2   :  { %16346 = vmatpush2.bf16.msra.mxu0 %v20418_v9  ;;  %v20447_v9 = vld [vmem:[#allocation8 + $0x1bc4] ss:$24 sps:$4 sm:$0xff]  }
 0x5c3   :  { %16389 = vmatpush2.bf16.msra.mxu1 %v20421_v36  ;;  %16401 = vmatprep.subr.bf16.mxu0 %v20426_v1  ;;  %v1348_v36 = vrot.slane %v21870_v17, %v22535_v8  ;;  %v1356_v1 = vrot.slane %v21870_v17, %v22538_v41  ;;  %v20448_v41 = vld [vmem:[#allocation8 + $0x1890] ss:$24 sps:$4 sm:$0xff]  }
 0x5c4   :  { %16444 = vmatprep.subr.bf16.mxu1 %v20429_v26  ;;  %v8643_v26 = vpop.f32.mrf.mxu0  ;;  %v20868_v8 = vld [vmem:[#allocation8 + $0xe78] ss:$24 sps:$4 sm:$0xff]  }
 0x5c5   :  { %16348 = vmatmul.mubr.bf16.vlgmr.msra.gmra.mxu0 %v23201_v60  ;;  %v8472_v61 = vadd.f32 %v22668_v44, %v1348_v36  ;;  %v8601_v14 = vadd.f32 %v22750_v58, %v1356_v1  ;;  %v8597_v35 = vadd.f32 %v22740_v53, %v1356_v1  ;;  %v20451_v44 = vld [vmem:[#allocation8 + $0x1b90] ss:$24 sps:$4 sm:$0xff]   ;;  %v20466_v1 = vld [vmem:[#allocation8 + $0x1800] ss:$24 sps:$4 sm:$0xff]  }
 0x5c6   :  { %16391 = vmatmul.mubr.bf16.vlgmr.msra.gmra.mxu1 %v23202_v40  ;;  %16402 = vmatpush1.bf16.msra.mxu0 %v20424_v18  ;;  %v8468_v18 = vadd.f32 %v22613_v15, %v1348_v36  ;;  %v8686_v15 = vpop.f32.mrf.mxu1 }
 0x5c7   :  { %16433 = vmatprep.mubr.bf16.mxu0 %v22825_v63  ;;  %16445 = vmatpush1.bf16.msra.mxu1 %v20427_v33  ;;  %v8644_v32 = vadd.f32 %v8643_v26, %v8601_v14  ;;  %v8515_v33 = vadd.f32 %v22738_v30, %v8472_v61  ;;  %v8640_v2 = vadd.f32 %v22759_v29, %v8597_v35  ;;  %v20469_v61 = vld [vmem:[#allocation8 + $0x1b00] ss:$24 sps:$4 sm:$0xff]   ;;  %v20474_v26 = vld [vmem:[#allocation8 + $0x1ad4] ss:$24 sps:$4 sm:$0xff]  }
 0x5c8   :  { %16476 = vmatprep.mubr.bf16.mxu1 %v22828_v56  ;;  %16403 = vmatprep.subr.bf16.mxu0 %v20432_v5  ;;  %v20459_v5 = vld [vmem:[#allocation8 + $0x1b64] ss:$24 sps:$4 sm:$0xff]   ;;  %v8511_v58 = vadd.f32 %v22618_v0, %v8468_v18  ;;  %v20465_v0 = vld [vmem:[#allocation8 + $0x1b34] ss:$24 sps:$4 sm:$0xff]   ;;  %v20472_v18 = vld [vmem:[#allocation8 + $0x1ad0] ss:$24 sps:$4 sm:$0xff]  }
 0x5c9   :  { %16446 = vmatprep.subr.bf16.mxu1 %v20435_v11  ;;  %v22842_v11 = vadd.f32 %v22748_v22, %v8515_v33  ;;  %v22844_v53 = vadd.f32 %v8686_v15, %v8644_v32  ;;  %v22850_v29 = vadd.f32 %v22764_v42, %v8640_v2  ;;  %v20475_v32 = vld [vmem:[#allocation8 + $0x1dd0] ss:$24 sps:$4 sm:$0xff]   ;;  %v20481_v15 = vld [vmem:[#allocation8 + $0x1da0] ss:$24 sps:$4 sm:$0xff]  }
 0x5ca   :  { %16404 = vmatpush1.bf16.msra.mxu0 %v20430_v38  ;;  %v20454_v38 = vld [vmem:[#allocation8 + $0x1860] ss:$24 sps:$4 sm:$0xff]   ;;  %v22847_v30 = vadd.f32 %v22680_v55, %v8511_v58 }
 0x5cb   :  { %16447 = vmatpush1.bf16.msra.mxu1 %v20433_v59  ;;  %16405 = vmatprep.subr.bf16.mxu0 %v20438_v54  ;;  %v20457_v59 = vld [vmem:[#allocation8 + $0x1b60] ss:$24 sps:$4 sm:$0xff]   ;;  %v20462_v54 = vld [vmem:[#allocation8 + $0x1834] ss:$24 sps:$4 sm:$0xff]   ;;  %v8782_v22 = vmul.f32 %v22842_v11, %v22842_v11  ;;  %v8760_v42 = vmul.f32 %v22850_v29, %v22850_v29 }
 0x5cc   :  { %16448 = vmatprep.subr.bf16.mxu1 %v20441_v7  ;;  %v8784_v7 = vmul.f32 %v22844_v53, %v22844_v53  ;;  %v8758_v55 = vmul.f32 %v22847_v30, %v22847_v30 }
 0x5cd   :  { %v8830_v17 = vmul.f32 %v8782_v22, %v22842_v11 }
 0x5ce   :  { %16406 = vmatpush1.bf16.msra.mxu0 %v20436_v19  ;;  %v20460_v19 = vld [vmem:[#allocation8 + $0x1830] ss:$24 sps:$4 sm:$0xff]   ;;  %v8832_v36 = vmul.f32 %v8784_v7, %v22844_v53 }
 0x5cf   :  { %16449 = vmatpush1.bf16.msra.mxu1 %v20439_v25  ;;  %16407 = vmatprep.subr.bf16.mxu0 %v20444_v12  ;;  %v20463_v25 = vld [vmem:[#allocation8 + $0x1b30] ss:$24 sps:$4 sm:$0xff]   ;;  %v20468_v12 = vld [vmem:[#allocation8 + $0x1804] ss:$24 sps:$4 sm:$0xff]   ;;  %v8878_v14 = vmul.f32 0.044715, %v8830_v17 }
 0x5d0   :  { %16450 = vmatprep.subr.bf16.mxu1 %v20447_v9  ;;  %v20471_v9 = vld [vmem:[#allocation8 + $0x1b04] ss:$24 sps:$4 sm:$0xff]   ;;  %v20484_v7 = vld [vmem:[#allocation8 + $0x1a70] ss:$24 sps:$4 sm:$0xff]   ;;  %v20493_v17 = vld [vmem:[#allocation8 + $0x1d40] ss:$24 sps:$4 sm:$0xff]  }
 0x5d2   :  { %16408 = vmatpush1.bf16.msra.mxu0 %v20442_v3  ;;  %v8806_v3 = vmul.f32 %v8758_v55, %v22847_v30  ;;  %v20487_v55 = vld [vmem:[#allocation8 + $0x1d70] ss:$24 sps:$4 sm:$0xff]  }
 0x5d3   :  { %16451 = vmatpush1.bf16.msra.mxu1 %v20445_v46  ;;  %16409 = vmatprep.subr.bf16.mxu0 %v20450_v49  ;;  %v8808_v46 = vmul.f32 %v8760_v42, %v22850_v29  ;;  %v20477_v49 = vld [vmem:[#allocation8 + $0x1dd4] ss:$24 sps:$4 sm:$0xff]   ;;  %v20495_v42 = vld [vmem:[#allocation8 + $0x1d44] ss:$24 sps:$4 sm:$0xff]  }
 0x5d4   :  { %16452 = vmatprep.subr.bf16.mxu1 %v20453_v39  ;;  %v8880_v39 = vmul.f32 0.044715, %v8832_v36  ;;  %v8854_v35 = vmul.f32 0.044715, %v8806_v3  ;;  %v20498_v36 = vld [vmem:[#allocation8 + $0x1a14] ss:$24 sps:$4 sm:$0xff]  }
 0x5d5   :  { %v8856_v33 = vmul.f32 0.044715, %v8808_v46  ;;  %v20496_v3 = vld [vmem:[#allocation8 + $0x1a10] ss:$24 sps:$4 sm:$0xff]   ;;  %v20507_v46 = vld [vmem:[#allocation8 + $0x1ce4] ss:$24 sps:$4 sm:$0xff]  }
 0x5d6   :  { %16410 = vmatpush1.bf16.msra.mxu0 %v20448_v41  ;;  %v20480_v41 = vld [vmem:[#allocation8 + $0x1aa4] ss:$24 sps:$4 sm:$0xff]   ;;  %v8928_v2 = vadd.f32 %v8880_v39, %v22844_v53  ;;  %v8902_v58 = vadd.f32 %v8854_v35, %v22847_v30  ;;  %v20510_v39 = vld [vmem:[#allocation8 + $0x19b4] ss:$24 sps:$4 sm:$0xff]  }
 0x5d7   :  { %16453 = vmatpush1.bf16.msra.mxu1 %v20451_v44  ;;  %16411 = vmatprep.subr.bf16.mxu0 %v20456_v52  ;;  %v20483_v44 = vld [vmem:[#allocation8 + $0x1da4] ss:$24 sps:$4 sm:$0xff]   ;;  %v8926_v52 = vadd.f32 %v8878_v14, %v22842_v11  ;;  %v20505_v14 = vld [vmem:[#allocation8 + $0x1ce0] ss:$24 sps:$4 sm:$0xff]  }
 0x5d8   :  { %16454 = vmatprep.subr.bf16.mxu1 %v20459_v5  ;;  %v20478_v5 = vld [vmem:[#allocation8 + $0x1aa0] ss:$24 sps:$4 sm:$0xff]   ;;  %v8976_v22 = vmul.f32 0.7978846, %v8928_v2  ;;  %v20519_v2 = vld [vmem:[#allocation8 + $0x1c84] ss:$24 sps:$4 sm:$0xff]  }
 0x5da   :  { %16412 = vmatpush1.bf16.msra.mxu0 %v20454_v38  ;;  %v20486_v38 = vld [vmem:[#allocation8 + $0x1a74] ss:$24 sps:$4 sm:$0xff]  }
 0x5db   :  { %16455 = vmatpush1.bf16.msra.mxu1 %v20457_v59  ;;  %16413 = vmatprep.subr.bf16.mxu0 %v20462_v54  ;;  %v8904_v59 = vadd.f32 %v8856_v33, %v22850_v29  ;;  %v20489_v54 = vld [vmem:[#allocation8 + $0x1d74] ss:$24 sps:$4 sm:$0xff]   ;;  %v20511_v33 = vld [vmem:[#allocation8 + $0x1cb0] ss:$24 sps:$4 sm:$0xff]  }
 0x5dc   :  { %16456 = vmatprep.subr.bf16.mxu1 %v20465_v0  ;;  %v8974_v0 = vmul.f32 0.7978846, %v8926_v52 }
 0x5de   :  { %16414 = vmatpush1.bf16.msra.mxu0 %v20460_v19  ;;  %v8950_v19 = vmul.f32 0.7978846, %v8902_v58  ;;  %21856 = vtanh.f32 %v8974_v0  ;;  %v8734_v0 = vmul.f32 0.5, %v22842_v11 }
 0x5df   :  { %16457 = vmatpush1.bf16.msra.mxu1 %v20463_v25  ;;  %16415 = vmatprep.subr.bf16.mxu0 %v20468_v12  ;;  %v20492_v25 = vld [vmem:[#allocation8 + $0x1a44] ss:$24 sps:$4 sm:$0xff]   ;;  %v8952_v12 = vmul.f32 0.7978846, %v8904_v59  ;;  %21858 = vtanh.f32 %v8976_v22  ;;  %v20517_v59 = vld [vmem:[#allocation8 + $0x1c80] ss:$24 sps:$4 sm:$0xff]  }
 0x5e0   :  { %16458 = vmatprep.subr.bf16.mxu1 %v20471_v9  ;;  %v20490_v9 = vld [vmem:[#allocation8 + $0x1a40] ss:$24 sps:$4 sm:$0xff]   ;;  %21860 = vtanh.f32 %v8950_v19  ;;  %v8736_v19 = vmul.f32 0.5, %v22844_v53  ;;  %v20531_v53 = vld [vmem:[#allocation8 + $0x2224] ss:$24 sps:$4 sm:$0xff]  }
 0x5e1   :  { %21862 = vtanh.f32 %v8952_v12 }
 0x5e2   :  { %16416 = vmatpush1.bf16.msra.mxu0 %v20466_v1  ;;  %v20501_v1 = vld [vmem:[#allocation8 + $0x1d14] ss:$24 sps:$4 sm:$0xff]  }
 0x5e3   :  { %16459 = vmatpush1.bf16.msra.mxu1 %v20469_v61  ;;  %16417 = vmatprep.subr.bf16.mxu0 %v20474_v26  ;;  %v20499_v61 = vld [vmem:[#allocation8 + $0x1d10] ss:$24 sps:$4 sm:$0xff]   ;;  %v20504_v26 = vld [vmem:[#allocation8 + $0x19e4] ss:$24 sps:$4 sm:$0xff]  }
 0x5e4   :  { %16460 = vmatprep.subr.bf16.mxu1 %v20477_v49  ;;  %v20502_v49 = vld [vmem:[#allocation8 + $0x19e0] ss:$24 sps:$4 sm:$0xff]  }
 0x5e6   :  { %16418 = vmatpush2.bf16.msra.mxu0 %v20472_v18  ;;  %v20513_v18 = vld [vmem:[#allocation8 + $0x1cb4] ss:$24 sps:$4 sm:$0xff]  }
 0x5e7   :  { %16461 = vmatpush2.bf16.msra.mxu1 %v20475_v32  ;;  %16419 = vmatprep.subr.bf16.mxu0 %v20480_v41  ;;  %v20508_v32 = vld [vmem:[#allocation8 + $0x19b0] ss:$24 sps:$4 sm:$0xff]  }
 0x5e8   :  { %16462 = vmatprep.subr.bf16.mxu1 %v20483_v44  ;;  %v20516_v44 = vld [vmem:[#allocation8 + $0x1984] ss:$24 sps:$4 sm:$0xff]  }
 0x5ea   :  { %16420 = vmatpush2.bf16.msra.mxu0 %v20478_v5 }
 0x5eb   :  { %16463 = vmatpush2.bf16.msra.mxu1 %v20481_v15  ;;  %16421 = vmatprep.subr.bf16.mxu0 %v20486_v38  ;;  %v21857_v35 = vpop.eup %21856  ;;  %v20514_v15 = vld [vmem:[#allocation8 + $0x1980] ss:$24 sps:$4 sm:$0xff]  }
 0x5ec   :  { %16464 = vmatprep.subr.bf16.mxu1 %v20489_v54  ;;  %v21859_v41 = vpop.eup %21858  ;;  %v9070_v58 = vadd.f32 1.0, %v21857_v35  ;;  %v20522_v54 = vld [vmem:[#allocation8 + $0x1f54] ss:$24 sps:$4 sm:$0xff]   ;;  %v20543_v35 = vld [vmem:[#allocation8 + $0x21c4] ss:$24 sps:$4 sm:$0xff]  }
 0x5ed   :  { %v21861_v52 = vpop.eup %21860  ;;  %v9072_v38 = vadd.f32 1.0, %v21859_v41  ;;  %v20541_v41 = vld [vmem:[#allocation8 + $0x21c0] ss:$24 sps:$4 sm:$0xff]  }
 0x5ee   :  { %16422 = vmatpush2.bf16.msra.mxu0 %v20484_v7  ;;  %v21863_v5 = vpop.eup %21862  ;;  %v9046_v22 = vadd.f32 1.0, %v21861_v52  ;;  %v20525_v7 = vld [vmem:[#allocation8 + $0x2254] ss:$24 sps:$4 sm:$0xff]   ;;  %v9118_v12 = vmul.f32 %v9070_v58, %v8734_v0  ;;  %v20544_v52 = vld [vmem:[#allocation8 + $0x1e90] ss:$24 sps:$4 sm:$0xff]  }
 0x5ef   :  { %16465 = vmatpush2.bf16.msra.mxu1 %v20487_v55  ;;  %16423 = vmatprep.subr.bf16.mxu0 %v20492_v25  ;;  %v9048_v55 = vadd.f32 1.0, %v21863_v5  ;;  %v8710_v25 = vmul.f32 0.5, %v22847_v30  ;;  %v20552_v5 = vld [vmem:[#allocation8 + $0x1e64] ss:$24 sps:$4 sm:$0xff]   ;;  %v20556_v0 = vld [vmem:[#allocation8 + $0x1e30] ss:$24 sps:$4 sm:$0xff]  }
 0x5f0   :  { %16466 = vmatprep.subr.bf16.mxu1 %v20495_v42  ;;  %v20520_v42 = vld [vmem:[#allocation8 + $0x1f50] ss:$24 sps:$4 sm:$0xff]   ;;  %v20555_v58 = vld [vmem:[#allocation8 + $0x2164] ss:$24 sps:$4 sm:$0xff]  }
 0x5f2   :  { %16424 = vmatpush2.bf16.msra.mxu0 %v20490_v9  ;;  %v8712_v9 = vmul.f32 0.5, %v22850_v29  ;;  %v20529_v29 = vld [vmem:[#allocation8 + $0x2220] ss:$24 sps:$4 sm:$0xff]  }
 0x5f3   :  { %16467 = vmatpush2.bf16.msra.mxu1 %v20493_v17  ;;  %16425 = vmatprep.subr.bf16.mxu0 %v20498_v36  ;;  %v9120_v17 = vmul.f32 %v9072_v38, %v8736_v19  ;;  %v20523_v36 = vld [vmem:[#allocation8 + $0x2250] ss:$24 sps:$4 sm:$0xff]   ;;  %v20553_v38 = vld [vmem:[#allocation8 + $0x2160] ss:$24 sps:$4 sm:$0xff]   ;;  %v20567_v19 = vld [vmem:[#allocation8 + $0x2104] ss:$24 sps:$4 sm:$0xff]  }
 0x5f4   :  { %16468 = vmatprep.subr.bf16.mxu1 %v20501_v1  ;;  %v9094_v1 = vmul.f32 %v9046_v22, %v8710_v25  ;;  %v9096_v11 = vmul.f32 %v9048_v55, %v8712_v9  ;;  %v20559_v22 = vld [vmem:[#allocation8 + $0x2130] ss:$24 sps:$4 sm:$0xff]   ;;  %v20562_v55 = vld [vmem:[#allocation8 + $0x1e00] ss:$24 sps:$4 sm:$0xff]  }
 0x5f5   :  { %v20565_v25 = vld [vmem:[#allocation8 + $0x2100] ss:$24 sps:$4 sm:$0xff]   ;;  %v20568_v9 = vld [vmem:[#allocation8 + $0x20d0] ss:$24 sps:$4 sm:$0xff]  }
 0x5f6   :  { %16426 = vmatpush2.bf16.msra.mxu0 %v20496_v3  ;;  %v20528_v3 = vld [vmem:[#allocation8 + $0x1f24] ss:$24 sps:$4 sm:$0xff]   ;;  %v22876_v30 = vpack.c.bf16 %v9120_v17, %v9096_v11  ;;  %v20571_v17 = vld [vmem:[#allocation8 + $0x23d0] ss:$24 sps:$4 sm:$0xff]   ;;  %v20574_v11 = vld [vmem:[#allocation8 + $0x20a0] ss:$24 sps:$4 sm:$0xff]  }
 0x5f7   :  { %16469 = vmatpush2.bf16.msra.mxu1 %v20499_v61  ;;  %16427 = vmatprep.subr.bf16.mxu0 %v20504_v26  ;;  %v22873_v61 = vpack.c.bf16 %v9118_v12, %v9094_v1  ;;  %v20526_v26 = vld [vmem:[#allocation8 + $0x1f20] ss:$24 sps:$4 sm:$0xff]   ;;  %v20570_v12 = vld [vmem:[#allocation8 + $0x20d4] ss:$24 sps:$4 sm:$0xff]   ;;  %v20579_v1 = vld [vmem:[#allocation8 + $0x23a4] ss:$24 sps:$4 sm:$0xff]  }
 0x5f8   :  { %16470 = vmatprep.subr.bf16.mxu1 %v20507_v46  ;;  %v20534_v46 = vld [vmem:[#allocation8 + $0x1ef4] ss:$24 sps:$4 sm:$0xff]  }
 0x5fa   :  { %16428 = vmatpush2.bf16.msra.mxu0 %v20502_v49  ;;  %v20537_v49 = vld [vmem:[#allocation8 + $0x21f4] ss:$24 sps:$4 sm:$0xff]  }
 0x5fb   :  { %16471 = vmatpush2.bf16.msra.mxu1 %v20505_v14  ;;  %16429 = vmatprep.subr.bf16.mxu0 %v20510_v39  ;;  %v20532_v14 = vld [vmem:[#allocation8 + $0x1ef0] ss:$24 sps:$4 sm:$0xff]  }
 0x5fc   :  { %16472 = vmatprep.subr.bf16.mxu1 %v20513_v18  ;;  %v20535_v39 = vld [vmem:[#allocation8 + $0x21f0] ss:$24 sps:$4 sm:$0xff]   ;;  %v20540_v18 = vld [vmem:[#allocation8 + $0x1ec4] ss:$24 sps:$4 sm:$0xff]  }
 0x5fe   :  { %16430 = vmatpush2.bf16.msra.mxu0 %v20508_v32  ;;  %v20538_v32 = vld [vmem:[#allocation8 + $0x1ec0] ss:$24 sps:$4 sm:$0xff]  }
 0x5ff   :  { %16473 = vmatpush2.bf16.msra.mxu1 %v20511_v33  ;;  %16431 = vmatprep.subr.bf16.mxu0 %v20516_v44  ;;  %v20546_v33 = vld [vmem:[#allocation8 + $0x1e94] ss:$24 sps:$4 sm:$0xff]  }
 0x600   :  { %16474 = vmatprep.subr.bf16.mxu1 %v20519_v2  ;;  %v20549_v44 = vld [vmem:[#allocation8 + $0x2194] ss:$24 sps:$4 sm:$0xff]   ;;  %v20547_v2 = vld [vmem:[#allocation8 + $0x2190] ss:$24 sps:$4 sm:$0xff]  }
 0x602   :  { %16432 = vmatpush2.bf16.msra.mxu0 %v20514_v15  ;;  %v20550_v15 = vld [vmem:[#allocation8 + $0x1e60] ss:$24 sps:$4 sm:$0xff]  }
 0x603   :  { %16475 = vmatpush2.bf16.msra.mxu1 %v20517_v59  ;;  %16487 = vmatprep.subr.bf16.mxu0 %v20522_v54  ;;  %v20558_v59 = vld [vmem:[#allocation8 + $0x1e34] ss:$24 sps:$4 sm:$0xff]  }
 0x604   :  { %16530 = vmatprep.subr.bf16.mxu1 %v20525_v7  ;;  %v20561_v54 = vld [vmem:[#allocation8 + $0x2134] ss:$24 sps:$4 sm:$0xff]   ;;  %v20564_v7 = vld [vmem:[#allocation8 + $0x1e04] ss:$24 sps:$4 sm:$0xff]  }
 0x605   :  { %16434 = vmatmul.mubr.bf16.vlgmr.msra.gmra.mxu0 %v22504_v13 }
 0x606   :  { %16477 = vmatmul.mubr.bf16.vlgmr.msra.gmra.mxu1 %v22592_v10  ;;  %16488 = vmatpush1.bf16.msra.mxu0 %v20520_v42  ;;  %v20573_v42 = vld [vmem:[#allocation8 + $0x23d4] ss:$24 sps:$4 sm:$0xff]  }
 0x607   :  { %16519 = vmatprep.mubr.bf16.mxu0 %v22873_v61  ;;  %16531 = vmatpush1.bf16.msra.mxu1 %v20523_v36  ;;  %v20576_v36 = vld [vmem:[#allocation8 + $0x20a4] ss:$24 sps:$4 sm:$0xff]  }
 0x608   :  { %16562 = vmatprep.mubr.bf16.mxu1 %v22876_v30  ;;  %16489 = vmatprep.subr.bf16.mxu0 %v20528_v3  ;;  %v20577_v3 = vld [vmem:[#allocation8 + $0x23a0] ss:$24 sps:$4 sm:$0xff]  }
 0x609   :  { %16532 = vmatprep.subr.bf16.mxu1 %v20531_v53  ;;  %v20582_v53 = vld [vmem:[#allocation8 + $0x2074] ss:$24 sps:$4 sm:$0xff]  }
 0x60a   :  { %16490 = vmatpush1.bf16.msra.mxu0 %v20526_v26  ;;  %v20585_v26 = vld [vmem:[#allocation8 + $0x2374] ss:$24 sps:$4 sm:$0xff]  }
 0x60b   :  { %16533 = vmatpush1.bf16.msra.mxu1 %v20529_v29  ;;  %16491 = vmatprep.subr.bf16.mxu0 %v20534_v46  ;;  %v20580_v29 = vld [vmem:[#allocation8 + $0x2070] ss:$24 sps:$4 sm:$0xff]  }
 0x60c   :  { %16534 = vmatprep.subr.bf16.mxu1 %v20537_v49  ;;  %v20583_v46 = vld [vmem:[#allocation8 + $0x2370] ss:$24 sps:$4 sm:$0xff]   ;;  %v20588_v49 = vld [vmem:[#allocation8 + $0x2044] ss:$24 sps:$4 sm:$0xff]  }
 0x60e   :  { %16492 = vmatpush1.bf16.msra.mxu0 %v20532_v14  ;;  %v20591_v14 = vld [vmem:[#allocation8 + $0x2344] ss:$24 sps:$4 sm:$0xff]  }
 0x60f   :  { %16535 = vmatpush1.bf16.msra.mxu1 %v20535_v39  ;;  %16493 = vmatprep.subr.bf16.mxu0 %v20540_v18  ;;  %v20586_v39 = vld [vmem:[#allocation8 + $0x2040] ss:$24 sps:$4 sm:$0xff]  }
 0x610   :  { %16536 = vmatprep.subr.bf16.mxu1 %v20543_v35  ;;  %v20589_v18 = vld [vmem:[#allocation8 + $0x2340] ss:$24 sps:$4 sm:$0xff]   ;;  %v20594_v35 = vld [vmem:[#allocation8 + $0x2014] ss:$24 sps:$4 sm:$0xff]  }
 0x612   :  { %16494 = vmatpush1.bf16.msra.mxu0 %v20538_v32  ;;  %v20597_v32 = vld [vmem:[#allocation8 + $0x2314] ss:$24 sps:$4 sm:$0xff]  }
 0x613   :  { %16537 = vmatpush1.bf16.msra.mxu1 %v20541_v41  ;;  %16495 = vmatprep.subr.bf16.mxu0 %v20546_v33  ;;  %v20592_v41 = vld [vmem:[#allocation8 + $0x2010] ss:$24 sps:$4 sm:$0xff]  }
 0x614   :  { %16538 = vmatprep.subr.bf16.mxu1 %v20549_v44  ;;  %v20595_v33 = vld [vmem:[#allocation8 + $0x2310] ss:$24 sps:$4 sm:$0xff]   ;;  %v20600_v44 = vld [vmem:[#allocation8 + $0x1fe4] ss:$24 sps:$4 sm:$0xff]  }
 0x616   :  { %16496 = vmatpush1.bf16.msra.mxu0 %v20544_v52  ;;  %v20603_v52 = vld [vmem:[#allocation8 + $0x22e4] ss:$24 sps:$4 sm:$0xff]  }
 0x617   :  { %16539 = vmatpush1.bf16.msra.mxu1 %v20547_v2  ;;  %16497 = vmatprep.subr.bf16.mxu0 %v20552_v5  ;;  %v20598_v2 = vld [vmem:[#allocation8 + $0x1fe0] ss:$24 sps:$4 sm:$0xff]  }
 0x618   :  { %16540 = vmatprep.subr.bf16.mxu1 %v20555_v58  ;;  %v20601_v5 = vld [vmem:[#allocation8 + $0x22e0] ss:$24 sps:$4 sm:$0xff]   ;;  %v20606_v58 = vld [vmem:[#allocation8 + $0x1fb4] ss:$24 sps:$4 sm:$0xff]  }
 0x61a   :  { %16498 = vmatpush1.bf16.msra.mxu0 %v20550_v15  ;;  %v20609_v15 = vld [vmem:[#allocation8 + $0x22b4] ss:$24 sps:$4 sm:$0xff]  }
 0x61b   :  { %16541 = vmatpush1.bf16.msra.mxu1 %v20553_v38  ;;  %16499 = vmatprep.subr.bf16.mxu0 %v20558_v59  ;;  %v20604_v38 = vld [vmem:[#allocation8 + $0x1fb0] ss:$24 sps:$4 sm:$0xff]  }
 0x61c   :  { %16542 = vmatprep.subr.bf16.mxu1 %v20561_v54  ;;  %v20607_v59 = vld [vmem:[#allocation8 + $0x22b0] ss:$24 sps:$4 sm:$0xff]   ;;  %v20612_v54 = vld [vmem:[#allocation8 + $0x1f84] ss:$24 sps:$4 sm:$0xff]  }
 0x61e   :  { %16500 = vmatpush1.bf16.msra.mxu0 %v20556_v0  ;;  %v20615_v0 = vld [vmem:[#allocation8 + $0x2284] ss:$24 sps:$4 sm:$0xff]  }
 0x61f   :  { %16543 = vmatpush1.bf16.msra.mxu1 %v20559_v22  ;;  %16501 = vmatprep.subr.bf16.mxu0 %v20564_v7  ;;  %v20610_v22 = vld [vmem:[#allocation8 + $0x1f80] ss:$24 sps:$4 sm:$0xff]  }
 0x620   :  { %16544 = vmatprep.subr.bf16.mxu1 %v20567_v19  ;;  %v20613_v7 = vld [vmem:[#allocation8 + $0x2280] ss:$24 sps:$4 sm:$0xff]   ;;  %v20618_v19 = vld [vmem:[#allocation8 + $0x15c] ss:$24 sps:$4 sm:$0xff]  }
 0x622   :  { %16502 = vmatpush1.bf16.msra.mxu0 %v20562_v55  ;;  %v20621_v55 = vld [vmem:[#allocation8 + $0x45c] ss:$24 sps:$4 sm:$0xff]  }
 0x623   :  { %16545 = vmatpush1.bf16.msra.mxu1 %v20565_v25  ;;  %16503 = vmatprep.subr.bf16.mxu0 %v20570_v12  ;;  %v20616_v25 = vld [vmem:[#allocation8 + $0x158] ss:$24 sps:$4 sm:$0xff]  }
 0x624   :  { %16546 = vmatprep.subr.bf16.mxu1 %v20573_v42  ;;  %v20619_v12 = vld [vmem:[#allocation8 + $0x458] ss:$24 sps:$4 sm:$0xff]   ;;  %v20624_v42 = vld [vmem:[#allocation8 + $0x12c] ss:$24 sps:$4 sm:$0xff]  }
 0x626   :  { %16504 = vmatpush2.bf16.msra.mxu0 %v20568_v9  ;;  %v20627_v9 = vld [vmem:[#allocation8 + $0x42c] ss:$24 sps:$4 sm:$0xff]  }
 0x627   :  { %16547 = vmatpush2.bf16.msra.mxu1 %v20571_v17  ;;  %16505 = vmatprep.subr.bf16.mxu0 %v20576_v36  ;;  %v20622_v17 = vld [vmem:[#allocation8 + $0x128] ss:$24 sps:$4 sm:$0xff]  }
 0x628   :  { %16548 = vmatprep.subr.bf16.mxu1 %v20579_v1  ;;  %v20625_v36 = vld [vmem:[#allocation8 + $0x428] ss:$24 sps:$4 sm:$0xff]   ;;  %v20630_v1 = vld [vmem:[#allocation8 + $0xfc] ss:$24 sps:$4 sm:$0xff]  }
 0x62a   :  { %16506 = vmatpush2.bf16.msra.mxu0 %v20574_v11  ;;  %v20633_v11 = vld [vmem:[#allocation8 + $0x3fc] ss:$24 sps:$4 sm:$0xff]  }
 0x62b   :  { %16549 = vmatpush2.bf16.msra.mxu1 %v20577_v3  ;;  %16507 = vmatprep.subr.bf16.mxu0 %v20582_v53  ;;  %v20628_v3 = vld [vmem:[#allocation8 + $0xf8] ss:$24 sps:$4 sm:$0xff]  }
 0x62c   :  { %16550 = vmatprep.subr.bf16.mxu1 %v20585_v26  ;;  %v20631_v53 = vld [vmem:[#allocation8 + $0x3f8] ss:$24 sps:$4 sm:$0xff]   ;;  %v20636_v26 = vld [vmem:[#allocation8 + $0xcc] ss:$24 sps:$4 sm:$0xff]  }
 0x62e   :  { %16508 = vmatpush2.bf16.msra.mxu0 %v20580_v29  ;;  %v20639_v29 = vld [vmem:[#allocation8 + $0x3cc] ss:$24 sps:$4 sm:$0xff]  }
 0x62f   :  { %16551 = vmatpush2.bf16.msra.mxu1 %v20583_v46  ;;  %16509 = vmatprep.subr.bf16.mxu0 %v20588_v49  ;;  %v20634_v46 = vld [vmem:[#allocation8 + $0xc8] ss:$24 sps:$4 sm:$0xff]  }
 0x630   :  { %16552 = vmatprep.subr.bf16.mxu1 %v20591_v14  ;;  %v20637_v49 = vld [vmem:[#allocation8 + $0x3c8] ss:$24 sps:$4 sm:$0xff]   ;;  %v20642_v14 = vld [vmem:[#allocation8 + $0x9c] ss:$24 sps:$4 sm:$0xff]  }
 0x632   :  { %16510 = vmatpush2.bf16.msra.mxu0 %v20586_v39  ;;  %v20645_v39 = vld [vmem:[#allocation8 + $0x39c] ss:$24 sps:$4 sm:$0xff]  }
 0x633   :  { %16553 = vmatpush2.bf16.msra.mxu1 %v20589_v18  ;;  %16511 = vmatprep.subr.bf16.mxu0 %v20594_v35  ;;  %v20640_v18 = vld [vmem:[#allocation8 + $0x98] ss:$24 sps:$4 sm:$0xff]  }
 0x634   :  { %16554 = vmatprep.subr.bf16.mxu1 %v20597_v32  ;;  %v20643_v35 = vld [vmem:[#allocation8 + $0x398] ss:$24 sps:$4 sm:$0xff]   ;;  %v20648_v32 = vld [vmem:[#allocation8 + $0x6c] ss:$24 sps:$4 sm:$0xff]  }
 0x636   :  { %16512 = vmatpush2.bf16.msra.mxu0 %v20592_v41  ;;  %v20651_v41 = vld [vmem:[#allocation8 + $0x36c] ss:$24 sps:$4 sm:$0xff]  }
 0x637   :  { %16555 = vmatpush2.bf16.msra.mxu1 %v20595_v33  ;;  %16513 = vmatprep.subr.bf16.mxu0 %v20600_v44  ;;  %v20646_v33 = vld [vmem:[#allocation8 + $0x68] ss:$24 sps:$4 sm:$0xff]  }
 0x638   :  { %16556 = vmatprep.subr.bf16.mxu1 %v20603_v52  ;;  %v20649_v44 = vld [vmem:[#allocation8 + $0x368] ss:$24 sps:$4 sm:$0xff]   ;;  %v20654_v52 = vld [vmem:[#allocation8 + $0x3c] ss:$24 sps:$4 sm:$0xff]  }
 0x63a   :  { %16514 = vmatpush2.bf16.msra.mxu0 %v20598_v2  ;;  %v20657_v2 = vld [vmem:[#allocation8 + $0x33c] ss:$24 sps:$4 sm:$0xff]  }
 0x63b   :  { %16557 = vmatpush2.bf16.msra.mxu1 %v20601_v5  ;;  %16515 = vmatprep.subr.bf16.mxu0 %v20606_v58  ;;  %v20652_v5 = vld [vmem:[#allocation8 + $0x38] ss:$24 sps:$4 sm:$0xff]  }
 0x63c   :  { %16558 = vmatprep.subr.bf16.mxu1 %v20609_v15  ;;  %v20655_v58 = vld [vmem:[#allocation8 + $0x338] ss:$24 sps:$4 sm:$0xff]   ;;  %v20660_v15 = vld [vmem:[#allocation8 + $0xc] ss:$24 sps:$4 sm:$0xff]  }
 0x63e   :  { %16516 = vmatpush2.bf16.msra.mxu0 %v20604_v38  ;;  %v20663_v38 = vld [vmem:[#allocation8 + $0x30c] ss:$24 sps:$4 sm:$0xff]  }
 0x63f   :  { %16559 = vmatpush2.bf16.msra.mxu1 %v20607_v59  ;;  %16517 = vmatprep.subr.bf16.mxu0 %v20612_v54  ;;  %v20658_v59 = vld [vmem:[#allocation8 + $0x8] ss:$24 sps:$4 sm:$0xff]  }
 0x640   :  { %16560 = vmatprep.subr.bf16.mxu1 %v20615_v0  ;;  %v20661_v54 = vld [vmem:[#allocation8 + $0x308] ss:$24 sps:$4 sm:$0xff]   ;;  %v20666_v0 = vld [vmem:[#allocation8 + $0x2dc] ss:$24 sps:$4 sm:$0xff]  }
 0x642   :  { %16518 = vmatpush2.bf16.msra.mxu0 %v20610_v22  ;;  %v20669_v22 = vld [vmem:[#allocation8 + $0x5dc] ss:$24 sps:$4 sm:$0xff]  }
 0x643   :  { %16561 = vmatpush2.bf16.msra.mxu1 %v20613_v7  ;;  %16573 = vmatprep.subr.bf16.mxu0 %v20618_v19  ;;  %v20664_v7 = vld [vmem:[#allocation8 + $0x2d8] ss:$24 sps:$4 sm:$0xff]  }
 0x644   :  { %16616 = vmatprep.subr.bf16.mxu1 %v20621_v55  ;;  %v20667_v19 = vld [vmem:[#allocation8 + $0x5d8] ss:$24 sps:$4 sm:$0xff]   ;;  %v20672_v55 = vld [vmem:[#allocation8 + $0x2ac] ss:$24 sps:$4 sm:$0xff]  }
 0x645   :  { %16520 = vmatmul.mubr.bf16.vlgmr.msra.gmra.mxu0 %v22736_v28 }
 0x646   :  { %16563 = vmatmul.mubr.bf16.vlgmr.msra.gmra.mxu1 %v22818_v24  ;;  %16574 = vmatpush1.bf16.msra.mxu0 %v20616_v25  ;;  %v20675_v25 = vld [vmem:[#allocation8 + $0x5ac] ss:$24 sps:$4 sm:$0xff]  }
 0x647   :  { %16605 = vmatprep.mubr.bf16.mxu0 %v22521_v4  ;;  %16617 = vmatpush1.bf16.msra.mxu1 %v20619_v12  ;;  %v20670_v12 = vld [vmem:[#allocation8 + $0x2a8] ss:$24 sps:$4 sm:$0xff]  }
 0x648   :  { %16648 = vmatprep.mubr.bf16.mxu1 %v22524_v62  ;;  %16575 = vmatprep.subr.bf16.mxu0 %v20624_v42  ;;  %v20673_v42 = vld [vmem:[#allocation8 + $0x5a8] ss:$24 sps:$4 sm:$0xff]  }
 0x649   :  { %16618 = vmatprep.subr.bf16.mxu1 %v20627_v9  ;;  %v20678_v9 = vld [vmem:[#allocation8 + $0x27c] ss:$24 sps:$4 sm:$0xff]  }
 0x64a   :  { %16576 = vmatpush1.bf16.msra.mxu0 %v20622_v17  ;;  %v20681_v17 = vld [vmem:[#allocation8 + $0x57c] ss:$24 sps:$4 sm:$0xff]  }
 0x64b   :  { %16619 = vmatpush1.bf16.msra.mxu1 %v20625_v36  ;;  %16577 = vmatprep.subr.bf16.mxu0 %v20630_v1  ;;  %v20676_v36 = vld [vmem:[#allocation8 + $0x278] ss:$24 sps:$4 sm:$0xff]  }
 0x64c   :  { %16620 = vmatprep.subr.bf16.mxu1 %v20633_v11  ;;  %v20679_v1 = vld [vmem:[#allocation8 + $0x578] ss:$24 sps:$4 sm:$0xff]   ;;  %v20684_v11 = vld [vmem:[#allocation8 + $0x24c] ss:$24 sps:$4 sm:$0xff]  }
 0x64e   :  { %16578 = vmatpush1.bf16.msra.mxu0 %v20628_v3  ;;  %v20687_v3 = vld [vmem:[#allocation8 + $0x54c] ss:$24 sps:$4 sm:$0xff]  }
 0x64f   :  { %16621 = vmatpush1.bf16.msra.mxu1 %v20631_v53  ;;  %16579 = vmatprep.subr.bf16.mxu0 %v20636_v26  ;;  %v20682_v53 = vld [vmem:[#allocation8 + $0x248] ss:$24 sps:$4 sm:$0xff]  }
 0x650   :  { %16622 = vmatprep.subr.bf16.mxu1 %v20639_v29  ;;  %v20685_v26 = vld [vmem:[#allocation8 + $0x548] ss:$24 sps:$4 sm:$0xff]   ;;  %v20690_v29 = vld [vmem:[#allocation8 + $0x21c] ss:$24 sps:$4 sm:$0xff]  }
 0x652   :  { %16580 = vmatpush1.bf16.msra.mxu0 %v20634_v46  ;;  %v20693_v46 = vld [vmem:[#allocation8 + $0x51c] ss:$24 sps:$4 sm:$0xff]  }
 0x653   :  { %16623 = vmatpush1.bf16.msra.mxu1 %v20637_v49  ;;  %16581 = vmatprep.subr.bf16.mxu0 %v20642_v14  ;;  %v20688_v49 = vld [vmem:[#allocation8 + $0x218] ss:$24 sps:$4 sm:$0xff]  }
 0x654   :  { %16624 = vmatprep.subr.bf16.mxu1 %v20645_v39  ;;  %v20691_v14 = vld [vmem:[#allocation8 + $0x518] ss:$24 sps:$4 sm:$0xff]   ;;  %v20696_v39 = vld [vmem:[#allocation8 + $0x1ec] ss:$24 sps:$4 sm:$0xff]  }
 0x656   :  { %16582 = vmatpush1.bf16.msra.mxu0 %v20640_v18  ;;  %v20699_v18 = vld [vmem:[#allocation8 + $0x4ec] ss:$24 sps:$4 sm:$0xff]  }
 0x657   :  { %16625 = vmatpush1.bf16.msra.mxu1 %v20643_v35  ;;  %16583 = vmatprep.subr.bf16.mxu0 %v20648_v32  ;;  %v20694_v35 = vld [vmem:[#allocation8 + $0x1e8] ss:$24 sps:$4 sm:$0xff]  }
 0x658   :  { %16626 = vmatprep.subr.bf16.mxu1 %v20651_v41  ;;  %v20697_v32 = vld [vmem:[#allocation8 + $0x4e8] ss:$24 sps:$4 sm:$0xff]   ;;  %v20702_v41 = vld [vmem:[#allocation8 + $0x1bc] ss:$24 sps:$4 sm:$0xff]  }
 0x65a   :  { %16584 = vmatpush1.bf16.msra.mxu0 %v20646_v33  ;;  %v20705_v33 = vld [vmem:[#allocation8 + $0x4bc] ss:$24 sps:$4 sm:$0xff]  }
 0x65b   :  { %16627 = vmatpush1.bf16.msra.mxu1 %v20649_v44  ;;  %16585 = vmatprep.subr.bf16.mxu0 %v20654_v52  ;;  %v20700_v44 = vld [vmem:[#allocation8 + $0x1b8] ss:$24 sps:$4 sm:$0xff]  }
 0x65c   :  { %16628 = vmatprep.subr.bf16.mxu1 %v20657_v2  ;;  %v20703_v52 = vld [vmem:[#allocation8 + $0x4b8] ss:$24 sps:$4 sm:$0xff]   ;;  %v20708_v2 = vld [vmem:[#allocation8 + $0x18c] ss:$24 sps:$4 sm:$0xff]  }
 0x65e   :  { %16586 = vmatpush1.bf16.msra.mxu0 %v20652_v5  ;;  %v20711_v5 = vld [vmem:[#allocation8 + $0x48c] ss:$24 sps:$4 sm:$0xff]  }
 0x65f   :  { %16629 = vmatpush1.bf16.msra.mxu1 %v20655_v58  ;;  %16587 = vmatprep.subr.bf16.mxu0 %v20660_v15  ;;  %v20706_v58 = vld [vmem:[#allocation8 + $0x188] ss:$24 sps:$4 sm:$0xff]  }
 0x660   :  { %16630 = vmatprep.subr.bf16.mxu1 %v20663_v38  ;;  %v20709_v15 = vld [vmem:[#allocation8 + $0x488] ss:$24 sps:$4 sm:$0xff]   ;;  %v20714_v38 = vld [vmem:[#allocation8 + $0x75c] ss:$24 sps:$4 sm:$0xff]  }
 0x662   :  { %16588 = vmatpush1.bf16.msra.mxu0 %v20658_v59  ;;  %v20717_v59 = vld [vmem:[#allocation8 + $0xa5c] ss:$24 sps:$4 sm:$0xff]  }
 0x663   :  { %16631 = vmatpush1.bf16.msra.mxu1 %v20661_v54  ;;  %16589 = vmatprep.subr.bf16.mxu0 %v20666_v0  ;;  %v20712_v54 = vld [vmem:[#allocation8 + $0x758] ss:$24 sps:$4 sm:$0xff]  }
 0x664   :  { %16632 = vmatprep.subr.bf16.mxu1 %v20669_v22  ;;  %v20715_v0 = vld [vmem:[#allocation8 + $0xa58] ss:$24 sps:$4 sm:$0xff]   ;;  %v20720_v22 = vld [vmem:[#allocation8 + $0x72c] ss:$24 sps:$4 sm:$0xff]  }
 0x666   :  { %16590 = vmatpush2.bf16.msra.mxu0 %v20664_v7  ;;  %v20723_v7 = vld [vmem:[#allocation8 + $0xa2c] ss:$24 sps:$4 sm:$0xff]  }
 0x667   :  { %16633 = vmatpush2.bf16.msra.mxu1 %v20667_v19  ;;  %16591 = vmatprep.subr.bf16.mxu0 %v20672_v55  ;;  %v20718_v19 = vld [vmem:[#allocation8 + $0x728] ss:$24 sps:$4 sm:$0xff]  }
 0x668   :  { %16634 = vmatprep.subr.bf16.mxu1 %v20675_v25  ;;  %v20721_v55 = vld [vmem:[#allocation8 + $0xa28] ss:$24 sps:$4 sm:$0xff]   ;;  %v20726_v25 = vld [vmem:[#allocation8 + $0x6fc] ss:$24 sps:$4 sm:$0xff]  }
 0x66a   :  { %16592 = vmatpush2.bf16.msra.mxu0 %v20670_v12  ;;  %v20729_v12 = vld [vmem:[#allocation8 + $0x9fc] ss:$24 sps:$4 sm:$0xff]  }
 0x66b   :  { %16635 = vmatpush2.bf16.msra.mxu1 %v20673_v42  ;;  %16593 = vmatprep.subr.bf16.mxu0 %v20678_v9  ;;  %v20724_v42 = vld [vmem:[#allocation8 + $0x6f8] ss:$24 sps:$4 sm:$0xff]  }
 0x66c   :  { %16636 = vmatprep.subr.bf16.mxu1 %v20681_v17  ;;  %v20727_v9 = vld [vmem:[#allocation8 + $0x9f8] ss:$24 sps:$4 sm:$0xff]   ;;  %v20732_v17 = vld [vmem:[#allocation8 + $0x6cc] ss:$24 sps:$4 sm:$0xff]  }
 0x66e   :  { %16594 = vmatpush2.bf16.msra.mxu0 %v20676_v36  ;;  %v20735_v36 = vld [vmem:[#allocation8 + $0x9cc] ss:$24 sps:$4 sm:$0xff]  }
 0x66f   :  { %16637 = vmatpush2.bf16.msra.mxu1 %v20679_v1  ;;  %16595 = vmatprep.subr.bf16.mxu0 %v20684_v11  ;;  %v20730_v1 = vld [vmem:[#allocation8 + $0x6c8] ss:$24 sps:$4 sm:$0xff]  }
 0x670   :  { %16638 = vmatprep.subr.bf16.mxu1 %v20687_v3  ;;  %v20733_v11 = vld [vmem:[#allocation8 + $0x9c8] ss:$24 sps:$4 sm:$0xff]   ;;  %v20738_v3 = vld [vmem:[#allocation8 + $0x69c] ss:$24 sps:$4 sm:$0xff]  }
 0x672   :  { %16596 = vmatpush2.bf16.msra.mxu0 %v20682_v53  ;;  %v20741_v53 = vld [vmem:[#allocation8 + $0x99c] ss:$24 sps:$4 sm:$0xff]  }
 0x673   :  { %16639 = vmatpush2.bf16.msra.mxu1 %v20685_v26  ;;  %16597 = vmatprep.subr.bf16.mxu0 %v20690_v29  ;;  %v20736_v26 = vld [vmem:[#allocation8 + $0x698] ss:$24 sps:$4 sm:$0xff]  }
 0x674   :  { %16640 = vmatprep.subr.bf16.mxu1 %v20693_v46  ;;  %v20739_v29 = vld [vmem:[#allocation8 + $0x998] ss:$24 sps:$4 sm:$0xff]   ;;  %v20744_v46 = vld [vmem:[#allocation8 + $0x66c] ss:$24 sps:$4 sm:$0xff]  }
 0x676   :  { %16598 = vmatpush2.bf16.msra.mxu0 %v20688_v49  ;;  %v20747_v49 = vld [vmem:[#allocation8 + $0x96c] ss:$24 sps:$4 sm:$0xff]  }
 0x677   :  { %16641 = vmatpush2.bf16.msra.mxu1 %v20691_v14  ;;  %16599 = vmatprep.subr.bf16.mxu0 %v20696_v39  ;;  %v20742_v14 = vld [vmem:[#allocation8 + $0x668] ss:$24 sps:$4 sm:$0xff]  }
 0x678   :  { %16642 = vmatprep.subr.bf16.mxu1 %v20699_v18  ;;  %v20745_v39 = vld [vmem:[#allocation8 + $0x968] ss:$24 sps:$4 sm:$0xff]   ;;  %v20750_v18 = vld [vmem:[#allocation8 + $0x63c] ss:$24 sps:$4 sm:$0xff]  }
 0x67a   :  { %16600 = vmatpush2.bf16.msra.mxu0 %v20694_v35  ;;  %v20753_v35 = vld [vmem:[#allocation8 + $0x93c] ss:$24 sps:$4 sm:$0xff]  }
 0x67b   :  { %16643 = vmatpush2.bf16.msra.mxu1 %v20697_v32  ;;  %16601 = vmatprep.subr.bf16.mxu0 %v20702_v41  ;;  %v20748_v32 = vld [vmem:[#allocation8 + $0x638] ss:$24 sps:$4 sm:$0xff]  }
 0x67c   :  { %16644 = vmatprep.subr.bf16.mxu1 %v20705_v33  ;;  %v20751_v41 = vld [vmem:[#allocation8 + $0x938] ss:$24 sps:$4 sm:$0xff]   ;;  %v20756_v33 = vld [vmem:[#allocation8 + $0x60c] ss:$24 sps:$4 sm:$0xff]  }
 0x67e   :  { %16602 = vmatpush2.bf16.msra.mxu0 %v20700_v44  ;;  %v20759_v44 = vld [vmem:[#allocation8 + $0x90c] ss:$24 sps:$4 sm:$0xff]  }
 0x67f   :  { %16645 = vmatpush2.bf16.msra.mxu1 %v20703_v52  ;;  %16603 = vmatprep.subr.bf16.mxu0 %v20708_v2  ;;  %v20754_v52 = vld [vmem:[#allocation8 + $0x608] ss:$24 sps:$4 sm:$0xff]  }
 0x680   :  { %16646 = vmatprep.subr.bf16.mxu1 %v20711_v5  ;;  %v20757_v2 = vld [vmem:[#allocation8 + $0x908] ss:$24 sps:$4 sm:$0xff]   ;;  %v20762_v5 = vld [vmem:[#allocation8 + $0x8dc] ss:$24 sps:$4 sm:$0xff]  }
 0x682   :  { %16604 = vmatpush2.bf16.msra.mxu0 %v20706_v58  ;;  %v20765_v58 = vld [vmem:[#allocation8 + $0xbdc] ss:$24 sps:$4 sm:$0xff]  }
 0x683   :  { %16647 = vmatpush2.bf16.msra.mxu1 %v20709_v15  ;;  %16659 = vmatprep.subr.bf16.mxu0 %v20714_v38  ;;  %v20760_v15 = vld [vmem:[#allocation8 + $0x8d8] ss:$24 sps:$4 sm:$0xff]  }
 0x684   :  { %16702 = vmatprep.subr.bf16.mxu1 %v20717_v59  ;;  %v20763_v38 = vld [vmem:[#allocation8 + $0xbd8] ss:$24 sps:$4 sm:$0xff]   ;;  %v20768_v59 = vld [vmem:[#allocation8 + $0x8ac] ss:$24 sps:$4 sm:$0xff]  }
 0x685   :  { %16606 = vmatmul.mubr.bf16.vlgmr.msra.gmra.mxu0 %v23167_v51 }
 0x686   :  { %16649 = vmatmul.mubr.bf16.vlgmr.msra.gmra.mxu1 %v23168_v45  ;;  %16660 = vmatpush1.bf16.msra.mxu0 %v20712_v54  ;;  %v20771_v54 = vld [vmem:[#allocation8 + $0xbac] ss:$24 sps:$4 sm:$0xff]  }
 0x687   :  { %16691 = vmatprep.mubr.bf16.mxu0 %v22607_v47  ;;  %16703 = vmatpush1.bf16.msra.mxu1 %v20715_v0  ;;  %v20766_v0 = vld [vmem:[#allocation8 + $0x8a8] ss:$24 sps:$4 sm:$0xff]  }
 0x688   :  { %16734 = vmatprep.mubr.bf16.mxu1 %v22610_v50  ;;  %16661 = vmatprep.subr.bf16.mxu0 %v20720_v22  ;;  %v20769_v22 = vld [vmem:[#allocation8 + $0xba8] ss:$24 sps:$4 sm:$0xff]  }
 0x689   :  { %16704 = vmatprep.subr.bf16.mxu1 %v20723_v7  ;;  %v20774_v7 = vld [vmem:[#allocation8 + $0x87c] ss:$24 sps:$4 sm:$0xff]  }
 0x68a   :  { %16662 = vmatpush1.bf16.msra.mxu0 %v20718_v19  ;;  %v20777_v19 = vld [vmem:[#allocation8 + $0xb7c] ss:$24 sps:$4 sm:$0xff]  }
 0x68b   :  { %16705 = vmatpush1.bf16.msra.mxu1 %v20721_v55  ;;  %16663 = vmatprep.subr.bf16.mxu0 %v20726_v25  ;;  %v20772_v55 = vld [vmem:[#allocation8 + $0x878] ss:$24 sps:$4 sm:$0xff]  }
 0x68c   :  { %16706 = vmatprep.subr.bf16.mxu1 %v20729_v12  ;;  %v20775_v25 = vld [vmem:[#allocation8 + $0xb78] ss:$24 sps:$4 sm:$0xff]   ;;  %v20780_v12 = vld [vmem:[#allocation8 + $0x84c] ss:$24 sps:$4 sm:$0xff]  }
 0x68e   :  { %16664 = vmatpush1.bf16.msra.mxu0 %v20724_v42  ;;  %v20783_v42 = vld [vmem:[#allocation8 + $0xb4c] ss:$24 sps:$4 sm:$0xff]  }
 0x68f   :  { %16707 = vmatpush1.bf16.msra.mxu1 %v20727_v9  ;;  %16665 = vmatprep.subr.bf16.mxu0 %v20732_v17  ;;  %v20778_v9 = vld [vmem:[#allocation8 + $0x848] ss:$24 sps:$4 sm:$0xff]  }
 0x690   :  { %16708 = vmatprep.subr.bf16.mxu1 %v20735_v36  ;;  %v20781_v17 = vld [vmem:[#allocation8 + $0xb48] ss:$24 sps:$4 sm:$0xff]   ;;  %v20786_v36 = vld [vmem:[#allocation8 + $0x81c] ss:$24 sps:$4 sm:$0xff]  }
 0x692   :  { %16666 = vmatpush1.bf16.msra.mxu0 %v20730_v1  ;;  %v20789_v1 = vld [vmem:[#allocation8 + $0xb1c] ss:$24 sps:$4 sm:$0xff]  }
 0x693   :  { %16709 = vmatpush1.bf16.msra.mxu1 %v20733_v11  ;;  %16667 = vmatprep.subr.bf16.mxu0 %v20738_v3  ;;  %v20784_v11 = vld [vmem:[#allocation8 + $0x818] ss:$24 sps:$4 sm:$0xff]  }
 0x694   :  { %16710 = vmatprep.subr.bf16.mxu1 %v20741_v53  ;;  %v20787_v3 = vld [vmem:[#allocation8 + $0xb18] ss:$24 sps:$4 sm:$0xff]   ;;  %v20792_v53 = vld [vmem:[#allocation8 + $0x7ec] ss:$24 sps:$4 sm:$0xff]  }
 0x696   :  { %16668 = vmatpush1.bf16.msra.mxu0 %v20736_v26  ;;  %v20795_v26 = vld [vmem:[#allocation8 + $0xaec] ss:$24 sps:$4 sm:$0xff]  }
 0x697   :  { %16711 = vmatpush1.bf16.msra.mxu1 %v20739_v29  ;;  %16669 = vmatprep.subr.bf16.mxu0 %v20744_v46  ;;  %v20790_v29 = vld [vmem:[#allocation8 + $0x7e8] ss:$24 sps:$4 sm:$0xff]  }
 0x698   :  { %16712 = vmatprep.subr.bf16.mxu1 %v20747_v49  ;;  %v20793_v46 = vld [vmem:[#allocation8 + $0xae8] ss:$24 sps:$4 sm:$0xff]   ;;  %v20798_v49 = vld [vmem:[#allocation8 + $0x7bc] ss:$24 sps:$4 sm:$0xff]  }
 0x69a   :  { %16670 = vmatpush1.bf16.msra.mxu0 %v20742_v14  ;;  %v20801_v14 = vld [vmem:[#allocation8 + $0xabc] ss:$24 sps:$4 sm:$0xff]  }
 0x69b   :  { %16713 = vmatpush1.bf16.msra.mxu1 %v20745_v39  ;;  %16671 = vmatprep.subr.bf16.mxu0 %v20750_v18  ;;  %v20796_v39 = vld [vmem:[#allocation8 + $0x7b8] ss:$24 sps:$4 sm:$0xff]  }
 0x69c   :  { %16714 = vmatprep.subr.bf16.mxu1 %v20753_v35  ;;  %v20799_v18 = vld [vmem:[#allocation8 + $0xab8] ss:$24 sps:$4 sm:$0xff]   ;;  %v20804_v35 = vld [vmem:[#allocation8 + $0x78c] ss:$24 sps:$4 sm:$0xff]  }
 0x69e   :  { %16672 = vmatpush1.bf16.msra.mxu0 %v20748_v32  ;;  %v20807_v32 = vld [vmem:[#allocation8 + $0xa8c] ss:$24 sps:$4 sm:$0xff]  }
 0x69f   :  { %16715 = vmatpush1.bf16.msra.mxu1 %v20751_v41  ;;  %16673 = vmatprep.subr.bf16.mxu0 %v20756_v33  ;;  %v20802_v41 = vld [vmem:[#allocation8 + $0x788] ss:$24 sps:$4 sm:$0xff]   ;;  %v22888_v33 = vpop.f32.mrf.mxu0 }
 0x6a0   :  { %16716 = vmatprep.subr.bf16.mxu1 %v20759_v44  ;;  %v20805_v44 = vld [vmem:[#allocation8 + $0xa88] ss:$24 sps:$4 sm:$0xff]  }
 0x6a2   :  { %16674 = vmatpush1.bf16.msra.mxu0 %v20754_v52  ;;  %v20810_v52 = vld [vmem:[#allocation8 + $0xd5c] ss:$24 sps:$4 sm:$0xff]  }
 0x6a3   :  { %16717 = vmatpush1.bf16.msra.mxu1 %v20757_v2  ;;  %16675 = vmatprep.subr.bf16.mxu0 %v20762_v5  ;;  %v22890_v2 = vpop.f32.mrf.mxu1  ;;  %v20813_v5 = vld [vmem:[#allocation8 + $0x105c] ss:$24 sps:$4 sm:$0xff]  }
 0x6a4   :  { %16718 = vmatprep.subr.bf16.mxu1 %v20765_v58  ;;  %v20808_v58 = vld [vmem:[#allocation8 + $0xd58] ss:$24 sps:$4 sm:$0xff]   ;;  %v16135_v20 = vadd.f32 %v22890_v2, %v22888_v33  ;;  %v20885_v2 = vld [vmem:[#allocation8 + $0x111c] ss:$24 sps:$4 sm:$0xff]  }
 0x6a6   :  { %16676 = vmatpush2.bf16.msra.mxu0 %v20760_v15  ;;  %v22892_v15 = vpop.f32.mrf.mxu0 }
 0x6a7   :  { %16719 = vmatpush2.bf16.msra.mxu1 %v20763_v38  ;;  %16677 = vmatprep.subr.bf16.mxu0 %v20768_v59  ;;  %v20811_v38 = vld [vmem:[#allocation8 + $0x1058] ss:$24 sps:$4 sm:$0xff]   ;;  %v22894_v59 = vpop.f32.mrf.mxu1 }
 0x6a8   :  { %16720 = vmatprep.subr.bf16.mxu1 %v20771_v54  ;;  %v20816_v54 = vld [vmem:[#allocation8 + $0xd2c] ss:$24 sps:$4 sm:$0xff]   ;;  %v16137_v21 = vadd.f32 %v22894_v59, %v22892_v15 }
 0x6aa   :  { %16678 = vmatpush2.bf16.msra.mxu0 %v20766_v0  ;;  %v20819_v0 = vld [vmem:[#allocation8 + $0x102c] ss:$24 sps:$4 sm:$0xff]  }
 0x6ab   :  { %16721 = vmatpush2.bf16.msra.mxu1 %v20769_v22  ;;  %16679 = vmatprep.subr.bf16.mxu0 %v20774_v7  ;;  %v20814_v22 = vld [vmem:[#allocation8 + $0xd28] ss:$24 sps:$4 sm:$0xff]   ;;  %v22898_v7 = vpop.f32.mrf.mxu0 }
 0x6ac   :  { %16722 = vmatprep.subr.bf16.mxu1 %v20777_v19  ;;  %v20817_v19 = vld [vmem:[#allocation8 + $0x1028] ss:$24 sps:$4 sm:$0xff]  }
 0x6ae   :  { %16680 = vmatpush2.bf16.msra.mxu0 %v20772_v55  ;;  %v20822_v55 = vld [vmem:[#allocation8 + $0xcfc] ss:$24 sps:$4 sm:$0xff]  }
 0x6af   :  { %16723 = vmatpush2.bf16.msra.mxu1 %v20775_v25  ;;  %16681 = vmatprep.subr.bf16.mxu0 %v20780_v12  ;;  %v22901_v25 = vpop.f32.mrf.mxu1  ;;  %v20825_v12 = vld [vmem:[#allocation8 + $0xffc] ss:$24 sps:$4 sm:$0xff]  }
 0x6b0   :  { %16724 = vmatprep.subr.bf16.mxu1 %v20783_v42  ;;  %v20820_v42 = vld [vmem:[#allocation8 + $0xcf8] ss:$24 sps:$4 sm:$0xff]  }
 0x6b2   :  { %16682 = vmatpush2.bf16.msra.mxu0 %v20778_v9  ;;  %v22904_v9 = vpop.f32.mrf.mxu0 }
 0x6b3   :  { %16725 = vmatpush2.bf16.msra.mxu1 %v20781_v17  ;;  %16683 = vmatprep.subr.bf16.mxu0 %v20786_v36  ;;  %v20823_v17 = vld [vmem:[#allocation8 + $0xff8] ss:$24 sps:$4 sm:$0xff]   ;;  %v20828_v36 = vld [vmem:[#allocation8 + $0xccc] ss:$24 sps:$4 sm:$0xff]  }
 0x6b4   :  { %16726 = vmatprep.subr.bf16.mxu1 %v20789_v1  ;;  %v22906_v1 = vpop.f32.mrf.mxu1 }
 0x6b5   :  { %v16141_v15 = vadd.f32 %v22906_v1, %v22904_v9 }
 0x6b6   :  { %16684 = vmatpush2.bf16.msra.mxu0 %v20784_v11  ;;  %v20831_v11 = vld [vmem:[#allocation8 + $0xfcc] ss:$24 sps:$4 sm:$0xff]  }
 0x6b7   :  { %16727 = vmatpush2.bf16.msra.mxu1 %v20787_v3  ;;  %16685 = vmatprep.subr.bf16.mxu0 %v20792_v53  ;;  %v22908_v3 = vpop.f32.mrf.mxu0  ;;  %v22910_v53 = vpop.f32.mrf.mxu1 }
 0x6b8   :  { %16728 = vmatprep.subr.bf16.mxu1 %v20795_v26  ;;  %v20826_v26 = vld [vmem:[#allocation8 + $0xcc8] ss:$24 sps:$4 sm:$0xff]  }
 0x6ba   :  { %16686 = vmatpush2.bf16.msra.mxu0 %v20790_v29  ;;  %v20829_v29 = vld [vmem:[#allocation8 + $0xfc8] ss:$24 sps:$4 sm:$0xff]  }
 0x6bb   :  { %16729 = vmatpush2.bf16.msra.mxu1 %v20793_v46  ;;  %16687 = vmatprep.subr.bf16.mxu0 %v20798_v49  ;;  %v20834_v46 = vld [vmem:[#allocation8 + $0xc9c] ss:$24 sps:$4 sm:$0xff]  }
 0x6bc   :  { %16730 = vmatprep.subr.bf16.mxu1 %v20801_v14  ;;  %v20837_v49 = vld [vmem:[#allocation8 + $0xf9c] ss:$24 sps:$4 sm:$0xff]   ;;  %v22912_v14 = vpop.f32.mrf.mxu0 }
 0x6bd   :  { %v16180_v33 = vadd.f32 %v22912_v14, %v16137_v21  ;;  %v20891_v14 = vld [vmem:[#allocation8 + $0x10ec] ss:$24 sps:$4 sm:$0xff]  }
 0x6be   :  { %16688 = vmatpush2.bf16.msra.mxu0 %v20796_v39  ;;  %v22914_v39 = vpop.f32.mrf.mxu1 }
 0x6bf   :  { %16731 = vmatpush2.bf16.msra.mxu1 %v20799_v18  ;;  %16689 = vmatprep.subr.bf16.mxu0 %v20804_v35  ;;  %v20832_v18 = vld [vmem:[#allocation8 + $0xc98] ss:$24 sps:$4 sm:$0xff]  }
 0x6c0   :  { %16732 = vmatprep.subr.bf16.mxu1 %v20807_v32  ;;  %v20835_v35 = vld [vmem:[#allocation8 + $0xf98] ss:$24 sps:$4 sm:$0xff]   ;;  %v20840_v32 = vld [vmem:[#allocation8 + $0xc6c] ss:$24 sps:$4 sm:$0xff]  }
 0x6c2   :  { %16690 = vmatpush2.bf16.msra.mxu0 %v20802_v41  ;;  %v20843_v41 = vld [vmem:[#allocation8 + $0xf6c] ss:$24 sps:$4 sm:$0xff]  }
 0x6c3   :  { %16733 = vmatpush2.bf16.msra.mxu1 %v20805_v44  ;;  %16745 = vmatprep.subr.bf16.mxu0 %v20810_v52  ;;  %v22916_v44 = vpop.f32.mrf.mxu0  ;;  %v22918_v52 = vpop.f32.mrf.mxu1 }
 0x6c4   :  { %16788 = vmatprep.subr.bf16.mxu1 %v20813_v5  ;;  %v20838_v5 = vld [vmem:[#allocation8 + $0xc68] ss:$24 sps:$4 sm:$0xff]  }
 0x6c5   :  { %16692 = vmatmul.mubr.bf16.vlgmr.msra.gmra.mxu0 %v23181_v37 }
 0x6c6   :  { %16735 = vmatmul.mubr.bf16.vlgmr.msra.gmra.mxu1 %v23182_v6  ;;  %16746 = vmatpush1.bf16.msra.mxu0 %v20808_v58  ;;  %v20841_v58 = vld [vmem:[#allocation8 + $0xf68] ss:$24 sps:$4 sm:$0xff]  }
 0x6c7   :  { %16777 = vmatprep.mubr.bf16.mxu0 %v22671_v43  ;;  %16789 = vmatpush1.bf16.msra.mxu1 %v20811_v38  ;;  %v20846_v38 = vld [vmem:[#allocation8 + $0xc3c] ss:$24 sps:$4 sm:$0xff]  }
 0x6c8   :  { %16820 = vmatprep.mubr.bf16.mxu1 %v22677_v34  ;;  %16747 = vmatprep.subr.bf16.mxu0 %v20816_v54  ;;  %v20849_v54 = vld [vmem:[#allocation8 + $0xf3c] ss:$24 sps:$4 sm:$0xff]   ;;  %v16139_v34 = vadd.f32 %v22901_v25, %v22898_v7  ;;  %v16223_v7 = vadd.f32 %v22914_v39, %v16180_v33 }
 0x6c9   :  { %16790 = vmatprep.subr.bf16.mxu1 %v20819_v0  ;;  %v22920_v0 = vpop.f32.mrf.mxu0 }
 0x6ca   :  { %16748 = vmatpush1.bf16.msra.mxu0 %v20814_v22  ;;  %v22922_v22 = vpop.f32.mrf.mxu1  ;;  %v16184_v21 = vadd.f32 %v22920_v0, %v16141_v15 }
 0x6cb   :  { %16791 = vmatpush1.bf16.msra.mxu1 %v20817_v19  ;;  %16749 = vmatprep.subr.bf16.mxu0 %v20822_v55  ;;  %v20844_v19 = vld [vmem:[#allocation8 + $0xc38] ss:$24 sps:$4 sm:$0xff]   ;;  %v22924_v55 = vpop.f32.mrf.mxu0 }
 0x6cc   :  { %16792 = vmatprep.subr.bf16.mxu1 %v20825_v12  ;;  %v20847_v12 = vld [vmem:[#allocation8 + $0xf38] ss:$24 sps:$4 sm:$0xff]   ;;  %v16227_v39 = vadd.f32 %v22922_v22, %v16184_v21  ;;  %v20906_v21 = vld [vmem:[#allocation8 + $0x135c] ss:$24 sps:$4 sm:$0xff]  }
 0x6ce   :  { %16750 = vmatpush1.bf16.msra.mxu0 %v20820_v42  ;;  %v20852_v42 = vld [vmem:[#allocation8 + $0xc0c] ss:$24 sps:$4 sm:$0xff]  }
 0x6cf   :  { %16793 = vmatpush1.bf16.msra.mxu1 %v20823_v17  ;;  %16751 = vmatprep.subr.bf16.mxu0 %v20828_v36  ;;  %v22926_v17 = vpop.f32.mrf.mxu1  ;;  %v20855_v36 = vld [vmem:[#allocation8 + $0xf0c] ss:$24 sps:$4 sm:$0xff]  }
 0x6d0   :  { %16794 = vmatprep.subr.bf16.mxu1 %v20831_v11  ;;  %v20850_v11 = vld [vmem:[#allocation8 + $0xc08] ss:$24 sps:$4 sm:$0xff]  }
 0x6d2   :  { %16752 = vmatpush1.bf16.msra.mxu0 %v20826_v26  ;;  %v22928_v26 = vpop.f32.mrf.mxu0 }
 0x6d3   :  { %16795 = vmatpush1.bf16.msra.mxu1 %v20829_v29  ;;  %16753 = vmatprep.subr.bf16.mxu0 %v20834_v46  ;;  %v20853_v29 = vld [vmem:[#allocation8 + $0xf08] ss:$24 sps:$4 sm:$0xff]   ;;  %v20858_v46 = vld [vmem:[#allocation8 + $0xedc] ss:$24 sps:$4 sm:$0xff]  }
 0x6d4   :  { %16796 = vmatprep.subr.bf16.mxu1 %v20837_v49  ;;  %v22930_v49 = vpop.f32.mrf.mxu1 }
 0x6d6   :  { %16754 = vmatpush1.bf16.msra.mxu0 %v20832_v18  ;;  %v20861_v18 = vld [vmem:[#allocation8 + $0x11dc] ss:$24 sps:$4 sm:$0xff]  }
 0x6d7   :  { %16797 = vmatpush1.bf16.msra.mxu1 %v20835_v35  ;;  %16755 = vmatprep.subr.bf16.mxu0 %v20840_v32  ;;  %v20856_v35 = vld [vmem:[#allocation8 + $0xed8] ss:$24 sps:$4 sm:$0xff]   ;;  %v22932_v32 = vpop.f32.mrf.mxu0 }
 0x6d8   :  { %16798 = vmatprep.subr.bf16.mxu1 %v20843_v41  ;;  %v20859_v41 = vld [vmem:[#allocation8 + $0x11d8] ss:$24 sps:$4 sm:$0xff]  }
 0x6da   :  { %16756 = vmatpush1.bf16.msra.mxu0 %v20838_v5  ;;  %v20864_v5 = vld [vmem:[#allocation8 + $0xeac] ss:$24 sps:$4 sm:$0xff]  }
 0x6db   :  { %16799 = vmatpush1.bf16.msra.mxu1 %v20841_v58  ;;  %16757 = vmatprep.subr.bf16.mxu0 %v20846_v38  ;;  %v22934_v58 = vpop.f32.mrf.mxu1  ;;  %v20867_v38 = vld [vmem:[#allocation8 + $0x11ac] ss:$24 sps:$4 sm:$0xff]  }
 0x6dc   :  { %16800 = vmatprep.subr.bf16.mxu1 %v20849_v54  ;;  %v20862_v54 = vld [vmem:[#allocation8 + $0xea8] ss:$24 sps:$4 sm:$0xff]  }
 0x6de   :  { %16758 = vmatpush1.bf16.msra.mxu0 %v20844_v19  ;;  %v22936_v19 = vpop.f32.mrf.mxu0 }
 0x6df   :  { %16801 = vmatpush1.bf16.msra.mxu1 %v20847_v12  ;;  %16759 = vmatprep.subr.bf16.mxu0 %v20852_v42  ;;  %v20865_v12 = vld [vmem:[#allocation8 + $0x11a8] ss:$24 sps:$4 sm:$0xff]   ;;  %v20870_v42 = vld [vmem:[#allocation8 + $0xe7c] ss:$24 sps:$4 sm:$0xff]  }
 0x6e0   :  { %16802 = vmatprep.subr.bf16.mxu1 %v20855_v36  ;;  %v22938_v36 = vpop.f32.mrf.mxu1 }
 0x6e2   :  { %16760 = vmatpush1.bf16.msra.mxu0 %v20850_v11  ;;  %v20873_v11 = vld [vmem:[#allocation8 + $0x117c] ss:$24 sps:$4 sm:$0xff]  }
 0x6e3   :  { %16803 = vmatpush1.bf16.msra.mxu1 %v20853_v29  ;;  %16761 = vmatprep.subr.bf16.mxu0 %v20858_v46  ;;  %v16349_v29 = vpop.f32.mrf.mxu0  ;;  %v22940_v46 = vpop.f32.mrf.mxu1 }
 0x6e4   :  { %16804 = vmatprep.subr.bf16.mxu1 %v20861_v18  ;;  %v20871_v18 = vld [vmem:[#allocation8 + $0x1178] ss:$24 sps:$4 sm:$0xff]  }
 0x6e5   :  { %v22947_v31 = vpop.f32.mrf.mxu1 }
 0x6e6   :  { %16762 = vmatpush2.bf16.msra.mxu0 %v20856_v35  ;;  %v20876_v35 = vld [vmem:[#allocation8 + $0xe4c] ss:$24 sps:$4 sm:$0xff]  }
 0x6e7   :  { %16805 = vmatpush2.bf16.msra.mxu1 %v20859_v41  ;;  %16763 = vmatprep.subr.bf16.mxu0 %v20864_v5  ;;  %v20879_v41 = vld [vmem:[#allocation8 + $0x114c] ss:$24 sps:$4 sm:$0xff]   ;;  %v16351_v5 = vpop.f32.mrf.mxu0  ;;  %v16396_v59 = vpop.f32.mrf.mxu1 }
 0x6e8   :  { %16806 = vmatprep.subr.bf16.mxu1 %v20867_v38  ;;  %v16178_v38 = vadd.f32 %v22908_v3, %v16135_v20  ;;  %v20880_v3 = vld [vmem:[#allocation8 + $0xe18] ss:$24 sps:$4 sm:$0xff]  }
 0x6ea   :  { %16764 = vmatpush2.bf16.msra.mxu0 %v20862_v54  ;;  %v20874_v54 = vld [vmem:[#allocation8 + $0xe48] ss:$24 sps:$4 sm:$0xff]   ;;  %v16221_v20 = vadd.f32 %v22910_v53, %v16178_v38  ;;  %v16398_v53 = vpop.f32.mrf.mxu1 }
 0x6eb   :  { %16807 = vmatpush2.bf16.msra.mxu1 %v20865_v12  ;;  %16765 = vmatprep.subr.bf16.mxu0 %v20870_v42  ;;  %v20877_v12 = vld [vmem:[#allocation8 + $0x1148] ss:$24 sps:$4 sm:$0xff]   ;;  %v20882_v42 = vld [vmem:[#allocation8 + $0xe1c] ss:$24 sps:$4 sm:$0xff]  }
 0x6ec   :  { %16808 = vmatprep.subr.bf16.mxu1 %v20873_v11  ;;  %v16353_v11 = vpop.f32.mrf.mxu0  ;;  %v16264_v25 = vadd.f32 %v22924_v55, %v16221_v20  ;;  %v20889_v38 = vld [vmem:[#allocation8 + $0x10e8] ss:$24 sps:$4 sm:$0xff]   ;;  %v20895_v20 = vld [vmem:[#allocation8 + $0x10b8] ss:$24 sps:$4 sm:$0xff]  }
 0x6ee   :  { %16766 = vmatpush2.bf16.msra.mxu0 %v20868_v8  ;;  %v16182_v8 = vadd.f32 %v22916_v44, %v16139_v34  ;;  %v16355_v9 = vpop.f32.mrf.mxu0  ;;  %v16266_v34 = vadd.f32 %v22928_v26, %v16223_v7  ;;  %v20886_v44 = vld [vmem:[#allocation8 + $0xde8] ss:$24 sps:$4 sm:$0xff]   ;;  %v16307_v0 = vadd.f32 %v22926_v17, %v16264_v25  ;;  %v16270_v26 = vadd.f32 %v22936_v19, %v16227_v39 }
 0x6ef   :  { %16809 = vmatpush2.bf16.msra.mxu1 %v20871_v18  ;;  %16767 = vmatprep.subr.bf16.mxu0 %v20876_v35  ;;  %v20883_v18 = vld [vmem:[#allocation8 + $0x1118] ss:$24 sps:$4 sm:$0xff]   ;;  %v20888_v35 = vld [vmem:[#allocation8 + $0xdec] ss:$24 sps:$4 sm:$0xff]   ;;  %v20898_v19 = vld [vmem:[#allocation8 + $0xd88] ss:$24 sps:$4 sm:$0xff]  }
 0x6f0   :  { %16810 = vmatprep.subr.bf16.mxu1 %v20879_v41  ;;  %v16225_v1 = vadd.f32 %v22918_v52, %v16182_v8  ;;  %v16435_v41 = vpop.f32.mrf.mxu0  ;;  %v16309_v52 = vadd.f32 %v22930_v49, %v16266_v34  ;;  %v16350_v33 = vadd.f32 %v16349_v29, %v16307_v0  ;;  %v20900_v8 = vld [vmem:[#allocation8 + $0xd8c] ss:$24 sps:$4 sm:$0xff]   ;;  %v20901_v7 = vld [vmem:[#allocation8 + $0x1088] ss:$24 sps:$4 sm:$0xff]  }
 0x6f2   :  { %16768 = vmatpush2.bf16.msra.mxu0 %v20874_v54  ;;  %v20894_v54 = vld [vmem:[#allocation8 + $0xdbc] ss:$24 sps:$4 sm:$0xff]   ;;  %v16268_v55 = vadd.f32 %v22932_v32, %v16225_v1  ;;  %v16437_v15 = vpop.f32.mrf.mxu0  ;;  %v16352_v17 = vadd.f32 %v16351_v5, %v16309_v52  ;;  %v20903_v32 = vld [vmem:[#allocation8 + $0x108c] ss:$24 sps:$4 sm:$0xff]   ;;  %v16393_v49 = vadd.f32 %v22940_v46, %v16350_v33  ;;  %v20904_v46 = vld [vmem:[#allocation8 + $0x1358] ss:$24 sps:$4 sm:$0xff]  }
 0x6f3   :  { %16811 = vmatpush2.bf16.msra.mxu1 %v20877_v12  ;;  %16769 = vmatprep.subr.bf16.mxu0 %v20882_v42  ;;  %v16478_v12 = vpop.f32.mrf.mxu1  ;;  %v20897_v42 = vld [vmem:[#allocation8 + $0x10bc] ss:$24 sps:$4 sm:$0xff]  }
 0x6f4   :  { %16812 = vmatprep.subr.bf16.mxu1 %v20885_v2  ;;  %v20892_v2 = vld [vmem:[#allocation8 + $0xdb8] ss:$24 sps:$4 sm:$0xff]   ;;  %v16311_v22 = vadd.f32 %v22934_v58, %v16268_v55  ;;  %v16439_v29 = vpop.f32.mrf.mxu0  ;;  %v16395_v25 = vadd.f32 %v22947_v31, %v16352_v17  ;;  %v16436_v58 = vadd.f32 %v16435_v41, %v16393_v49  ;;  %v20909_v1 = vld [vmem:[#allocation8 + $0x165c] ss:$24 sps:$4 sm:$0xff]   ;;  %v20912_v31 = vld [vmem:[#allocation8 + $0x132c] ss:$24 sps:$4 sm:$0xff]  }
 0x6f5   :  { %v23203_v41 = vld [vmem:[#allocation16_spill] sm:$0xff] }
 0x6f6   :  { %16770 = vmatpush2.bf16.msra.mxu0 %v20880_v3  ;;  %v16480_v3 = vpop.f32.mrf.mxu1  ;;  %v16479_v39 = vadd.f32 %v16478_v12, %v16436_v58  ;;  %v20924_v58 = vld [vmem:[#allocation8 + $0x12cc] ss:$24 sps:$4 sm:$0xff]  }
 0x6f7   :  { %16813 = vmatpush2.bf16.msra.mxu1 %v20883_v18  ;;  %16771 = vmatprep.subr.bf16.mxu0 %v20888_v35  ;;  %v16313_v18 = vadd.f32 %v22938_v36, %v16270_v26  ;;  %v16354_v35 = vadd.f32 %v16353_v11, %v16311_v22  ;;  %v17609_v36 = vld [vmem:[#allocation10] sm:$0x3f]  ;;  %v16441_v11 = vpop.f32.mrf.mxu0 }
 0x6f8   :  { %16814 = vmatprep.subr.bf16.mxu1 %v20891_v14  ;;  %v16482_v5 = vpop.f32.mrf.mxu1  ;;  %v17618_v12 = vrot.slane %v17609_v36, %v22440_v57 }
 0x6f9   :  { %v16356_v14 = vadd.f32 %v16355_v9, %v16313_v18  ;;  %v16397_v34 = vadd.f32 %v16396_v59, %v16354_v35  ;;  %v20915_v59 = vld [vmem:[#allocation8 + $0x162c] ss:$24 sps:$4 sm:$0xff]   ;;  %v20921_v18 = vld [vmem:[#allocation8 + $0x15fc] ss:$24 sps:$4 sm:$0xff]  }
 0x6fa   :  { %16772 = vmatpush2.bf16.msra.mxu0 %v20886_v44  ;;  %v16438_v44 = vadd.f32 %v16437_v15, %v16395_v25  ;;  %v16484_v55 = vpop.f32.mrf.mxu1  ;;  %v20910_v15 = vld [vmem:[#allocation8 + $0x1328] ss:$24 sps:$4 sm:$0xff]   ;;  %v20916_v25 = vld [vmem:[#allocation8 + $0x12f8] ss:$24 sps:$4 sm:$0xff]  }
 0x6fb   :  { %16815 = vmatpush2.bf16.msra.mxu1 %v20889_v38  ;;  %16773 = vmatprep.subr.bf16.mxu0 %v20894_v54  ;;  %v20907_v38 = vld [vmem:[#allocation8 + $0x1658] ss:$24 sps:$4 sm:$0xff]   ;;  %v16399_v54 = vadd.f32 %v16398_v53, %v16356_v14  ;;  %v16440_v0 = vadd.f32 %v16439_v29, %v16397_v34 }
 0x6fc   :  { %16816 = vmatprep.subr.bf16.mxu1 %v20897_v42  ;;  %v17614_v42 = vrot.slane %v17609_v36, %v23203_v41  ;;  %v16481_v52 = vadd.f32 %v16480_v3, %v16438_v44  ;;  %v20919_v14 = vld [vmem:[#allocation8 + $0x15f8] ss:$24 sps:$4 sm:$0xff]   ;;  %v20927_v44 = vld [vmem:[#allocation8 + $0x15cc] ss:$24 sps:$4 sm:$0xff]  }
 0x6fd   :  { %v16442_v26 = vadd.f32 %v16441_v11, %v16399_v54  ;;  %v16483_v22 = vadd.f32 %v16482_v5, %v16440_v0  ;;  %v20925_v54 = vld [vmem:[#allocation8 + $0x15c8] ss:$24 sps:$4 sm:$0xff]   ;;  %v20936_v41 = vld [vmem:[#allocation8 + $0x126c] ss:$24 sps:$4 sm:$0xff]  }
 0x6fe   :  { %16774 = vmatpush2.bf16.msra.mxu0 %v20892_v2 }
 0x6ff   :  { %16817 = vmatpush2.bf16.msra.mxu1 %v20895_v20  ;;  %16775 = vmatprep.subr.bf16.mxu0 %v20900_v8  ;;  %v20913_v20 = vld [vmem:[#allocation8 + $0x1628] ss:$24 sps:$4 sm:$0xff]   ;;  %v20918_v8 = vld [vmem:[#allocation8 + $0x12fc] ss:$24 sps:$4 sm:$0xff]   ;;  %v16485_v35 = vadd.f32 %v16484_v55, %v16442_v26 }
 0x700   :  { %16818 = vmatprep.subr.bf16.mxu1 %v20903_v32  ;;  %v20933_v55 = vld [vmem:[#allocation8 + $0x159c] ss:$24 sps:$4 sm:$0xff]  }
 0x701   :  { %v20942_v26 = vld [vmem:[#allocation8 + $0x123c] ss:$24 sps:$4 sm:$0xff]  }
 0x702   :  { %16776 = vmatpush2.bf16.msra.mxu0 %v20898_v19 }
 0x703   :  { %16819 = vmatpush2.bf16.msra.mxu1 %v20901_v7  ;;  %16831 = vmatprep.subr.bf16.mxu0 %v20906_v21 }
 0x704   :  { %16874 = vmatprep.subr.bf16.mxu1 %v20909_v1 }
 0x705   :  { %v16521_v9 = vpop.f32.mrf.mxu0  ;;  %16778 = vmatmul.mubr.bf16.vlgmr.msra.gmra.mxu0 %v23195_v27 }
 0x706   :  { %v16522_v33 = vadd.f32 %v16521_v9, %v16479_v39  ;;  %v16564_v2 = vpop.f32.mrf.mxu1  ;;  %16821 = vmatmul.mubr.bf16.vlgmr.msra.gmra.mxu1 %v23196_v16  ;;  %16832 = vmatpush1.bf16.msra.mxu0 %v20904_v46  ;;  %v20930_v39 = vld [vmem:[#allocation8 + $0x129c] ss:$24 sps:$4 sm:$0xff]   ;;  %v20931_v9 = vld [vmem:[#allocation8 + $0x1598] ss:$24 sps:$4 sm:$0xff]  }
 0x707   :  { %16863 = vmatprep.mubr.bf16.mxu0 %v22753_v23  ;;  %16875 = vmatpush1.bf16.msra.mxu1 %v20907_v38  ;;  %v16523_v53 = vpop.f32.mrf.mxu0  ;;  %v20922_v38 = vld [vmem:[#allocation8 + $0x12c8] ss:$24 sps:$4 sm:$0xff]  }
 0x708   :  { %v16565_v17 = vadd.f32 %v16564_v2, %v16522_v33  ;;  %16906 = vmatprep.mubr.bf16.mxu1 %v22756_v48  ;;  %v16524_v3 = vadd.f32 %v16523_v53, %v16481_v52  ;;  %v16566_v32 = vpop.f32.mrf.mxu1  ;;  %16833 = vmatprep.subr.bf16.mxu0 %v20912_v31  ;;  %v20928_v31 = vld [vmem:[#allocation8 + $0x1298] ss:$24 sps:$4 sm:$0xff]   ;;  %v20937_v52 = vld [vmem:[#allocation8 + $0x1568] ss:$24 sps:$4 sm:$0xff]   ;;  %v20945_v33 = vld [vmem:[#allocation8 + $0x153c] ss:$24 sps:$4 sm:$0xff]  }
 0x709   :  { %v16525_v49 = vpop.f32.mrf.mxu0  ;;  %16876 = vmatprep.subr.bf16.mxu1 %v20915_v59  ;;  %v20934_v59 = vld [vmem:[#allocation8 + $0x1268] ss:$24 sps:$4 sm:$0xff]   ;;  %v20940_v2 = vld [vmem:[#allocation8 + $0x1238] ss:$24 sps:$4 sm:$0xff]   ;;  %v20948_v53 = vld [vmem:[#allocation8 + $0x120c] ss:$24 sps:$4 sm:$0xff]  }
 0x70a   :  { %v17641_v19 = vadd.f32 %v17614_v42, %v16565_v17  ;;  %v16567_v29 = vadd.f32 %v16566_v32, %v16524_v3  ;;  %v16526_v7 = vadd.f32 %v16525_v49, %v16483_v22  ;;  %v16568_v21 = vpop.f32.mrf.mxu1  ;;  %16834 = vmatpush1.bf16.msra.mxu0 %v20910_v15  ;;  %v20943_v15 = vld [vmem:[#allocation8 + $0x1538] ss:$24 sps:$4 sm:$0xff]   ;;  %v20954_v22 = vld [vmem:[#allocation8 + $0x14dc] ss:$24 sps:$4 sm:$0xff]   ;;  %v20963_v49 = vld [vmem:[#allocation8 + $0x17ac] ss:$24 sps:$4 sm:$0xff]  }
 0x70b   :  { %16877 = vmatpush1.bf16.msra.mxu1 %v20913_v20  ;;  %v16527_v57 = vpop.f32.mrf.mxu0  ;;  %16835 = vmatprep.subr.bf16.mxu0 %v20918_v8  ;;  %v20946_v20 = vld [vmem:[#allocation8 + $0x1208] ss:$24 sps:$4 sm:$0xff]   ;;  %v20957_v17 = vld [vmem:[#allocation8 + $0x17dc] ss:$24 sps:$4 sm:$0xff]   ;;  %v20952_v3 = vld [vmem:[#allocation8 + $0x14d8] ss:$24 sps:$4 sm:$0xff]  }
 0x70c   :  { %17653 = vst [vmem:[#allocation11] sm:$0xff] %v17641_v19  ;;  %v17642_v5 = vadd.f32 %v17618_v12, %v16567_v29  ;;  %v16569_v1 = vadd.f32 %v16568_v21, %v16526_v7  ;;  %v16528_v34 = vadd.f32 %v16527_v57, %v16485_v35  ;;  %16878 = vmatprep.subr.bf16.mxu1 %v20921_v18  ;;  %v16570_v36 = vpop.f32.mrf.mxu1  ;;  %v20949_v8 = vld [vmem:[#allocation8 + $0x1508] ss:$24 sps:$4 sm:$0xff]   ;;  %v20955_v32 = vld [vmem:[#allocation8 + $0x17d8] ss:$24 sps:$4 sm:$0xff]  }
 0x70d   :  { %v20960_v18 = vld [vmem:[#allocation8 + $0x14ac] ss:$24 sps:$4 sm:$0xff]   ;;  %v20958_v35 = vld [vmem:[#allocation8 + $0x14a8] ss:$24 sps:$4 sm:$0xff]   ;;  %v20966_v29 = vld [vmem:[#allocation8 + $0x147c] ss:$24 sps:$4 sm:$0xff]  }
 0x70e   :  { %17654 = vst [vmem:[#allocation11 + $0x8] sm:$0xff] %v17642_v5  ;;  %v17647_v46 = vadd.f32 %v17614_v42, %v16569_v1  ;;  %v16571_v11 = vadd.f32 %v16570_v36, %v16528_v34  ;;  %16836 = vmatpush1.bf16.msra.mxu0 %v20916_v25  ;;  %v20939_v42 = vld [vmem:[#allocation8 + $0x156c] ss:$24 sps:$4 sm:$0xff]   ;;  %v20961_v19 = vld [vmem:[#allocation8 + $0x17a8] ss:$24 sps:$4 sm:$0xff]  }
 0x70f   :  { %16879 = vmatpush1.bf16.msra.mxu1 %v20919_v14  ;;  %16837 = vmatprep.subr.bf16.mxu0 %v20924_v58  ;;  %v20969_v7 = vld [vmem:[#allocation8 + $0x177c] ss:$24 sps:$4 sm:$0xff]   ;;  %v20964_v21 = vld [vmem:[#allocation8 + $0x1478] ss:$24 sps:$4 sm:$0xff]   ;;  %v20972_v57 = vld [vmem:[#allocation8 + $0x144c] ss:$24 sps:$4 sm:$0xff]  }
 0x710   :  { %17659 = vst [vmem:[#allocation11 + $0x30] sm:$0xff] %v17647_v46  ;;  %v17648_v0 = vadd.f32 %v17618_v12, %v16571_v11  ;;  %16880 = vmatprep.subr.bf16.mxu1 %v20927_v44  ;;  %v20951_v12 = vld [vmem:[#allocation8 + $0x150c] ss:$24 sps:$4 sm:$0xff]   ;;  %v20967_v25 = vld [vmem:[#allocation8 + $0x1778] ss:$24 sps:$4 sm:$0xff]  }
 0x711   :  { %v20975_v14 = vld [vmem:[#allocation8 + $0x174c] ss:$24 sps:$4 sm:$0xff]   ;;  %v20970_v58 = vld [vmem:[#allocation8 + $0x1448] ss:$24 sps:$4 sm:$0xff]   ;;  %v20978_v1 = vld [vmem:[#allocation8 + $0x141c] ss:$24 sps:$4 sm:$0xff]  }
 0x712   :  { %17660 = vst [vmem:[#allocation11 + $0x38] sm:$0xff] %v17648_v0  ;;  %16838 = vmatpush1.bf16.msra.mxu0 %v20922_v38  ;;  %v20973_v5 = vld [vmem:[#allocation8 + $0x1748] ss:$24 sps:$4 sm:$0xff]   ;;  %v20981_v34 = vld [vmem:[#allocation8 + $0x171c] ss:$24 sps:$4 sm:$0xff]  }
 0x713   :  { %16881 = vmatpush1.bf16.msra.mxu1 %v20925_v54  ;;  %16839 = vmatprep.subr.bf16.mxu0 %v20930_v39  ;;  %v20976_v44 = vld [vmem:[#allocation8 + $0x1418] ss:$24 sps:$4 sm:$0xff]   ;;  %v20984_v46 = vld [vmem:[#allocation8 + $0x13ec] ss:$24 sps:$4 sm:$0xff]   ;;  %v20982_v38 = vld [vmem:[#allocation8 + $0x13e8] ss:$24 sps:$4 sm:$0xff]  }
 0x714   :  { %16882 = vmatprep.subr.bf16.mxu1 %v20933_v55  ;;  %v20979_v36 = vld [vmem:[#allocation8 + $0x1718] ss:$24 sps:$4 sm:$0xff]   ;;  %v20987_v11 = vld [vmem:[#allocation8 + $0x16ec] ss:$24 sps:$4 sm:$0xff]   ;;  %v20985_v54 = vld [vmem:[#allocation8 + $0x16e8] ss:$24 sps:$4 sm:$0xff]  }
 0x715   :  { %v20990_v39 = vld [vmem:[#allocation8 + $0x13bc] ss:$24 sps:$4 sm:$0xff]   ;;  %v20988_v55 = vld [vmem:[#allocation8 + $0x13b8] ss:$24 sps:$4 sm:$0xff]  }
 0x716   :  { %16840 = vmatpush1.bf16.msra.mxu0 %v20928_v31  ;;  %v20993_v0 = vld [vmem:[#allocation8 + $0x16bc] ss:$24 sps:$4 sm:$0xff]   ;;  %v20991_v31 = vld [vmem:[#allocation8 + $0x16b8] ss:$24 sps:$4 sm:$0xff]  }
 0x717   :  { %16883 = vmatpush1.bf16.msra.mxu1 %v20931_v9  ;;  %16841 = vmatprep.subr.bf16.mxu0 %v20936_v41  ;;  %v20996_v9 = vld [vmem:[#allocation8 + $0x138c] ss:$24 sps:$4 sm:$0xff]  }
 0x718   :  { %16884 = vmatprep.subr.bf16.mxu1 %v20939_v42  ;;  %v20999_v41 = vld [vmem:[#allocation8 + $0x168c] ss:$24 sps:$4 sm:$0xff]   ;;  %v20994_v42 = vld [vmem:[#allocation8 + $0x1388] ss:$24 sps:$4 sm:$0xff]  }
 0x71a   :  { %16842 = vmatpush1.bf16.msra.mxu0 %v20934_v59  ;;  %v20997_v59 = vld [vmem:[#allocation8 + $0x1688] ss:$24 sps:$4 sm:$0xff]  }
 0x71b   :  { %16885 = vmatpush1.bf16.msra.mxu1 %v20937_v52  ;;  %16843 = vmatprep.subr.bf16.mxu0 %v20942_v26  ;;  %v21002_v52 = vld [vmem:[#allocation8 + $0x195c] ss:$24 sps:$4 sm:$0xff]  }
 0x71c   :  { %16886 = vmatprep.subr.bf16.mxu1 %v20945_v33  ;;  %v21005_v26 = vld [vmem:[#allocation8 + $0x1c5c] ss:$24 sps:$4 sm:$0xff]   ;;  %v21000_v33 = vld [vmem:[#allocation8 + $0x1958] ss:$24 sps:$4 sm:$0xff]  }
 0x71e   :  { %16844 = vmatpush1.bf16.msra.mxu0 %v20940_v2  ;;  %v21003_v2 = vld [vmem:[#allocation8 + $0x1c58] ss:$24 sps:$4 sm:$0xff]  }
 0x71f   :  { %16887 = vmatpush1.bf16.msra.mxu1 %v20943_v15  ;;  %16845 = vmatprep.subr.bf16.mxu0 %v20948_v53  ;;  %v21008_v15 = vld [vmem:[#allocation8 + $0x192c] ss:$24 sps:$4 sm:$0xff]  }
 0x720   :  { %16888 = vmatprep.subr.bf16.mxu1 %v20951_v12  ;;  %v21011_v53 = vld [vmem:[#allocation8 + $0x1c2c] ss:$24 sps:$4 sm:$0xff]   ;;  %v21006_v12 = vld [vmem:[#allocation8 + $0x1928] ss:$24 sps:$4 sm:$0xff]  }
 0x722   :  { %16846 = vmatpush1.bf16.msra.mxu0 %v20946_v20  ;;  %v21009_v20 = vld [vmem:[#allocation8 + $0x1c28] ss:$24 sps:$4 sm:$0xff]  }
 0x723   :  { %16889 = vmatpush1.bf16.msra.mxu1 %v20949_v8  ;;  %16847 = vmatprep.subr.bf16.mxu0 %v20954_v22  ;;  %v21014_v8 = vld [vmem:[#allocation8 + $0x18fc] ss:$24 sps:$4 sm:$0xff]  }
 0x724   :  { %16890 = vmatprep.subr.bf16.mxu1 %v20957_v17  ;;  %v21017_v22 = vld [vmem:[#allocation8 + $0x1bfc] ss:$24 sps:$4 sm:$0xff]   ;;  %v21012_v17 = vld [vmem:[#allocation8 + $0x18f8] ss:$24 sps:$4 sm:$0xff]  }
 0x726   :  { %16848 = vmatpush2.bf16.msra.mxu0 %v20952_v3  ;;  %v21015_v3 = vld [vmem:[#allocation8 + $0x1bf8] ss:$24 sps:$4 sm:$0xff]  }
 0x727   :  { %16891 = vmatpush2.bf16.msra.mxu1 %v20955_v32  ;;  %16849 = vmatprep.subr.bf16.mxu0 %v20960_v18  ;;  %v21020_v32 = vld [vmem:[#allocation8 + $0x18cc] ss:$24 sps:$4 sm:$0xff]  }
 0x728   :  { %16892 = vmatprep.subr.bf16.mxu1 %v20963_v49  ;;  %v21023_v18 = vld [vmem:[#allocation8 + $0x1bcc] ss:$24 sps:$4 sm:$0xff]   ;;  %v21018_v49 = vld [vmem:[#allocation8 + $0x18c8] ss:$24 sps:$4 sm:$0xff]  }
 0x72a   :  { %16850 = vmatpush2.bf16.msra.mxu0 %v20958_v35  ;;  %v21021_v35 = vld [vmem:[#allocation8 + $0x1bc8] ss:$24 sps:$4 sm:$0xff]  }
 0x72b   :  { %16893 = vmatpush2.bf16.msra.mxu1 %v20961_v19  ;;  %16851 = vmatprep.subr.bf16.mxu0 %v20966_v29  ;;  %v21026_v19 = vld [vmem:[#allocation8 + $0x189c] ss:$24 sps:$4 sm:$0xff]  }
 0x72c   :  { %16894 = vmatprep.subr.bf16.mxu1 %v20969_v7  ;;  %v21029_v29 = vld [vmem:[#allocation8 + $0x1b9c] ss:$24 sps:$4 sm:$0xff]   ;;  %v21024_v7 = vld [vmem:[#allocation8 + $0x1898] ss:$24 sps:$4 sm:$0xff]  }
 0x72e   :  { %16852 = vmatpush2.bf16.msra.mxu0 %v20964_v21  ;;  %v21027_v21 = vld [vmem:[#allocation8 + $0x1b98] ss:$24 sps:$4 sm:$0xff]  }
 0x72f   :  { %16895 = vmatpush2.bf16.msra.mxu1 %v20967_v25  ;;  %16853 = vmatprep.subr.bf16.mxu0 %v20972_v57  ;;  %v21032_v25 = vld [vmem:[#allocation8 + $0x186c] ss:$24 sps:$4 sm:$0xff]  }
 0x730   :  { %16896 = vmatprep.subr.bf16.mxu1 %v20975_v14  ;;  %v21035_v57 = vld [vmem:[#allocation8 + $0x1b6c] ss:$24 sps:$4 sm:$0xff]   ;;  %v21030_v14 = vld [vmem:[#allocation8 + $0x1868] ss:$24 sps:$4 sm:$0xff]  }
 0x732   :  { %16854 = vmatpush2.bf16.msra.mxu0 %v20970_v58  ;;  %v21033_v58 = vld [vmem:[#allocation8 + $0x1b68] ss:$24 sps:$4 sm:$0xff]  }
 0x733   :  { %16897 = vmatpush2.bf16.msra.mxu1 %v20973_v5  ;;  %16855 = vmatprep.subr.bf16.mxu0 %v20978_v1  ;;  %v21038_v5 = vld [vmem:[#allocation8 + $0x183c] ss:$24 sps:$4 sm:$0xff]  }
 0x734   :  { %16898 = vmatprep.subr.bf16.mxu1 %v20981_v34  ;;  %v21041_v1 = vld [vmem:[#allocation8 + $0x1b3c] ss:$24 sps:$4 sm:$0xff]   ;;  %v21036_v34 = vld [vmem:[#allocation8 + $0x1838] ss:$24 sps:$4 sm:$0xff]  }
 0x736   :  { %16856 = vmatpush2.bf16.msra.mxu0 %v20976_v44  ;;  %v21039_v44 = vld [vmem:[#allocation8 + $0x1b38] ss:$24 sps:$4 sm:$0xff]  }
 0x737   :  { %16899 = vmatpush2.bf16.msra.mxu1 %v20979_v36  ;;  %16857 = vmatprep.subr.bf16.mxu0 %v20984_v46  ;;  %v21044_v36 = vld [vmem:[#allocation8 + $0x180c] ss:$24 sps:$4 sm:$0xff]  }
 0x738   :  { %16900 = vmatprep.subr.bf16.mxu1 %v20987_v11  ;;  %v21047_v46 = vld [vmem:[#allocation8 + $0x1b0c] ss:$24 sps:$4 sm:$0xff]   ;;  %v21042_v11 = vld [vmem:[#allocation8 + $0x1808] ss:$24 sps:$4 sm:$0xff]  }
 0x73a   :  { %16858 = vmatpush2.bf16.msra.mxu0 %v20982_v38  ;;  %v21045_v38 = vld [vmem:[#allocation8 + $0x1b08] ss:$24 sps:$4 sm:$0xff]  }
 0x73b   :  { %16901 = vmatpush2.bf16.msra.mxu1 %v20985_v54  ;;  %16859 = vmatprep.subr.bf16.mxu0 %v20990_v39  ;;  %v21050_v54 = vld [vmem:[#allocation8 + $0x1adc] ss:$24 sps:$4 sm:$0xff]  }
 0x73c   :  { %16902 = vmatprep.subr.bf16.mxu1 %v20993_v0  ;;  %v21053_v39 = vld [vmem:[#allocation8 + $0x1ddc] ss:$24 sps:$4 sm:$0xff]   ;;  %v21048_v0 = vld [vmem:[#allocation8 + $0x1ad8] ss:$24 sps:$4 sm:$0xff]  }
 0x73e   :  { %16860 = vmatpush2.bf16.msra.mxu0 %v20988_v55  ;;  %v21051_v55 = vld [vmem:[#allocation8 + $0x1dd8] ss:$24 sps:$4 sm:$0xff]  }
 0x73f   :  { %16903 = vmatpush2.bf16.msra.mxu1 %v20991_v31  ;;  %16861 = vmatprep.subr.bf16.mxu0 %v20996_v9  ;;  %v21056_v31 = vld [vmem:[#allocation8 + $0x1aac] ss:$24 sps:$4 sm:$0xff]  }
 0x740   :  { %16904 = vmatprep.subr.bf16.mxu1 %v20999_v41  ;;  %v21059_v9 = vld [vmem:[#allocation8 + $0x1dac] ss:$24 sps:$4 sm:$0xff]   ;;  %v21054_v41 = vld [vmem:[#allocation8 + $0x1aa8] ss:$24 sps:$4 sm:$0xff]  }
 0x742   :  { %16862 = vmatpush2.bf16.msra.mxu0 %v20994_v42  ;;  %v21057_v42 = vld [vmem:[#allocation8 + $0x1da8] ss:$24 sps:$4 sm:$0xff]  }
 0x743   :  { %16905 = vmatpush2.bf16.msra.mxu1 %v20997_v59  ;;  %16917 = vmatprep.subr.bf16.mxu0 %v21002_v52  ;;  %v21062_v59 = vld [vmem:[#allocation8 + $0x1a7c] ss:$24 sps:$4 sm:$0xff]  }
 0x744   :  { %16960 = vmatprep.subr.bf16.mxu1 %v21005_v26  ;;  %v21065_v52 = vld [vmem:[#allocation8 + $0x1d7c] ss:$24 sps:$4 sm:$0xff]   ;;  %v21060_v26 = vld [vmem:[#allocation8 + $0x1a78] ss:$24 sps:$4 sm:$0xff]  }
 0x745   :  { %16864 = vmatmul.mubr.bf16.vlgmr.msra.gmra.mxu0 %v23201_v60 }
 0x746   :  { %16907 = vmatmul.mubr.bf16.vlgmr.msra.gmra.mxu1 %v23202_v40  ;;  %16918 = vmatpush1.bf16.msra.mxu0 %v21000_v33  ;;  %v21063_v33 = vld [vmem:[#allocation8 + $0x1d78] ss:$24 sps:$4 sm:$0xff]  }
 0x747   :  { %16949 = vmatprep.mubr.bf16.mxu0 %v22825_v63  ;;  %16961 = vmatpush1.bf16.msra.mxu1 %v21003_v2  ;;  %v21068_v2 = vld [vmem:[#allocation8 + $0x1a4c] ss:$24 sps:$4 sm:$0xff]  }
 0x748   :  { %16992 = vmatprep.mubr.bf16.mxu1 %v22828_v56  ;;  %16919 = vmatprep.subr.bf16.mxu0 %v21008_v15  ;;  %v21071_v15 = vld [vmem:[#allocation8 + $0x1d4c] ss:$24 sps:$4 sm:$0xff]  }
 0x749   :  { %16962 = vmatprep.subr.bf16.mxu1 %v21011_v53  ;;  %v21066_v53 = vld [vmem:[#allocation8 + $0x1a48] ss:$24 sps:$4 sm:$0xff]  }
 0x74a   :  { %16920 = vmatpush1.bf16.msra.mxu0 %v21006_v12  ;;  %v21069_v12 = vld [vmem:[#allocation8 + $0x1d48] ss:$24 sps:$4 sm:$0xff]  }
 0x74b   :  { %16963 = vmatpush1.bf16.msra.mxu1 %v21009_v20  ;;  %16921 = vmatprep.subr.bf16.mxu0 %v21014_v8  ;;  %v21074_v20 = vld [vmem:[#allocation8 + $0x1a1c] ss:$24 sps:$4 sm:$0xff]  }
 0x74c   :  { %16964 = vmatprep.subr.bf16.mxu1 %v21017_v22  ;;  %v21077_v8 = vld [vmem:[#allocation8 + $0x1d1c] ss:$24 sps:$4 sm:$0xff]   ;;  %v21072_v22 = vld [vmem:[#allocation8 + $0x1a18] ss:$24 sps:$4 sm:$0xff]  }
 0x74e   :  { %16922 = vmatpush1.bf16.msra.mxu0 %v21012_v17  ;;  %v21075_v17 = vld [vmem:[#allocation8 + $0x1d18] ss:$24 sps:$4 sm:$0xff]  }
 0x74f   :  { %16965 = vmatpush1.bf16.msra.mxu1 %v21015_v3  ;;  %16923 = vmatprep.subr.bf16.mxu0 %v21020_v32  ;;  %v21080_v3 = vld [vmem:[#allocation8 + $0x19ec] ss:$24 sps:$4 sm:$0xff]  }
 0x750   :  { %16966 = vmatprep.subr.bf16.mxu1 %v21023_v18  ;;  %v21083_v32 = vld [vmem:[#allocation8 + $0x1cec] ss:$24 sps:$4 sm:$0xff]   ;;  %v21078_v18 = vld [vmem:[#allocation8 + $0x19e8] ss:$24 sps:$4 sm:$0xff]  }
 0x752   :  { %16924 = vmatpush1.bf16.msra.mxu0 %v21018_v49  ;;  %v21081_v49 = vld [vmem:[#allocation8 + $0x1ce8] ss:$24 sps:$4 sm:$0xff]  }
 0x753   :  { %16967 = vmatpush1.bf16.msra.mxu1 %v21021_v35  ;;  %16925 = vmatprep.subr.bf16.mxu0 %v21026_v19  ;;  %v21086_v35 = vld [vmem:[#allocation8 + $0x19bc] ss:$24 sps:$4 sm:$0xff]  }
 0x754   :  { %16968 = vmatprep.subr.bf16.mxu1 %v21029_v29  ;;  %v21089_v19 = vld [vmem:[#allocation8 + $0x1cbc] ss:$24 sps:$4 sm:$0xff]   ;;  %v21084_v29 = vld [vmem:[#allocation8 + $0x19b8] ss:$24 sps:$4 sm:$0xff]  }
 0x756   :  { %16926 = vmatpush1.bf16.msra.mxu0 %v21024_v7  ;;  %v21087_v7 = vld [vmem:[#allocation8 + $0x1cb8] ss:$24 sps:$4 sm:$0xff]  }
 0x757   :  { %16969 = vmatpush1.bf16.msra.mxu1 %v21027_v21  ;;  %16927 = vmatprep.subr.bf16.mxu0 %v21032_v25  ;;  %v21092_v21 = vld [vmem:[#allocation8 + $0x198c] ss:$24 sps:$4 sm:$0xff]  }
 0x758   :  { %16970 = vmatprep.subr.bf16.mxu1 %v21035_v57  ;;  %v21095_v25 = vld [vmem:[#allocation8 + $0x1c8c] ss:$24 sps:$4 sm:$0xff]   ;;  %v21090_v57 = vld [vmem:[#allocation8 + $0x1988] ss:$24 sps:$4 sm:$0xff]  }
 0x75a   :  { %16928 = vmatpush1.bf16.msra.mxu0 %v21030_v14  ;;  %v21093_v14 = vld [vmem:[#allocation8 + $0x1c88] ss:$24 sps:$4 sm:$0xff]  }
 0x75b   :  { %16971 = vmatpush1.bf16.msra.mxu1 %v21033_v58  ;;  %16929 = vmatprep.subr.bf16.mxu0 %v21038_v5  ;;  %v21098_v58 = vld [vmem:[#allocation8 + $0x1f5c] ss:$24 sps:$4 sm:$0xff]  }
 0x75c   :  { %16972 = vmatprep.subr.bf16.mxu1 %v21041_v1  ;;  %v21101_v5 = vld [vmem:[#allocation8 + $0x225c] ss:$24 sps:$4 sm:$0xff]   ;;  %v21096_v1 = vld [vmem:[#allocation8 + $0x1f58] ss:$24 sps:$4 sm:$0xff]  }
 0x75e   :  { %16930 = vmatpush1.bf16.msra.mxu0 %v21036_v34  ;;  %v21099_v34 = vld [vmem:[#allocation8 + $0x2258] ss:$24 sps:$4 sm:$0xff]  }
 0x75f   :  { %16973 = vmatpush1.bf16.msra.mxu1 %v21039_v44  ;;  %16931 = vmatprep.subr.bf16.mxu0 %v21044_v36  ;;  %v21104_v44 = vld [vmem:[#allocation8 + $0x1f2c] ss:$24 sps:$4 sm:$0xff]  }
 0x760   :  { %16974 = vmatprep.subr.bf16.mxu1 %v21047_v46  ;;  %v21107_v36 = vld [vmem:[#allocation8 + $0x222c] ss:$24 sps:$4 sm:$0xff]   ;;  %v21102_v46 = vld [vmem:[#allocation8 + $0x1f28] ss:$24 sps:$4 sm:$0xff]  }
 0x762   :  { %16932 = vmatpush1.bf16.msra.mxu0 %v21042_v11  ;;  %v21105_v11 = vld [vmem:[#allocation8 + $0x2228] ss:$24 sps:$4 sm:$0xff]  }
 0x763   :  { %16975 = vmatpush1.bf16.msra.mxu1 %v21045_v38  ;;  %16933 = vmatprep.subr.bf16.mxu0 %v21050_v54  ;;  %v21110_v38 = vld [vmem:[#allocation8 + $0x1efc] ss:$24 sps:$4 sm:$0xff]  }
 0x764   :  { %16976 = vmatprep.subr.bf16.mxu1 %v21053_v39  ;;  %v21113_v54 = vld [vmem:[#allocation8 + $0x21fc] ss:$24 sps:$4 sm:$0xff]   ;;  %v21108_v39 = vld [vmem:[#allocation8 + $0x1ef8] ss:$24 sps:$4 sm:$0xff]  }
 0x766   :  { %16934 = vmatpush2.bf16.msra.mxu0 %v21048_v0  ;;  %v21111_v0 = vld [vmem:[#allocation8 + $0x21f8] ss:$24 sps:$4 sm:$0xff]  }
 0x767   :  { %16977 = vmatpush2.bf16.msra.mxu1 %v21051_v55  ;;  %16935 = vmatprep.subr.bf16.mxu0 %v21056_v31  ;;  %v21116_v55 = vld [vmem:[#allocation8 + $0x1ecc] ss:$24 sps:$4 sm:$0xff]  }
 0x768   :  { %16978 = vmatprep.subr.bf16.mxu1 %v21059_v9  ;;  %v21119_v31 = vld [vmem:[#allocation8 + $0x21cc] ss:$24 sps:$4 sm:$0xff]   ;;  %v21114_v9 = vld [vmem:[#allocation8 + $0x1ec8] ss:$24 sps:$4 sm:$0xff]  }
 0x76a   :  { %16936 = vmatpush2.bf16.msra.mxu0 %v21054_v41  ;;  %v21117_v41 = vld [vmem:[#allocation8 + $0x21c8] ss:$24 sps:$4 sm:$0xff]  }
 0x76b   :  { %16979 = vmatpush2.bf16.msra.mxu1 %v21057_v42  ;;  %16937 = vmatprep.subr.bf16.mxu0 %v21062_v59  ;;  %v21122_v42 = vld [vmem:[#allocation8 + $0x1e9c] ss:$24 sps:$4 sm:$0xff]  }
 0x76c   :  { %16980 = vmatprep.subr.bf16.mxu1 %v21065_v52  ;;  %v21125_v59 = vld [vmem:[#allocation8 + $0x219c] ss:$24 sps:$4 sm:$0xff]   ;;  %v21120_v52 = vld [vmem:[#allocation8 + $0x1e98] ss:$24 sps:$4 sm:$0xff]  }
 0x76e   :  { %16938 = vmatpush2.bf16.msra.mxu0 %v21060_v26  ;;  %v21123_v26 = vld [vmem:[#allocation8 + $0x2198] ss:$24 sps:$4 sm:$0xff]  }
 0x76f   :  { %16981 = vmatpush2.bf16.msra.mxu1 %v21063_v33  ;;  %16939 = vmatprep.subr.bf16.mxu0 %v21068_v2  ;;  %v21128_v33 = vld [vmem:[#allocation8 + $0x1e6c] ss:$24 sps:$4 sm:$0xff]  }
 0x770   :  { %16982 = vmatprep.subr.bf16.mxu1 %v21071_v15  ;;  %v21131_v2 = vld [vmem:[#allocation8 + $0x216c] ss:$24 sps:$4 sm:$0xff]   ;;  %v21126_v15 = vld [vmem:[#allocation8 + $0x1e68] ss:$24 sps:$4 sm:$0xff]  }
 0x772   :  { %16940 = vmatpush2.bf16.msra.mxu0 %v21066_v53  ;;  %v21129_v53 = vld [vmem:[#allocation8 + $0x2168] ss:$24 sps:$4 sm:$0xff]  }
 0x773   :  { %16983 = vmatpush2.bf16.msra.mxu1 %v21069_v12  ;;  %16941 = vmatprep.subr.bf16.mxu0 %v21074_v20  ;;  %v21134_v12 = vld [vmem:[#allocation8 + $0x1e3c] ss:$24 sps:$4 sm:$0xff]  }
 0x774   :  { %16984 = vmatprep.subr.bf16.mxu1 %v21077_v8  ;;  %v21137_v20 = vld [vmem:[#allocation8 + $0x213c] ss:$24 sps:$4 sm:$0xff]   ;;  %v21132_v8 = vld [vmem:[#allocation8 + $0x1e38] ss:$24 sps:$4 sm:$0xff]  }
 0x776   :  { %16942 = vmatpush2.bf16.msra.mxu0 %v21072_v22  ;;  %v21135_v22 = vld [vmem:[#allocation8 + $0x2138] ss:$24 sps:$4 sm:$0xff]  }
 0x777   :  { %16985 = vmatpush2.bf16.msra.mxu1 %v21075_v17  ;;  %16943 = vmatprep.subr.bf16.mxu0 %v21080_v3  ;;  %v21140_v17 = vld [vmem:[#allocation8 + $0x1e0c] ss:$24 sps:$4 sm:$0xff]  }
 0x778   :  { %16986 = vmatprep.subr.bf16.mxu1 %v21083_v32  ;;  %v21143_v3 = vld [vmem:[#allocation8 + $0x210c] ss:$24 sps:$4 sm:$0xff]   ;;  %v21138_v32 = vld [vmem:[#allocation8 + $0x1e08] ss:$24 sps:$4 sm:$0xff]  }
 0x77a   :  { %16944 = vmatpush2.bf16.msra.mxu0 %v21078_v18  ;;  %v21141_v18 = vld [vmem:[#allocation8 + $0x2108] ss:$24 sps:$4 sm:$0xff]  }
 0x77b   :  { %16987 = vmatpush2.bf16.msra.mxu1 %v21081_v49  ;;  %16945 = vmatprep.subr.bf16.mxu0 %v21086_v35  ;;  %v21146_v49 = vld [vmem:[#allocation8 + $0x20dc] ss:$24 sps:$4 sm:$0xff]  }
 0x77c   :  { %16988 = vmatprep.subr.bf16.mxu1 %v21089_v19  ;;  %v21149_v35 = vld [vmem:[#allocation8 + $0x23dc] ss:$24 sps:$4 sm:$0xff]   ;;  %v21144_v19 = vld [vmem:[#allocation8 + $0x20d8] ss:$24 sps:$4 sm:$0xff]  }
 0x77e   :  { %16946 = vmatpush2.bf16.msra.mxu0 %v21084_v29  ;;  %v21147_v29 = vld [vmem:[#allocation8 + $0x23d8] ss:$24 sps:$4 sm:$0xff]  }
 0x77f   :  { %16989 = vmatpush2.bf16.msra.mxu1 %v21087_v7  ;;  %16947 = vmatprep.subr.bf16.mxu0 %v21092_v21  ;;  %v21152_v7 = vld [vmem:[#allocation8 + $0x20ac] ss:$24 sps:$4 sm:$0xff]  }
 0x780   :  { %16990 = vmatprep.subr.bf16.mxu1 %v21095_v25  ;;  %v21155_v21 = vld [vmem:[#allocation8 + $0x23ac] ss:$24 sps:$4 sm:$0xff]   ;;  %v21150_v25 = vld [vmem:[#allocation8 + $0x20a8] ss:$24 sps:$4 sm:$0xff]  }
 0x782   :  { %16948 = vmatpush2.bf16.msra.mxu0 %v21090_v57  ;;  %v21153_v57 = vld [vmem:[#allocation8 + $0x23a8] ss:$24 sps:$4 sm:$0xff]  }
 0x783   :  { %16991 = vmatpush2.bf16.msra.mxu1 %v21093_v14  ;;  %17003 = vmatprep.subr.bf16.mxu0 %v21098_v58  ;;  %v21158_v14 = vld [vmem:[#allocation8 + $0x207c] ss:$24 sps:$4 sm:$0xff]  }
 0x784   :  { %17046 = vmatprep.subr.bf16.mxu1 %v21101_v5  ;;  %v21161_v58 = vld [vmem:[#allocation8 + $0x237c] ss:$24 sps:$4 sm:$0xff]   ;;  %v21156_v5 = vld [vmem:[#allocation8 + $0x2078] ss:$24 sps:$4 sm:$0xff]  }
 0x785   :  { %16950 = vmatmul.mubr.bf16.vlgmr.msra.gmra.mxu0 %v22504_v13 }
 0x786   :  { %16993 = vmatmul.mubr.bf16.vlgmr.msra.gmra.mxu1 %v22592_v10  ;;  %17004 = vmatpush1.bf16.msra.mxu0 %v21096_v1  ;;  %v21159_v1 = vld [vmem:[#allocation8 + $0x2378] ss:$24 sps:$4 sm:$0xff]  }
 0x787   :  { %17035 = vmatprep.mubr.bf16.mxu0 %v22873_v61  ;;  %17047 = vmatpush1.bf16.msra.mxu1 %v21099_v34  ;;  %v21164_v34 = vld [vmem:[#allocation8 + $0x204c] ss:$24 sps:$4 sm:$0xff]  }
 0x788   :  { %17078 = vmatprep.mubr.bf16.mxu1 %v22876_v30  ;;  %17005 = vmatprep.subr.bf16.mxu0 %v21104_v44  ;;  %v21167_v44 = vld [vmem:[#allocation8 + $0x234c] ss:$24 sps:$4 sm:$0xff]  }
 0x789   :  { %17048 = vmatprep.subr.bf16.mxu1 %v21107_v36  ;;  %v21162_v36 = vld [vmem:[#allocation8 + $0x2048] ss:$24 sps:$4 sm:$0xff]  }
 0x78a   :  { %17006 = vmatpush1.bf16.msra.mxu0 %v21102_v46  ;;  %v21165_v46 = vld [vmem:[#allocation8 + $0x2348] ss:$24 sps:$4 sm:$0xff]  }
 0x78b   :  { %17049 = vmatpush1.bf16.msra.mxu1 %v21105_v11  ;;  %17007 = vmatprep.subr.bf16.mxu0 %v21110_v38  ;;  %v21170_v11 = vld [vmem:[#allocation8 + $0x201c] ss:$24 sps:$4 sm:$0xff]  }
 0x78c   :  { %17050 = vmatprep.subr.bf16.mxu1 %v21113_v54  ;;  %v21173_v38 = vld [vmem:[#allocation8 + $0x231c] ss:$24 sps:$4 sm:$0xff]   ;;  %v21168_v54 = vld [vmem:[#allocation8 + $0x2018] ss:$24 sps:$4 sm:$0xff]  }
 0x78e   :  { %17008 = vmatpush1.bf16.msra.mxu0 %v21108_v39  ;;  %v21171_v39 = vld [vmem:[#allocation8 + $0x2318] ss:$24 sps:$4 sm:$0xff]  }
 0x78f   :  { %17051 = vmatpush1.bf16.msra.mxu1 %v21111_v0  ;;  %17009 = vmatprep.subr.bf16.mxu0 %v21116_v55  ;;  %v21176_v0 = vld [vmem:[#allocation8 + $0x1fec] ss:$24 sps:$4 sm:$0xff]  }
 0x790   :  { %17052 = vmatprep.subr.bf16.mxu1 %v21119_v31  ;;  %v21179_v55 = vld [vmem:[#allocation8 + $0x22ec] ss:$24 sps:$4 sm:$0xff]   ;;  %v21174_v31 = vld [vmem:[#allocation8 + $0x1fe8] ss:$24 sps:$4 sm:$0xff]  }
 0x792   :  { %17010 = vmatpush1.bf16.msra.mxu0 %v21114_v9  ;;  %v21177_v9 = vld [vmem:[#allocation8 + $0x22e8] ss:$24 sps:$4 sm:$0xff]  }
 0x793   :  { %17053 = vmatpush1.bf16.msra.mxu1 %v21117_v41  ;;  %17011 = vmatprep.subr.bf16.mxu0 %v21122_v42  ;;  %v21182_v41 = vld [vmem:[#allocation8 + $0x1fbc] ss:$24 sps:$4 sm:$0xff]  }
 0x794   :  { %17054 = vmatprep.subr.bf16.mxu1 %v21125_v59  ;;  %v21185_v42 = vld [vmem:[#allocation8 + $0x22bc] ss:$24 sps:$4 sm:$0xff]   ;;  %v21180_v59 = vld [vmem:[#allocation8 + $0x1fb8] ss:$24 sps:$4 sm:$0xff]  }
 0x796   :  { %17012 = vmatpush1.bf16.msra.mxu0 %v21120_v52  ;;  %v21183_v52 = vld [vmem:[#allocation8 + $0x22b8] ss:$24 sps:$4 sm:$0xff]  }
 0x797   :  { %17055 = vmatpush1.bf16.msra.mxu1 %v21123_v26  ;;  %17013 = vmatprep.subr.bf16.mxu0 %v21128_v33  ;;  %v21188_v26 = vld [vmem:[#allocation8 + $0x1f8c] ss:$24 sps:$4 sm:$0xff]  }
 0x798   :  { %17056 = vmatprep.subr.bf16.mxu1 %v21131_v2  ;;  %v21191_v33 = vld [vmem:[#allocation8 + $0x228c] ss:$24 sps:$4 sm:$0xff]   ;;  %v21186_v2 = vld [vmem:[#allocation8 + $0x1f88] ss:$24 sps:$4 sm:$0xff]  }
 0x79a   :  { %17014 = vmatpush1.bf16.msra.mxu0 %v21126_v15  ;;  %v21189_v15 = vld [vmem:[#allocation8 + $0x2288] ss:$24 sps:$4 sm:$0xff]  }
 0x79b   :  { %17057 = vmatpush1.bf16.msra.mxu1 %v21129_v53  ;;  %17015 = vmatprep.subr.bf16.mxu0 %v21134_v12  ;;  %v21194_v53 = vld [vmem:[#allocation8 + $0x164] ss:$24 sps:$4 sm:$0xff]  }
 0x79c   :  { %17058 = vmatprep.subr.bf16.mxu1 %v21137_v20  ;;  %v21197_v12 = vld [vmem:[#allocation8 + $0x464] ss:$24 sps:$4 sm:$0xff]   ;;  %v21192_v20 = vld [vmem:[#allocation8 + $0x160] ss:$24 sps:$4 sm:$0xff]  }
 0x79e   :  { %17016 = vmatpush1.bf16.msra.mxu0 %v21132_v8  ;;  %v21195_v8 = vld [vmem:[#allocation8 + $0x460] ss:$24 sps:$4 sm:$0xff]  }
 0x79f   :  { %17059 = vmatpush1.bf16.msra.mxu1 %v21135_v22  ;;  %17017 = vmatprep.subr.bf16.mxu0 %v21140_v17  ;;  %v21200_v22 = vld [vmem:[#allocation8 + $0x134] ss:$24 sps:$4 sm:$0xff]  }
 0x7a0   :  { %17060 = vmatprep.subr.bf16.mxu1 %v21143_v3  ;;  %v21203_v17 = vld [vmem:[#allocation8 + $0x434] ss:$24 sps:$4 sm:$0xff]   ;;  %v21198_v3 = vld [vmem:[#allocation8 + $0x130] ss:$24 sps:$4 sm:$0xff]  }
 0x7a2   :  { %17018 = vmatpush1.bf16.msra.mxu0 %v21138_v32  ;;  %v21201_v32 = vld [vmem:[#allocation8 + $0x430] ss:$24 sps:$4 sm:$0xff]  }
 0x7a3   :  { %17061 = vmatpush1.bf16.msra.mxu1 %v21141_v18  ;;  %17019 = vmatprep.subr.bf16.mxu0 %v21146_v49  ;;  %v21206_v18 = vld [vmem:[#allocation8 + $0x104] ss:$24 sps:$4 sm:$0xff]  }
 0x7a4   :  { %17062 = vmatprep.subr.bf16.mxu1 %v21149_v35  ;;  %v21209_v49 = vld [vmem:[#allocation8 + $0x404] ss:$24 sps:$4 sm:$0xff]   ;;  %v21204_v35 = vld [vmem:[#allocation8 + $0x100] ss:$24 sps:$4 sm:$0xff]  }
 0x7a6   :  { %17020 = vmatpush2.bf16.msra.mxu0 %v21144_v19  ;;  %v21207_v19 = vld [vmem:[#allocation8 + $0x400] ss:$24 sps:$4 sm:$0xff]  }
 0x7a7   :  { %17063 = vmatpush2.bf16.msra.mxu1 %v21147_v29  ;;  %17021 = vmatprep.subr.bf16.mxu0 %v21152_v7  ;;  %v21212_v29 = vld [vmem:[#allocation8 + $0xd4] ss:$24 sps:$4 sm:$0xff]  }
 0x7a8   :  { %17064 = vmatprep.subr.bf16.mxu1 %v21155_v21  ;;  %v21215_v7 = vld [vmem:[#allocation8 + $0x3d4] ss:$24 sps:$4 sm:$0xff]   ;;  %v21210_v21 = vld [vmem:[#allocation8 + $0xd0] ss:$24 sps:$4 sm:$0xff]  }
 0x7aa   :  { %17022 = vmatpush2.bf16.msra.mxu0 %v21150_v25  ;;  %v21218_v25 = vld [vmem:[#allocation8 + $0xa4] ss:$24 sps:$4 sm:$0xff]  }
 0x7ab   :  { %17065 = vmatpush2.bf16.msra.mxu1 %v21153_v57  ;;  %17023 = vmatprep.subr.bf16.mxu0 %v21158_v14  ;;  %v21221_v57 = vld [vmem:[#allocation8 + $0x3a4] ss:$24 sps:$4 sm:$0xff]   ;;  %v21219_v14 = vld [vmem:[#allocation8 + $0x3a0] ss:$24 sps:$4 sm:$0xff]  }
 0x7ac   :  { %17066 = vmatprep.subr.bf16.mxu1 %v21161_v58  ;;  %v21224_v58 = vld [vmem:[#allocation8 + $0x74] ss:$24 sps:$4 sm:$0xff]  }
 0x7ae   :  { %17024 = vmatpush2.bf16.msra.mxu0 %v21156_v5  ;;  %v21227_v5 = vld [vmem:[#allocation8 + $0x374] ss:$24 sps:$4 sm:$0xff]  }
 0x7af   :  { %17067 = vmatpush2.bf16.msra.mxu1 %v21159_v1  ;;  %17025 = vmatprep.subr.bf16.mxu0 %v21164_v34  ;;  %v21222_v1 = vld [vmem:[#allocation8 + $0x70] ss:$24 sps:$4 sm:$0xff]  }
 0x7b0   :  { %17068 = vmatprep.subr.bf16.mxu1 %v21167_v44  ;;  %v21225_v34 = vld [vmem:[#allocation8 + $0x370] ss:$24 sps:$4 sm:$0xff]   ;;  %v21230_v44 = vld [vmem:[#allocation8 + $0x44] ss:$24 sps:$4 sm:$0xff]  }
 0x7b2   :  { %17026 = vmatpush2.bf16.msra.mxu0 %v21162_v36  ;;  %v21233_v36 = vld [vmem:[#allocation8 + $0x344] ss:$24 sps:$4 sm:$0xff]  }
 0x7b3   :  { %17069 = vmatpush2.bf16.msra.mxu1 %v21165_v46  ;;  %17027 = vmatprep.subr.bf16.mxu0 %v21170_v11  ;;  %v21228_v46 = vld [vmem:[#allocation8 + $0x40] ss:$24 sps:$4 sm:$0xff]  }
 0x7b4   :  { %17070 = vmatprep.subr.bf16.mxu1 %v21173_v38  ;;  %v21231_v11 = vld [vmem:[#allocation8 + $0x340] ss:$24 sps:$4 sm:$0xff]   ;;  %v21236_v38 = vld [vmem:[#allocation8 + $0x14] ss:$24 sps:$4 sm:$0xff]  }
 0x7b6   :  { %17028 = vmatpush2.bf16.msra.mxu0 %v21168_v54  ;;  %v21239_v54 = vld [vmem:[#allocation8 + $0x314] ss:$24 sps:$4 sm:$0xff]  }
 0x7b7   :  { %17071 = vmatpush2.bf16.msra.mxu1 %v21171_v39  ;;  %17029 = vmatprep.subr.bf16.mxu0 %v21176_v0  ;;  %v21234_v39 = vld [vmem:[#allocation8 + $0x10] ss:$24 sps:$4 sm:$0xff]  }
 0x7b8   :  { %17072 = vmatprep.subr.bf16.mxu1 %v21179_v55  ;;  %v21237_v0 = vld [vmem:[#allocation8 + $0x310] ss:$24 sps:$4 sm:$0xff]   ;;  %v21242_v55 = vld [vmem:[#allocation8 + $0x2e4] ss:$24 sps:$4 sm:$0xff]  }
 0x7ba   :  { %17030 = vmatpush2.bf16.msra.mxu0 %v21174_v31  ;;  %v21245_v31 = vld [vmem:[#allocation8 + $0x5e4] ss:$24 sps:$4 sm:$0xff]  }
 0x7bb   :  { %17073 = vmatpush2.bf16.msra.mxu1 %v21177_v9  ;;  %17031 = vmatprep.subr.bf16.mxu0 %v21182_v41  ;;  %v21240_v9 = vld [vmem:[#allocation8 + $0x2e0] ss:$24 sps:$4 sm:$0xff]  }
 0x7bc   :  { %17074 = vmatprep.subr.bf16.mxu1 %v21185_v42  ;;  %v21243_v41 = vld [vmem:[#allocation8 + $0x5e0] ss:$24 sps:$4 sm:$0xff]   ;;  %v21248_v42 = vld [vmem:[#allocation8 + $0x2b4] ss:$24 sps:$4 sm:$0xff]  }
 0x7be   :  { %17032 = vmatpush2.bf16.msra.mxu0 %v21180_v59  ;;  %v21251_v59 = vld [vmem:[#allocation8 + $0x5b4] ss:$24 sps:$4 sm:$0xff]  }
 0x7bf   :  { %17075 = vmatpush2.bf16.msra.mxu1 %v21183_v52  ;;  %17033 = vmatprep.subr.bf16.mxu0 %v21188_v26  ;;  %v21246_v52 = vld [vmem:[#allocation8 + $0x2b0] ss:$24 sps:$4 sm:$0xff]  }
 0x7c0   :  { %17076 = vmatprep.subr.bf16.mxu1 %v21191_v33  ;;  %v21249_v26 = vld [vmem:[#allocation8 + $0x5b0] ss:$24 sps:$4 sm:$0xff]   ;;  %v21254_v33 = vld [vmem:[#allocation8 + $0x284] ss:$24 sps:$4 sm:$0xff]  }
 0x7c2   :  { %17034 = vmatpush2.bf16.msra.mxu0 %v21186_v2  ;;  %v21257_v2 = vld [vmem:[#allocation8 + $0x584] ss:$24 sps:$4 sm:$0xff]  }
 0x7c3   :  { %17077 = vmatpush2.bf16.msra.mxu1 %v21189_v15  ;;  %17089 = vmatprep.subr.bf16.mxu0 %v21194_v53  ;;  %v21252_v15 = vld [vmem:[#allocation8 + $0x280] ss:$24 sps:$4 sm:$0xff]  }
 0x7c4   :  { %17132 = vmatprep.subr.bf16.mxu1 %v21197_v12  ;;  %v21255_v53 = vld [vmem:[#allocation8 + $0x580] ss:$24 sps:$4 sm:$0xff]   ;;  %v21260_v12 = vld [vmem:[#allocation8 + $0x254] ss:$24 sps:$4 sm:$0xff]  }
 0x7c5   :  { %17036 = vmatmul.mubr.bf16.vlgmr.msra.gmra.mxu0 %v22736_v28 }
 0x7c6   :  { %17079 = vmatmul.mubr.bf16.vlgmr.msra.gmra.mxu1 %v22818_v24  ;;  %17090 = vmatpush1.bf16.msra.mxu0 %v21192_v20  ;;  %v21263_v20 = vld [vmem:[#allocation8 + $0x554] ss:$24 sps:$4 sm:$0xff]  }
 0x7c7   :  { %17121 = vmatprep.mubr.bf16.mxu0 %v22521_v4  ;;  %17133 = vmatpush1.bf16.msra.mxu1 %v21195_v8  ;;  %v21213_v4 = vld [vmem:[#allocation8 + $0x3d0] ss:$24 sps:$4 sm:$0xff]  }
 0x7c8   :  { %17164 = vmatprep.mubr.bf16.mxu1 %v22524_v62  ;;  %17091 = vmatprep.subr.bf16.mxu0 %v21200_v22  ;;  %v21216_v62 = vld [vmem:[#allocation8 + $0xa0] ss:$24 sps:$4 sm:$0xff]   ;;  %v21258_v8 = vld [vmem:[#allocation8 + $0x250] ss:$24 sps:$4 sm:$0xff]  }
 0x7c9   :  { %17134 = vmatprep.subr.bf16.mxu1 %v21203_v17  ;;  %v21261_v22 = vld [vmem:[#allocation8 + $0x550] ss:$24 sps:$4 sm:$0xff]   ;;  %v21266_v17 = vld [vmem:[#allocation8 + $0x224] ss:$24 sps:$4 sm:$0xff]  }
 0x7ca   :  { %17092 = vmatpush1.bf16.msra.mxu0 %v21198_v3  ;;  %v21269_v3 = vld [vmem:[#allocation8 + $0x524] ss:$24 sps:$4 sm:$0xff]  }
 0x7cb   :  { %17135 = vmatpush1.bf16.msra.mxu1 %v21201_v32  ;;  %17093 = vmatprep.subr.bf16.mxu0 %v21206_v18  ;;  %v21264_v32 = vld [vmem:[#allocation8 + $0x220] ss:$24 sps:$4 sm:$0xff]  }
 0x7cc   :  { %17136 = vmatprep.subr.bf16.mxu1 %v21209_v49  ;;  %v21267_v18 = vld [vmem:[#allocation8 + $0x520] ss:$24 sps:$4 sm:$0xff]   ;;  %v21272_v49 = vld [vmem:[#allocation8 + $0x1f4] ss:$24 sps:$4 sm:$0xff]  }
 0x7ce   :  { %17094 = vmatpush1.bf16.msra.mxu0 %v21204_v35  ;;  %v21275_v35 = vld [vmem:[#allocation8 + $0x4f4] ss:$24 sps:$4 sm:$0xff]  }
 0x7cf   :  { %17137 = vmatpush1.bf16.msra.mxu1 %v21207_v19  ;;  %17095 = vmatprep.subr.bf16.mxu0 %v21212_v29  ;;  %v21270_v19 = vld [vmem:[#allocation8 + $0x1f0] ss:$24 sps:$4 sm:$0xff]  }
 0x7d0   :  { %17138 = vmatprep.subr.bf16.mxu1 %v21215_v7  ;;  %v21273_v29 = vld [vmem:[#allocation8 + $0x4f0] ss:$24 sps:$4 sm:$0xff]   ;;  %v21278_v7 = vld [vmem:[#allocation8 + $0x1c4] ss:$24 sps:$4 sm:$0xff]  }
 0x7d2   :  { %17096 = vmatpush1.bf16.msra.mxu0 %v21210_v21  ;;  %v21281_v21 = vld [vmem:[#allocation8 + $0x4c4] ss:$24 sps:$4 sm:$0xff]  }
 0x7d3   :  { %17139 = vmatpush1.bf16.msra.mxu1 %v21213_v4  ;;  %17097 = vmatprep.subr.bf16.mxu0 %v21218_v25  ;;  %v21276_v4 = vld [vmem:[#allocation8 + $0x1c0] ss:$24 sps:$4 sm:$0xff]  }
 0x7d4   :  { %17140 = vmatprep.subr.bf16.mxu1 %v21221_v57  ;;  %v21279_v25 = vld [vmem:[#allocation8 + $0x4c0] ss:$24 sps:$4 sm:$0xff]   ;;  %v21284_v57 = vld [vmem:[#allocation8 + $0x194] ss:$24 sps:$4 sm:$0xff]  }
 0x7d6   :  { %17098 = vmatpush1.bf16.msra.mxu0 %v21216_v62  ;;  %v21287_v62 = vld [vmem:[#allocation8 + $0x494] ss:$24 sps:$4 sm:$0xff]  }
 0x7d7   :  { %17141 = vmatpush1.bf16.msra.mxu1 %v21219_v14  ;;  %17099 = vmatprep.subr.bf16.mxu0 %v21224_v58  ;;  %v21282_v14 = vld [vmem:[#allocation8 + $0x190] ss:$24 sps:$4 sm:$0xff]  }
 0x7d8   :  { %17142 = vmatprep.subr.bf16.mxu1 %v21227_v5  ;;  %v21285_v58 = vld [vmem:[#allocation8 + $0x490] ss:$24 sps:$4 sm:$0xff]   ;;  %v21290_v5 = vld [vmem:[#allocation8 + $0x764] ss:$24 sps:$4 sm:$0xff]  }
 0x7da   :  { %17100 = vmatpush1.bf16.msra.mxu0 %v21222_v1  ;;  %v21293_v1 = vld [vmem:[#allocation8 + $0xa64] ss:$24 sps:$4 sm:$0xff]  }
 0x7db   :  { %17143 = vmatpush1.bf16.msra.mxu1 %v21225_v34  ;;  %17101 = vmatprep.subr.bf16.mxu0 %v21230_v44  ;;  %v21288_v34 = vld [vmem:[#allocation8 + $0x760] ss:$24 sps:$4 sm:$0xff]  }
 0x7dc   :  { %17144 = vmatprep.subr.bf16.mxu1 %v21233_v36  ;;  %v21291_v44 = vld [vmem:[#allocation8 + $0xa60] ss:$24 sps:$4 sm:$0xff]   ;;  %v21296_v36 = vld [vmem:[#allocation8 + $0x734] ss:$24 sps:$4 sm:$0xff]  }
 0x7de   :  { %17102 = vmatpush1.bf16.msra.mxu0 %v21228_v46  ;;  %v21299_v46 = vld [vmem:[#allocation8 + $0xa34] ss:$24 sps:$4 sm:$0xff]  }
 0x7df   :  { %17145 = vmatpush1.bf16.msra.mxu1 %v21231_v11  ;;  %17103 = vmatprep.subr.bf16.mxu0 %v21236_v38  ;;  %v21294_v11 = vld [vmem:[#allocation8 + $0x730] ss:$24 sps:$4 sm:$0xff]  }
 0x7e0   :  { %17146 = vmatprep.subr.bf16.mxu1 %v21239_v54  ;;  %v21297_v38 = vld [vmem:[#allocation8 + $0xa30] ss:$24 sps:$4 sm:$0xff]   ;;  %v21302_v54 = vld [vmem:[#allocation8 + $0x704] ss:$24 sps:$4 sm:$0xff]  }
 0x7e2   :  { %17104 = vmatpush1.bf16.msra.mxu0 %v21234_v39  ;;  %v21305_v39 = vld [vmem:[#allocation8 + $0xa04] ss:$24 sps:$4 sm:$0xff]  }
 0x7e3   :  { %17147 = vmatpush1.bf16.msra.mxu1 %v21237_v0  ;;  %17105 = vmatprep.subr.bf16.mxu0 %v21242_v55  ;;  %v21300_v0 = vld [vmem:[#allocation8 + $0x700] ss:$24 sps:$4 sm:$0xff]   ;;  %v21308_v55 = vld [vmem:[#allocation8 + $0x6d4] ss:$24 sps:$4 sm:$0xff]  }
 0x7e4   :  { %17148 = vmatprep.subr.bf16.mxu1 %v21245_v31  ;;  %v21306_v31 = vld [vmem:[#allocation8 + $0x6d0] ss:$24 sps:$4 sm:$0xff]  }
 0x7e6   :  { %17106 = vmatpush2.bf16.msra.mxu0 %v21240_v9  ;;  %v21314_v9 = vld [vmem:[#allocation8 + $0x6a4] ss:$24 sps:$4 sm:$0xff]  }
 0x7e7   :  { %17149 = vmatpush2.bf16.msra.mxu1 %v21243_v41  ;;  %17107 = vmatprep.subr.bf16.mxu0 %v21248_v42  ;;  %v21317_v41 = vld [vmem:[#allocation8 + $0x9a4] ss:$24 sps:$4 sm:$0xff]   ;;  %v21315_v42 = vld [vmem:[#allocation8 + $0x9a0] ss:$24 sps:$4 sm:$0xff]  }
 0x7e8   :  { %17150 = vmatprep.subr.bf16.mxu1 %v21251_v59  ;;  %v21320_v59 = vld [vmem:[#allocation8 + $0x674] ss:$24 sps:$4 sm:$0xff]  }
 0x7ea   :  { %17108 = vmatpush2.bf16.msra.mxu0 %v21246_v52  ;;  %v21323_v52 = vld [vmem:[#allocation8 + $0x974] ss:$24 sps:$4 sm:$0xff]  }
 0x7eb   :  { %17151 = vmatpush2.bf16.msra.mxu1 %v21249_v26  ;;  %17109 = vmatprep.subr.bf16.mxu0 %v21254_v33  ;;  %v21318_v26 = vld [vmem:[#allocation8 + $0x670] ss:$24 sps:$4 sm:$0xff]  }
 0x7ec   :  { %17152 = vmatprep.subr.bf16.mxu1 %v21257_v2  ;;  %v21321_v33 = vld [vmem:[#allocation8 + $0x970] ss:$24 sps:$4 sm:$0xff]   ;;  %v21326_v2 = vld [vmem:[#allocation8 + $0x644] ss:$24 sps:$4 sm:$0xff]  }
 0x7ee   :  { %17110 = vmatpush2.bf16.msra.mxu0 %v21252_v15  ;;  %v21329_v15 = vld [vmem:[#allocation8 + $0x944] ss:$24 sps:$4 sm:$0xff]  }
 0x7ef   :  { %17153 = vmatpush2.bf16.msra.mxu1 %v21255_v53  ;;  %17111 = vmatprep.subr.bf16.mxu0 %v21260_v12  ;;  %v21324_v53 = vld [vmem:[#allocation8 + $0x640] ss:$24 sps:$4 sm:$0xff]  }
 0x7f0   :  { %17154 = vmatprep.subr.bf16.mxu1 %v21263_v20  ;;  %v21327_v12 = vld [vmem:[#allocation8 + $0x940] ss:$24 sps:$4 sm:$0xff]   ;;  %v21332_v20 = vld [vmem:[#allocation8 + $0x614] ss:$24 sps:$4 sm:$0xff]  }
 0x7f2   :  { %17112 = vmatpush2.bf16.msra.mxu0 %v21258_v8  ;;  %v21335_v8 = vld [vmem:[#allocation8 + $0x914] ss:$24 sps:$4 sm:$0xff]  }
 0x7f3   :  { %17155 = vmatpush2.bf16.msra.mxu1 %v21261_v22  ;;  %17113 = vmatprep.subr.bf16.mxu0 %v21266_v17  ;;  %v21330_v22 = vld [vmem:[#allocation8 + $0x610] ss:$24 sps:$4 sm:$0xff]  }
 0x7f4   :  { %17156 = vmatprep.subr.bf16.mxu1 %v21269_v3  ;;  %v21333_v17 = vld [vmem:[#allocation8 + $0x910] ss:$24 sps:$4 sm:$0xff]   ;;  %v21338_v3 = vld [vmem:[#allocation8 + $0x8e4] ss:$24 sps:$4 sm:$0xff]  }
 0x7f6   :  { %17114 = vmatpush2.bf16.msra.mxu0 %v21264_v32  ;;  %v21341_v32 = vld [vmem:[#allocation8 + $0xbe4] ss:$24 sps:$4 sm:$0xff]  }
 0x7f7   :  { %17157 = vmatpush2.bf16.msra.mxu1 %v21267_v18  ;;  %17115 = vmatprep.subr.bf16.mxu0 %v21272_v49  ;;  %v21336_v18 = vld [vmem:[#allocation8 + $0x8e0] ss:$24 sps:$4 sm:$0xff]  }
 0x7f8   :  { %17158 = vmatprep.subr.bf16.mxu1 %v21275_v35  ;;  %v21339_v49 = vld [vmem:[#allocation8 + $0xbe0] ss:$24 sps:$4 sm:$0xff]   ;;  %v21344_v35 = vld [vmem:[#allocation8 + $0x8b4] ss:$24 sps:$4 sm:$0xff]  }
 0x7fa   :  { %17116 = vmatpush2.bf16.msra.mxu0 %v21270_v19  ;;  %v21347_v19 = vld [vmem:[#allocation8 + $0xbb4] ss:$24 sps:$4 sm:$0xff]  }
 0x7fb   :  { %17159 = vmatpush2.bf16.msra.mxu1 %v21273_v29  ;;  %17117 = vmatprep.subr.bf16.mxu0 %v21278_v7  ;;  %v21342_v29 = vld [vmem:[#allocation8 + $0x8b0] ss:$24 sps:$4 sm:$0xff]  }
 0x7fc   :  { %17160 = vmatprep.subr.bf16.mxu1 %v21281_v21  ;;  %v21345_v7 = vld [vmem:[#allocation8 + $0xbb0] ss:$24 sps:$4 sm:$0xff]   ;;  %v21350_v21 = vld [vmem:[#allocation8 + $0x884] ss:$24 sps:$4 sm:$0xff]  }
 0x7fe   :  { %17118 = vmatpush2.bf16.msra.mxu0 %v21276_v4  ;;  %v21353_v4 = vld [vmem:[#allocation8 + $0xb84] ss:$24 sps:$4 sm:$0xff]  }
 0x7ff   :  { %17161 = vmatpush2.bf16.msra.mxu1 %v21279_v25  ;;  %17119 = vmatprep.subr.bf16.mxu0 %v21284_v57  ;;  %v21348_v25 = vld [vmem:[#allocation8 + $0x880] ss:$24 sps:$4 sm:$0xff]  }
 0x800   :  { %17162 = vmatprep.subr.bf16.mxu1 %v21287_v62  ;;  %v21351_v57 = vld [vmem:[#allocation8 + $0xb80] ss:$24 sps:$4 sm:$0xff]   ;;  %v21356_v62 = vld [vmem:[#allocation8 + $0x854] ss:$24 sps:$4 sm:$0xff]  }
 0x802   :  { %17120 = vmatpush2.bf16.msra.mxu0 %v21282_v14  ;;  %v21359_v14 = vld [vmem:[#allocation8 + $0xb54] ss:$24 sps:$4 sm:$0xff]  }
 0x803   :  { %17163 = vmatpush2.bf16.msra.mxu1 %v21285_v58  ;;  %17175 = vmatprep.subr.bf16.mxu0 %v21290_v5  ;;  %v21354_v58 = vld [vmem:[#allocation8 + $0x850] ss:$24 sps:$4 sm:$0xff]  }
 0x804   :  { %17218 = vmatprep.subr.bf16.mxu1 %v21293_v1  ;;  %v21357_v5 = vld [vmem:[#allocation8 + $0xb50] ss:$24 sps:$4 sm:$0xff]   ;;  %v21362_v1 = vld [vmem:[#allocation8 + $0x824] ss:$24 sps:$4 sm:$0xff]  }
 0x805   :  { %17122 = vmatmul.mubr.bf16.vlgmr.msra.gmra.mxu0 %v23167_v51  ;;  %v21303_v51 = vld [vmem:[#allocation8 + $0xa00] ss:$24 sps:$4 sm:$0xff]  }
 0x806   :  { %17165 = vmatmul.mubr.bf16.vlgmr.msra.gmra.mxu1 %v23168_v45  ;;  %17176 = vmatpush1.bf16.msra.mxu0 %v21288_v34  ;;  %v21311_v45 = vld [vmem:[#allocation8 + $0x9d4] ss:$24 sps:$4 sm:$0xff]   ;;  %v21365_v34 = vld [vmem:[#allocation8 + $0xb24] ss:$24 sps:$4 sm:$0xff]  }
 0x807   :  { %17207 = vmatprep.mubr.bf16.mxu0 %v22607_v47  ;;  %17219 = vmatpush1.bf16.msra.mxu1 %v21291_v44  ;;  %v21309_v47 = vld [vmem:[#allocation8 + $0x9d0] ss:$24 sps:$4 sm:$0xff]   ;;  %v21360_v44 = vld [vmem:[#allocation8 + $0x820] ss:$24 sps:$4 sm:$0xff]  }
 0x808   :  { %17250 = vmatprep.mubr.bf16.mxu1 %v22610_v50  ;;  %17177 = vmatprep.subr.bf16.mxu0 %v21296_v36  ;;  %v21312_v50 = vld [vmem:[#allocation8 + $0x6a0] ss:$24 sps:$4 sm:$0xff]  }
 0x809   :  { %17220 = vmatprep.subr.bf16.mxu1 %v21299_v46  ;;  %v21363_v36 = vld [vmem:[#allocation8 + $0xb20] ss:$24 sps:$4 sm:$0xff]   ;;  %v21368_v46 = vld [vmem:[#allocation8 + $0x7f4] ss:$24 sps:$4 sm:$0xff]  }
 0x80a   :  { %17178 = vmatpush1.bf16.msra.mxu0 %v21294_v11  ;;  %v21371_v11 = vld [vmem:[#allocation8 + $0xaf4] ss:$24 sps:$4 sm:$0xff]  }
 0x80b   :  { %17221 = vmatpush1.bf16.msra.mxu1 %v21297_v38  ;;  %17179 = vmatprep.subr.bf16.mxu0 %v21302_v54  ;;  %v21366_v38 = vld [vmem:[#allocation8 + $0x7f0] ss:$24 sps:$4 sm:$0xff]  }
 0x80c   :  { %17222 = vmatprep.subr.bf16.mxu1 %v21305_v39  ;;  %v21369_v54 = vld [vmem:[#allocation8 + $0xaf0] ss:$24 sps:$4 sm:$0xff]   ;;  %v21374_v39 = vld [vmem:[#allocation8 + $0x7c4] ss:$24 sps:$4 sm:$0xff]  }
 0x80e   :  { %17180 = vmatpush1.bf16.msra.mxu0 %v21300_v0  ;;  %v21377_v0 = vld [vmem:[#allocation8 + $0xac4] ss:$24 sps:$4 sm:$0xff]  }
 0x80f   :  { %17223 = vmatpush1.bf16.msra.mxu1 %v21303_v51  ;;  %17181 = vmatprep.subr.bf16.mxu0 %v21308_v55  ;;  %v21372_v51 = vld [vmem:[#allocation8 + $0x7c0] ss:$24 sps:$4 sm:$0xff]  }
 0x810   :  { %17224 = vmatprep.subr.bf16.mxu1 %v21311_v45  ;;  %v21375_v55 = vld [vmem:[#allocation8 + $0xac0] ss:$24 sps:$4 sm:$0xff]   ;;  %v21380_v45 = vld [vmem:[#allocation8 + $0x794] ss:$24 sps:$4 sm:$0xff]  }
 0x812   :  { %17182 = vmatpush1.bf16.msra.mxu0 %v21306_v31  ;;  %v21383_v31 = vld [vmem:[#allocation8 + $0xa94] ss:$24 sps:$4 sm:$0xff]  }
 0x813   :  { %17225 = vmatpush1.bf16.msra.mxu1 %v21309_v47  ;;  %17183 = vmatprep.subr.bf16.mxu0 %v21314_v9  ;;  %v21378_v47 = vld [vmem:[#allocation8 + $0x790] ss:$24 sps:$4 sm:$0xff]   ;;  %v22992_v9 = vpop.f32.mrf.mxu0 }
 0x814   :  { %17226 = vmatprep.subr.bf16.mxu1 %v21317_v41  ;;  %v21381_v41 = vld [vmem:[#allocation8 + $0xa90] ss:$24 sps:$4 sm:$0xff]  }
 0x816   :  { %17184 = vmatpush1.bf16.msra.mxu0 %v21312_v50  ;;  %v21386_v50 = vld [vmem:[#allocation8 + $0xd64] ss:$24 sps:$4 sm:$0xff]  }
 0x817   :  { %17227 = vmatpush1.bf16.msra.mxu1 %v21315_v42  ;;  %17185 = vmatprep.subr.bf16.mxu0 %v21320_v59  ;;  %v22994_v42 = vpop.f32.mrf.mxu1  ;;  %v21389_v59 = vld [vmem:[#allocation8 + $0x1064] ss:$24 sps:$4 sm:$0xff]  }
 0x818   :  { %17228 = vmatprep.subr.bf16.mxu1 %v21323_v52  ;;  %v21384_v52 = vld [vmem:[#allocation8 + $0xd60] ss:$24 sps:$4 sm:$0xff]  }
 0x81a   :  { %17186 = vmatpush1.bf16.msra.mxu0 %v21318_v26  ;;  %v22996_v26 = vpop.f32.mrf.mxu0 }
 0x81b   :  { %17229 = vmatpush1.bf16.msra.mxu1 %v21321_v33  ;;  %17187 = vmatprep.subr.bf16.mxu0 %v21326_v2  ;;  %v21387_v33 = vld [vmem:[#allocation8 + $0x1060] ss:$24 sps:$4 sm:$0xff]   ;;  %v22998_v2 = vpop.f32.mrf.mxu1 }
 0x81c   :  { %17230 = vmatprep.subr.bf16.mxu1 %v21329_v15  ;;  %v21392_v15 = vld [vmem:[#allocation8 + $0xd34] ss:$24 sps:$4 sm:$0xff]  }
 0x81e   :  { %17188 = vmatpush1.bf16.msra.mxu0 %v21324_v53  ;;  %v21395_v53 = vld [vmem:[#allocation8 + $0x1034] ss:$24 sps:$4 sm:$0xff]  }
 0x81f   :  { %17231 = vmatpush1.bf16.msra.mxu1 %v21327_v12  ;;  %17189 = vmatprep.subr.bf16.mxu0 %v21332_v20  ;;  %v21390_v12 = vld [vmem:[#allocation8 + $0xd30] ss:$24 sps:$4 sm:$0xff]   ;;  %v23002_v20 = vpop.f32.mrf.mxu0 }
 0x820   :  { %17232 = vmatprep.subr.bf16.mxu1 %v21335_v8  ;;  %v21393_v8 = vld [vmem:[#allocation8 + $0x1030] ss:$24 sps:$4 sm:$0xff]  }
 0x822   :  { %17190 = vmatpush1.bf16.msra.mxu0 %v21330_v22  ;;  %v21398_v22 = vld [vmem:[#allocation8 + $0xd04] ss:$24 sps:$4 sm:$0xff]  }
 0x823   :  { %17233 = vmatpush1.bf16.msra.mxu1 %v21333_v17  ;;  %17191 = vmatprep.subr.bf16.mxu0 %v21338_v3  ;;  %v23005_v17 = vpop.f32.mrf.mxu1  ;;  %v23204_v3 = vld [vmem:[#allocation23_spill] sm:$0xff] }
 0x824   :  { %17234 = vmatprep.subr.bf16.mxu1 %v21341_v32  ;;  %v21401_v32 = vld [vmem:[#allocation8 + $0x1004] ss:$24 sps:$4 sm:$0xff]  }
 0x826   :  { %17192 = vmatpush2.bf16.msra.mxu0 %v21336_v18  ;;  %v23008_v18 = vpop.f32.mrf.mxu0 }
 0x827   :  { %17235 = vmatpush2.bf16.msra.mxu1 %v21339_v49  ;;  %17193 = vmatprep.subr.bf16.mxu0 %v21344_v35  ;;  %v21404_v49 = vld [vmem:[#allocation8 + $0xcd4] ss:$24 sps:$4 sm:$0xff]   ;;  %v23010_v35 = vpop.f32.mrf.mxu1 }
 0x828   :  { %17236 = vmatprep.subr.bf16.mxu1 %v21347_v19  ;;  %v23012_v19 = vpop.f32.mrf.mxu0 }
 0x82a   :  { %17194 = vmatpush2.bf16.msra.mxu0 %v21342_v29  ;;  %v23014_v29 = vpop.f32.mrf.mxu1 }
 0x82b   :  { %17237 = vmatpush2.bf16.msra.mxu1 %v21345_v7  ;;  %17195 = vmatprep.subr.bf16.mxu0 %v21350_v21  ;;  %v21402_v7 = vld [vmem:[#allocation8 + $0xcd0] ss:$24 sps:$4 sm:$0xff]  }
 0x82c   :  { %17238 = vmatprep.subr.bf16.mxu1 %v21353_v4  ;;  %v21405_v21 = vld [vmem:[#allocation8 + $0xfd0] ss:$24 sps:$4 sm:$0xff]   ;;  %v21410_v4 = vld [vmem:[#allocation8 + $0xca4] ss:$24 sps:$4 sm:$0xff]  }
 0x82e   :  { %17196 = vmatpush2.bf16.msra.mxu0 %v21348_v25  ;;  %v21413_v25 = vld [vmem:[#allocation8 + $0xfa4] ss:$24 sps:$4 sm:$0xff]  }
 0x82f   :  { %17239 = vmatpush2.bf16.msra.mxu1 %v21351_v57  ;;  %17197 = vmatprep.subr.bf16.mxu0 %v21356_v62  ;;  %v23016_v57 = vpop.f32.mrf.mxu0  ;;  %v23018_v62 = vpop.f32.mrf.mxu1 }
 0x830   :  { %17240 = vmatprep.subr.bf16.mxu1 %v21359_v14  ;;  %v21408_v14 = vld [vmem:[#allocation8 + $0xca0] ss:$24 sps:$4 sm:$0xff]  }
 0x832   :  { %17198 = vmatpush2.bf16.msra.mxu0 %v21354_v58  ;;  %v21411_v58 = vld [vmem:[#allocation8 + $0xfa0] ss:$24 sps:$4 sm:$0xff]  }
 0x833   :  { %17241 = vmatpush2.bf16.msra.mxu1 %v21357_v5  ;;  %17199 = vmatprep.subr.bf16.mxu0 %v21362_v1  ;;  %v21416_v5 = vld [vmem:[#allocation8 + $0xc74] ss:$24 sps:$4 sm:$0xff]  }
 0x834   :  { %17242 = vmatprep.subr.bf16.mxu1 %v21365_v34  ;;  %v21419_v1 = vld [vmem:[#allocation8 + $0xf74] ss:$24 sps:$4 sm:$0xff]   ;;  %v23020_v34 = vpop.f32.mrf.mxu0 }
 0x836   :  { %17200 = vmatpush2.bf16.msra.mxu0 %v21360_v44  ;;  %v23022_v44 = vpop.f32.mrf.mxu1 }
 0x837   :  { %17243 = vmatpush2.bf16.msra.mxu1 %v21363_v36  ;;  %17201 = vmatprep.subr.bf16.mxu0 %v21368_v46  ;;  %v21414_v36 = vld [vmem:[#allocation8 + $0xc70] ss:$24 sps:$4 sm:$0xff]  }
 0x838   :  { %17244 = vmatprep.subr.bf16.mxu1 %v21371_v11  ;;  %v21417_v46 = vld [vmem:[#allocation8 + $0xf70] ss:$24 sps:$4 sm:$0xff]   ;;  %v21422_v11 = vld [vmem:[#allocation8 + $0xc44] ss:$24 sps:$4 sm:$0xff]  }
 0x83a   :  { %17202 = vmatpush2.bf16.msra.mxu0 %v21366_v38  ;;  %v21425_v38 = vld [vmem:[#allocation8 + $0xf44] ss:$24 sps:$4 sm:$0xff]  }
 0x83b   :  { %17245 = vmatpush2.bf16.msra.mxu1 %v21369_v54  ;;  %17203 = vmatprep.subr.bf16.mxu0 %v21374_v39  ;;  %v23024_v54 = vpop.f32.mrf.mxu0  ;;  %v23026_v39 = vpop.f32.mrf.mxu1 }
 0x83c   :  { %17246 = vmatprep.subr.bf16.mxu1 %v21377_v0  ;;  %v21420_v0 = vld [vmem:[#allocation8 + $0xc40] ss:$24 sps:$4 sm:$0xff]  }
 0x83e   :  { %17204 = vmatpush2.bf16.msra.mxu0 %v21372_v51  ;;  %v23028_v51 = vpop.f32.mrf.mxu0 }
 0x83f   :  { %17247 = vmatpush2.bf16.msra.mxu1 %v21375_v55  ;;  %17205 = vmatprep.subr.bf16.mxu0 %v21380_v45  ;;  %v21423_v55 = vld [vmem:[#allocation8 + $0xf40] ss:$24 sps:$4 sm:$0xff]   ;;  %v21428_v45 = vld [vmem:[#allocation8 + $0xc14] ss:$24 sps:$4 sm:$0xff]  }
 0x840   :  { %17248 = vmatprep.subr.bf16.mxu1 %v21383_v31  ;;  %v23030_v31 = vpop.f32.mrf.mxu1 }
 0x842   :  { %17206 = vmatpush2.bf16.msra.mxu0 %v21378_v47  ;;  %v21431_v47 = vld [vmem:[#allocation8 + $0xf14] ss:$24 sps:$4 sm:$0xff]  }
 0x843   :  { %17249 = vmatpush2.bf16.msra.mxu1 %v21381_v41  ;;  %17261 = vmatprep.subr.bf16.mxu0 %v21386_v50  ;;  %v21426_v41 = vld [vmem:[#allocation8 + $0xc10] ss:$24 sps:$4 sm:$0xff]   ;;  %v23032_v50 = vpop.f32.mrf.mxu0 }
 0x844   :  { %17304 = vmatprep.subr.bf16.mxu1 %v21389_v59  ;;  %v21429_v59 = vld [vmem:[#allocation8 + $0xf10] ss:$24 sps:$4 sm:$0xff]  }
 0x845   :  { %17208 = vmatmul.mubr.bf16.vlgmr.msra.gmra.mxu0 %v23181_v37  ;;  %v21396_v37 = vld [vmem:[#allocation8 + $0xd00] ss:$24 sps:$4 sm:$0xff]  }
 0x846   :  { %17251 = vmatmul.mubr.bf16.vlgmr.msra.gmra.mxu1 %v23182_v6  ;;  %17262 = vmatpush1.bf16.msra.mxu0 %v21384_v52  ;;  %v21399_v6 = vld [vmem:[#allocation8 + $0x1000] ss:$24 sps:$4 sm:$0xff]   ;;  %v21434_v52 = vld [vmem:[#allocation8 + $0xee4] ss:$24 sps:$4 sm:$0xff]  }
 0x847   :  { %17293 = vmatprep.mubr.bf16.mxu0 %v22671_v43  ;;  %17305 = vmatpush1.bf16.msra.mxu1 %v21387_v33  ;;  %v21407_v43 = vld [vmem:[#allocation8 + $0xfd4] ss:$24 sps:$4 sm:$0xff]   ;;  %v23034_v33 = vpop.f32.mrf.mxu1 }
 0x848   :  { %17336 = vmatprep.mubr.bf16.mxu1 %v23204_v3  ;;  %17263 = vmatprep.subr.bf16.mxu0 %v21392_v15  ;;  %v21437_v15 = vld [vmem:[#allocation8 + $0x11e4] ss:$24 sps:$4 sm:$0xff]  }
 0x849   :  { %17306 = vmatprep.subr.bf16.mxu1 %v21395_v53  ;;  %v21432_v53 = vld [vmem:[#allocation8 + $0xee0] ss:$24 sps:$4 sm:$0xff]   ;;  %v23038_v3 = vpop.f32.mrf.mxu1 }
 0x84a   :  { %17264 = vmatpush1.bf16.msra.mxu0 %v21390_v12  ;;  %v23036_v12 = vpop.f32.mrf.mxu0 }
 0x84b   :  { %17307 = vmatpush1.bf16.msra.mxu1 %v21393_v8  ;;  %17265 = vmatprep.subr.bf16.mxu0 %v21398_v22  ;;  %v21435_v8 = vld [vmem:[#allocation8 + $0x11e0] ss:$24 sps:$4 sm:$0xff]   ;;  %v21440_v22 = vld [vmem:[#allocation8 + $0xeb4] ss:$24 sps:$4 sm:$0xff]  }
 0x84c   :  { %17308 = vmatprep.subr.bf16.mxu1 %v21401_v32  ;;  %v21443_v32 = vld [vmem:[#allocation8 + $0x11b4] ss:$24 sps:$4 sm:$0xff]  }
 0x84e   :  { %17266 = vmatpush1.bf16.msra.mxu0 %v21396_v37  ;;  %v21438_v37 = vld [vmem:[#allocation8 + $0xeb0] ss:$24 sps:$4 sm:$0xff]  }
 0x84f   :  { %17309 = vmatpush1.bf16.msra.mxu1 %v21399_v6  ;;  %17267 = vmatprep.subr.bf16.mxu0 %v21404_v49  ;;  %v23040_v6 = vpop.f32.mrf.mxu0  ;;  %v21441_v49 = vld [vmem:[#allocation8 + $0x11b0] ss:$24 sps:$4 sm:$0xff]  }
 0x850   :  { %17310 = vmatprep.subr.bf16.mxu1 %v21407_v43  ;;  %v21446_v43 = vld [vmem:[#allocation8 + $0xe84] ss:$24 sps:$4 sm:$0xff]  }
 0x852   :  { %17268 = vmatpush1.bf16.msra.mxu0 %v21402_v7  ;;  %v23042_v7 = vpop.f32.mrf.mxu1 }
 0x853   :  { %17311 = vmatpush1.bf16.msra.mxu1 %v21405_v21  ;;  %17269 = vmatprep.subr.bf16.mxu0 %v21410_v4  ;;  %v21449_v21 = vld [vmem:[#allocation8 + $0x1184] ss:$24 sps:$4 sm:$0xff]   ;;  %v16865_v4 = vpop.f32.mrf.mxu0 }
 0x854   :  { %17312 = vmatprep.subr.bf16.mxu1 %v21413_v25  ;;  %v23044_v25 = vpop.f32.mrf.mxu1 }
 0x856   :  { %17270 = vmatpush1.bf16.msra.mxu0 %v21408_v14  ;;  %v21444_v14 = vld [vmem:[#allocation8 + $0xe80] ss:$24 sps:$4 sm:$0xff]  }
 0x857   :  { %17313 = vmatpush1.bf16.msra.mxu1 %v21411_v58  ;;  %17271 = vmatprep.subr.bf16.mxu0 %v21416_v5  ;;  %v21447_v58 = vld [vmem:[#allocation8 + $0x1180] ss:$24 sps:$4 sm:$0xff]   ;;  %v21452_v5 = vld [vmem:[#allocation8 + $0xe54] ss:$24 sps:$4 sm:$0xff]  }
 0x858   :  { %17314 = vmatprep.subr.bf16.mxu1 %v21419_v1  ;;  %v16651_v1 = vadd.f32 %v22994_v42, %v22992_v9  ;;  %v21461_v42 = vld [vmem:[#allocation8 + $0x1124] ss:$24 sps:$4 sm:$0xff]  }
 0x85a   :  { %17272 = vmatpush1.bf16.msra.mxu0 %v21414_v36  ;;  %v21455_v36 = vld [vmem:[#allocation8 + $0x1154] ss:$24 sps:$4 sm:$0xff]  }
 0x85b   :  { %17315 = vmatpush1.bf16.msra.mxu1 %v21417_v46  ;;  %17273 = vmatprep.subr.bf16.mxu0 %v21422_v11  ;;  %v16867_v46 = vpop.f32.mrf.mxu0  ;;  %v16653_v11 = vadd.f32 %v22998_v2, %v22996_v26  ;;  %v16657_v26 = vadd.f32 %v23010_v35, %v23008_v18 }
 0x85c   :  { %17316 = vmatprep.subr.bf16.mxu1 %v21425_v38  ;;  %v16694_v38 = vadd.f32 %v23012_v19, %v16651_v1 }
 0x85d   :  { %v16696_v9 = vadd.f32 %v23016_v57, %v16653_v11  ;;  %v21476_v11 = vld [vmem:[#allocation8 + $0xd94] ss:$24 sps:$4 sm:$0xff]  }
 0x85e   :  { %17274 = vmatpush1.bf16.msra.mxu0 %v21420_v0  ;;  %v23051_v0 = vpop.f32.mrf.mxu1  ;;  %v16737_v2 = vadd.f32 %v23014_v29, %v16694_v38 }
 0x85f   :  { %17317 = vmatpush1.bf16.msra.mxu1 %v21423_v55  ;;  %17275 = vmatprep.subr.bf16.mxu0 %v21428_v45  ;;  %v21450_v55 = vld [vmem:[#allocation8 + $0xe50] ss:$24 sps:$4 sm:$0xff]  }
 0x860   :  { %17318 = vmatprep.subr.bf16.mxu1 %v21431_v47  ;;  %v21453_v45 = vld [vmem:[#allocation8 + $0x1150] ss:$24 sps:$4 sm:$0xff]   ;;  %v21458_v47 = vld [vmem:[#allocation8 + $0xe24] ss:$24 sps:$4 sm:$0xff]   ;;  %v16780_v57 = vadd.f32 %v23028_v51, %v16737_v2 }
 0x862   :  { %17276 = vmatpush1.bf16.msra.mxu0 %v21426_v41  ;;  %v16655_v41 = vadd.f32 %v23005_v17, %v23002_v20  ;;  %v16739_v20 = vadd.f32 %v23018_v62, %v16696_v9  ;;  %v16700_v17 = vadd.f32 %v23024_v54, %v16657_v26  ;;  %v16823_v54 = vadd.f32 %v23030_v31, %v16780_v57  ;;  %v21485_v26 = vld [vmem:[#allocation8 + $0x1664] ss:$24 sps:$4 sm:$0xff]  }
 0x863   :  { %17319 = vmatpush1.bf16.msra.mxu1 %v21429_v59  ;;  %17277 = vmatprep.subr.bf16.mxu0 %v21434_v52  ;;  %v16869_v59 = vpop.f32.mrf.mxu0  ;;  %v16912_v52 = vpop.f32.mrf.mxu1  ;;  %v23074_v57 = vld [vmem:[#allocation10] sm:$0x3f] }
 0x864   :  { %17320 = vmatprep.subr.bf16.mxu1 %v21437_v15  ;;  %v16698_v19 = vadd.f32 %v23020_v34, %v16655_v41  ;;  %v21456_v15 = vld [vmem:[#allocation8 + $0xe20] ss:$24 sps:$4 sm:$0xff]   ;;  %v16782_v29 = vadd.f32 %v23032_v50, %v16739_v20  ;;  %v16743_v62 = vadd.f32 %v23026_v39, %v16700_v17  ;;  %v21482_v41 = vld [vmem:[#allocation8 + $0x1364] ss:$24 sps:$4 sm:$0xff]   ;;  %v21488_v17 = vld [vmem:[#allocation8 + $0x1334] ss:$24 sps:$4 sm:$0xff]  }
 0x865   :  { %v16871_v18 = vpop.f32.mrf.mxu0  ;;  %v16914_v34 = vpop.f32.mrf.mxu1 }
 0x866   :  { %17278 = vmatpush2.bf16.msra.mxu0 %v21432_v53  ;;  %v21459_v53 = vld [vmem:[#allocation8 + $0x1120] ss:$24 sps:$4 sm:$0xff]   ;;  %v16741_v35 = vadd.f32 %v23022_v44, %v16698_v19  ;;  %v16825_v44 = vadd.f32 %v23034_v33, %v16782_v29  ;;  %v16786_v50 = vadd.f32 %v23040_v6, %v16743_v62  ;;  %v21474_v6 = vld [vmem:[#allocation8 + $0xd90] ss:$24 sps:$4 sm:$0xff]  }
 0x867   :  { %17321 = vmatpush2.bf16.msra.mxu1 %v21435_v8  ;;  %17279 = vmatprep.subr.bf16.mxu0 %v21440_v22  ;;  %v21464_v8 = vld [vmem:[#allocation8 + $0xdf4] ss:$24 sps:$4 sm:$0xff]  }
 0x868   :  { %17322 = vmatprep.subr.bf16.mxu1 %v21443_v32  ;;  %v21467_v22 = vld [vmem:[#allocation8 + $0x10f4] ss:$24 sps:$4 sm:$0xff]   ;;  %v21462_v32 = vld [vmem:[#allocation8 + $0xdf0] ss:$24 sps:$4 sm:$0xff]   ;;  %v16784_v51 = vadd.f32 %v23036_v12, %v16741_v35  ;;  %v16868_v31 = vadd.f32 %v16867_v46, %v16825_v44 }
 0x869   :  { %v21479_v12 = vld [vmem:[#allocation8 + $0x1094] ss:$24 sps:$4 sm:$0xff]  }
 0x86a   :  { %17280 = vmatpush2.bf16.msra.mxu0 %v21438_v37  ;;  %v16951_v37 = vpop.f32.mrf.mxu0  ;;  %v16827_v39 = vadd.f32 %v23038_v3, %v16784_v51  ;;  %v16911_v9 = vadd.f32 %v23051_v0, %v16868_v31  ;;  %v21494_v51 = vld [vmem:[#allocation8 + $0x1304] ss:$24 sps:$4 sm:$0xff]   ;;  %v21495_v31 = vld [vmem:[#allocation8 + $0x1600] ss:$24 sps:$4 sm:$0xff]  }
 0x86b   :  { %17323 = vmatpush2.bf16.msra.mxu1 %v21441_v49  ;;  %17281 = vmatprep.subr.bf16.mxu0 %v21446_v43  ;;  %v21465_v49 = vld [vmem:[#allocation8 + $0x10f0] ss:$24 sps:$4 sm:$0xff]   ;;  %v21470_v43 = vld [vmem:[#allocation8 + $0xdc4] ss:$24 sps:$4 sm:$0xff]  }
 0x86c   :  { %17324 = vmatprep.subr.bf16.mxu1 %v21449_v21  ;;  %v16994_v21 = vpop.f32.mrf.mxu1  ;;  %v16953_v1 = vpop.f32.mrf.mxu0 }
 0x86d   :  { %v16954_v19 = vadd.f32 %v16953_v1, %v16911_v9  ;;  %v21506_v9 = vld [vmem:[#allocation8 + $0x12a4] ss:$24 sps:$4 sm:$0xff]  }
 0x86e   :  { %17282 = vmatpush2.bf16.msra.mxu0 %v21444_v14  ;;  %v21473_v14 = vld [vmem:[#allocation8 + $0x10c4] ss:$24 sps:$4 sm:$0xff]   ;;  %v16996_v38 = vpop.f32.mrf.mxu1 }
 0x86f   :  { %17325 = vmatpush2.bf16.msra.mxu1 %v21447_v58  ;;  %17283 = vmatprep.subr.bf16.mxu0 %v21452_v5  ;;  %v16866_v58 = vadd.f32 %v16865_v4, %v16823_v54  ;;  %v21468_v5 = vld [vmem:[#allocation8 + $0xdc0] ss:$24 sps:$4 sm:$0xff]   ;;  %v16955_v4 = vpop.f32.mrf.mxu0  ;;  %v16997_v35 = vadd.f32 %v16996_v38, %v16954_v19  ;;  %v21489_v54 = vld [vmem:[#allocation8 + $0x1630] ss:$24 sps:$4 sm:$0xff]   ;;  %v21500_v38 = vld [vmem:[#allocation8 + $0x12d4] ss:$24 sps:$4 sm:$0xff]  }
 0x870   :  { %17326 = vmatprep.subr.bf16.mxu1 %v21455_v36  ;;  %v21471_v36 = vld [vmem:[#allocation8 + $0x10c0] ss:$24 sps:$4 sm:$0xff]   ;;  %v16998_v46 = vpop.f32.mrf.mxu1  ;;  %v21515_v19 = vld [vmem:[#allocation8 + $0x1574] ss:$24 sps:$4 sm:$0xff]  }
 0x871   :  { %v16909_v33 = vadd.f32 %v23044_v25, %v16866_v58  ;;  %v16957_v25 = vpop.f32.mrf.mxu0 }
 0x872   :  { %17284 = vmatpush2.bf16.msra.mxu0 %v21450_v55  ;;  %v16829_v55 = vadd.f32 %v23042_v7, %v16786_v50  ;;  %v21480_v7 = vld [vmem:[#allocation8 + $0x1360] ss:$24 sps:$4 sm:$0xff]   ;;  %v17000_v20 = vpop.f32.mrf.mxu1  ;;  %v21497_v50 = vld [vmem:[#allocation8 + $0x1604] ss:$24 sps:$4 sm:$0xff]  }
 0x873   :  { %17327 = vmatpush2.bf16.msra.mxu1 %v21453_v45  ;;  %17285 = vmatprep.subr.bf16.mxu0 %v21458_v47  ;;  %v16870_v45 = vadd.f32 %v16869_v59, %v16827_v39  ;;  %v21477_v47 = vld [vmem:[#allocation8 + $0x1090] ss:$24 sps:$4 sm:$0xff]   ;;  %v16952_v3 = vadd.f32 %v16951_v37, %v16909_v33  ;;  %v21483_v59 = vld [vmem:[#allocation8 + $0x1660] ss:$24 sps:$4 sm:$0xff]   ;;  %v21503_v33 = vld [vmem:[#allocation8 + $0x15d4] ss:$24 sps:$4 sm:$0xff]  }
 0x874   :  { %17328 = vmatprep.subr.bf16.mxu1 %v21461_v42  ;;  %v16872_v42 = vadd.f32 %v16871_v18, %v16829_v55 }
 0x875   :  { %v16913_v2 = vadd.f32 %v16912_v52, %v16870_v45  ;;  %v21491_v52 = vld [vmem:[#allocation8 + $0x1634] ss:$24 sps:$4 sm:$0xff]  }
 0x876   :  { %17286 = vmatpush2.bf16.msra.mxu0 %v21456_v15  ;;  %v16915_v15 = vadd.f32 %v16914_v34, %v16872_v42  ;;  %v21486_v34 = vld [vmem:[#allocation8 + $0x1330] ss:$24 sps:$4 sm:$0xff]  }
 0x877   :  { %17329 = vmatpush2.bf16.msra.mxu1 %v21459_v53  ;;  %17287 = vmatprep.subr.bf16.mxu0 %v21464_v8  ;;  %v16995_v53 = vadd.f32 %v16994_v21, %v16952_v3  ;;  %v16956_v8 = vadd.f32 %v16955_v4, %v16913_v2  ;;  %v21509_v3 = vld [vmem:[#allocation8 + $0x15a4] ss:$24 sps:$4 sm:$0xff]   ;;  %v21512_v2 = vld [vmem:[#allocation8 + $0x1274] ss:$24 sps:$4 sm:$0xff]  }
 0x878   :  { %17330 = vmatprep.subr.bf16.mxu1 %v21467_v22  ;;  %v23205_v22 = vld [vmem:[#allocation18_spill] sm:$0xff]  ;;  %v16958_v29 = vadd.f32 %v16957_v25, %v16915_v15  ;;  %v21513_v25 = vld [vmem:[#allocation8 + $0x1570] ss:$24 sps:$4 sm:$0xff]  }
 0x879   :  { %v17622_v18 = vrot.slane %v23074_v57, %v23205_v22  ;;  %v16999_v21 = vadd.f32 %v16998_v46, %v16956_v8  ;;  %v21504_v46 = vld [vmem:[#allocation8 + $0x12a0] ss:$24 sps:$4 sm:$0xff]   ;;  %v21521_v15 = vld [vmem:[#allocation8 + $0x1544] ss:$24 sps:$4 sm:$0xff]   ;;  %v21525_v22 = vld [vmem:[#allocation8 + $0x1510] ss:$24 sps:$4 sm:$0xff]  }
 0x87a   :  { %17288 = vmatpush2.bf16.msra.mxu0 %v21462_v32  ;;  %v17001_v58 = vadd.f32 %v17000_v20, %v16958_v29  ;;  %v21519_v8 = vld [vmem:[#allocation8 + $0x1540] ss:$24 sps:$4 sm:$0xff]   ;;  %v21524_v20 = vld [vmem:[#allocation8 + $0x1214] ss:$24 sps:$4 sm:$0xff]  }
 0x87b   :  { %17331 = vmatpush2.bf16.msra.mxu1 %v21465_v49  ;;  %17289 = vmatprep.subr.bf16.mxu0 %v21470_v43  ;;  %v23206_v43 = vld [vmem:[#allocation55_spill] sm:$0xff] }
 0x87c   :  { %17332 = vmatprep.subr.bf16.mxu1 %v21473_v14  ;;  %v17626_v62 = vrot.slane %v23074_v57, %v23206_v43  ;;  %v21531_v29 = vld [vmem:[#allocation8 + $0x17e0] ss:$24 sps:$4 sm:$0xff]   ;;  %v21542_v43 = vld [vmem:[#allocation8 + $0x1484] ss:$24 sps:$4 sm:$0xff]  }
 0x87e   :  { %17290 = vmatpush2.bf16.msra.mxu0 %v21468_v5 }
 0x87f   :  { %17333 = vmatpush2.bf16.msra.mxu1 %v21471_v36  ;;  %17291 = vmatprep.subr.bf16.mxu0 %v21476_v11  ;;  %v21492_v11 = vld [vmem:[#allocation8 + $0x1300] ss:$24 sps:$4 sm:$0xff]  }
 0x880   :  { %17334 = vmatprep.subr.bf16.mxu1 %v21479_v12 }
 0x882   :  { %17292 = vmatpush2.bf16.msra.mxu0 %v21474_v6 }
 0x883   :  { %17335 = vmatpush2.bf16.msra.mxu1 %v21477_v47  ;;  %17347 = vmatprep.subr.bf16.mxu0 %v21482_v41  ;;  %v21498_v47 = vld [vmem:[#allocation8 + $0x12d0] ss:$24 sps:$4 sm:$0xff]  }
 0x884   :  { %17390 = vmatprep.subr.bf16.mxu1 %v21485_v26  ;;  %v21501_v41 = vld [vmem:[#allocation8 + $0x15d0] ss:$24 sps:$4 sm:$0xff]   ;;  %v21507_v26 = vld [vmem:[#allocation8 + $0x15a0] ss:$24 sps:$4 sm:$0xff]  }
 0x885   :  { %v17037_v0 = vpop.f32.mrf.mxu0  ;;  %17294 = vmatmul.mubr.bf16.vlgmr.msra.gmra.mxu0 %v23195_v27 }
 0x886   :  { %v17038_v32 = vadd.f32 %v17037_v0, %v16995_v53  ;;  %v17080_v37 = vpop.f32.mrf.mxu1  ;;  %17337 = vmatmul.mubr.bf16.vlgmr.msra.gmra.mxu1 %v23196_v16  ;;  %17348 = vmatpush1.bf16.msra.mxu0 %v21480_v7  ;;  %v21510_v7 = vld [vmem:[#allocation8 + $0x1270] ss:$24 sps:$4 sm:$0xff]   ;;  %v21516_v53 = vld [vmem:[#allocation8 + $0x1240] ss:$24 sps:$4 sm:$0xff]  }
 0x887   :  { %17379 = vmatprep.mubr.bf16.mxu0 %v22753_v23  ;;  %17391 = vmatpush1.bf16.msra.mxu1 %v21483_v59  ;;  %v17039_v49 = vpop.f32.mrf.mxu0  ;;  %v21518_v59 = vld [vmem:[#allocation8 + $0x1244] ss:$24 sps:$4 sm:$0xff]   ;;  %v21522_v0 = vld [vmem:[#allocation8 + $0x1210] ss:$24 sps:$4 sm:$0xff]  }
 0x888   :  { %v17081_v27 = vadd.f32 %v17080_v37, %v17038_v32  ;;  %17422 = vmatprep.mubr.bf16.mxu1 %v22756_v48  ;;  %v17040_v14 = vadd.f32 %v17039_v49, %v16997_v35  ;;  %v17082_v44 = vpop.f32.mrf.mxu1  ;;  %17349 = vmatprep.subr.bf16.mxu0 %v21488_v17  ;;  %v21527_v17 = vld [vmem:[#allocation8 + $0x1514] ss:$24 sps:$4 sm:$0xff]   ;;  %v21528_v35 = vld [vmem:[#allocation8 + $0x14e0] ss:$24 sps:$4 sm:$0xff]   ;;  %v21537_v49 = vld [vmem:[#allocation8 + $0x17b0] ss:$24 sps:$4 sm:$0xff]  }
 0x889   :  { %v17041_v16 = vpop.f32.mrf.mxu0  ;;  %17392 = vmatprep.subr.bf16.mxu1 %v21491_v52  ;;  %v21533_v52 = vld [vmem:[#allocation8 + $0x17e4] ss:$24 sps:$4 sm:$0xff]   ;;  %v21536_v32 = vld [vmem:[#allocation8 + $0x14b4] ss:$24 sps:$4 sm:$0xff]  }
 0x88a   :  { %v17643_v5 = vadd.f32 %v17622_v18, %v17081_v27  ;;  %v17083_v23 = vadd.f32 %v17082_v44, %v17040_v14  ;;  %v17042_v1 = vadd.f32 %v17041_v16, %v16999_v21  ;;  %v17084_v36 = vpop.f32.mrf.mxu1  ;;  %17350 = vmatpush1.bf16.msra.mxu0 %v21486_v34  ;;  %v21539_v37 = vld [vmem:[#allocation8 + $0x17b4] ss:$24 sps:$4 sm:$0xff]   ;;  %v21534_v34 = vld [vmem:[#allocation8 + $0x14b0] ss:$24 sps:$4 sm:$0xff]   ;;  %v21557_v16 = vld [vmem:[#allocation8 + $0x1724] ss:$24 sps:$4 sm:$0xff]  }
 0x88b   :  { %17393 = vmatpush1.bf16.msra.mxu1 %v21489_v54  ;;  %v17043_v39 = vpop.f32.mrf.mxu0  ;;  %17351 = vmatprep.subr.bf16.mxu0 %v21494_v51  ;;  %v21540_v54 = vld [vmem:[#allocation8 + $0x1480] ss:$24 sps:$4 sm:$0xff]   ;;  %v21548_v21 = vld [vmem:[#allocation8 + $0x1454] ss:$24 sps:$4 sm:$0xff]   ;;  %v21546_v14 = vld [vmem:[#allocation8 + $0x1450] ss:$24 sps:$4 sm:$0xff]  }
 0x88c   :  { %17655 = vst [vmem:[#allocation11 + $0x10] sm:$0xff] %v17643_v5  ;;  %v17644_v48 = vadd.f32 %v17626_v62, %v17083_v23  ;;  %v17085_v12 = vadd.f32 %v17084_v36, %v17042_v1  ;;  %v17044_v55 = vadd.f32 %v17043_v39, %v17001_v58  ;;  %17394 = vmatprep.subr.bf16.mxu1 %v21497_v50  ;;  %v17086_v45 = vpop.f32.mrf.mxu1  ;;  %v21543_v51 = vld [vmem:[#allocation8 + $0x1780] ss:$24 sps:$4 sm:$0xff]   ;;  %v21551_v27 = vld [vmem:[#allocation8 + $0x1754] ss:$24 sps:$4 sm:$0xff]  }
 0x88d   :  { %v21549_v44 = vld [vmem:[#allocation8 + $0x1750] ss:$24 sps:$4 sm:$0xff]   ;;  %v21554_v50 = vld [vmem:[#allocation8 + $0x1424] ss:$24 sps:$4 sm:$0xff]   ;;  %v21552_v58 = vld [vmem:[#allocation8 + $0x1420] ss:$24 sps:$4 sm:$0xff]  }
 0x88e   :  { %17656 = vst [vmem:[#allocation11 + $0x18] sm:$0xff] %v17644_v48  ;;  %v17649_v6 = vadd.f32 %v17622_v18, %v17085_v12  ;;  %v17087_v4 = vadd.f32 %v17086_v45, %v17044_v55  ;;  %17352 = vmatpush1.bf16.msra.mxu0 %v21492_v11  ;;  %v21530_v18 = vld [vmem:[#allocation8 + $0x14e4] ss:$24 sps:$4 sm:$0xff]   ;;  %v21555_v5 = vld [vmem:[#allocation8 + $0x1720] ss:$24 sps:$4 sm:$0xff]  }
 0x88f   :  { %17395 = vmatpush1.bf16.msra.mxu1 %v21495_v31  ;;  %17353 = vmatprep.subr.bf16.mxu0 %v21500_v38  ;;  %v21560_v23 = vld [vmem:[#allocation8 + $0x13f4] ss:$24 sps:$4 sm:$0xff]   ;;  %v21558_v36 = vld [vmem:[#allocation8 + $0x13f0] ss:$24 sps:$4 sm:$0xff]   ;;  %v21566_v39 = vld [vmem:[#allocation8 + $0x13c4] ss:$24 sps:$4 sm:$0xff]  }
 0x890   :  { %17661 = vst [vmem:[#allocation11 + $0x40] sm:$0xff] %v17649_v6  ;;  %v17650_v42 = vadd.f32 %v17626_v62, %v17087_v4  ;;  %17396 = vmatprep.subr.bf16.mxu1 %v21503_v33  ;;  %v21545_v62 = vld [vmem:[#allocation8 + $0x1784] ss:$24 sps:$4 sm:$0xff]   ;;  %v21563_v1 = vld [vmem:[#allocation8 + $0x16f4] ss:$24 sps:$4 sm:$0xff]  }
 0x891   :  { %v21561_v11 = vld [vmem:[#allocation8 + $0x16f0] ss:$24 sps:$4 sm:$0xff]   ;;  %v21569_v31 = vld [vmem:[#allocation8 + $0x16c4] ss:$24 sps:$4 sm:$0xff]   ;;  %v21564_v38 = vld [vmem:[#allocation8 + $0x13c0] ss:$24 sps:$4 sm:$0xff]  }
 0x892   :  { %17662 = vst [vmem:[#allocation11 + $0x48] sm:$0xff] %v17650_v42  ;;  %17354 = vmatpush1.bf16.msra.mxu0 %v21498_v47  ;;  %v21567_v48 = vld [vmem:[#allocation8 + $0x16c0] ss:$24 sps:$4 sm:$0xff]   ;;  %v21572_v12 = vld [vmem:[#allocation8 + $0x1394] ss:$24 sps:$4 sm:$0xff]  }
 0x893   :  { %17397 = vmatpush1.bf16.msra.mxu1 %v21501_v41  ;;  %17355 = vmatprep.subr.bf16.mxu0 %v21506_v9  ;;  %v21575_v55 = vld [vmem:[#allocation8 + $0x1694] ss:$24 sps:$4 sm:$0xff]   ;;  %v21570_v33 = vld [vmem:[#allocation8 + $0x1390] ss:$24 sps:$4 sm:$0xff]   ;;  %v21578_v6 = vld [vmem:[#allocation8 + $0x1964] ss:$24 sps:$4 sm:$0xff]  }
 0x894   :  { %17398 = vmatprep.subr.bf16.mxu1 %v21509_v3  ;;  %v21573_v45 = vld [vmem:[#allocation8 + $0x1690] ss:$24 sps:$4 sm:$0xff]   ;;  %v21581_v4 = vld [vmem:[#allocation8 + $0x1c64] ss:$24 sps:$4 sm:$0xff]   ;;  %v21576_v47 = vld [vmem:[#allocation8 + $0x1960] ss:$24 sps:$4 sm:$0xff]  }
 0x895   :  { %v21579_v41 = vld [vmem:[#allocation8 + $0x1c60] ss:$24 sps:$4 sm:$0xff]   ;;  %v21584_v9 = vld [vmem:[#allocation8 + $0x1934] ss:$24 sps:$4 sm:$0xff]   ;;  %v21582_v3 = vld [vmem:[#allocation8 + $0x1930] ss:$24 sps:$4 sm:$0xff]  }
 0x896   :  { %17356 = vmatpush1.bf16.msra.mxu0 %v21504_v46  ;;  %v21587_v42 = vld [vmem:[#allocation8 + $0x1c34] ss:$24 sps:$4 sm:$0xff]   ;;  %v21585_v46 = vld [vmem:[#allocation8 + $0x1c30] ss:$24 sps:$4 sm:$0xff]  }
 0x897   :  { %17399 = vmatpush1.bf16.msra.mxu1 %v21507_v26  ;;  %17357 = vmatprep.subr.bf16.mxu0 %v21512_v2  ;;  %v21590_v26 = vld [vmem:[#allocation8 + $0x1904] ss:$24 sps:$4 sm:$0xff]  }
 0x898   :  { %17400 = vmatprep.subr.bf16.mxu1 %v21515_v19  ;;  %v21593_v2 = vld [vmem:[#allocation8 + $0x1c04] ss:$24 sps:$4 sm:$0xff]   ;;  %v21588_v19 = vld [vmem:[#allocation8 + $0x1900] ss:$24 sps:$4 sm:$0xff]  }
 0x89a   :  { %17358 = vmatpush1.bf16.msra.mxu0 %v21510_v7  ;;  %v21596_v7 = vld [vmem:[#allocation8 + $0x18d4] ss:$24 sps:$4 sm:$0xff]  }
 0x89b   :  { %17401 = vmatpush1.bf16.msra.mxu1 %v21513_v25  ;;  %17359 = vmatprep.subr.bf16.mxu0 %v21518_v59  ;;  %v21594_v25 = vld [vmem:[#allocation8 + $0x18d0] ss:$24 sps:$4 sm:$0xff]   ;;  %v21602_v59 = vld [vmem:[#allocation8 + $0x18a4] ss:$24 sps:$4 sm:$0xff]  }
 0x89c   :  { %17402 = vmatprep.subr.bf16.mxu1 %v21521_v15  ;;  %v21605_v15 = vld [vmem:[#allocation8 + $0x1ba4] ss:$24 sps:$4 sm:$0xff]  }
 0x89e   :  { %17360 = vmatpush1.bf16.msra.mxu0 %v21516_v53  ;;  %v21603_v53 = vld [vmem:[#allocation8 + $0x1ba0] ss:$24 sps:$4 sm:$0xff]  }
 0x89f   :  { %17403 = vmatpush1.bf16.msra.mxu1 %v21519_v8  ;;  %17361 = vmatprep.subr.bf16.mxu0 %v21524_v20  ;;  %v21608_v8 = vld [vmem:[#allocation8 + $0x1874] ss:$24 sps:$4 sm:$0xff]  }
 0x8a0   :  { %17404 = vmatprep.subr.bf16.mxu1 %v21527_v17  ;;  %v21611_v20 = vld [vmem:[#allocation8 + $0x1b74] ss:$24 sps:$4 sm:$0xff]   ;;  %v21606_v17 = vld [vmem:[#allocation8 + $0x1870] ss:$24 sps:$4 sm:$0xff]  }
 0x8a2   :  { %17362 = vmatpush1.bf16.msra.mxu0 %v21522_v0  ;;  %v21609_v0 = vld [vmem:[#allocation8 + $0x1b70] ss:$24 sps:$4 sm:$0xff]  }
 0x8a3   :  { %17405 = vmatpush1.bf16.msra.mxu1 %v21525_v22  ;;  %17363 = vmatprep.subr.bf16.mxu0 %v21530_v18  ;;  %v21614_v22 = vld [vmem:[#allocation8 + $0x1844] ss:$24 sps:$4 sm:$0xff]  }
 0x8a4   :  { %17406 = vmatprep.subr.bf16.mxu1 %v21533_v52  ;;  %v21617_v18 = vld [vmem:[#allocation8 + $0x1b44] ss:$24 sps:$4 sm:$0xff]   ;;  %v21612_v52 = vld [vmem:[#allocation8 + $0x1840] ss:$24 sps:$4 sm:$0xff]  }
 0x8a6   :  { %17364 = vmatpush2.bf16.msra.mxu0 %v21528_v35  ;;  %v21615_v35 = vld [vmem:[#allocation8 + $0x1b40] ss:$24 sps:$4 sm:$0xff]  }
 0x8a7   :  { %17407 = vmatpush2.bf16.msra.mxu1 %v21531_v29  ;;  %17365 = vmatprep.subr.bf16.mxu0 %v21536_v32  ;;  %v21620_v29 = vld [vmem:[#allocation8 + $0x1814] ss:$24 sps:$4 sm:$0xff]  }
 0x8a8   :  { %17408 = vmatprep.subr.bf16.mxu1 %v21539_v37  ;;  %v21623_v32 = vld [vmem:[#allocation8 + $0x1b14] ss:$24 sps:$4 sm:$0xff]   ;;  %v21618_v37 = vld [vmem:[#allocation8 + $0x1810] ss:$24 sps:$4 sm:$0xff]  }
 0x8aa   :  { %17366 = vmatpush2.bf16.msra.mxu0 %v21534_v34  ;;  %v21621_v34 = vld [vmem:[#allocation8 + $0x1b10] ss:$24 sps:$4 sm:$0xff]  }
 0x8ab   :  { %17409 = vmatpush2.bf16.msra.mxu1 %v21537_v49  ;;  %17367 = vmatprep.subr.bf16.mxu0 %v21542_v43  ;;  %v21626_v49 = vld [vmem:[#allocation8 + $0x1ae4] ss:$24 sps:$4 sm:$0xff]  }
 0x8ac   :  { %17410 = vmatprep.subr.bf16.mxu1 %v21545_v62  ;;  %v21629_v43 = vld [vmem:[#allocation8 + $0x1de4] ss:$24 sps:$4 sm:$0xff]   ;;  %v21624_v62 = vld [vmem:[#allocation8 + $0x1ae0] ss:$24 sps:$4 sm:$0xff]  }
 0x8ae   :  { %17368 = vmatpush2.bf16.msra.mxu0 %v21540_v54  ;;  %v21627_v54 = vld [vmem:[#allocation8 + $0x1de0] ss:$24 sps:$4 sm:$0xff]  }
 0x8af   :  { %17411 = vmatpush2.bf16.msra.mxu1 %v21543_v51  ;;  %17369 = vmatprep.subr.bf16.mxu0 %v21548_v21  ;;  %v21632_v51 = vld [vmem:[#allocation8 + $0x1ab4] ss:$24 sps:$4 sm:$0xff]  }
 0x8b0   :  { %17412 = vmatprep.subr.bf16.mxu1 %v21551_v27  ;;  %v21635_v21 = vld [vmem:[#allocation8 + $0x1db4] ss:$24 sps:$4 sm:$0xff]   ;;  %v21630_v27 = vld [vmem:[#allocation8 + $0x1ab0] ss:$24 sps:$4 sm:$0xff]  }
 0x8b2   :  { %17370 = vmatpush2.bf16.msra.mxu0 %v21546_v14  ;;  %v21633_v14 = vld [vmem:[#allocation8 + $0x1db0] ss:$24 sps:$4 sm:$0xff]  }
 0x8b3   :  { %17413 = vmatpush2.bf16.msra.mxu1 %v21549_v44  ;;  %17371 = vmatprep.subr.bf16.mxu0 %v21554_v50  ;;  %v21638_v44 = vld [vmem:[#allocation8 + $0x1a84] ss:$24 sps:$4 sm:$0xff]  }
 0x8b4   :  { %17414 = vmatprep.subr.bf16.mxu1 %v21557_v16  ;;  %v21641_v50 = vld [vmem:[#allocation8 + $0x1d84] ss:$24 sps:$4 sm:$0xff]   ;;  %v21636_v16 = vld [vmem:[#allocation8 + $0x1a80] ss:$24 sps:$4 sm:$0xff]  }
 0x8b6   :  { %17372 = vmatpush2.bf16.msra.mxu0 %v21552_v58  ;;  %v21639_v58 = vld [vmem:[#allocation8 + $0x1d80] ss:$24 sps:$4 sm:$0xff]  }
 0x8b7   :  { %17415 = vmatpush2.bf16.msra.mxu1 %v21555_v5  ;;  %17373 = vmatprep.subr.bf16.mxu0 %v21560_v23  ;;  %v21644_v5 = vld [vmem:[#allocation8 + $0x1a54] ss:$24 sps:$4 sm:$0xff]  }
 0x8b8   :  { %17416 = vmatprep.subr.bf16.mxu1 %v21563_v1  ;;  %v21647_v23 = vld [vmem:[#allocation8 + $0x1d54] ss:$24 sps:$4 sm:$0xff]   ;;  %v21642_v1 = vld [vmem:[#allocation8 + $0x1a50] ss:$24 sps:$4 sm:$0xff]  }
 0x8ba   :  { %17374 = vmatpush2.bf16.msra.mxu0 %v21558_v36  ;;  %v21645_v36 = vld [vmem:[#allocation8 + $0x1d50] ss:$24 sps:$4 sm:$0xff]  }
 0x8bb   :  { %17417 = vmatpush2.bf16.msra.mxu1 %v21561_v11  ;;  %17375 = vmatprep.subr.bf16.mxu0 %v21566_v39  ;;  %v21650_v11 = vld [vmem:[#allocation8 + $0x1a24] ss:$24 sps:$4 sm:$0xff]  }
 0x8bc   :  { %17418 = vmatprep.subr.bf16.mxu1 %v21569_v31  ;;  %v21653_v39 = vld [vmem:[#allocation8 + $0x1d24] ss:$24 sps:$4 sm:$0xff]   ;;  %v21648_v31 = vld [vmem:[#allocation8 + $0x1a20] ss:$24 sps:$4 sm:$0xff]  }
 0x8be   :  { %17376 = vmatpush2.bf16.msra.mxu0 %v21564_v38  ;;  %v21651_v38 = vld [vmem:[#allocation8 + $0x1d20] ss:$24 sps:$4 sm:$0xff]  }
 0x8bf   :  { %17419 = vmatpush2.bf16.msra.mxu1 %v21567_v48  ;;  %17377 = vmatprep.subr.bf16.mxu0 %v21572_v12  ;;  %v21656_v48 = vld [vmem:[#allocation8 + $0x19f4] ss:$24 sps:$4 sm:$0xff]  }
 0x8c0   :  { %17420 = vmatprep.subr.bf16.mxu1 %v21575_v55  ;;  %v21659_v12 = vld [vmem:[#allocation8 + $0x1cf4] ss:$24 sps:$4 sm:$0xff]   ;;  %v21654_v55 = vld [vmem:[#allocation8 + $0x19f0] ss:$24 sps:$4 sm:$0xff]  }
 0x8c2   :  { %17378 = vmatpush2.bf16.msra.mxu0 %v21570_v33  ;;  %v21657_v33 = vld [vmem:[#allocation8 + $0x1cf0] ss:$24 sps:$4 sm:$0xff]  }
 0x8c3   :  { %17421 = vmatpush2.bf16.msra.mxu1 %v21573_v45  ;;  %17433 = vmatprep.subr.bf16.mxu0 %v21578_v6  ;;  %v21662_v45 = vld [vmem:[#allocation8 + $0x19c4] ss:$24 sps:$4 sm:$0xff]  }
 0x8c4   :  { %17476 = vmatprep.subr.bf16.mxu1 %v21581_v4  ;;  %v21665_v6 = vld [vmem:[#allocation8 + $0x1cc4] ss:$24 sps:$4 sm:$0xff]   ;;  %v21660_v4 = vld [vmem:[#allocation8 + $0x19c0] ss:$24 sps:$4 sm:$0xff]  }
 0x8c5   :  { %17380 = vmatmul.mubr.bf16.vlgmr.msra.gmra.mxu0 %v23201_v60  ;;  %v21591_v60 = vld [vmem:[#allocation8 + $0x1c00] ss:$24 sps:$4 sm:$0xff]  }
 0x8c6   :  { %17423 = vmatmul.mubr.bf16.vlgmr.msra.gmra.mxu1 %v23202_v40  ;;  %17434 = vmatpush1.bf16.msra.mxu0 %v21576_v47  ;;  %v21599_v40 = vld [vmem:[#allocation8 + $0x1bd4] ss:$24 sps:$4 sm:$0xff]   ;;  %v21663_v47 = vld [vmem:[#allocation8 + $0x1cc0] ss:$24 sps:$4 sm:$0xff]  }
 0x8c7   :  { %17465 = vmatprep.mubr.bf16.mxu0 %v22825_v63  ;;  %17477 = vmatpush1.bf16.msra.mxu1 %v21579_v41  ;;  %v21597_v63 = vld [vmem:[#allocation8 + $0x1bd0] ss:$24 sps:$4 sm:$0xff]   ;;  %v21668_v41 = vld [vmem:[#allocation8 + $0x1994] ss:$24 sps:$4 sm:$0xff]  }
 0x8c8   :  { %17508 = vmatprep.mubr.bf16.mxu1 %v22828_v56  ;;  %17435 = vmatprep.subr.bf16.mxu0 %v21584_v9  ;;  %v21600_v56 = vld [vmem:[#allocation8 + $0x18a0] ss:$24 sps:$4 sm:$0xff]   ;;  %v21671_v9 = vld [vmem:[#allocation8 + $0x1c94] ss:$24 sps:$4 sm:$0xff]  }
 0x8c9   :  { %17478 = vmatprep.subr.bf16.mxu1 %v21587_v42  ;;  %v21666_v42 = vld [vmem:[#allocation8 + $0x1990] ss:$24 sps:$4 sm:$0xff]  }
 0x8ca   :  { %17436 = vmatpush1.bf16.msra.mxu0 %v21582_v3  ;;  %v21669_v3 = vld [vmem:[#allocation8 + $0x1c90] ss:$24 sps:$4 sm:$0xff]  }
 0x8cb   :  { %17479 = vmatpush1.bf16.msra.mxu1 %v21585_v46  ;;  %17437 = vmatprep.subr.bf16.mxu0 %v21590_v26  ;;  %v21674_v46 = vld [vmem:[#allocation8 + $0x1f64] ss:$24 sps:$4 sm:$0xff]  }
 0x8cc   :  { %17480 = vmatprep.subr.bf16.mxu1 %v21593_v2  ;;  %v21677_v26 = vld [vmem:[#allocation8 + $0x2264] ss:$24 sps:$4 sm:$0xff]   ;;  %v21672_v2 = vld [vmem:[#allocation8 + $0x1f60] ss:$24 sps:$4 sm:$0xff]  }
 0x8ce   :  { %17438 = vmatpush1.bf16.msra.mxu0 %v21588_v19  ;;  %v21675_v19 = vld [vmem:[#allocation8 + $0x2260] ss:$24 sps:$4 sm:$0xff]  }
 0x8cf   :  { %17481 = vmatpush1.bf16.msra.mxu1 %v21591_v60  ;;  %17439 = vmatprep.subr.bf16.mxu0 %v21596_v7  ;;  %v21680_v60 = vld [vmem:[#allocation8 + $0x1f34] ss:$24 sps:$4 sm:$0xff]  }
 0x8d0   :  { %17482 = vmatprep.subr.bf16.mxu1 %v21599_v40  ;;  %v21683_v7 = vld [vmem:[#allocation8 + $0x2234] ss:$24 sps:$4 sm:$0xff]   ;;  %v21678_v40 = vld [vmem:[#allocation8 + $0x1f30] ss:$24 sps:$4 sm:$0xff]  }
 0x8d2   :  { %17440 = vmatpush1.bf16.msra.mxu0 %v21594_v25  ;;  %v21681_v25 = vld [vmem:[#allocation8 + $0x2230] ss:$24 sps:$4 sm:$0xff]  }
 0x8d3   :  { %17483 = vmatpush1.bf16.msra.mxu1 %v21597_v63  ;;  %17441 = vmatprep.subr.bf16.mxu0 %v21602_v59  ;;  %v21686_v63 = vld [vmem:[#allocation8 + $0x1f04] ss:$24 sps:$4 sm:$0xff]  }
 0x8d4   :  { %17484 = vmatprep.subr.bf16.mxu1 %v21605_v15  ;;  %v21689_v59 = vld [vmem:[#allocation8 + $0x2204] ss:$24 sps:$4 sm:$0xff]   ;;  %v21684_v15 = vld [vmem:[#allocation8 + $0x1f00] ss:$24 sps:$4 sm:$0xff]  }
 0x8d6   :  { %17442 = vmatpush1.bf16.msra.mxu0 %v21600_v56  ;;  %v21692_v56 = vld [vmem:[#allocation8 + $0x1ed4] ss:$24 sps:$4 sm:$0xff]  }
 0x8d7   :  { %17485 = vmatpush1.bf16.msra.mxu1 %v21603_v53  ;;  %17443 = vmatprep.subr.bf16.mxu0 %v21608_v8  ;;  %v21690_v53 = vld [vmem:[#allocation8 + $0x1ed0] ss:$24 sps:$4 sm:$0xff]   ;;  %v21698_v8 = vld [vmem:[#allocation8 + $0x1ea4] ss:$24 sps:$4 sm:$0xff]  }
 0x8d8   :  { %17486 = vmatprep.subr.bf16.mxu1 %v21611_v20  ;;  %v21701_v20 = vld [vmem:[#allocation8 + $0x21a4] ss:$24 sps:$4 sm:$0xff]  }
 0x8da   :  { %17444 = vmatpush1.bf16.msra.mxu0 %v21606_v17  ;;  %v21699_v17 = vld [vmem:[#allocation8 + $0x21a0] ss:$24 sps:$4 sm:$0xff]  }
 0x8db   :  { %17487 = vmatpush1.bf16.msra.mxu1 %v21609_v0  ;;  %17445 = vmatprep.subr.bf16.mxu0 %v21614_v22  ;;  %v21704_v0 = vld [vmem:[#allocation8 + $0x1e74] ss:$24 sps:$4 sm:$0xff]  }
 0x8dc   :  { %17488 = vmatprep.subr.bf16.mxu1 %v21617_v18  ;;  %v21707_v22 = vld [vmem:[#allocation8 + $0x2174] ss:$24 sps:$4 sm:$0xff]   ;;  %v21702_v18 = vld [vmem:[#allocation8 + $0x1e70] ss:$24 sps:$4 sm:$0xff]  }
 0x8de   :  { %17446 = vmatpush1.bf16.msra.mxu0 %v21612_v52  ;;  %v21705_v52 = vld [vmem:[#allocation8 + $0x2170] ss:$24 sps:$4 sm:$0xff]  }
 0x8df   :  { %17489 = vmatpush1.bf16.msra.mxu1 %v21615_v35  ;;  %17447 = vmatprep.subr.bf16.mxu0 %v21620_v29  ;;  %v21710_v35 = vld [vmem:[#allocation8 + $0x1e44] ss:$24 sps:$4 sm:$0xff]  }
 0x8e0   :  { %17490 = vmatprep.subr.bf16.mxu1 %v21623_v32  ;;  %v21713_v29 = vld [vmem:[#allocation8 + $0x2144] ss:$24 sps:$4 sm:$0xff]   ;;  %v21708_v32 = vld [vmem:[#allocation8 + $0x1e40] ss:$24 sps:$4 sm:$0xff]  }
 0x8e2   :  { %17448 = vmatpush1.bf16.msra.mxu0 %v21618_v37  ;;  %v21711_v37 = vld [vmem:[#allocation8 + $0x2140] ss:$24 sps:$4 sm:$0xff]  }
 0x8e3   :  { %17491 = vmatpush1.bf16.msra.mxu1 %v21621_v34  ;;  %17449 = vmatprep.subr.bf16.mxu0 %v21626_v49  ;;  %v21716_v34 = vld [vmem:[#allocation8 + $0x1e14] ss:$24 sps:$4 sm:$0xff]  }
 0x8e4   :  { %17492 = vmatprep.subr.bf16.mxu1 %v21629_v43  ;;  %v21719_v49 = vld [vmem:[#allocation8 + $0x2114] ss:$24 sps:$4 sm:$0xff]   ;;  %v21714_v43 = vld [vmem:[#allocation8 + $0x1e10] ss:$24 sps:$4 sm:$0xff]  }
 0x8e6   :  { %17450 = vmatpush2.bf16.msra.mxu0 %v21624_v62  ;;  %v21717_v62 = vld [vmem:[#allocation8 + $0x2110] ss:$24 sps:$4 sm:$0xff]  }
 0x8e7   :  { %17493 = vmatpush2.bf16.msra.mxu1 %v21627_v54  ;;  %17451 = vmatprep.subr.bf16.mxu0 %v21632_v51  ;;  %v21722_v54 = vld [vmem:[#allocation8 + $0x20e4] ss:$24 sps:$4 sm:$0xff]  }
 0x8e8   :  { %17494 = vmatprep.subr.bf16.mxu1 %v21635_v21  ;;  %v21725_v51 = vld [vmem:[#allocation8 + $0x23e4] ss:$24 sps:$4 sm:$0xff]   ;;  %v21720_v21 = vld [vmem:[#allocation8 + $0x20e0] ss:$24 sps:$4 sm:$0xff]  }
 0x8ea   :  { %17452 = vmatpush2.bf16.msra.mxu0 %v21630_v27  ;;  %v21723_v27 = vld [vmem:[#allocation8 + $0x23e0] ss:$24 sps:$4 sm:$0xff]  }
 0x8eb   :  { %17495 = vmatpush2.bf16.msra.mxu1 %v21633_v14  ;;  %17453 = vmatprep.subr.bf16.mxu0 %v21638_v44  ;;  %v21728_v14 = vld [vmem:[#allocation8 + $0x20b4] ss:$24 sps:$4 sm:$0xff]  }
 0x8ec   :  { %17496 = vmatprep.subr.bf16.mxu1 %v21641_v50  ;;  %v21731_v44 = vld [vmem:[#allocation8 + $0x23b4] ss:$24 sps:$4 sm:$0xff]   ;;  %v21726_v50 = vld [vmem:[#allocation8 + $0x20b0] ss:$24 sps:$4 sm:$0xff]  }
 0x8ee   :  { %17454 = vmatpush2.bf16.msra.mxu0 %v21636_v16  ;;  %v21729_v16 = vld [vmem:[#allocation8 + $0x23b0] ss:$24 sps:$4 sm:$0xff]  }
 0x8ef   :  { %17497 = vmatpush2.bf16.msra.mxu1 %v21639_v58  ;;  %17455 = vmatprep.subr.bf16.mxu0 %v21644_v5  ;;  %v21734_v58 = vld [vmem:[#allocation8 + $0x2084] ss:$24 sps:$4 sm:$0xff]  }
 0x8f0   :  { %17498 = vmatprep.subr.bf16.mxu1 %v21647_v23  ;;  %v21737_v5 = vld [vmem:[#allocation8 + $0x2384] ss:$24 sps:$4 sm:$0xff]   ;;  %v21732_v23 = vld [vmem:[#allocation8 + $0x2080] ss:$24 sps:$4 sm:$0xff]  }
 0x8f2   :  { %17456 = vmatpush2.bf16.msra.mxu0 %v21642_v1  ;;  %v21735_v1 = vld [vmem:[#allocation8 + $0x2380] ss:$24 sps:$4 sm:$0xff]  }
 0x8f3   :  { %17499 = vmatpush2.bf16.msra.mxu1 %v21645_v36  ;;  %17457 = vmatprep.subr.bf16.mxu0 %v21650_v11  ;;  %v21740_v36 = vld [vmem:[#allocation8 + $0x2054] ss:$24 sps:$4 sm:$0xff]  }
 0x8f4   :  { %17500 = vmatprep.subr.bf16.mxu1 %v21653_v39  ;;  %v21743_v11 = vld [vmem:[#allocation8 + $0x2354] ss:$24 sps:$4 sm:$0xff]   ;;  %v21738_v39 = vld [vmem:[#allocation8 + $0x2050] ss:$24 sps:$4 sm:$0xff]  }
 0x8f6   :  { %17458 = vmatpush2.bf16.msra.mxu0 %v21648_v31  ;;  %v21741_v31 = vld [vmem:[#allocation8 + $0x2350] ss:$24 sps:$4 sm:$0xff]  }
 0x8f7   :  { %17501 = vmatpush2.bf16.msra.mxu1 %v21651_v38  ;;  %17459 = vmatprep.subr.bf16.mxu0 %v21656_v48  ;;  %v21746_v38 = vld [vmem:[#allocation8 + $0x2024] ss:$24 sps:$4 sm:$0xff]  }
 0x8f8   :  { %17502 = vmatprep.subr.bf16.mxu1 %v21659_v12  ;;  %v21749_v48 = vld [vmem:[#allocation8 + $0x2324] ss:$24 sps:$4 sm:$0xff]   ;;  %v21744_v12 = vld [vmem:[#allocation8 + $0x2020] ss:$24 sps:$4 sm:$0xff]  }
 0x8fa   :  { %17460 = vmatpush2.bf16.msra.mxu0 %v21654_v55  ;;  %v21747_v55 = vld [vmem:[#allocation8 + $0x2320] ss:$24 sps:$4 sm:$0xff]  }
 0x8fb   :  { %17503 = vmatpush2.bf16.msra.mxu1 %v21657_v33  ;;  %17461 = vmatprep.subr.bf16.mxu0 %v21662_v45  ;;  %v21752_v33 = vld [vmem:[#allocation8 + $0x1ff4] ss:$24 sps:$4 sm:$0xff]  }
 0x8fc   :  { %17504 = vmatprep.subr.bf16.mxu1 %v21665_v6  ;;  %v21755_v45 = vld [vmem:[#allocation8 + $0x22f4] ss:$24 sps:$4 sm:$0xff]   ;;  %v21750_v6 = vld [vmem:[#allocation8 + $0x1ff0] ss:$24 sps:$4 sm:$0xff]  }
 0x8fe   :  { %17462 = vmatpush2.bf16.msra.mxu0 %v21660_v4  ;;  %v21753_v4 = vld [vmem:[#allocation8 + $0x22f0] ss:$24 sps:$4 sm:$0xff]  }
 0x8ff   :  { %17505 = vmatpush2.bf16.msra.mxu1 %v21663_v47  ;;  %17463 = vmatprep.subr.bf16.mxu0 %v21668_v41  ;;  %v21758_v47 = vld [vmem:[#allocation8 + $0x1fc4] ss:$24 sps:$4 sm:$0xff]  }
 0x900   :  { %17506 = vmatprep.subr.bf16.mxu1 %v21671_v9  ;;  %v21761_v41 = vld [vmem:[#allocation8 + $0x22c4] ss:$24 sps:$4 sm:$0xff]   ;;  %v21756_v9 = vld [vmem:[#allocation8 + $0x1fc0] ss:$24 sps:$4 sm:$0xff]  }
 0x902   :  { %17464 = vmatpush2.bf16.msra.mxu0 %v21666_v42  ;;  %v21759_v42 = vld [vmem:[#allocation8 + $0x22c0] ss:$24 sps:$4 sm:$0xff]  }
 0x903   :  { %17507 = vmatpush2.bf16.msra.mxu1 %v21669_v3  ;;  %17519 = vmatprep.subr.bf16.mxu0 %v21674_v46  ;;  %v21764_v3 = vld [vmem:[#allocation8 + $0x1f94] ss:$24 sps:$4 sm:$0xff]  }
 0x904   :  { %17562 = vmatprep.subr.bf16.mxu1 %v21677_v26  ;;  %v21767_v46 = vld [vmem:[#allocation8 + $0x2294] ss:$24 sps:$4 sm:$0xff]   ;;  %v21762_v26 = vld [vmem:[#allocation8 + $0x1f90] ss:$24 sps:$4 sm:$0xff]  }
 0x905   :  { %17466 = vmatmul.mubr.bf16.vlgmr.msra.gmra.mxu0 %v22504_v13  ;;  %v21687_v13 = vld [vmem:[#allocation8 + $0x2200] ss:$24 sps:$4 sm:$0xff]  }
 0x906   :  { %17509 = vmatmul.mubr.bf16.vlgmr.msra.gmra.mxu1 %v22592_v10  ;;  %17520 = vmatpush1.bf16.msra.mxu0 %v21672_v2  ;;  %v21695_v10 = vld [vmem:[#allocation8 + $0x21d4] ss:$24 sps:$4 sm:$0xff]   ;;  %v21765_v2 = vld [vmem:[#allocation8 + $0x2290] ss:$24 sps:$4 sm:$0xff]  }
 0x907   :  { %17551 = vmatprep.mubr.bf16.mxu0 %v22873_v61  ;;  %17563 = vmatpush1.bf16.msra.mxu1 %v21675_v19  ;;  %v21693_v61 = vld [vmem:[#allocation8 + $0x21d0] ss:$24 sps:$4 sm:$0xff]   ;;  %v17123_v19 = vpop.f32.mrf.mxu0 }
 0x908   :  { %17594 = vmatprep.mubr.bf16.mxu1 %v22876_v30  ;;  %17521 = vmatprep.subr.bf16.mxu0 %v21680_v60  ;;  %v21696_v30 = vld [vmem:[#allocation8 + $0x1ea0] ss:$24 sps:$4 sm:$0xff]   ;;  %v17166_v60 = vpop.f32.mrf.mxu1 }
 0x909   :  { %17564 = vmatprep.subr.bf16.mxu1 %v21683_v7  ;;  %v17125_v7 = vpop.f32.mrf.mxu0 }
 0x90a   :  { %17522 = vmatpush1.bf16.msra.mxu0 %v21678_v40  ;;  %v17168_v40 = vpop.f32.mrf.mxu1 }
 0x90b   :  { %17565 = vmatpush1.bf16.msra.mxu1 %v21681_v25  ;;  %17523 = vmatprep.subr.bf16.mxu0 %v21686_v63  ;;  %v17127_v25 = vpop.f32.mrf.mxu0 }
 0x90c   :  { %17566 = vmatprep.subr.bf16.mxu1 %v21689_v59  ;;  %v17170_v63 = vpop.f32.mrf.mxu1 }
 0x90d   :  { %v17129_v59 = vpop.f32.mrf.mxu0 }
 0x90e   :  { %17524 = vmatpush1.bf16.msra.mxu0 %v21684_v15  ;;  %v17172_v15 = vpop.f32.mrf.mxu1 }
 0x90f   :  { %17567 = vmatpush1.bf16.msra.mxu1 %v21687_v13  ;;  %17525 = vmatprep.subr.bf16.mxu0 %v21692_v56  ;;  %v17209_v13 = vpop.f32.mrf.mxu0 }
 0x910   :  { %17568 = vmatprep.subr.bf16.mxu1 %v21695_v10  ;;  %v17252_v56 = vpop.f32.mrf.mxu1 }
 0x911   :  { %v17211_v10 = vpop.f32.mrf.mxu0 }
 0x912   :  { %17526 = vmatpush1.bf16.msra.mxu0 %v21690_v53  ;;  %v17254_v53 = vpop.f32.mrf.mxu1 }
 0x913   :  { %17569 = vmatpush1.bf16.msra.mxu1 %v21693_v61  ;;  %17527 = vmatprep.subr.bf16.mxu0 %v21698_v8  ;;  %v17213_v61 = vpop.f32.mrf.mxu0 }
 0x914   :  { %17570 = vmatprep.subr.bf16.mxu1 %v21701_v20  ;;  %v17256_v8 = vpop.f32.mrf.mxu1 }
 0x915   :  { %v17215_v20 = vpop.f32.mrf.mxu0 }
 0x916   :  { %17528 = vmatpush1.bf16.msra.mxu0 %v21696_v30  ;;  %v17258_v30 = vpop.f32.mrf.mxu1 }
 0x917   :  { %17571 = vmatpush1.bf16.msra.mxu1 %v21699_v17  ;;  %17529 = vmatprep.subr.bf16.mxu0 %v21704_v0 }
 0x918   :  { %17572 = vmatprep.subr.bf16.mxu1 %v21707_v22 }
 0x91a   :  { %17530 = vmatpush1.bf16.msra.mxu0 %v21702_v18 }
 0x91b   :  { %17573 = vmatpush1.bf16.msra.mxu1 %v21705_v52  ;;  %17531 = vmatprep.subr.bf16.mxu0 %v21710_v35 }
 0x91c   :  { %17574 = vmatprep.subr.bf16.mxu1 %v21713_v29 }
 0x91e   :  { %17532 = vmatpush1.bf16.msra.mxu0 %v21708_v32 }
 0x91f   :  { %17575 = vmatpush1.bf16.msra.mxu1 %v21711_v37  ;;  %17533 = vmatprep.subr.bf16.mxu0 %v21716_v34  ;;  %v17167_v37 = vadd.f32 %v17166_v60, %v17123_v19 }
 0x920   :  { %17576 = vmatprep.subr.bf16.mxu1 %v21719_v49  ;;  %v17169_v49 = vadd.f32 %v17168_v40, %v17125_v7 }
 0x922   :  { %17534 = vmatpush1.bf16.msra.mxu0 %v21714_v43  ;;  %v17210_v43 = vadd.f32 %v17209_v13, %v17167_v37 }
 0x923   :  { %17577 = vmatpush1.bf16.msra.mxu1 %v21717_v62  ;;  %17535 = vmatprep.subr.bf16.mxu0 %v21722_v54  ;;  %v17171_v54 = vadd.f32 %v17170_v63, %v17127_v25 }
 0x924   :  { %17578 = vmatprep.subr.bf16.mxu1 %v21725_v51  ;;  %v17212_v51 = vadd.f32 %v17211_v10, %v17169_v49 }
 0x926   :  { %17536 = vmatpush2.bf16.msra.mxu0 %v21720_v21 }
 0x927   :  { %17579 = vmatpush2.bf16.msra.mxu1 %v21723_v27  ;;  %17537 = vmatprep.subr.bf16.mxu0 %v21728_v14  ;;  %v17173_v27 = vadd.f32 %v17172_v15, %v17129_v59  ;;  %v17253_v14 = vadd.f32 %v17252_v56, %v17210_v43 }
 0x928   :  { %17580 = vmatprep.subr.bf16.mxu1 %v21731_v44  ;;  %v17214_v44 = vadd.f32 %v17213_v61, %v17171_v54 }
 0x92a   :  { %17538 = vmatpush2.bf16.msra.mxu0 %v21726_v50 }
 0x92b   :  { %17581 = vmatpush2.bf16.msra.mxu1 %v21729_v16  ;;  %17539 = vmatprep.subr.bf16.mxu0 %v21734_v58  ;;  %v17255_v16 = vadd.f32 %v17254_v53, %v17212_v51  ;;  %v17216_v58 = vadd.f32 %v17215_v20, %v17173_v27  ;;  %v23207_v20 = vld [vmem:[#allocation20_spill] sm:$0xff] }
 0x92c   :  { %17582 = vmatprep.subr.bf16.mxu1 %v21737_v5 }
 0x92e   :  { %17540 = vmatpush2.bf16.msra.mxu0 %v21732_v23 }
 0x92f   :  { %17583 = vmatpush2.bf16.msra.mxu1 %v21735_v1  ;;  %17541 = vmatprep.subr.bf16.mxu0 %v21740_v36  ;;  %v17257_v1 = vadd.f32 %v17256_v8, %v17214_v44 }
 0x930   :  { %17584 = vmatprep.subr.bf16.mxu1 %v21743_v11 }
 0x932   :  { %17542 = vmatpush2.bf16.msra.mxu0 %v21738_v39 }
 0x933   :  { %17585 = vmatpush2.bf16.msra.mxu1 %v21741_v31  ;;  %17543 = vmatprep.subr.bf16.mxu0 %v21746_v38  ;;  %v17259_v31 = vadd.f32 %v17258_v30, %v17216_v58  ;;  %v17630_v30 = vrot.slane %v23074_v57, %v23207_v20 }
 0x934   :  { %17586 = vmatprep.subr.bf16.mxu1 %v21749_v48 }
 0x936   :  { %17544 = vmatpush2.bf16.msra.mxu0 %v21744_v12 }
 0x937   :  { %17587 = vmatpush2.bf16.msra.mxu1 %v21747_v55  ;;  %17545 = vmatprep.subr.bf16.mxu0 %v21752_v33 }
 0x938   :  { %17588 = vmatprep.subr.bf16.mxu1 %v21755_v45 }
 0x93a   :  { %17546 = vmatpush2.bf16.msra.mxu0 %v21750_v6 }
 0x93b   :  { %17589 = vmatpush2.bf16.msra.mxu1 %v21753_v4  ;;  %17547 = vmatprep.subr.bf16.mxu0 %v21758_v47 }
 0x93c   :  { %17590 = vmatprep.subr.bf16.mxu1 %v21761_v41 }
 0x93e   :  { %17548 = vmatpush2.bf16.msra.mxu0 %v21756_v9 }
 0x93f   :  { %17591 = vmatpush2.bf16.msra.mxu1 %v21759_v42  ;;  %17549 = vmatprep.subr.bf16.mxu0 %v21764_v3 }
 0x940   :  { %17592 = vmatprep.subr.bf16.mxu1 %v21767_v46 }
 0x942   :  { %17550 = vmatpush2.bf16.msra.mxu0 %v21762_v26 }
 0x943   :  { %17593 = vmatpush2.bf16.msra.mxu1 %v21765_v2 }
 0x945   :  { %17552 = vmatmul.mubr.bf16.vlgmr.msra.gmra.mxu0 %v22736_v28  ;;  %v17295_v17 = vpop.f32.mrf.mxu0 }
 0x946   :  { %17595 = vmatmul.mubr.bf16.vlgmr.msra.gmra.mxu1 %v22818_v24  ;;  %v17338_v28 = vpop.f32.mrf.mxu1  ;;  %v17296_v5 = vadd.f32 %v17295_v17, %v17253_v14 }
 0x947   :  { %v17297_v0 = vpop.f32.mrf.mxu0 }
 0x948   :  { %v17340_v24 = vpop.f32.mrf.mxu1  ;;  %v17298_v36 = vadd.f32 %v17297_v0, %v17255_v16  ;;  %v17339_v38 = vadd.f32 %v17338_v28, %v17296_v5 }
 0x949   :  { %v17299_v22 = vpop.f32.mrf.mxu0 }
 0x94a   :  { %v17342_v18 = vpop.f32.mrf.mxu1  ;;  %v17300_v48 = vadd.f32 %v17299_v22, %v17257_v1  ;;  %v17341_v55 = vadd.f32 %v17340_v24, %v17298_v36 }
 0x94b   :  { %v17301_v52 = vpop.f32.mrf.mxu0 }
 0x94c   :  { %v17344_v35 = vpop.f32.mrf.mxu1  ;;  %v17302_v33 = vadd.f32 %v17301_v52, %v17259_v31  ;;  %v17343_v4 = vadd.f32 %v17342_v18, %v17300_v48  ;;  %v23208_v18 = vld [vmem:[#allocation56_spill] sm:$0xff] }
 0x94d   :  { %v17634_v52 = vrot.slane %v23074_v57, %v23208_v18 }
 0x94e   :  { %v17345_v9 = vadd.f32 %v17344_v35, %v17302_v33 }
 0x985   :  { %v17381_v29 = vpop.f32.mrf.mxu0 }
 0x986   :  { %v17424_v32 = vpop.f32.mrf.mxu1  ;;  %v17382_v45 = vadd.f32 %v17381_v29, %v17339_v38 }
 0x987   :  { %v17383_v34 = vpop.f32.mrf.mxu0 }
 0x988   :  { %v17426_v62 = vpop.f32.mrf.mxu1  ;;  %v17384_v47 = vadd.f32 %v17383_v34, %v17341_v55  ;;  %v17425_v42 = vadd.f32 %v17424_v32, %v17382_v45 }
 0x989   :  { %v17385_v21 = vpop.f32.mrf.mxu0 }
 0x98a   :  { %v17428_v50 = vpop.f32.mrf.mxu1  ;;  %v17386_v3 = vadd.f32 %v17385_v21, %v17343_v4  ;;  %v17427_v26 = vadd.f32 %v17426_v62, %v17384_v47 }
 0x98b   :  { %v17387_v23 = vpop.f32.mrf.mxu0 }
 0x98c   :  { %v17430_v11 = vpop.f32.mrf.mxu1  ;;  %v17388_v2 = vadd.f32 %v17387_v23, %v17345_v9  ;;  %v17429_v7 = vadd.f32 %v17428_v50, %v17386_v3 }
 0x98e   :  { %v17431_v63 = vadd.f32 %v17430_v11, %v17388_v2 }
 0x9c5   :  { %v17467_v39 = vpop.f32.mrf.mxu0 }
 0x9c6   :  { %v17510_v12 = vpop.f32.mrf.mxu1  ;;  %v17468_v19 = vadd.f32 %v17467_v39, %v17425_v42 }
 0x9c7   :  { %v17469_v6 = vpop.f32.mrf.mxu0 }
 0x9c8   :  { %v17512_v41 = vpop.f32.mrf.mxu1  ;;  %v17470_v40 = vadd.f32 %v17469_v6, %v17427_v26  ;;  %v17511_v59 = vadd.f32 %v17510_v12, %v17468_v19 }
 0x9c9   :  { %v17471_v46 = vpop.f32.mrf.mxu0 }
 0x9ca   :  { %v17514_v60 = vpop.f32.mrf.mxu1  ;;  %v17472_v15 = vadd.f32 %v17471_v46, %v17429_v7  ;;  %v17513_v10 = vadd.f32 %v17512_v41, %v17470_v40 }
 0x9cb   :  { %v17473_v25 = vpop.f32.mrf.mxu0 }
 0x9cc   :  { %v17516_v13 = vpop.f32.mrf.mxu1  ;;  %v17474_v53 = vadd.f32 %v17473_v25, %v17431_v63  ;;  %v17515_v28 = vadd.f32 %v17514_v60, %v17472_v15 }
 0x9ce   :  { %v17517_v29 = vadd.f32 %v17516_v13, %v17474_v53 }
 0xa05   :  { %v17553_v56 = vpop.f32.mrf.mxu0 }
 0xa06   :  { %v17554_v61 = vadd.f32 %v17553_v56, %v17511_v59  ;;  %v17596_v8 = vpop.f32.mrf.mxu1 }
 0xa07   :  { %v17555_v17 = vpop.f32.mrf.mxu0 }
 0xa08   :  { %v17597_v0 = vadd.f32 %v17596_v8, %v17554_v61  ;;  %v17556_v24 = vadd.f32 %v17555_v17, %v17513_v10  ;;  %v17598_v22 = vpop.f32.mrf.mxu1 }
 0xa09   :  { %v17557_v35 = vpop.f32.mrf.mxu0 }
 0xa0a   :  { %v17645_v32 = vadd.f32 %v17630_v30, %v17597_v0  ;;  %v17599_v37 = vadd.f32 %v17598_v22, %v17556_v24  ;;  %v17558_v34 = vadd.f32 %v17557_v35, %v17515_v28  ;;  %v17600_v49 = vpop.f32.mrf.mxu1 }
 0xa0b   :  { %v17559_v43 = vpop.f32.mrf.mxu0 }
 0xa0c   :  { %17657 = vst [vmem:[#allocation11 + $0x20] sm:$0xff] %v17645_v32  ;;  %v17646_v62 = vadd.f32 %v17634_v52, %v17599_v37  ;;  %v17601_v54 = vadd.f32 %v17600_v49, %v17558_v34  ;;  %v17560_v51 = vadd.f32 %v17559_v43, %v17517_v29  ;;  %v17602_v21 = vpop.f32.mrf.mxu1 }
 0xa0e   :  { %17658 = vst [vmem:[#allocation11 + $0x28] sm:$0xff] %v17646_v62  ;;  %v17651_v27 = vadd.f32 %v17630_v30, %v17601_v54  ;;  %v17603_v14 = vadd.f32 %v17602_v21, %v17560_v51 }
 0xa10   :  { %17663 = vst [vmem:[#allocation11 + $0x50] sm:$0xff] %v17651_v27  ;;  %v17652_v44 = vadd.f32 %v17634_v52, %v17603_v14 }
 0xa12   :  { %17664 = vst [vmem:[#allocation11 + $0x58] sm:$0xff] %v17652_v44 }
 0xa13   :  { %21983 = shalt.err (!%p21980_p1)
}
 0xa14   :  { %17716 = dma.vmem_to_hbm [thread:$0]  %s17711_s4, 1536, %s23109_s5, [#allocation4], %s22007_s9, %s22007_s9, %s22008_s10  }
 0xa15   :  { %21998 = dma.done.wait [#allocation4], 1536  }
 0xa16   :  { %21999 = vsyncadd [#allocation4], 4294965760 }
 0xa17   :  { %17720 = vsyncpa [#allocation3], 1 }
 0xa18   :  { %17721 = vsyncpa [#allocation6], 1 }
 0xa19   :  { %17722 = vsyncpa [#allocation9], 1 }
 0xa1a   :  { %17723 = vsyncpa [#allocation4], 1 }

</bundles_post_ra>
